<compile_context>
chip_gen: v5e
topology: v5e:2x2
jax: 0.10.0
libtpu: 0.0.40
codegen_flags: <defaults>
</compile_context>

<pallas_src>
import functools

import jax
import jax.numpy as jnp
from jax import lax
from jax.experimental import pallas as pl
from jax.experimental.pallas import tpu as pltpu

EPS = 1e-5


# ----------------------------------------------------------------------------
# Fused DownBlock kernel
# ----------------------------------------------------------------------------
def _down_block_kernel(x_ref, w1_ref, wsc_ref, w2_ref, w3_ref, w4_ref, p_ref,
                       o_ref, xpad_ref, hpad_ref):
    """Inputs
        x_ref:   (N, Ho, Wo, 4*Cin) space-to-depth input, channel = (ph,pw,c)
        w1_ref:  (9*Cin, Cout)  block1.conv1 3x3/s2 (rows ordered kh,kw,cin)
        wsc_ref: (Cin,   Cout)  block1.shortcut 1x1/s2
        w2_ref:  (9*Cout, Cout) block1.conv2 3x3/s1
        w3_ref:  (9*Cout, Cout) block2.conv1 3x3/s1
        w4_ref:  (9*Cout, Cout) block2.conv2 3x3/s1
        p_ref:   (5, 3, Cout)   per-conv (bias, gamma, beta); conv order:
                 0=b1.conv1, 1=b1.shortcut, 2=b1.conv2, 3=b2.conv1, 4=b2.conv2
      Output
        o_ref:   (N*Ho*Wo, Cout) rows ordered (n, oh, ow)
      Scratch
        xpad_ref: VMEM (N, Ho+1, Wo+1, 4*Cin)  top/left zero-padded s2d input
        hpad_ref: VMEM (N, Ho+2, Wo+2, Cout)   zero-padded intermediate act.
    """
    n, ho, wo, c4 = x_ref.shape
    cin = c4 // 4
    cout = o_ref.shape[-1]
    rows = n * ho * wo

    prm = p_ref[...]                                   # (5, 3, Cout)

    def bias(i):
        return prm[i:i + 1, 0, :]

    def gamma(i):
        return prm[i:i + 1, 1, :]

    def beta(i):
        return prm[i:i + 1, 2, :]

    def bn(y, i):
        # Training-mode BatchNorm over all rows (N*Ho*Wo), biased variance.
        mu = jnp.mean(y, axis=0, keepdims=True)
        var = jnp.mean((y - mu) ** 2, axis=0, keepdims=True)
        return (y - mu) * lax.rsqrt(var + EPS) * gamma(i) + beta(i)

    relu = lambda v: jnp.maximum(v, 0.0)
    dot = functools.partial(jnp.dot, preferred_element_type=jnp.float32,
                            precision=lax.Precision.HIGHEST)

    # ---- block1.conv1 (3x3, stride 2, pad 1) via space-to-depth windows ----
    # tap kh reads s2d grid row oh + d with phase ph:
    #   kh=0 -> (d=-1, ph=1), kh=1 -> (d=0, ph=0), kh=2 -> (d=0, ph=1)
    # and likewise for kw.  With the s2d input stored at [1:ho+1, 1:wo+1] of a
    # zeroed buffer, tap (kh,kw) is the unstrided window starting at
    # (0 if k==0 else 1).  The zero border realises the conv padding.
    xpad_ref[...] = jnp.zeros_like(xpad_ref)
    xpad_ref[:, 1:ho + 1, 1:wo + 1, :] = x_ref[...]

    starts = {0: (0, 1), 1: (1, 0), 2: (1, 1)}        # k -> (window_start, phase)
    cols = []
    xc = None
    for kh in range(3):
        sh, ph = starts[kh]
        for kw in range(3):
            sw, pw = starts[kw]
            c0 = (ph * 2 + pw) * cin
            win = xpad_ref[:, sh:sh + ho, sw:sw + wo, c0:c0 + cin]   # (N,Ho,Wo,Cin)
            col = win.reshape(rows, cin)
            cols.append(col)
            if kh == 1 and kw == 1:
                # Center tap == x[:, 0::2, 0::2, :]: exactly the 1x1 stride-2
                # shortcut input -> reuse instead of a second gather/launch.
                xc = col
    patches1 = jnp.concatenate(cols, axis=1)                          # (rows, 9*Cin)

    h = relu(bn(dot(patches1, w1_ref[...]) + bias(0), 0))             # bn1(conv1)
    sc = bn(dot(xc, wsc_ref[...]) + bias(1), 1)                       # shortcut (no relu)

    # ---- generic 3x3 stride-1 pad-1 conv on a VMEM-resident activation ----
    def conv3x3_s1(hin, w_ref_, i):
        hpad_ref[...] = jnp.zeros_like(hpad_ref)
        hpad_ref[:, 1:ho + 1, 1:wo + 1, :] = hin.reshape(n, ho, wo, cout)
        cs = []
        for kh in range(3):
            for kw in range(3):
                cs.append(
                    hpad_ref[:, kh:kh + ho, kw:kw + wo, :].reshape(rows, cout))
        patches = jnp.concatenate(cs, axis=1)                         # (rows, 9*Cout)
        return dot(patches, w_ref_[...]) + bias(i)

    # ---- rest of block1 ----
    h = relu(bn(conv3x3_s1(h, w2_ref, 2), 2))
    out1 = relu(h + sc)

    # ---- block2 (no downsample, identity shortcut) ----
    h = relu(bn(conv3x3_s1(out1, w3_ref, 3), 3))
    h = relu(bn(conv3x3_s1(h, w4_ref, 4), 4))
    o_ref[...] = relu(h + out1)


# ----------------------------------------------------------------------------
# Host wrappers
# ----------------------------------------------------------------------------
def pack_params(params):
    """Repack PyTorch-layout parameters into the matrices the fused kernel
    consumes.  Pure layout work on a few KiB -- call once, outside the
    per-forward hot path."""
    b1, b2 = params["block1"], params["block2"]

    def conv_mat(w):  # (Cout, Cin, KH, KW) -> (KH*KW*Cin, Cout), rows (kh,kw,cin)
        cout, cin, kh, kw = w.shape
        return jnp.transpose(w, (2, 3, 1, 0)).reshape(kh * kw * cin, cout)

    scal = jnp.stack([
        jnp.stack([b1["b1"], b1["g1"], b1["be1"]]),
        jnp.stack([b1["sc_b"], b1["sc_gamma"], b1["sc_beta"]]),
        jnp.stack([b1["b2"], b1["g2"], b1["be2"]]),
        jnp.stack([b2["b1"], b2["g1"], b2["be1"]]),
        jnp.stack([b2["b2"], b2["g2"], b2["be2"]]),
    ])                                                 # (5, 3, Cout)
    return dict(w1=conv_mat(b1["w1"]), wsc=conv_mat(b1["sc_w"]),
                w2=conv_mat(b1["w2"]), w3=conv_mat(b2["w1"]),
                w4=conv_mat(b2["w2"]), scal=scal)


def down_block(x_nchw, packed):
    """x_nchw: (N, Cin, H, W) float32 -> (N, Cout, H/2, W/2) float32."""
    N, Cin, H, W = x_nchw.shape
    Cout = packed["w1"].shape[1]
    Ho, Wo = H // 2, W // 2

    # Boundary layout plumbing: NCHW -> NHWC -> space-to-depth so the
    # stride-2 conv becomes unstrided window slicing inside the kernel.
    x = jnp.transpose(x_nchw, (0, 2, 3, 1))
    x = x.reshape(N, Ho, 2, Wo, 2, Cin).transpose(0, 1, 3, 2, 4, 5)
    x = x.reshape(N, Ho, Wo, 4 * Cin)                  # channel = (ph, pw, c)

    args = (x, packed["w1"], packed["wsc"], packed["w2"], packed["w3"],
            packed["w4"], packed["scal"])

    def full_spec(a):
        return pl.BlockSpec(a.shape, lambda i, nd=a.ndim: (0,) * nd)

    out = pl.pallas_call(
        _down_block_kernel,
        out_shape=jax.ShapeDtypeStruct((N * Ho * Wo, Cout), jnp.float32),
        grid=(1,),
        in_specs=[full_spec(a) for a in args],
        out_specs=pl.BlockSpec((N * Ho * Wo, Cout), lambda i: (0, 0)),
        scratch_shapes=[
            pltpu.VMEM((N, Ho + 1, Wo + 1, 4 * Cin), jnp.float32),
            pltpu.VMEM((N, Ho + 2, Wo + 2, Cout), jnp.float32),
        ],
        compiler_params=pltpu.CompilerParams(
            dimension_semantics=("arbitrary",)),
    )(*args)

    out = out.reshape(N, Ho, Wo, Cout)
    return jnp.transpose(out, (0, 3, 1, 2))            # NHWC -> NCHW


# ----------------------------------------------------------------------------
# Deterministic parameter init (shapes follow the PyTorch module __init__)
# ----------------------------------------------------------------------------
def _init_conv(key, cout, cin, k):
    kw, kb = jax.random.split(key)
    fan_in = cin * k * k
    w = jax.random.normal(kw, (cout, cin, k, k), jnp.float32) / jnp.sqrt(fan_in)
    b = 0.01 * jax.random.normal(kb, (cout,), jnp.float32)
    return w, b


def _init_bn(key, c):
    kg, kb = jax.random.split(key)
    gamma = 1.0 + 0.1 * jax.random.normal(kg, (c,), jnp.float32)
    beta = 0.1 * jax.random.normal(kb, (c,), jnp.float32)
    return gamma, beta


def _init_res_block(key, cin, cout, downsample, k=3):
    keys = jax.random.split(key, 6)
    p = {}
    p["w1"], p["b1"] = _init_conv(keys[0], cout, cin, k)
    p["g1"], p["be1"] = _init_bn(keys[1], cout)
    p["w2"], p["b2"] = _init_conv(keys[2], cout, cout, k)
    p["g2"], p["be2"] = _init_bn(keys[3], cout)
    if downsample:
        p["sc_w"], p["sc_b"] = _init_conv(keys[4], cout, cin, 1)
        p["sc_gamma"], p["sc_beta"] = _init_bn(keys[5], cout)
    return p


# ----------------------------------------------------------------------------
# Pure-JAX reference (for in-script numerical validation only)
# ----------------------------------------------------------------------------
def _ref_conv(x, w, b, stride, padding):
    w_hwio = jnp.transpose(w, (2, 3, 1, 0))
    y = lax.conv_general_dilated(
        x, w_hwio, (stride, stride), [(padding, padding)] * 2,
        dimension_numbers=("NHWC", "HWIO", "NHWC"),
        precision=lax.Precision.HIGHEST)
    return y + b


def _ref_bn(x, gamma, beta):
    mu = jnp.mean(x, axis=(0, 1, 2), keepdims=True)
    var = jnp.mean((x - mu) ** 2, axis=(0, 1, 2), keepdims=True)
    return (x - mu) * lax.rsqrt(var + EPS) * gamma + beta


def _ref_res_block(x, p, downsample):
    if downsample:
        sc = _ref_bn(_ref_conv(x, p["sc_w"], p["sc_b"], 2, 0),
                     p["sc_gamma"], p["sc_beta"])
    else:
        sc = x
    s1 = 2 if downsample else 1
    h = jax.nn.relu(_ref_bn(_ref_conv(x, p["w1"], p["b1"], s1, 1),
                            p["g1"], p["be1"]))
    h = jax.nn.relu(_ref_bn(_ref_conv(h, p["w2"], p["b2"], 1, 1),
                            p["g2"], p["be2"]))
    return jax.nn.relu(h + sc)


def _ref_down_block(x_nchw, params):
    x = jnp.transpose(x_nchw, (0, 2, 3, 1))
    x = _ref_res_block(x, params["block1"], downsample=True)
    x = _ref_res_block(x, params["block2"], downsample=False)
    return jnp.transpose(x, (0, 3, 1, 2))


if __name__ == "__main__":
    key = jax.random.PRNGKey(0)
    kx, k1, k2 = jax.random.split(key, 3)

    in_channels = 4
    out_channels = int(2.0 * in_channels)  # growth_factor = 2.0
    params = {
        "block1": _init_res_block(k1, in_channels, out_channels, downsample=True),
        "block2": _init_res_block(k2, out_channels, out_channels, downsample=False),
    }

    x = jax.random.normal(kx, (2, in_channels, 16, 16), jnp.float32)  # NCHW

    packed = pack_params(params)          # one-time weight repack (not hot path)
    fwd = jax.jit(down_block)
    out = jax.block_until_ready(fwd(x, packed))

    assert out.shape == (2, out_channels, 8, 8), out.shape

    ref = jax.block_until_ready(_ref_down_block(x, params))
    assert jnp.allclose(out, ref, atol=1e-3, rtol=1e-3), (
        float(jnp.max(jnp.abs(out - ref))))

    # TODO(synk): SelfAttention / FeatureWiseAffine branches are disabled by the
    # module defaults (use_attn=False, position_emb_dim=None) and are not built.
    # TODO(synk): BatchNorm running_mean/var momentum updates (training side
    # effect) are not modeled; only the returned tensor is reproduced.
    print("KERNEL_OK")
</pallas_src>

<mosaic_0001>
module attributes {stable_mosaic.version = 11 : i64} {
  func.func @_down_block_kernel(%arg0: i32, %arg1: memref<2x8x8x16xf32, #tpu.memory_space<vmem>>, %arg2: memref<36x8xf32, #tpu.memory_space<vmem>>, %arg3: memref<4x8xf32, #tpu.memory_space<vmem>>, %arg4: memref<72x8xf32, #tpu.memory_space<vmem>>, %arg5: memref<72x8xf32, #tpu.memory_space<vmem>>, %arg6: memref<72x8xf32, #tpu.memory_space<vmem>>, %arg7: memref<5x3x8xf32, #tpu.memory_space<vmem>>, %arg8: memref<128x8xf32, #tpu.memory_space<vmem>>, %arg9: memref<2x9x9x16xf32, #tpu.memory_space<vmem>>, %arg10: memref<2x10x10x8xf32, #tpu.memory_space<vmem>>) attributes {dimension_semantics = [#tpu.dimension_semantics<arbitrary>], iteration_bounds = array<i64: 1>, scalar_prefetch = 0 : i64, scratch_operands = 2 : i64, tpu.core_type = #tpu.core_type<tc>, window_params = [{pipeline_mode = #tpu.pipeline_mode<synchronous>, transform_indices = @transform_0, window_bounds = array<i64: 2, 8, 8, 16>}, {pipeline_mode = #tpu.pipeline_mode<synchronous>, transform_indices = @transform_1, window_bounds = array<i64: 36, 8>}, {pipeline_mode = #tpu.pipeline_mode<synchronous>, transform_indices = @transform_2, window_bounds = array<i64: 4, 8>}, {pipeline_mode = #tpu.pipeline_mode<synchronous>, transform_indices = @transform_3, window_bounds = array<i64: 72, 8>}, {pipeline_mode = #tpu.pipeline_mode<synchronous>, transform_indices = @transform_4, window_bounds = array<i64: 72, 8>}, {pipeline_mode = #tpu.pipeline_mode<synchronous>, transform_indices = @transform_5, window_bounds = array<i64: 72, 8>}, {pipeline_mode = #tpu.pipeline_mode<synchronous>, transform_indices = @transform_6, window_bounds = array<i64: 5, 3, 8>}, {pipeline_mode = #tpu.pipeline_mode<synchronous>, transform_indices = @transform_7, window_bounds = array<i64: 128, 8>}]} {
    %c0 = arith.constant 0 : index
    %c0_0 = arith.constant 0 : index
    %c0_1 = arith.constant 0 : index
    %0 = vector.load %arg7[%c0, %c0_0, %c0_1] : memref<5x3x8xf32, #tpu.memory_space<vmem>>, vector<5x3x8xf32>
    %cst = arith.constant 0.000000e+00 : f32
    %1 = vector.broadcast %cst : f32 to vector<2x9x9x16xf32>
    %c0_2 = arith.constant 0 : index
    %c0_3 = arith.constant 0 : index
    %c0_4 = arith.constant 0 : index
    %c0_5 = arith.constant 0 : index
    %2 = vector.load %arg9[%c0_2, %c0_3, %c0_4, %c0_5] : memref<2x9x9x16xf32, #tpu.memory_space<vmem>>, vector<2x9x9x16xf32>
    tpu.vector_store %arg9[%c0_2, %c0_3, %c0_4, %c0_5], %1 {strides = array<i32>} : memref<2x9x9x16xf32, #tpu.memory_space<vmem>>, vector<2x9x9x16xf32>,
    %c0_6 = arith.constant 0 : index
    %c0_7 = arith.constant 0 : index
    %c0_8 = arith.constant 0 : index
    %c0_9 = arith.constant 0 : index
    %3 = vector.load %arg1[%c0_6, %c0_7, %c0_8, %c0_9] : memref<2x8x8x16xf32, #tpu.memory_space<vmem>>, vector<2x8x8x16xf32>
    %c0_10 = arith.constant 0 : index
    %c1 = arith.constant 1 : index
    %c1_11 = arith.constant 1 : index
    %c0_12 = arith.constant 0 : index
    %4 = vector.load %arg9[%c0_10, %c1, %c1_11, %c0_12] : memref<2x9x9x16xf32, #tpu.memory_space<vmem>>, vector<2x8x8x16xf32>
    tpu.vector_store %arg9[%c0_10, %c1, %c1_11, %c0_12], %3 {strides = array<i32>} : memref<2x9x9x16xf32, #tpu.memory_space<vmem>>, vector<2x8x8x16xf32>,
    %c0_13 = arith.constant 0 : index
    %c0_14 = arith.constant 0 : index
    %c0_15 = arith.constant 0 : index
    %c12 = arith.constant 12 : index
    %5 = vector.load %arg9[%c0_13, %c0_14, %c0_15, %c12] : memref<2x9x9x16xf32, #tpu.memory_space<vmem>>, vector<2x8x8x4xf32>
    %6 = vector.shape_cast %5 : vector<2x8x8x4xf32> to vector<128x4xf32>
    %c0_16 = arith.constant 0 : index
    %c0_17 = arith.constant 0 : index
    %c1_18 = arith.constant 1 : index
    %c8 = arith.constant 8 : index
    %7 = vector.load %arg9[%c0_16, %c0_17, %c1_18, %c8] : memref<2x9x9x16xf32, #tpu.memory_space<vmem>>, vector<2x8x8x4xf32>
    %8 = vector.shape_cast %7 : vector<2x8x8x4xf32> to vector<128x4xf32>
    %c0_19 = arith.constant 0 : index
    %c0_20 = arith.constant 0 : index
    %c1_21 = arith.constant 1 : index
    %c12_22 = arith.constant 12 : index
    %9 = vector.load %arg9[%c0_19, %c0_20, %c1_21, %c12_22] : memref<2x9x9x16xf32, #tpu.memory_space<vmem>>, vector<2x8x8x4xf32>
    %10 = vector.shape_cast %9 : vector<2x8x8x4xf32> to vector<128x4xf32>
    %c0_23 = arith.constant 0 : index
    %c1_24 = arith.constant 1 : index
    %c0_25 = arith.constant 0 : index
    %c4 = arith.constant 4 : index
    %11 = vector.load %arg9[%c0_23, %c1_24, %c0_25, %c4] : memref<2x9x9x16xf32, #tpu.memory_space<vmem>>, vector<2x8x8x4xf32>
    %12 = vector.shape_cast %11 : vector<2x8x8x4xf32> to vector<128x4xf32>
    %c0_26 = arith.constant 0 : index
    %c1_27 = arith.constant 1 : index
    %c1_28 = arith.constant 1 : index
    %c0_29 = arith.constant 0 : index
    %13 = vector.load %arg9[%c0_26, %c1_27, %c1_28, %c0_29] : memref<2x9x9x16xf32, #tpu.memory_space<vmem>>, vector<2x8x8x4xf32>
    %14 = vector.shape_cast %13 : vector<2x8x8x4xf32> to vector<128x4xf32>
    %c0_30 = arith.constant 0 : index
    %c1_31 = arith.constant 1 : index
    %c1_32 = arith.constant 1 : index
    %c4_33 = arith.constant 4 : index
    %15 = vector.load %arg9[%c0_30, %c1_31, %c1_32, %c4_33] : memref<2x9x9x16xf32, #tpu.memory_space<vmem>>, vector<2x8x8x4xf32>
    %16 = vector.shape_cast %15 : vector<2x8x8x4xf32> to vector<128x4xf32>
    %c0_34 = arith.constant 0 : index
    %c1_35 = arith.constant 1 : index
    %c0_36 = arith.constant 0 : index
    %c12_37 = arith.constant 12 : index
    %17 = vector.load %arg9[%c0_34, %c1_35, %c0_36, %c12_37] : memref<2x9x9x16xf32, #tpu.memory_space<vmem>>, vector<2x8x8x4xf32>
    %18 = vector.shape_cast %17 : vector<2x8x8x4xf32> to vector<128x4xf32>
    %c0_38 = arith.constant 0 : index
    %c1_39 = arith.constant 1 : index
    %c1_40 = arith.constant 1 : index
    %c8_41 = arith.constant 8 : index
    %19 = vector.load %arg9[%c0_38, %c1_39, %c1_40, %c8_41] : memref<2x9x9x16xf32, #tpu.memory_space<vmem>>, vector<2x8x8x4xf32>
    %20 = vector.shape_cast %19 : vector<2x8x8x4xf32> to vector<128x4xf32>
    %c0_42 = arith.constant 0 : index
    %c1_43 = arith.constant 1 : index
    %c1_44 = arith.constant 1 : index
    %c12_45 = arith.constant 12 : index
    %21 = vector.load %arg9[%c0_42, %c1_43, %c1_44, %c12_45] : memref<2x9x9x16xf32, #tpu.memory_space<vmem>>, vector<2x8x8x4xf32>
    %22 = vector.shape_cast %21 : vector<2x8x8x4xf32> to vector<128x4xf32>
    %23 = tpu.concatenate %6, %8, %10, %12, %14, %16, %18, %20, %22 in 1 : vector<128x4xf32>, vector<128x4xf32>, vector<128x4xf32>, vector<128x4xf32>, vector<128x4xf32>, vector<128x4xf32>, vector<128x4xf32>, vector<128x4xf32>, vector<128x4xf32> -> vector<128x36xf32>
    %c0_46 = arith.constant 0 : index
    %c0_47 = arith.constant 0 : index
    %24 = vector.load %arg2[%c0_46, %c0_47] : memref<36x8xf32, #tpu.memory_space<vmem>>, vector<36x8xf32>
    %cst_48 = arith.constant dense<0.000000e+00> : vector<128x8xf32>
    %25 = tpu.matmul %23, %24, %cst_48 {dimension_numbers = #tpu.dot_dimension_numbers<[1], [0], [0], [1], [0, 0, 1, 1], [], []>, precision = #tpu.contract_precision<fp32>} : vector<128x36xf32>, vector<36x8xf32>, vector<128x8xf32> -> vector<128x8xf32>
    %26 = vector.extract_strided_slice %0 {offsets = [0, 0, 0], sizes = [1, 1, 8], strides = [1, 1, 1]} : vector<5x3x8xf32> to vector<1x1x8xf32>
    %27 = vector.shape_cast %26 : vector<1x1x8xf32> to vector<1x8xf32>
    %28 = vector.broadcast %27 : vector<1x8xf32> to vector<128x8xf32>
    %29 = arith.addf %25, %28 : vector<128x8xf32>
    %cst_49 = arith.constant dense<0.000000e+00> : vector<8xf32>
    %30 = vector.multi_reduction <add>, %29, %cst_49 [0] : vector<128x8xf32> to vector<8xf32>
    %31 = vector.shape_cast %30 : vector<8xf32> to vector<1x8xf32>
    %cst_50 = arith.constant 1.280000e+02 : f32
    %32 = vector.broadcast %cst_50 : f32 to vector<1x8xf32>
    %33 = arith.divf %31, %32 : vector<1x8xf32>
    %34 = vector.broadcast %33 : vector<1x8xf32> to vector<128x8xf32>
    %35 = arith.subf %29, %34 : vector<128x8xf32>
    %36 = arith.mulf %35, %35 : vector<128x8xf32>
    %cst_51 = arith.constant dense<0.000000e+00> : vector<8xf32>
    %37 = vector.multi_reduction <add>, %36, %cst_51 [0] : vector<128x8xf32> to vector<8xf32>
    %38 = vector.shape_cast %37 : vector<8xf32> to vector<1x8xf32>
    %cst_52 = arith.constant 1.280000e+02 : f32
    %39 = vector.broadcast %cst_52 : f32 to vector<1x8xf32>
    %40 = arith.divf %38, %39 : vector<1x8xf32>
    %41 = vector.broadcast %33 : vector<1x8xf32> to vector<128x8xf32>
    %42 = arith.subf %29, %41 : vector<128x8xf32>
    %cst_53 = arith.constant 9.99999974E-6 : f32
    %43 = vector.broadcast %cst_53 : f32 to vector<1x8xf32>
    %44 = arith.addf %40, %43 : vector<1x8xf32>
    %45 = math.rsqrt %44 : vector<1x8xf32>
    %46 = vector.broadcast %45 : vector<1x8xf32> to vector<128x8xf32>
    %47 = arith.mulf %42, %46 : vector<128x8xf32>
    %48 = vector.extract_strided_slice %0 {offsets = [0, 1, 0], sizes = [1, 1, 8], strides = [1, 1, 1]} : vector<5x3x8xf32> to vector<1x1x8xf32>
    %49 = vector.shape_cast %48 : vector<1x1x8xf32> to vector<1x8xf32>
    %50 = vector.broadcast %49 : vector<1x8xf32> to vector<128x8xf32>
    %51 = arith.mulf %47, %50 : vector<128x8xf32>
    %52 = vector.extract_strided_slice %0 {offsets = [0, 2, 0], sizes = [1, 1, 8], strides = [1, 1, 1]} : vector<5x3x8xf32> to vector<1x1x8xf32>
    %53 = vector.shape_cast %52 : vector<1x1x8xf32> to vector<1x8xf32>
    %54 = vector.broadcast %53 : vector<1x8xf32> to vector<128x8xf32>
    %55 = arith.addf %51, %54 : vector<128x8xf32>
    %cst_54 = arith.constant 0.000000e+00 : f32
    %56 = vector.broadcast %cst_54 : f32 to vector<128x8xf32>
    %57 = arith.maximumf %55, %56 : vector<128x8xf32>
    %c0_55 = arith.constant 0 : index
    %c0_56 = arith.constant 0 : index
    %58 = vector.load %arg3[%c0_55, %c0_56] : memref<4x8xf32, #tpu.memory_space<vmem>>, vector<4x8xf32>
    %cst_57 = arith.constant dense<0.000000e+00> : vector<128x8xf32>
    %59 = tpu.matmul %14, %58, %cst_57 {dimension_numbers = #tpu.dot_dimension_numbers<[1], [0], [0], [1], [0, 0, 1, 1], [], []>, precision = #tpu.contract_precision<fp32>} : vector<128x4xf32>, vector<4x8xf32>, vector<128x8xf32> -> vector<128x8xf32>
    %60 = vector.extract_strided_slice %0 {offsets = [1, 0, 0], sizes = [1, 1, 8], strides = [1, 1, 1]} : vector<5x3x8xf32> to vector<1x1x8xf32>
    %61 = vector.shape_cast %60 : vector<1x1x8xf32> to vector<1x8xf32>
    %62 = vector.broadcast %61 : vector<1x8xf32> to vector<128x8xf32>
    %63 = arith.addf %59, %62 : vector<128x8xf32>
    %cst_58 = arith.constant dense<0.000000e+00> : vector<8xf32>
    %64 = vector.multi_reduction <add>, %63, %cst_58 [0] : vector<128x8xf32> to vector<8xf32>
    %65 = vector.shape_cast %64 : vector<8xf32> to vector<1x8xf32>
    %cst_59 = arith.constant 1.280000e+02 : f32
    %66 = vector.broadcast %cst_59 : f32 to vector<1x8xf32>
    %67 = arith.divf %65, %66 : vector<1x8xf32>
    %68 = vector.broadcast %67 : vector<1x8xf32> to vector<128x8xf32>
    %69 = arith.subf %63, %68 : vector<128x8xf32>
    %70 = arith.mulf %69, %69 : vector<128x8xf32>
    %cst_60 = arith.constant dense<0.000000e+00> : vector<8xf32>
    %71 = vector.multi_reduction <add>, %70, %cst_60 [0] : vector<128x8xf32> to vector<8xf32>
    %72 = vector.shape_cast %71 : vector<8xf32> to vector<1x8xf32>
    %cst_61 = arith.constant 1.280000e+02 : f32
    %73 = vector.broadcast %cst_61 : f32 to vector<1x8xf32>
    %74 = arith.divf %72, %73 : vector<1x8xf32>
    %75 = vector.broadcast %67 : vector<1x8xf32> to vector<128x8xf32>
    %76 = arith.subf %63, %75 : vector<128x8xf32>
    %cst_62 = arith.constant 9.99999974E-6 : f32
    %77 = vector.broadcast %cst_62 : f32 to vector<1x8xf32>
    %78 = arith.addf %74, %77 : vector<1x8xf32>
    %79 = math.rsqrt %78 : vector<1x8xf32>
    %80 = vector.broadcast %79 : vector<1x8xf32> to vector<128x8xf32>
    %81 = arith.mulf %76, %80 : vector<128x8xf32>
    %82 = vector.extract_strided_slice %0 {offsets = [1, 1, 0], sizes = [1, 1, 8], strides = [1, 1, 1]} : vector<5x3x8xf32> to vector<1x1x8xf32>
    %83 = vector.shape_cast %82 : vector<1x1x8xf32> to vector<1x8xf32>
    %84 = vector.broadcast %83 : vector<1x8xf32> to vector<128x8xf32>
    %85 = arith.mulf %81, %84 : vector<128x8xf32>
    %86 = vector.extract_strided_slice %0 {offsets = [1, 2, 0], sizes = [1, 1, 8], strides = [1, 1, 1]} : vector<5x3x8xf32> to vector<1x1x8xf32>
    %87 = vector.shape_cast %86 : vector<1x1x8xf32> to vector<1x8xf32>
    %88 = vector.broadcast %87 : vector<1x8xf32> to vector<128x8xf32>
    %89 = arith.addf %85, %88 : vector<128x8xf32>
    %cst_63 = arith.constant 0.000000e+00 : f32
    %90 = vector.broadcast %cst_63 : f32 to vector<2x10x10x8xf32>
    %c0_64 = arith.constant 0 : index
    %c0_65 = arith.constant 0 : index
    %c0_66 = arith.constant 0 : index
    %c0_67 = arith.constant 0 : index
    %91 = vector.load %arg10[%c0_64, %c0_65, %c0_66, %c0_67] : memref<2x10x10x8xf32, #tpu.memory_space<vmem>>, vector<2x10x10x8xf32>
    tpu.vector_store %arg10[%c0_64, %c0_65, %c0_66, %c0_67], %90 {strides = array<i32>} : memref<2x10x10x8xf32, #tpu.memory_space<vmem>>, vector<2x10x10x8xf32>,
    %92 = vector.shape_cast %57 : vector<128x8xf32> to vector<2x8x8x8xf32>
    %c0_68 = arith.constant 0 : index
    %c1_69 = arith.constant 1 : index
    %c1_70 = arith.constant 1 : index
    %c0_71 = arith.constant 0 : index
    %93 = vector.load %arg10[%c0_68, %c1_69, %c1_70, %c0_71] : memref<2x10x10x8xf32, #tpu.memory_space<vmem>>, vector<2x8x8x8xf32>
    tpu.vector_store %arg10[%c0_68, %c1_69, %c1_70, %c0_71], %92 {strides = array<i32>} : memref<2x10x10x8xf32, #tpu.memory_space<vmem>>, vector<2x8x8x8xf32>,
    %c0_72 = arith.constant 0 : index
    %c0_73 = arith.constant 0 : index
    %c0_74 = arith.constant 0 : index
    %c0_75 = arith.constant 0 : index
    %94 = vector.load %arg10[%c0_72, %c0_73, %c0_74, %c0_75] : memref<2x10x10x8xf32, #tpu.memory_space<vmem>>, vector<2x8x8x8xf32>
    %95 = vector.shape_cast %94 : vector<2x8x8x8xf32> to vector<128x8xf32>
    %c0_76 = arith.constant 0 : index
    %c0_77 = arith.constant 0 : index
    %c1_78 = arith.constant 1 : index
    %c0_79 = arith.constant 0 : index
    %96 = vector.load %arg10[%c0_76, %c0_77, %c1_78, %c0_79] : memref<2x10x10x8xf32, #tpu.memory_space<vmem>>, vector<2x8x8x8xf32>
    %97 = vector.shape_cast %96 : vector<2x8x8x8xf32> to vector<128x8xf32>
    %c0_80 = arith.constant 0 : index
    %c0_81 = arith.constant 0 : index
    %c2 = arith.constant 2 : index
    %c0_82 = arith.constant 0 : index
    %98 = vector.load %arg10[%c0_80, %c0_81, %c2, %c0_82] : memref<2x10x10x8xf32, #tpu.memory_space<vmem>>, vector<2x8x8x8xf32>
    %99 = vector.shape_cast %98 : vector<2x8x8x8xf32> to vector<128x8xf32>
    %c0_83 = arith.constant 0 : index
    %c1_84 = arith.constant 1 : index
    %c0_85 = arith.constant 0 : index
    %c0_86 = arith.constant 0 : index
    %100 = vector.load %arg10[%c0_83, %c1_84, %c0_85, %c0_86] : memref<2x10x10x8xf32, #tpu.memory_space<vmem>>, vector<2x8x8x8xf32>
    %101 = vector.shape_cast %100 : vector<2x8x8x8xf32> to vector<128x8xf32>
    %c0_87 = arith.constant 0 : index
    %c1_88 = arith.constant 1 : index
    %c1_89 = arith.constant 1 : index
    %c0_90 = arith.constant 0 : index
    %102 = vector.load %arg10[%c0_87, %c1_88, %c1_89, %c0_90] : memref<2x10x10x8xf32, #tpu.memory_space<vmem>>, vector<2x8x8x8xf32>
    %103 = vector.shape_cast %102 : vector<2x8x8x8xf32> to vector<128x8xf32>
    %c0_91 = arith.constant 0 : index
    %c1_92 = arith.constant 1 : index
    %c2_93 = arith.constant 2 : index
    %c0_94 = arith.constant 0 : index
    %104 = vector.load %arg10[%c0_91, %c1_92, %c2_93, %c0_94] : memref<2x10x10x8xf32, #tpu.memory_space<vmem>>, vector<2x8x8x8xf32>
    %105 = vector.shape_cast %104 : vector<2x8x8x8xf32> to vector<128x8xf32>
    %c0_95 = arith.constant 0 : index
    %c2_96 = arith.constant 2 : index
    %c0_97 = arith.constant 0 : index
    %c0_98 = arith.constant 0 : index
    %106 = vector.load %arg10[%c0_95, %c2_96, %c0_97, %c0_98] : memref<2x10x10x8xf32, #tpu.memory_space<vmem>>, vector<2x8x8x8xf32>
    %107 = vector.shape_cast %106 : vector<2x8x8x8xf32> to vector<128x8xf32>
    %c0_99 = arith.constant 0 : index
    %c2_100 = arith.constant 2 : index
    %c1_101 = arith.constant 1 : index
    %c0_102 = arith.constant 0 : index
    %108 = vector.load %arg10[%c0_99, %c2_100, %c1_101, %c0_102] : memref<2x10x10x8xf32, #tpu.memory_space<vmem>>, vector<2x8x8x8xf32>
    %109 = vector.shape_cast %108 : vector<2x8x8x8xf32> to vector<128x8xf32>
    %c0_103 = arith.constant 0 : index
    %c2_104 = arith.constant 2 : index
    %c2_105 = arith.constant 2 : index
    %c0_106 = arith.constant 0 : index
    %110 = vector.load %arg10[%c0_103, %c2_104, %c2_105, %c0_106] : memref<2x10x10x8xf32, #tpu.memory_space<vmem>>, vector<2x8x8x8xf32>
    %111 = vector.shape_cast %110 : vector<2x8x8x8xf32> to vector<128x8xf32>
    %112 = tpu.concatenate %95, %97, %99, %101, %103, %105, %107, %109, %111 in 1 : vector<128x8xf32>, vector<128x8xf32>, vector<128x8xf32>, vector<128x8xf32>, vector<128x8xf32>, vector<128x8xf32>, vector<128x8xf32>, vector<128x8xf32>, vector<128x8xf32> -> vector<128x72xf32>
    %c0_107 = arith.constant 0 : index
    %c0_108 = arith.constant 0 : index
    %113 = vector.load %arg4[%c0_107, %c0_108] : memref<72x8xf32, #tpu.memory_space<vmem>>, vector<72x8xf32>
    %cst_109 = arith.constant dense<0.000000e+00> : vector<128x8xf32>
    %114 = tpu.matmul %112, %113, %cst_109 {dimension_numbers = #tpu.dot_dimension_numbers<[1], [0], [0], [1], [0, 0, 1, 1], [], []>, precision = #tpu.contract_precision<fp32>} : vector<128x72xf32>, vector<72x8xf32>, vector<128x8xf32> -> vector<128x8xf32>
    %115 = vector.extract_strided_slice %0 {offsets = [2, 0, 0], sizes = [1, 1, 8], strides = [1, 1, 1]} : vector<5x3x8xf32> to vector<1x1x8xf32>
    %116 = vector.shape_cast %115 : vector<1x1x8xf32> to vector<1x8xf32>
    %117 = vector.broadcast %116 : vector<1x8xf32> to vector<128x8xf32>
    %118 = arith.addf %114, %117 : vector<128x8xf32>
    %cst_110 = arith.constant dense<0.000000e+00> : vector<8xf32>
    %119 = vector.multi_reduction <add>, %118, %cst_110 [0] : vector<128x8xf32> to vector<8xf32>
    %120 = vector.shape_cast %119 : vector<8xf32> to vector<1x8xf32>
    %cst_111 = arith.constant 1.280000e+02 : f32
    %121 = vector.broadcast %cst_111 : f32 to vector<1x8xf32>
    %122 = arith.divf %120, %121 : vector<1x8xf32>
    %123 = vector.broadcast %122 : vector<1x8xf32> to vector<128x8xf32>
    %124 = arith.subf %118, %123 : vector<128x8xf32>
    %125 = arith.mulf %124, %124 : vector<128x8xf32>
    %cst_112 = arith.constant dense<0.000000e+00> : vector<8xf32>
    %126 = vector.multi_reduction <add>, %125, %cst_112 [0] : vector<128x8xf32> to vector<8xf32>
    %127 = vector.shape_cast %126 : vector<8xf32> to vector<1x8xf32>
    %cst_113 = arith.constant 1.280000e+02 : f32
    %128 = vector.broadcast %cst_113 : f32 to vector<1x8xf32>
    %129 = arith.divf %127, %128 : vector<1x8xf32>
    %130 = vector.broadcast %122 : vector<1x8xf32> to vector<128x8xf32>
    %131 = arith.subf %118, %130 : vector<128x8xf32>
    %cst_114 = arith.constant 9.99999974E-6 : f32
    %132 = vector.broadcast %cst_114 : f32 to vector<1x8xf32>
    %133 = arith.addf %129, %132 : vector<1x8xf32>
    %134 = math.rsqrt %133 : vector<1x8xf32>
    %135 = vector.broadcast %134 : vector<1x8xf32> to vector<128x8xf32>
    %136 = arith.mulf %131, %135 : vector<128x8xf32>
    %137 = vector.extract_strided_slice %0 {offsets = [2, 1, 0], sizes = [1, 1, 8], strides = [1, 1, 1]} : vector<5x3x8xf32> to vector<1x1x8xf32>
    %138 = vector.shape_cast %137 : vector<1x1x8xf32> to vector<1x8xf32>
    %139 = vector.broadcast %138 : vector<1x8xf32> to vector<128x8xf32>
    %140 = arith.mulf %136, %139 : vector<128x8xf32>
    %141 = vector.extract_strided_slice %0 {offsets = [2, 2, 0], sizes = [1, 1, 8], strides = [1, 1, 1]} : vector<5x3x8xf32> to vector<1x1x8xf32>
    %142 = vector.shape_cast %141 : vector<1x1x8xf32> to vector<1x8xf32>
    %143 = vector.broadcast %142 : vector<1x8xf32> to vector<128x8xf32>
    %144 = arith.addf %140, %143 : vector<128x8xf32>
    %cst_115 = arith.constant 0.000000e+00 : f32
    %145 = vector.broadcast %cst_115 : f32 to vector<128x8xf32>
    %146 = arith.maximumf %144, %145 : vector<128x8xf32>
    %147 = arith.addf %146, %89 : vector<128x8xf32>
    %cst_116 = arith.constant 0.000000e+00 : f32
    %148 = vector.broadcast %cst_116 : f32 to vector<128x8xf32>
    %149 = arith.maximumf %147, %148 : vector<128x8xf32>
    %cst_117 = arith.constant 0.000000e+00 : f32
    %150 = vector.broadcast %cst_117 : f32 to vector<2x10x10x8xf32>
    %c0_118 = arith.constant 0 : index
    %c0_119 = arith.constant 0 : index
    %c0_120 = arith.constant 0 : index
    %c0_121 = arith.constant 0 : index
    %151 = vector.load %arg10[%c0_118, %c0_119, %c0_120, %c0_121] : memref<2x10x10x8xf32, #tpu.memory_space<vmem>>, vector<2x10x10x8xf32>
    tpu.vector_store %arg10[%c0_118, %c0_119, %c0_120, %c0_121], %150 {strides = array<i32>} : memref<2x10x10x8xf32, #tpu.memory_space<vmem>>, vector<2x10x10x8xf32>,
    %152 = vector.shape_cast %149 : vector<128x8xf32> to vector<2x8x8x8xf32>
    %c0_122 = arith.constant 0 : index
    %c1_123 = arith.constant 1 : index
    %c1_124 = arith.constant 1 : index
    %c0_125 = arith.constant 0 : index
    %153 = vector.load %arg10[%c0_122, %c1_123, %c1_124, %c0_125] : memref<2x10x10x8xf32, #tpu.memory_space<vmem>>, vector<2x8x8x8xf32>
    tpu.vector_store %arg10[%c0_122, %c1_123, %c1_124, %c0_125], %152 {strides = array<i32>} : memref<2x10x10x8xf32, #tpu.memory_space<vmem>>, vector<2x8x8x8xf32>,
    %c0_126 = arith.constant 0 : index
    %c0_127 = arith.constant 0 : index
    %c0_128 = arith.constant 0 : index
    %c0_129 = arith.constant 0 : index
    %154 = vector.load %arg10[%c0_126, %c0_127, %c0_128, %c0_129] : memref<2x10x10x8xf32, #tpu.memory_space<vmem>>, vector<2x8x8x8xf32>
    %155 = vector.shape_cast %154 : vector<2x8x8x8xf32> to vector<128x8xf32>
    %c0_130 = arith.constant 0 : index
    %c0_131 = arith.constant 0 : index
    %c1_132 = arith.constant 1 : index
    %c0_133 = arith.constant 0 : index
    %156 = vector.load %arg10[%c0_130, %c0_131, %c1_132, %c0_133] : memref<2x10x10x8xf32, #tpu.memory_space<vmem>>, vector<2x8x8x8xf32>
    %157 = vector.shape_cast %156 : vector<2x8x8x8xf32> to vector<128x8xf32>
    %c0_134 = arith.constant 0 : index
    %c0_135 = arith.constant 0 : index
    %c2_136 = arith.constant 2 : index
    %c0_137 = arith.constant 0 : index
    %158 = vector.load %arg10[%c0_134, %c0_135, %c2_136, %c0_137] : memref<2x10x10x8xf32, #tpu.memory_space<vmem>>, vector<2x8x8x8xf32>
    %159 = vector.shape_cast %158 : vector<2x8x8x8xf32> to vector<128x8xf32>
    %c0_138 = arith.constant 0 : index
    %c1_139 = arith.constant 1 : index
    %c0_140 = arith.constant 0 : index
    %c0_141 = arith.constant 0 : index
    %160 = vector.load %arg10[%c0_138, %c1_139, %c0_140, %c0_141] : memref<2x10x10x8xf32, #tpu.memory_space<vmem>>, vector<2x8x8x8xf32>
    %161 = vector.shape_cast %160 : vector<2x8x8x8xf32> to vector<128x8xf32>
    %c0_142 = arith.constant 0 : index
    %c1_143 = arith.constant 1 : index
    %c1_144 = arith.constant 1 : index
    %c0_145 = arith.constant 0 : index
    %162 = vector.load %arg10[%c0_142, %c1_143, %c1_144, %c0_145] : memref<2x10x10x8xf32, #tpu.memory_space<vmem>>, vector<2x8x8x8xf32>
    %163 = vector.shape_cast %162 : vector<2x8x8x8xf32> to vector<128x8xf32>
    %c0_146 = arith.constant 0 : index
    %c1_147 = arith.constant 1 : index
    %c2_148 = arith.constant 2 : index
    %c0_149 = arith.constant 0 : index
    %164 = vector.load %arg10[%c0_146, %c1_147, %c2_148, %c0_149] : memref<2x10x10x8xf32, #tpu.memory_space<vmem>>, vector<2x8x8x8xf32>
    %165 = vector.shape_cast %164 : vector<2x8x8x8xf32> to vector<128x8xf32>
    %c0_150 = arith.constant 0 : index
    %c2_151 = arith.constant 2 : index
    %c0_152 = arith.constant 0 : index
    %c0_153 = arith.constant 0 : index
    %166 = vector.load %arg10[%c0_150, %c2_151, %c0_152, %c0_153] : memref<2x10x10x8xf32, #tpu.memory_space<vmem>>, vector<2x8x8x8xf32>
    %167 = vector.shape_cast %166 : vector<2x8x8x8xf32> to vector<128x8xf32>
    %c0_154 = arith.constant 0 : index
    %c2_155 = arith.constant 2 : index
    %c1_156 = arith.constant 1 : index
    %c0_157 = arith.constant 0 : index
    %168 = vector.load %arg10[%c0_154, %c2_155, %c1_156, %c0_157] : memref<2x10x10x8xf32, #tpu.memory_space<vmem>>, vector<2x8x8x8xf32>
    %169 = vector.shape_cast %168 : vector<2x8x8x8xf32> to vector<128x8xf32>
    %c0_158 = arith.constant 0 : index
    %c2_159 = arith.constant 2 : index
    %c2_160 = arith.constant 2 : index
    %c0_161 = arith.constant 0 : index
    %170 = vector.load %arg10[%c0_158, %c2_159, %c2_160, %c0_161] : memref<2x10x10x8xf32, #tpu.memory_space<vmem>>, vector<2x8x8x8xf32>
    %171 = vector.shape_cast %170 : vector<2x8x8x8xf32> to vector<128x8xf32>
    %172 = tpu.concatenate %155, %157, %159, %161, %163, %165, %167, %169, %171 in 1 : vector<128x8xf32>, vector<128x8xf32>, vector<128x8xf32>, vector<128x8xf32>, vector<128x8xf32>, vector<128x8xf32>, vector<128x8xf32>, vector<128x8xf32>, vector<128x8xf32> -> vector<128x72xf32>
    %c0_162 = arith.constant 0 : index
    %c0_163 = arith.constant 0 : index
    %173 = vector.load %arg5[%c0_162, %c0_163] : memref<72x8xf32, #tpu.memory_space<vmem>>, vector<72x8xf32>
    %cst_164 = arith.constant dense<0.000000e+00> : vector<128x8xf32>
    %174 = tpu.matmul %172, %173, %cst_164 {dimension_numbers = #tpu.dot_dimension_numbers<[1], [0], [0], [1], [0, 0, 1, 1], [], []>, precision = #tpu.contract_precision<fp32>} : vector<128x72xf32>, vector<72x8xf32>, vector<128x8xf32> -> vector<128x8xf32>
    %175 = vector.extract_strided_slice %0 {offsets = [3, 0, 0], sizes = [1, 1, 8], strides = [1, 1, 1]} : vector<5x3x8xf32> to vector<1x1x8xf32>
    %176 = vector.shape_cast %175 : vector<1x1x8xf32> to vector<1x8xf32>
    %177 = vector.broadcast %176 : vector<1x8xf32> to vector<128x8xf32>
    %178 = arith.addf %174, %177 : vector<128x8xf32>
    %cst_165 = arith.constant dense<0.000000e+00> : vector<8xf32>
    %179 = vector.multi_reduction <add>, %178, %cst_165 [0] : vector<128x8xf32> to vector<8xf32>
    %180 = vector.shape_cast %179 : vector<8xf32> to vector<1x8xf32>
    %cst_166 = arith.constant 1.280000e+02 : f32
    %181 = vector.broadcast %cst_166 : f32 to vector<1x8xf32>
    %182 = arith.divf %180, %181 : vector<1x8xf32>
    %183 = vector.broadcast %182 : vector<1x8xf32> to vector<128x8xf32>
    %184 = arith.subf %178, %183 : vector<128x8xf32>
    %185 = arith.mulf %184, %184 : vector<128x8xf32>
    %cst_167 = arith.constant dense<0.000000e+00> : vector<8xf32>
    %186 = vector.multi_reduction <add>, %185, %cst_167 [0] : vector<128x8xf32> to vector<8xf32>
    %187 = vector.shape_cast %186 : vector<8xf32> to vector<1x8xf32>
    %cst_168 = arith.constant 1.280000e+02 : f32
    %188 = vector.broadcast %cst_168 : f32 to vector<1x8xf32>
    %189 = arith.divf %187, %188 : vector<1x8xf32>
    %190 = vector.broadcast %182 : vector<1x8xf32> to vector<128x8xf32>
    %191 = arith.subf %178, %190 : vector<128x8xf32>
    %cst_169 = arith.constant 9.99999974E-6 : f32
    %192 = vector.broadcast %cst_169 : f32 to vector<1x8xf32>
    %193 = arith.addf %189, %192 : vector<1x8xf32>
    %194 = math.rsqrt %193 : vector<1x8xf32>
    %195 = vector.broadcast %194 : vector<1x8xf32> to vector<128x8xf32>
    %196 = arith.mulf %191, %195 : vector<128x8xf32>
    %197 = vector.extract_strided_slice %0 {offsets = [3, 1, 0], sizes = [1, 1, 8], strides = [1, 1, 1]} : vector<5x3x8xf32> to vector<1x1x8xf32>
    %198 = vector.shape_cast %197 : vector<1x1x8xf32> to vector<1x8xf32>
    %199 = vector.broadcast %198 : vector<1x8xf32> to vector<128x8xf32>
    %200 = arith.mulf %196, %199 : vector<128x8xf32>
    %201 = vector.extract_strided_slice %0 {offsets = [3, 2, 0], sizes = [1, 1, 8], strides = [1, 1, 1]} : vector<5x3x8xf32> to vector<1x1x8xf32>
    %202 = vector.shape_cast %201 : vector<1x1x8xf32> to vector<1x8xf32>
    %203 = vector.broadcast %202 : vector<1x8xf32> to vector<128x8xf32>
    %204 = arith.addf %200, %203 : vector<128x8xf32>
    %cst_170 = arith.constant 0.000000e+00 : f32
    %205 = vector.broadcast %cst_170 : f32 to vector<128x8xf32>
    %206 = arith.maximumf %204, %205 : vector<128x8xf32>
    %cst_171 = arith.constant 0.000000e+00 : f32
    %207 = vector.broadcast %cst_171 : f32 to vector<2x10x10x8xf32>
    %c0_172 = arith.constant 0 : index
    %c0_173 = arith.constant 0 : index
    %c0_174 = arith.constant 0 : index
    %c0_175 = arith.constant 0 : index
    %208 = vector.load %arg10[%c0_172, %c0_173, %c0_174, %c0_175] : memref<2x10x10x8xf32, #tpu.memory_space<vmem>>, vector<2x10x10x8xf32>
    tpu.vector_store %arg10[%c0_172, %c0_173, %c0_174, %c0_175], %207 {strides = array<i32>} : memref<2x10x10x8xf32, #tpu.memory_space<vmem>>, vector<2x10x10x8xf32>,
    %209 = vector.shape_cast %206 : vector<128x8xf32> to vector<2x8x8x8xf32>
    %c0_176 = arith.constant 0 : index
    %c1_177 = arith.constant 1 : index
    %c1_178 = arith.constant 1 : index
    %c0_179 = arith.constant 0 : index
    %210 = vector.load %arg10[%c0_176, %c1_177, %c1_178, %c0_179] : memref<2x10x10x8xf32, #tpu.memory_space<vmem>>, vector<2x8x8x8xf32>
    tpu.vector_store %arg10[%c0_176, %c1_177, %c1_178, %c0_179], %209 {strides = array<i32>} : memref<2x10x10x8xf32, #tpu.memory_space<vmem>>, vector<2x8x8x8xf32>,
    %c0_180 = arith.constant 0 : index
    %c0_181 = arith.constant 0 : index
    %c0_182 = arith.constant 0 : index
    %c0_183 = arith.constant 0 : index
    %211 = vector.load %arg10[%c0_180, %c0_181, %c0_182, %c0_183] : memref<2x10x10x8xf32, #tpu.memory_space<vmem>>, vector<2x8x8x8xf32>
    %212 = vector.shape_cast %211 : vector<2x8x8x8xf32> to vector<128x8xf32>
    %c0_184 = arith.constant 0 : index
    %c0_185 = arith.constant 0 : index
    %c1_186 = arith.constant 1 : index
    %c0_187 = arith.constant 0 : index
    %213 = vector.load %arg10[%c0_184, %c0_185, %c1_186, %c0_187] : memref<2x10x10x8xf32, #tpu.memory_space<vmem>>, vector<2x8x8x8xf32>
    %214 = vector.shape_cast %213 : vector<2x8x8x8xf32> to vector<128x8xf32>
    %c0_188 = arith.constant 0 : index
    %c0_189 = arith.constant 0 : index
    %c2_190 = arith.constant 2 : index
    %c0_191 = arith.constant 0 : index
    %215 = vector.load %arg10[%c0_188, %c0_189, %c2_190, %c0_191] : memref<2x10x10x8xf32, #tpu.memory_space<vmem>>, vector<2x8x8x8xf32>
    %216 = vector.shape_cast %215 : vector<2x8x8x8xf32> to vector<128x8xf32>
    %c0_192 = arith.constant 0 : index
    %c1_193 = arith.constant 1 : index
    %c0_194 = arith.constant 0 : index
    %c0_195 = arith.constant 0 : index
    %217 = vector.load %arg10[%c0_192, %c1_193, %c0_194, %c0_195] : memref<2x10x10x8xf32, #tpu.memory_space<vmem>>, vector<2x8x8x8xf32>
    %218 = vector.shape_cast %217 : vector<2x8x8x8xf32> to vector<128x8xf32>
    %c0_196 = arith.constant 0 : index
    %c1_197 = arith.constant 1 : index
    %c1_198 = arith.constant 1 : index
    %c0_199 = arith.constant 0 : index
    %219 = vector.load %arg10[%c0_196, %c1_197, %c1_198, %c0_199] : memref<2x10x10x8xf32, #tpu.memory_space<vmem>>, vector<2x8x8x8xf32>
    %220 = vector.shape_cast %219 : vector<2x8x8x8xf32> to vector<128x8xf32>
    %c0_200 = arith.constant 0 : index
    %c1_201 = arith.constant 1 : index
    %c2_202 = arith.constant 2 : index
    %c0_203 = arith.constant 0 : index
    %221 = vector.load %arg10[%c0_200, %c1_201, %c2_202, %c0_203] : memref<2x10x10x8xf32, #tpu.memory_space<vmem>>, vector<2x8x8x8xf32>
    %222 = vector.shape_cast %221 : vector<2x8x8x8xf32> to vector<128x8xf32>
    %c0_204 = arith.constant 0 : index
    %c2_205 = arith.constant 2 : index
    %c0_206 = arith.constant 0 : index
    %c0_207 = arith.constant 0 : index
    %223 = vector.load %arg10[%c0_204, %c2_205, %c0_206, %c0_207] : memref<2x10x10x8xf32, #tpu.memory_space<vmem>>, vector<2x8x8x8xf32>
    %224 = vector.shape_cast %223 : vector<2x8x8x8xf32> to vector<128x8xf32>
    %c0_208 = arith.constant 0 : index
    %c2_209 = arith.constant 2 : index
    %c1_210 = arith.constant 1 : index
    %c0_211 = arith.constant 0 : index
    %225 = vector.load %arg10[%c0_208, %c2_209, %c1_210, %c0_211] : memref<2x10x10x8xf32, #tpu.memory_space<vmem>>, vector<2x8x8x8xf32>
    %226 = vector.shape_cast %225 : vector<2x8x8x8xf32> to vector<128x8xf32>
    %c0_212 = arith.constant 0 : index
    %c2_213 = arith.constant 2 : index
    %c2_214 = arith.constant 2 : index
    %c0_215 = arith.constant 0 : index
    %227 = vector.load %arg10[%c0_212, %c2_213, %c2_214, %c0_215] : memref<2x10x10x8xf32, #tpu.memory_space<vmem>>, vector<2x8x8x8xf32>
    %228 = vector.shape_cast %227 : vector<2x8x8x8xf32> to vector<128x8xf32>
    %229 = tpu.concatenate %212, %214, %216, %218, %220, %222, %224, %226, %228 in 1 : vector<128x8xf32>, vector<128x8xf32>, vector<128x8xf32>, vector<128x8xf32>, vector<128x8xf32>, vector<128x8xf32>, vector<128x8xf32>, vector<128x8xf32>, vector<128x8xf32> -> vector<128x72xf32>
    %c0_216 = arith.constant 0 : index
    %c0_217 = arith.constant 0 : index
    %230 = vector.load %arg6[%c0_216, %c0_217] : memref<72x8xf32, #tpu.memory_space<vmem>>, vector<72x8xf32>
    %cst_218 = arith.constant dense<0.000000e+00> : vector<128x8xf32>
    %231 = tpu.matmul %229, %230, %cst_218 {dimension_numbers = #tpu.dot_dimension_numbers<[1], [0], [0], [1], [0, 0, 1, 1], [], []>, precision = #tpu.contract_precision<fp32>} : vector<128x72xf32>, vector<72x8xf32>, vector<128x8xf32> -> vector<128x8xf32>
    %232 = vector.extract_strided_slice %0 {offsets = [4, 0, 0], sizes = [1, 1, 8], strides = [1, 1, 1]} : vector<5x3x8xf32> to vector<1x1x8xf32>
    %233 = vector.shape_cast %232 : vector<1x1x8xf32> to vector<1x8xf32>
    %234 = vector.broadcast %233 : vector<1x8xf32> to vector<128x8xf32>
    %235 = arith.addf %231, %234 : vector<128x8xf32>
    %cst_219 = arith.constant dense<0.000000e+00> : vector<8xf32>
    %236 = vector.multi_reduction <add>, %235, %cst_219 [0] : vector<128x8xf32> to vector<8xf32>
    %237 = vector.shape_cast %236 : vector<8xf32> to vector<1x8xf32>
    %cst_220 = arith.constant 1.280000e+02 : f32
    %238 = vector.broadcast %cst_220 : f32 to vector<1x8xf32>
    %239 = arith.divf %237, %238 : vector<1x8xf32>
    %240 = vector.broadcast %239 : vector<1x8xf32> to vector<128x8xf32>
    %241 = arith.subf %235, %240 : vector<128x8xf32>
    %242 = arith.mulf %241, %241 : vector<128x8xf32>
    %cst_221 = arith.constant dense<0.000000e+00> : vector<8xf32>
    %243 = vector.multi_reduction <add>, %242, %cst_221 [0] : vector<128x8xf32> to vector<8xf32>
    %244 = vector.shape_cast %243 : vector<8xf32> to vector<1x8xf32>
    %cst_222 = arith.constant 1.280000e+02 : f32
    %245 = vector.broadcast %cst_222 : f32 to vector<1x8xf32>
    %246 = arith.divf %244, %245 : vector<1x8xf32>
    %247 = vector.broadcast %239 : vector<1x8xf32> to vector<128x8xf32>
    %248 = arith.subf %235, %247 : vector<128x8xf32>
    %cst_223 = arith.constant 9.99999974E-6 : f32
    %249 = vector.broadcast %cst_223 : f32 to vector<1x8xf32>
    %250 = arith.addf %246, %249 : vector<1x8xf32>
    %251 = math.rsqrt %250 : vector<1x8xf32>
    %252 = vector.broadcast %251 : vector<1x8xf32> to vector<128x8xf32>
    %253 = arith.mulf %248, %252 : vector<128x8xf32>
    %254 = vector.extract_strided_slice %0 {offsets = [4, 1, 0], sizes = [1, 1, 8], strides = [1, 1, 1]} : vector<5x3x8xf32> to vector<1x1x8xf32>
    %255 = vector.shape_cast %254 : vector<1x1x8xf32> to vector<1x8xf32>
    %256 = vector.broadcast %255 : vector<1x8xf32> to vector<128x8xf32>
    %257 = arith.mulf %253, %256 : vector<128x8xf32>
    %258 = vector.extract_strided_slice %0 {offsets = [4, 2, 0], sizes = [1, 1, 8], strides = [1, 1, 1]} : vector<5x3x8xf32> to vector<1x1x8xf32>
    %259 = vector.shape_cast %258 : vector<1x1x8xf32> to vector<1x8xf32>
    %260 = vector.broadcast %259 : vector<1x8xf32> to vector<128x8xf32>
    %261 = arith.addf %257, %260 : vector<128x8xf32>
    %cst_224 = arith.constant 0.000000e+00 : f32
    %262 = vector.broadcast %cst_224 : f32 to vector<128x8xf32>
    %263 = arith.maximumf %261, %262 : vector<128x8xf32>
    %264 = arith.addf %263, %149 : vector<128x8xf32>
    %cst_225 = arith.constant 0.000000e+00 : f32
    %265 = vector.broadcast %cst_225 : f32 to vector<128x8xf32>
    %266 = arith.maximumf %264, %265 : vector<128x8xf32>
    %c0_226 = arith.constant 0 : index
    %c0_227 = arith.constant 0 : index
    %267 = vector.load %arg8[%c0_226, %c0_227] : memref<128x8xf32, #tpu.memory_space<vmem>>, vector<128x8xf32>
    tpu.vector_store %arg8[%c0_226, %c0_227], %266 {strides = array<i32>} : memref<128x8xf32, #tpu.memory_space<vmem>>, vector<128x8xf32>,
    return
  }
  func.func @transform_0(%arg0: i32) -> (i32, i32, i32, i32) {
    %c0_i32 = arith.constant 0 : i32
    %c0_i32_0 = arith.constant 0 : i32
    %c0_i32_1 = arith.constant 0 : i32
    %c0_i32_2 = arith.constant 0 : i32
    %c0_i32_3 = arith.constant 0 : i32
    return %c0_i32, %c0_i32_0, %c0_i32_1, %c0_i32_2 : i32, i32, i32, i32
  }
  func.func @transform_1(%arg0: i32) -> (i32, i32) {
    %c0_i32 = arith.constant 0 : i32
    %c0_i32_0 = arith.constant 0 : i32
    %c0_i32_1 = arith.constant 0 : i32
    return %c0_i32, %c0_i32_0 : i32, i32
  }
  func.func @transform_2(%arg0: i32) -> (i32, i32) {
    %c0_i32 = arith.constant 0 : i32
    %c0_i32_0 = arith.constant 0 : i32
    %c0_i32_1 = arith.constant 0 : i32
    return %c0_i32, %c0_i32_0 : i32, i32
  }
  func.func @transform_3(%arg0: i32) -> (i32, i32) {
    %c0_i32 = arith.constant 0 : i32
    %c0_i32_0 = arith.constant 0 : i32
    %c0_i32_1 = arith.constant 0 : i32
    return %c0_i32, %c0_i32_0 : i32, i32
  }
  func.func @transform_4(%arg0: i32) -> (i32, i32) {
    %c0_i32 = arith.constant 0 : i32
    %c0_i32_0 = arith.constant 0 : i32
    %c0_i32_1 = arith.constant 0 : i32
    return %c0_i32, %c0_i32_0 : i32, i32
  }
  func.func @transform_5(%arg0: i32) -> (i32, i32) {
    %c0_i32 = arith.constant 0 : i32
    %c0_i32_0 = arith.constant 0 : i32
    %c0_i32_1 = arith.constant 0 : i32
    return %c0_i32, %c0_i32_0 : i32, i32
  }
  func.func @transform_6(%arg0: i32) -> (i32, i32, i32) {
    %c0_i32 = arith.constant 0 : i32
    %c0_i32_0 = arith.constant 0 : i32
    %c0_i32_1 = arith.constant 0 : i32
    %c0_i32_2 = arith.constant 0 : i32
    return %c0_i32, %c0_i32_0, %c0_i32_1 : i32, i32, i32
  }
  func.func @transform_7(%arg0: i32) -> (i32, i32) {
    %c0_i32 = arith.constant 0 : i32
    %c0_i32_0 = arith.constant 0 : i32
    %c0_i32_1 = arith.constant 0 : i32
    return %c0_i32, %c0_i32_0 : i32, i32
  }
}

</mosaic_0001>

<bundles_post_ra>
// kernel: down_block.1
= control target key start
LH: loop header
LB: loop body
LE: loop exit
PB: predicated region body
PF: predicated region fallthrough
CT: control target
= control target key end

     0   :  { %vm31_vm0 = vcmask 130048   ;;  %v13740_v0 = vmov 0.0   ;;  %s7922_s24 = smov 116   ;;  %vm33_vm1 = vcmask 122880   ;;  %s7923_s27 = smov 8   ;;  %vm708_vm2 = vcmask 1043456   ;;  %s13732_s0 = inlined_call_operand.vmem [shape: f32[2,8,8,16], index: 0, kind: input, shape index: {}]   ;;  %s13733_s1 = inlined_call_operand.vmem [shape: f32[36,8], index: 1, kind: input, shape index: {}]   ;;  %s13734_s2 = inlined_call_operand.vmem [shape: f32[4,8], index: 2, kind: input, shape index: {}]   ;;  %s13735_s6 = inlined_call_operand.vmem [shape: f32[5,3,8], index: 6, kind: input, shape index: {}]   ;;  %s13736_s3 = inlined_call_operand.vmem [shape: f32[72,8], index: 3, kind: input, shape index: {}]   ;;  %s13737_s4 = inlined_call_operand.vmem [shape: f32[72,8], index: 4, kind: input, shape index: {}]   ;;  %s13738_s5 = inlined_call_operand.vmem [shape: f32[72,8], index: 5, kind: input, shape index: {}]   ;;  %s13739_s7 = inlined_call_operand.vmem [shape: f32[128,8], index: 7, kind: output, shape index: {}]  }
   0x1   :  { %51 = vst.msk [vmem:[#allocation2 + $0x90] sm:$0xff] %vm31_vm0, %v13740_v0  ;;  %v77_v2 = vld [vmem:[%s13732_s0 + $0x40] sm:$0xff]  ;;  %s7924_s28 = smov 12   ;;  %v78_v5 = vld [vmem:[%s13732_s0 + $0x48] sm:$0xff]  ;;  %s7925_s8 = smov 16   ;;  %v79_v9 = vld [vmem:[%s13732_s0 + $0x50] sm:$0xff] }
   0x2   :  { %32 = vst.msk [vmem:[#allocation2] sm:$0xff] %vm31_vm0, %v13740_v0  ;;  %s7926_s9 = smov 20   ;;  %v69_v6 = vld [vmem:[%s13732_s0] sm:$0xff]  ;;  %s7927_s12 = smov 124   ;;  %v70_v13 = vld [vmem:[%s13732_s0 + $0x8] sm:$0xff]  ;;  %v80_v16 = vld [vmem:[%s13732_s0 + $0x58] sm:$0xff] }
   0x3   :  { %35 = vst.msk [vmem:[#allocation2 + $0x10] sm:$0xff] %vm31_vm0, %v13740_v0  ;;  %v71_v19 = vld [vmem:[%s13732_s0 + $0x10] sm:$0xff]  ;;  %v81_v22 = vld [vmem:[%s13732_s0 + $0x60] sm:$0xff]  ;;  %v656_v27 = vld [vmem:[%s13733_s1 + $0x18] sm:$0xff]  ;;  %vm535_vm3 = vcmask 64512   ;;  %vm518_vm4 = vcmask 31744  }
   0x4   :  { %37 = vst.msk [vmem:[#allocation2 + $0x20] sm:$0xff] %vm31_vm0, %v13740_v0  ;;  %v657_v23 = vld [vmem:[%s13733_s1 + $0x20] sm:$0xf]  ;;  %v8128_v30 = vand.u32 4294901760, %v656_v27  ;;  %v655_v31 = vld [vmem:[%s13733_s1 + $0x10] sm:$0xff]  ;;  %v72_v34 = vld [vmem:[%s13732_s0 + $0x18] sm:$0xff] }
   0x5   :  { %39 = vst.msk [vmem:[#allocation2 + $0x30] sm:$0xff] %vm31_vm0, %v13740_v0  ;;  %v710_v24 = vsel %vm708_vm2, %v657_v23, 0  ;;  %v8146_v35 = vand.u32 4294901760, %v655_v31  ;;  %v654_v37 = vld [vmem:[%s13733_s1 + $0x8] sm:$0xff]  ;;  %v653_v42 = vld [vmem:[%s13733_s1] sm:$0xff]  ;;  %vm552_vm5 = vcmask 97280  }
   0x6   :  { %41 = vst.msk [vmem:[#allocation2 + $0x40] sm:$0xff] %vm31_vm0, %v13740_v0  ;;  %v8118_v26 = vand.u32 4294901760, %v710_v24  ;;  %v8141_v33 = vsub.f32 %v656_v27, %v8128_v30  ;;  %v8164_v41 = vand.u32 4294901760, %v654_v37  ;;  %v8184_v48 = vand.u32 4294901760, %v653_v42  ;;  %s7931_s14 = smov 64   ;;  %s7932_s15 = smov 40  }
   0x7   :  { %43 = vst.msk [vmem:[#allocation2 + $0x50] sm:$0xff] %vm31_vm0, %v13740_v0  ;;  %v8162_v40 = vsub.f32 %v655_v31, %v8146_v35  ;;  %vm585_vm6 = vcmask 162816   ;;  %vm602_vm7 = vcmask 195584   ;;  %vm619_vm8 = vcmask 228352   ;;  %s7933_s16 = smov 32   ;;  %s7934_s17 = smov 24  }
   0x8   :  { %v110_v1 = vld [vmem:[#allocation2 + $0x90] sm:$0xff]  ;;  %45 = vst.msk [vmem:[#allocation2 + $0x60] sm:$0xff] %vm31_vm0, %v13740_v0  ;;  %v8126_v29 = vsub.f32 %v710_v24, %v8118_v26  ;;  %7870 = vmatpush.msra.mxu2 %v8118_v26  ;;  %724 = vmatpush.msra.mxu0 %v8118_v26  ;;  %v881_v39 = vand.u32 4294901760, %v8141_v33  ;;  %v892_v47 = vsub.f32 %v654_v37, %v8164_v41  ;;  %vm636_vm9 = vcmask 261120  }
   0x9   :  { %198 = vrot.lane.b32.xlu0 %v110_v1, %s7922_s24  ;;  %47 = vst.msk [vmem:[#allocation2 + $0x70] sm:$0xff] %vm31_vm0, %v13740_v0  ;;  %v102_v8 = vld [vmem:[#allocation2] sm:$0xff]  ;;  %v887_v46 = vand.u32 4294901760, %v8162_v40  ;;  %v898_v53 = vsub.f32 %v653_v42, %v8184_v48  ;;  %vm659_vm10 = vcmask 293888   ;;  %vm2385_vm12 = vcmask 58368  }
   0xa   :  { %49 = vst.msk [vmem:[#allocation2 + $0x80] sm:$0xff] %vm31_vm0, %v13740_v0  ;;  %v875_v32 = vand.u32 4294901760, %v8126_v29  ;;  %7871 = vmatpush.msra.mxu2 %v8128_v30  ;;  %726 = vmatpush.msra.mxu0 %v8128_v30  ;;  %v882_v45 = vsub.f32 %v8141_v33, %v881_v39  ;;  %v893_v52 = vand.u32 4294901760, %v892_v47 }
   0xb   :  { %53 = vst.msk [vmem:[#allocation2 + $0xa0] sm:$0xff] %vm31_vm0, %v13740_v0  ;;  %v888_v51 = vsub.f32 %v8162_v40, %v887_v46  ;;  %v899_v57 = vand.u32 4294901760, %v898_v53 }
   0xc   :  { %55 = vst.msk [vmem:[#allocation2 + $0xb0] sm:$0xff] %vm31_vm0, %v13740_v0  ;;  %v876_v38 = vsub.f32 %v8126_v29, %v875_v32  ;;  %7872 = vmatpush.msra.mxu2 %v8146_v35  ;;  %728 = vmatpush.msra.mxu0 %v8146_v35  ;;  %v883_v50 = vand.u32 4294901760, %v882_v45  ;;  %v894_v56 = vsub.f32 %v892_v47, %v893_v52 }
   0xd   :  { %57 = vst.msk [vmem:[#allocation2 + $0xc0] sm:$0xff] %vm31_vm0, %v13740_v0  ;;  %v889_v55 = vand.u32 4294901760, %v888_v51  ;;  %v900_v59 = vsub.f32 %v898_v53, %v899_v57 }
   0xe   :  { %59 = vst.msk [vmem:[#allocation2 + $0xd0] sm:$0xff] %vm31_vm0, %v13740_v0  ;;  %v877_v44 = vand.u32 4294901760, %v876_v38  ;;  %7873 = vmatpush.msra.mxu2 %v8164_v41  ;;  %730 = vmatpush.msra.mxu0 %v8164_v41  ;;  %v895_v58 = vand.u32 4294901760, %v894_v56 }
   0xf   :  { %61 = vst.msk [vmem:[#allocation2 + $0xe0] sm:$0xff] %vm31_vm0, %v13740_v0  ;;  %v901_v60 = vand.u32 4294901760, %v900_v59 }
  0x10   :  { %63 = vst.msk [vmem:[#allocation2 + $0xf0] sm:$0xff] %vm31_vm0, %v13740_v0  ;;  %7875 = vmatpush.msra.mxu3 %v877_v44  ;;  %878 = vmatpush.msra.mxu1 %v877_v44 }
  0x11   :  { %65 = vst.msk [vmem:[#allocation2 + $0x100] sm:$0xff] %vm31_vm0, %v13740_v0  ;;  %7874 = vmatpush.msra.mxu2 %v8184_v48  ;;  %732 = vmatpush.msra.mxu0 %v8184_v48 }
  0x12   :  { %67 = vst.msk [vmem:[#allocation2 + $0x110] sm:$0xff] %vm31_vm0, %v13740_v0  ;;  %7876 = vmatpush.msra.mxu3 %v883_v50  ;;  %884 = vmatpush.msra.mxu1 %v883_v50 }
  0x13   :  { %54 = vst.msk [vmem:[#allocation2 + $0xa8] sm:$0x1] %vm33_vm1, %v13740_v0  ;;  %981 = vmatpush.msrb.mxu2 %v8126_v29  ;;  %1207 = vmatpush.msrb.mxu0 %v875_v32 }
  0x14   :  { %94 = vst.msk [vmem:[#allocation2 + $0xa1] sm:$0xff] %vm31_vm0, %v77_v2  ;;  %7877 = vmatpush.msra.mxu3 %v889_v55  ;;  %890 = vmatpush.msra.mxu1 %v889_v55  ;;  %v82_v2 = vld [vmem:[%s13732_s0 + $0x68] sm:$0xff] }
  0x15   :  { %34 = vst.msk [vmem:[#allocation2 + $0x8] sm:$0x1] %vm33_vm1, %v13740_v0  ;;  %984 = vmatpush.msrb.mxu2 %v8141_v33  ;;  %1211 = vmatpush.msrb.mxu0 %v881_v39 }
  0x16   :  { %36 = vst.msk [vmem:[#allocation2 + $0x18] sm:$0x1] %vm33_vm1, %v13740_v0  ;;  %7878 = vmatpush.msra.mxu3 %v895_v58  ;;  %896 = vmatpush.msra.mxu1 %v895_v58 }
  0x17   :  { %38 = vst.msk [vmem:[#allocation2 + $0x28] sm:$0x1] %vm33_vm1, %v13740_v0  ;;  %987 = vmatpush.msrb.mxu2 %v8162_v40  ;;  %1215 = vmatpush.msrb.mxu0 %v887_v46 }
  0x18   :  { %40 = vst.msk [vmem:[#allocation2 + $0x38] sm:$0x1] %vm33_vm1, %v13740_v0  ;;  %7879 = vmatpush.msra.mxu3 %v901_v60  ;;  %902 = vmatpush.msra.mxu1 %v901_v60 }
  0x19   :  { %42 = vst.msk [vmem:[#allocation2 + $0x48] sm:$0x1] %vm33_vm1, %v13740_v0  ;;  %990 = vmatpush.msrb.mxu2 %v892_v47  ;;  %1219 = vmatpush.msrb.mxu0 %v893_v52 }
  0x1a   :  { %44 = vst.msk [vmem:[#allocation2 + $0x58] sm:$0x1] %vm33_vm1, %v13740_v0  ;;  %1087 = vmatpush.msrb.mxu3 %v8118_v26  ;;  %1301 = vmatpush.msrb.mxu1 %v8118_v26 }
  0x1b   :  { %v142_v3 = vld [vmem:[#allocation2 + $0xa0] sm:$0xff]  ;;  %46 = vst.msk [vmem:[#allocation2 + $0x68] sm:$0x1] %vm33_vm1, %v13740_v0  ;;  %993 = vmatpush.msrb.mxu2 %v898_v53  ;;  %1223 = vmatpush.msrb.mxu0 %v899_v57 }
  0x1c   :  { %326 = vrot.lane.b32.xlu1 %v142_v3, %s7923_s27  ;;  %48 = vst.msk [vmem:[#allocation2 + $0x78] sm:$0x1] %vm33_vm1, %v13740_v0  ;;  %438 = vrot.lane.b32.xlu2 %v142_v3, %s7924_s28  ;;  %v158_v4 = vld [vmem:[#allocation2 + $0xa1] sm:$0xff] }
  0x1d   :  { %50 = vst.msk [vmem:[#allocation2 + $0x88] sm:$0x1] %vm33_vm1, %v13740_v0  ;;  %v118_v11 = vld [vmem:[#allocation2 + $0x1] sm:$0xff]  ;;  %1089 = vmatpush.msrb.mxu3 %v8128_v30  ;;  %1303 = vmatpush.msrb.mxu1 %v8128_v30 }
  0x1e   :  { %52 = vst.msk [vmem:[#allocation2 + $0x98] sm:$0x1] %vm33_vm1, %v13740_v0 }
  0x1f   :  { %56 = vst.msk [vmem:[#allocation2 + $0xb8] sm:$0x1] %vm33_vm1, %v13740_v0  ;;  %1091 = vmatpush.msrb.mxu3 %v8146_v35  ;;  %1305 = vmatpush.msrb.mxu1 %v8146_v35  ;;  %v83_v35 = vld [vmem:[%s13732_s0 + $0x70] sm:$0xff] }
  0x20   :  { %58 = vst.msk [vmem:[#allocation2 + $0xc8] sm:$0x1] %vm33_vm1, %v13740_v0 }
  0x21   :  { %60 = vst.msk [vmem:[#allocation2 + $0xd8] sm:$0x1] %vm33_vm1, %v13740_v0  ;;  %1093 = vmatpush.msrb.mxu3 %v8164_v41  ;;  %1307 = vmatpush.msrb.mxu1 %v8164_v41 }
  0x22   :  { %62 = vst.msk [vmem:[#allocation2 + $0xe8] sm:$0x1] %vm33_vm1, %v13740_v0 }
  0x23   :  { %64 = vst.msk [vmem:[#allocation2 + $0xf8] sm:$0x1] %vm33_vm1, %v13740_v0  ;;  %1095 = vmatpush.msrb.mxu3 %v8184_v48  ;;  %1309 = vmatpush.msrb.mxu1 %v8184_v48 }
  0x24   :  { %66 = vst.msk [vmem:[#allocation2 + $0x108] sm:$0x1] %vm33_vm1, %v13740_v0  ;;  %390 = vrot.lane.b32.xlu1 %v158_v4, %s7925_s8  ;;  %486 = vrot.lane.b32.xlu2 %v158_v4, %s7926_s9 }
  0x25   :  { %68 = vst.msk [vmem:[#allocation2 + $0x118] sm:$0x1] %vm33_vm1, %v13740_v0  ;;  %v126_v7 = vld [vmem:[#allocation2 + $0x91] sm:$0xff]  ;;  %vm3163_vm1 = vcmask 326656  }
  0x26   :  { %262 = vrot.lane.b32.xlu0 %v126_v7, %s7927_s12  ;;  %95 = vst.msk [vmem:[#allocation2 + $0xb1] sm:$0xff] %vm31_vm0, %v78_v5  ;;  %v73_v5 = vld [vmem:[%s13732_s0 + $0x20] sm:$0xff] }
  0x27   :  { %86 = vst.msk [vmem:[#allocation2 + $0x11] sm:$0xff] %vm31_vm0, %v69_v6 }
  0x28   :  { %96 = vst.msk [vmem:[#allocation2 + $0xc1] sm:$0xff] %vm31_vm0, %v79_v9 }
  0x29   :  { %87 = vst.msk [vmem:[#allocation2 + $0x21] sm:$0xff] %vm31_vm0, %v70_v13 }
  0x2a   :  { %97 = vst.msk [vmem:[#allocation2 + $0xd1] sm:$0xff] %vm31_vm0, %v80_v16 }
  0x2b   :  { %88 = vst.msk [vmem:[#allocation2 + $0x31] sm:$0xff] %vm31_vm0, %v71_v19 }
  0x2c   :  { %264 = vrot.lane.b32.xlu1 %v158_v4, %s7927_s12  ;;  %182 = vrot.lane.b32.xlu2 %v102_v8, %s7922_s24  ;;  %98 = vst.msk [vmem:[#allocation2 + $0xe1] sm:$0xff] %vm31_vm0, %v81_v22 }
  0x2d   :  { %v143_v10 = vld [vmem:[#allocation2 + $0xb0] sm:$0xff]  ;;  %89 = vst.msk [vmem:[#allocation2 + $0x41] sm:$0xff] %vm31_vm0, %v72_v34 }
  0x2e   :  { %200 = vrot.lane.b32.xlu0 %v142_v3, %s7922_s24  ;;  %v159_v12 = vld [vmem:[#allocation2 + $0xb1] sm:$0xff]  ;;  %2384 = vst.msk [vmem:[#allocation3] sm:$0xff] %vm535_vm3, %v13740_v0 }
  0x2f   :  { %v150_v14 = vld [vmem:[#allocation2 + $0x11] sm:$0xff]  ;;  %v144_v17 = vld [vmem:[#allocation2 + $0xc0] sm:$0xff]  ;;  %2387 = vst.msk [vmem:[#allocation3 + $0x10] sm:$0xff] %vm535_vm3, %v13740_v0 }
  0x30   :  { %v134_v15 = vld [vmem:[#allocation2 + $0x10] sm:$0xff]  ;;  %v160_v18 = vld [vmem:[#allocation2 + $0xc1] sm:$0xff]  ;;  %2389 = vst.msk [vmem:[#allocation3 + $0x20] sm:$0xff] %vm535_vm3, %v13740_v0 }
  0x31   :  { %v151_v20 = vld [vmem:[#allocation2 + $0x21] sm:$0xff]  ;;  %v8116_v25 = vld [vmem:[#allocation2 + $0xd0] sm:$0xff]  ;;  %2391 = vst.msk [vmem:[#allocation3 + $0x30] sm:$0xff] %vm535_vm3, %v13740_v0 }
  0x32   :  { %v135_v21 = vld [vmem:[#allocation2 + $0x20] sm:$0xff]  ;;  %v8123_v28 = vld [vmem:[#allocation2 + $0xd1] sm:$0xff]  ;;  %2393 = vst.msk [vmem:[#allocation3 + $0x40] sm:$0xff] %vm535_vm3, %v13740_v0 }
  0x33   :  { %v8173_v43 = vld [vmem:[#allocation2 + $0x31] sm:$0xff]  ;;  %2395 = vst.msk [vmem:[#allocation3 + $0x50] sm:$0xff] %vm535_vm3, %v13740_v0  ;;  %v146_v3 = vld [vmem:[#allocation2 + $0xe0] sm:$0xff] }
  0x34   :  { %328 = vrot.lane.b32.xlu1 %v143_v10, %s7923_s27  ;;  %392 = vrot.lane.b32.xlu2 %v159_v12, %s7925_s8  ;;  %v8186_v49 = vld [vmem:[#allocation2 + $0x30] sm:$0xff]  ;;  %2397 = vst.msk [vmem:[#allocation3 + $0x60] sm:$0xff] %vm535_vm3, %v13740_v0  ;;  %v162_v4 = vld [vmem:[#allocation2 + $0xe1] sm:$0xff] }
  0x35   :  { %2399 = vst.msk [vmem:[#allocation3 + $0x70] sm:$0xff] %vm535_vm3, %v13740_v0  ;;  %v137_v13 = vld [vmem:[#allocation2 + $0x40] sm:$0xff] }
  0x36   :  { %246 = vrot.lane.b32.xlu0 %v118_v11, %s7927_s12  ;;  %2401 = vst.msk [vmem:[#allocation3 + $0x80] sm:$0xff] %vm535_vm3, %v13740_v0 }
  0x37   :  { %2403 = vst.msk [vmem:[#allocation3 + $0x90] sm:$0xff] %vm535_vm3, %v13740_v0 }
  0x38   :  { %2405 = vst.msk [vmem:[#allocation3 + $0xa0] sm:$0xff] %vm535_vm3, %v13740_v0 }
  0x39   :  { %2407 = vst.msk [vmem:[#allocation3 + $0xb0] sm:$0xff] %vm535_vm3, %v13740_v0 }
  0x3a   :  { %2409 = vst.msk [vmem:[#allocation3 + $0xc0] sm:$0xff] %vm535_vm3, %v13740_v0 }
  0x3b   :  { %2411 = vst.msk [vmem:[#allocation3 + $0xd0] sm:$0xff] %vm535_vm3, %v13740_v0 }
  0x3c   :  { %374 = vrot.lane.b32.xlu1 %v150_v14, %s7925_s8  ;;  %440 = vrot.lane.b32.xlu2 %v143_v10, %s7924_s28  ;;  %2413 = vst.msk [vmem:[#allocation3 + $0xe0] sm:$0xff] %vm535_vm3, %v13740_v0 }
  0x3d   :  { %2415 = vst.msk [vmem:[#allocation3 + $0xf0] sm:$0xff] %vm535_vm3, %v13740_v0 }
  0x3e   :  { %310 = vrot.lane.b32.xlu0 %v134_v15, %s7923_s27  ;;  %2417 = vst.msk [vmem:[#allocation3 + $0x100] sm:$0xff] %vm535_vm3, %v13740_v0 }
  0x3f   :  { %2419 = vst.msk [vmem:[#allocation3 + $0x110] sm:$0xff] %vm535_vm3, %v13740_v0 }
  0x40   :  { %2421 = vst.msk [vmem:[#allocation3 + $0x120] sm:$0xff] %vm535_vm3, %v13740_v0 }
  0x41   :  { %2423 = vst.msk [vmem:[#allocation3 + $0x130] sm:$0xff] %vm535_vm3, %v13740_v0 }
  0x42   :  { %99 = vst.msk [vmem:[#allocation2 + $0xf1] sm:$0xff] %vm31_vm0, %v82_v2 }
  0x43   :  { %90 = vst.msk [vmem:[#allocation2 + $0x51] sm:$0xff] %vm31_vm0, %v73_v5 }
  0x44   :  { %422 = vrot.lane.b32.xlu1 %v134_v15, %s7924_s28  ;;  %202 = vrot.lane.b32.xlu2 %v143_v10, %s7922_s24  ;;  %v153_v10 = vld [vmem:[#allocation2 + $0x41] sm:$0xff]  ;;  %100 = vst.msk [vmem:[#allocation2 + $0x101] sm:$0xff] %vm31_vm0, %v83_v35 }
  0x46   :  { %488 = vrot.lane.b32.xlu0 %v159_v12, %s7926_s9 }
  0x49   :  { %v147_v38 = vld [vmem:[#allocation2 + $0xf0] sm:$0xff] }
  0x4a   :  { %v163_v41 = vld [vmem:[#allocation2 + $0xf1] sm:$0xff] }
  0x4b   :  { %v154_v51 = vld [vmem:[#allocation2 + $0x51] sm:$0xff] }
  0x4c   :  { %470 = vrot.lane.b32.xlu1 %v150_v14, %s7926_s9  ;;  %184 = vrot.lane.b32.xlu2 %v134_v15, %s7922_s24  ;;  %v138_v55 = vld [vmem:[#allocation2 + $0x50] sm:$0xff] }
  0x4e   :  { %266 = vrot.lane.b32.xlu0 %v159_v12, %s7927_s12 }
  0x54   :  { %330 = vrot.lane.b32.xlu1 %v144_v17, %s7923_s27  ;;  %394 = vrot.lane.b32.xlu2 %v160_v18, %s7925_s8 }
  0x56   :  { %248 = vrot.lane.b32.xlu0 %v150_v14, %s7927_s12 }
  0x5c   :  { %376 = vrot.lane.b32.xlu1 %v151_v20, %s7925_s8  ;;  %442 = vrot.lane.b32.xlu2 %v144_v17, %s7924_s28 }
  0x5e   :  { %312 = vrot.lane.b32.xlu0 %v135_v21, %s7923_s27 }
  0x64   :  { %424 = vrot.lane.b32.xlu1 %v135_v21, %s7924_s28  ;;  %204 = vrot.lane.b32.xlu2 %v144_v17, %s7922_s24 }
  0x66   :  { %490 = vrot.lane.b32.xlu0 %v160_v18, %s7926_s9 }
  0x6c   :  { %472 = vrot.lane.b32.xlu1 %v151_v20, %s7926_s9  ;;  %186 = vrot.lane.b32.xlu2 %v135_v21, %s7922_s24 }
  0x6e   :  { %268 = vrot.lane.b32.xlu0 %v160_v18, %s7927_s12 }
  0x74   :  { %332 = vrot.lane.b32.xlu1 %v8116_v25, %s7923_s27  ;;  %396 = vrot.lane.b32.xlu2 %v8123_v28, %s7925_s8 }
  0x76   :  { %250 = vrot.lane.b32.xlu0 %v151_v20, %s7927_s12  ;;  %v8151_v36 = vpop.permute.xlu2 %438 }
  0x7b   :  { %v199_v62 = vpop.permute.xlu0 %198 }
  0x7c   :  { %378 = vrot.lane.b32.xlu1 %v8173_v43, %s7925_s8  ;;  %444 = vrot.lane.b32.xlu2 %v8116_v25, %s7924_s28 }
  0x7e   :  { %314 = vrot.lane.b32.xlu0 %v8186_v49, %s7923_s27  ;;  %v8203_v54 = vpop.permute.xlu2 %486 }
  0x84   :  { %426 = vrot.lane.b32.xlu1 %v8186_v49, %s7924_s28  ;;  %206 = vrot.lane.b32.xlu2 %v8116_v25, %s7922_s24 }
  0x86   :  { %492 = vrot.lane.b32.xlu0 %v8123_v28, %s7926_s9  ;;  %v8233_v61 = vpop.permute.xlu2 %182 }
  0x8c   :  { %474 = vrot.lane.b32.xlu1 %v8173_v43, %s7926_s9  ;;  %188 = vrot.lane.b32.xlu2 %v8186_v49, %s7922_s24 }
  0x8e   :  { %270 = vrot.lane.b32.xlu0 %v8123_v28, %s7927_s12  ;;  %v327_v63 = vpop.permute.xlu1 %326  ;;  %v8257_v1 = vpop.permute.xlu2 %392 }
  0x94   :  { %334 = vrot.lane.b32.xlu1 %v146_v3, %s7923_s27  ;;  %398 = vrot.lane.b32.xlu2 %v162_v4, %s7925_s8 }
  0x96   :  { %252 = vrot.lane.b32.xlu0 %v8173_v43, %s7927_s12  ;;  %v391_v6 = vpop.permute.xlu1 %390  ;;  %v8272_v7 = vpop.permute.xlu2 %440  ;;  %v74_v43 = vld [vmem:[%s13732_s0 + $0x28] sm:$0xff] }
  0x97   :  { %91 = vst.msk [vmem:[#allocation2 + $0x61] sm:$0xff] %vm31_vm0, %v74_v43 }
  0x98   :  { %v263_v8 = vpop.permute.xlu0 %262 }
  0x99   :  { %v527_v9 = vsel %vm518_vm4, %v199_v62, %v263_v8 }
  0x9a   :  { %v544_v11 = vsel %vm535_vm3, %v527_v9, %v263_v8 }
  0x9b   :  { %v561_v12 = vsel %vm552_vm5, %v544_v11, %v327_v63 }
  0x9c   :  { %v577_v14 = vsel %vm31_vm0, %v561_v12, %v391_v6  ;;  %380 = vrot.lane.b32.xlu1 %v153_v10, %s7925_s8  ;;  %446 = vrot.lane.b32.xlu2 %v146_v3, %s7924_s28 }
  0x9d   :  { %v594_v15 = vsel %vm585_vm6, %v577_v14, %v391_v6 }
  0x9e   :  { %v611_v16 = vsel %vm602_vm7, %v594_v15, %v8151_v36  ;;  %316 = vrot.lane.b32.xlu0 %v137_v13, %s7923_s27  ;;  %v265_v17 = vpop.permute.xlu1 %264  ;;  %v8285_v18 = vpop.permute.xlu2 %202 }
  0x9f   :  { %v628_v19 = vsel %vm619_vm8, %v611_v16, %v8203_v54 }
  0xa0   :  { %v201_v20 = vpop.permute.xlu0 %200  ;;  %v645_v21 = vsel %vm636_vm9, %v628_v19, %v8203_v54  ;;  %v84_v19 = vld [vmem:[%s13732_s0 + $0x78] sm:$0xff] }
  0xa1   :  { %v685_v22 = vsel %vm659_vm10, %v645_v21, 0  ;;  %v528_v31 = vsel %vm518_vm4, %v201_v20, %v265_v17  ;;  %101 = vst.msk [vmem:[#allocation2 + $0x111] sm:$0xff] %vm31_vm0, %v84_v19  ;;  %v148_v21 = vld [vmem:[#allocation2 + $0x100] sm:$0xff] }
  0xa2   :  { %v8292_v23 = vand.u32 4294901760, %v685_v22  ;;  %v545_v32 = vsel %vm535_vm3, %v528_v31, %v265_v17 }
  0xa4   :  { %936 = vmatmul.f32.vlgmr.msra.gmra.mxu3 %v8292_v23  ;;  %428 = vrot.lane.b32.xlu1 %v137_v13, %s7924_s28  ;;  %v8297_v24 = vsub.f32 %v685_v22, %v8292_v23 }
  0xa5   :  { %208 = vrot.lane.b32.xlu2 %v146_v3, %s7922_s24 }
  0xa6   :  { %494 = vrot.lane.b32.xlu0 %v162_v4, %s7926_s9  ;;  %v329_v25 = vpop.permute.xlu1 %328  ;;  %v799_v26 = vand.u32 4294901760, %v8297_v24  ;;  %v8302_v27 = vpop.permute.xlu2 %184 }
  0xa7   :  { %v562_v36 = vsel %vm552_vm5, %v545_v32, %v329_v25 }
  0xa8   :  { %v247_v28 = vpop.permute.xlu0 %246  ;;  %v800_v29 = vsub.f32 %v8297_v24, %v799_v26  ;;  %v578_v39 = vsel %vm31_vm0, %v562_v36, %v8257_v1  ;;  %v165_v19 = vld [vmem:[#allocation2 + $0x111] sm:$0xff] }
  0xa9   :  { %v519_v40 = vsel %vm518_vm4, %v8233_v61, %v247_v28  ;;  %v595_v42 = vsel %vm585_vm6, %v578_v39, %v8257_v1 }
  0xaa   :  { %v801_v30 = vand.u32 4294901760, %v800_v29  ;;  %v536_v44 = vsel %vm535_vm3, %v519_v40, %v247_v28  ;;  %v612_v48 = vsel %vm602_vm7, %v595_v42, %v8272_v7  ;;  %v164_v28 = vld [vmem:[#allocation2 + $0x101] sm:$0xff] }
  0xac   :  { %802 = vmatmul.f32.vlgmr.msra.gmra.mxu2 %v801_v30  ;;  %476 = vrot.lane.b32.xlu1 %v153_v10, %s7926_s9  ;;  %v75_v30 = vld [vmem:[%s13732_s0 + $0x30] sm:$0xff] }
  0xad   :  { %190 = vrot.lane.b32.xlu2 %v137_v13, %s7922_s24  ;;  %92 = vst.msk [vmem:[#allocation2 + $0x71] sm:$0xff] %vm31_vm0, %v75_v30 }
  0xae   :  { %272 = vrot.lane.b32.xlu0 %v162_v4, %s7927_s12  ;;  %v375_v33 = vpop.permute.xlu1 %374  ;;  %v8312_v34 = vpop.permute.xlu2 %394 }
  0xb0   :  { %v311_v37 = vpop.permute.xlu0 %310 }
  0xb1   :  { %v553_v47 = vsel %vm552_vm5, %v536_v44, %v311_v37  ;;  %v8410_v37 = vld [vmem:[#allocation2 + $0x61] sm:$0xff] }
  0xb2   :  { %v569_v52 = vsel %vm31_vm0, %v553_v47, %v375_v33 }
  0xb3   :  { %v586_v57 = vsel %vm585_vm6, %v569_v52, %v375_v33 }
  0xb4   :  { %336 = vrot.lane.b32.xlu1 %v147_v38, %s7923_s27  ;;  %v8480_v30 = vld [vmem:[#allocation2 + $0x71] sm:$0xff] }
  0xb5   :  { %400 = vrot.lane.b32.xlu2 %v163_v41, %s7925_s8 }
  0xb6   :  { %254 = vrot.lane.b32.xlu0 %v153_v10, %s7927_s12  ;;  %v423_v45 = vpop.permute.xlu1 %422  ;;  %v8332_v46 = vpop.permute.xlu2 %442 }
  0xb7   :  { %v603_v59 = vsel %vm602_vm7, %v586_v57, %v423_v45 }
  0xb8   :  { %v489_v49 = vpop.permute.xlu0 %488 }
  0xb9   :  { %v629_v50 = vsel %vm619_vm8, %v612_v48, %v489_v49 }
  0xba   :  { %v646_v53 = vsel %vm636_vm9, %v629_v50, %v489_v49 }
  0xbb   :  { %v688_v54 = vsel %vm659_vm10, %v646_v53, 0 }
  0xbc   :  { %v8342_v56 = vand.u32 4294901760, %v688_v54  ;;  %382 = vrot.lane.b32.xlu1 %v154_v51, %s7925_s8 }
  0xbd   :  { %448 = vrot.lane.b32.xlu2 %v147_v38, %s7924_s28 }
  0xbe   :  { %v8348_v58 = vsub.f32 %v688_v54, %v8342_v56  ;;  %940 = vmatmul.f32.gmra.mxu3 %v8342_v56  ;;  %318 = vrot.lane.b32.xlu0 %v138_v55, %s7923_s27  ;;  %v471_v60 = vpop.permute.xlu1 %470  ;;  %v8353_v61 = vpop.permute.xlu2 %204 }
  0xbf   :  { %v620_v62 = vsel %vm619_vm8, %v603_v59, %v471_v60 }
  0xc0   :  { %v267_v63 = vpop.permute.xlu0 %266  ;;  %v637_v1 = vsel %vm636_vm9, %v620_v62, %v471_v60  ;;  %v807_v2 = vand.u32 4294901760, %v8348_v58 }
  0xc1   :  { %v661_v3 = vsel %vm659_vm10, %v637_v1, 0  ;;  %v529_v14 = vsel %vm518_vm4, %v8285_v18, %v267_v63 }
  0xc2   :  { %v8359_v4 = vand.u32 4294901760, %v661_v3  ;;  %v808_v5 = vsub.f32 %v8348_v58, %v807_v2  ;;  %v546_v15 = vsel %vm535_vm3, %v529_v14, %v267_v63  ;;  %v149_v14 = vld [vmem:[#allocation2 + $0x110] sm:$0xff] }
  0xc4   :  { %v8365_v6 = vsub.f32 %v661_v3, %v8359_v4  ;;  %v809_v7 = vand.u32 4294901760, %v808_v5  ;;  %430 = vrot.lane.b32.xlu1 %v138_v55, %s7924_s28  ;;  %904 = vmatmul.f32.vlgmr.msra.gmra.mxu1 %v8359_v4 }
  0xc5   :  { %210 = vrot.lane.b32.xlu2 %v147_v38, %s7922_s24 }
  0xc6   :  { %810 = vmatmul.f32.gmra.mxu2 %v809_v7  ;;  %496 = vrot.lane.b32.xlu0 %v163_v41, %s7926_s9  ;;  %v331_v8 = vpop.permute.xlu1 %330  ;;  %v735_v9 = vand.u32 4294901760, %v8365_v6  ;;  %v8372_v10 = vpop.permute.xlu2 %186  ;;  %v76_v7 = vld [vmem:[%s13732_s0 + $0x38] sm:$0xff] }
  0xc7   :  { %v563_v20 = vsel %vm552_vm5, %v546_v15, %v331_v8  ;;  %93 = vst.msk [vmem:[#allocation2 + $0x81] sm:$0xff] %vm31_vm0, %v76_v7 }
  0xc8   :  { %v249_v11 = vpop.permute.xlu0 %248  ;;  %v736_v12 = vsub.f32 %v8365_v6, %v735_v9  ;;  %v579_v22 = vsel %vm31_vm0, %v563_v20, %v8312_v34 }
  0xc9   :  { %v520_v25 = vsel %vm518_vm4, %v8302_v27, %v249_v11  ;;  %v596_v29 = vsel %vm585_vm6, %v579_v22, %v8312_v34 }
  0xca   :  { %v737_v13 = vand.u32 4294901760, %v736_v12  ;;  %v537_v31 = vsel %vm535_vm3, %v520_v25, %v249_v11  ;;  %v613_v34 = vsel %vm602_vm7, %v596_v29, %v8332_v46 }
  0xcc   :  { %478 = vrot.lane.b32.xlu1 %v154_v51, %s7926_s9  ;;  %738 = vmatmul.f32.vlgmr.msra.gmra.mxu0 %v737_v13 }
  0xcd   :  { %192 = vrot.lane.b32.xlu2 %v138_v55, %s7922_s24 }
  0xce   :  { %274 = vrot.lane.b32.xlu0 %v163_v41, %s7927_s12  ;;  %v377_v16 = vpop.permute.xlu1 %376  ;;  %v8383_v17 = vpop.permute.xlu2 %396  ;;  %v139_v41 = vld [vmem:[#allocation2 + $0x60] sm:$0xff] }
  0xcf   :  { %v141_v7 = vld [vmem:[#allocation2 + $0x80] sm:$0xff] }
  0xd0   :  { %v313_v18 = vpop.permute.xlu0 %312 }
  0xd1   :  { %v554_v27 = vsel %vm552_vm5, %v537_v31, %v313_v18 }
  0xd2   :  { %v570_v38 = vsel %vm31_vm0, %v554_v27, %v377_v16  ;;  %v140_v27 = vld [vmem:[#allocation2 + $0x70] sm:$0xff] }
  0xd3   :  { %v587_v43 = vsel %vm585_vm6, %v570_v38, %v377_v16 }
  0xd4   :  { %338 = vrot.lane.b32.xlu1 %v148_v21, %s7923_s27 }
  0xd5   :  { %402 = vrot.lane.b32.xlu2 %v164_v28, %s7925_s8 }
  0xd6   :  { %256 = vrot.lane.b32.xlu0 %v154_v51, %s7927_s12  ;;  %v425_v32 = vpop.permute.xlu1 %424  ;;  %v8403_v33 = vpop.permute.xlu2 %444 }
  0xd7   :  { %v604_v45 = vsel %vm602_vm7, %v587_v43, %v425_v32 }
  0xd8   :  { %v491_v35 = vpop.permute.xlu0 %490 }
  0xd9   :  { %v630_v36 = vsel %vm619_vm8, %v613_v34, %v491_v35 }
  0xda   :  { %v647_v39 = vsel %vm636_vm9, %v630_v36, %v491_v35 }
  0xdb   :  { %v691_v40 = vsel %vm659_vm10, %v647_v39, 0 }
  0xdc   :  { %v8415_v42 = vand.u32 4294901760, %v691_v40  ;;  %384 = vrot.lane.b32.xlu1 %v8410_v37, %s7925_s8 }
  0xdd   :  { %450 = vrot.lane.b32.xlu2 %v148_v21, %s7924_s28 }
  0xde   :  { %v8422_v44 = vsub.f32 %v691_v40, %v8415_v42  ;;  %320 = vrot.lane.b32.xlu0 %v139_v41, %s7923_s27  ;;  %944 = vmatmul.f32.gmra.mxu3 %v8415_v42  ;;  %v473_v46 = vpop.permute.xlu1 %472  ;;  %v8427_v47 = vpop.permute.xlu2 %206 }
  0xdf   :  { %v621_v48 = vsel %vm619_vm8, %v604_v45, %v473_v46 }
  0xe0   :  { %v269_v49 = vpop.permute.xlu0 %268  ;;  %v638_v50 = vsel %vm636_vm9, %v621_v48, %v473_v46  ;;  %v815_v51 = vand.u32 4294901760, %v8422_v44 }
  0xe1   :  { %v664_v52 = vsel %vm659_vm10, %v638_v50, 0  ;;  %v530_v5 = vsel %vm518_vm4, %v8353_v61, %v269_v49 }
  0xe2   :  { %v8433_v53 = vand.u32 4294901760, %v664_v52  ;;  %v816_v54 = vsub.f32 %v8422_v44, %v815_v51  ;;  %v547_v8 = vsel %vm535_vm3, %v530_v5, %v269_v49 }
  0xe4   :  { %v8439_v55 = vsub.f32 %v664_v52, %v8433_v53  ;;  %v817_v57 = vand.u32 4294901760, %v816_v54  ;;  %432 = vrot.lane.b32.xlu1 %v139_v41, %s7924_s28  ;;  %908 = vmatmul.f32.gmra.mxu1 %v8433_v53 }
  0xe5   :  { %212 = vrot.lane.b32.xlu2 %v148_v21, %s7922_s24 }
  0xe6   :  { %498 = vrot.lane.b32.xlu0 %v164_v28, %s7926_s9  ;;  %818 = vmatmul.f32.gmra.mxu2 %v817_v57  ;;  %v333_v59 = vpop.permute.xlu1 %332  ;;  %v743_v60 = vand.u32 4294901760, %v8439_v55  ;;  %v8446_v62 = vpop.permute.xlu2 %188 }
  0xe7   :  { %v564_v61 = vsel %vm552_vm5, %v547_v8, %v333_v59 }
  0xe8   :  { %v251_v63 = vpop.permute.xlu0 %250  ;;  %v744_v1 = vsub.f32 %v8439_v55, %v743_v60  ;;  %v580_v15 = vsel %vm31_vm0, %v564_v61, %v8383_v17 }
  0xe9   :  { %v521_v16 = vsel %vm518_vm4, %v8372_v10, %v251_v63  ;;  %v597_v20 = vsel %vm585_vm6, %v580_v15, %v8383_v17  ;;  %v8532_v15 = vld [vmem:[#allocation2 + $0x81] sm:$0xff] }
  0xea   :  { %v745_v3 = vand.u32 4294901760, %v744_v1  ;;  %v538_v18 = vsel %vm535_vm3, %v521_v16, %v251_v63  ;;  %v614_v10 = vsel %vm602_vm7, %v597_v20, %v8403_v33 }
  0xec   :  { %480 = vrot.lane.b32.xlu1 %v8410_v37, %s7926_s9  ;;  %746 = vmatmul.f32.gmra.mxu0 %v745_v3 }
  0xed   :  { %194 = vrot.lane.b32.xlu2 %v139_v41, %s7922_s24 }
  0xee   :  { %276 = vrot.lane.b32.xlu0 %v164_v28, %s7927_s12  ;;  %v379_v11 = vpop.permute.xlu1 %378  ;;  %v8461_v12 = vpop.permute.xlu2 %398 }
  0xf0   :  { %v315_v13 = vpop.permute.xlu0 %314 }
  0xf1   :  { %v555_v25 = vsel %vm552_vm5, %v538_v18, %v315_v13 }
  0xf2   :  { %v571_v17 = vsel %vm31_vm0, %v555_v25, %v379_v11 }
  0xf3   :  { %v588_v35 = vsel %vm585_vm6, %v571_v17, %v379_v11 }
  0xf4   :  { %340 = vrot.lane.b32.xlu1 %v149_v14, %s7923_s27 }
  0xf5   :  { %404 = vrot.lane.b32.xlu2 %v165_v19, %s7925_s8 }
  0xf6   :  { %258 = vrot.lane.b32.xlu0 %v8410_v37, %s7927_s12  ;;  %v427_v21 = vpop.permute.xlu1 %426  ;;  %v447_v22 = vpop.permute.xlu2 %446 }
  0xf7   :  { %v605_v36 = vsel %vm602_vm7, %v588_v35, %v427_v21 }
  0xf8   :  { %v493_v28 = vpop.permute.xlu0 %492 }
  0xf9   :  { %v631_v29 = vsel %vm619_vm8, %v614_v10, %v493_v28 }
  0xfa   :  { %v648_v31 = vsel %vm636_vm9, %v631_v29, %v493_v28 }
  0xfb   :  { %v694_v32 = vsel %vm659_vm10, %v648_v31, 0 }
  0xfc   :  { %v8485_v34 = vand.u32 4294901760, %v694_v32  ;;  %386 = vrot.lane.b32.xlu1 %v8480_v30, %s7925_s8 }
  0xfd   :  { %452 = vrot.lane.b32.xlu2 %v149_v14, %s7924_s28 }
  0xfe   :  { %v8492_v33 = vsub.f32 %v694_v32, %v8485_v34  ;;  %322 = vrot.lane.b32.xlu0 %v140_v27, %s7923_s27  ;;  %948 = vmatmul.f32.gmra.mxu3 %v8485_v34  ;;  %v475_v38 = vpop.permute.xlu1 %474 }
  0xff   :  { %v622_v39 = vsel %vm619_vm8, %v605_v36, %v475_v38  ;;  %v8498_v40 = vpop.permute.xlu2 %208 }
 0x100   :  { %v271_v41 = vpop.permute.xlu0 %270  ;;  %v639_v43 = vsel %vm636_vm9, %v622_v39, %v475_v38  ;;  %v823_v45 = vand.u32 4294901760, %v8492_v33 }
 0x101   :  { %v667_v46 = vsel %vm659_vm10, %v639_v43, 0  ;;  %v531_v5 = vsel %vm518_vm4, %v8427_v47, %v271_v41 }
 0x102   :  { %v8503_v48 = vand.u32 4294901760, %v667_v46  ;;  %v824_v49 = vsub.f32 %v8492_v33, %v823_v45  ;;  %v548_v8 = vsel %vm535_vm3, %v531_v5, %v271_v41 }
 0x104   :  { %v8509_v50 = vsub.f32 %v667_v46, %v8503_v48  ;;  %v825_v52 = vand.u32 4294901760, %v824_v49  ;;  %434 = vrot.lane.b32.xlu1 %v140_v27, %s7924_s28  ;;  %912 = vmatmul.f32.gmra.mxu1 %v8503_v48 }
 0x105   :  { %482 = vrot.lane.b32.xlu2 %v8480_v30, %s7926_s9 }
 0x106   :  { %500 = vrot.lane.b32.xlu0 %v165_v19, %s7926_s9  ;;  %826 = vmatmul.f32.gmra.mxu2 %v825_v52  ;;  %v335_v54 = vpop.permute.xlu1 %334  ;;  %v751_v57 = vand.u32 4294901760, %v8509_v50 }
 0x107   :  { %v191_v1 = vpop.permute.xlu2 %190  ;;  %v565_v61 = vsel %vm552_vm5, %v548_v8, %v335_v54 }
 0x108   :  { %v253_v59 = vpop.permute.xlu0 %252  ;;  %v752_v63 = vsub.f32 %v8509_v50, %v751_v57  ;;  %v581_v14 = vsel %vm31_vm0, %v565_v61, %v8461_v12 }
 0x109   :  { %v522_v47 = vsel %vm518_vm4, %v8446_v62, %v253_v59  ;;  %v598_v19 = vsel %vm585_vm6, %v581_v14, %v8461_v12 }
 0x10a   :  { %v753_v3 = vand.u32 4294901760, %v752_v63  ;;  %v539_v20 = vsel %vm535_vm3, %v522_v47, %v253_v59  ;;  %v615_v62 = vsel %vm602_vm7, %v598_v19, %v447_v22 }
 0x10c   :  { %260 = vrot.lane.b32.xlu1 %v8480_v30, %s7927_s12  ;;  %754 = vmatmul.f32.gmra.mxu0 %v753_v3  ;;  %s7930_s12 = smov 56  }
 0x10d   :  { %324 = vrot.lane.b32.xlu2 %v141_v7, %s7923_s27 }
 0x10e   :  { %196 = vrot.lane.b32.xlu0 %v140_v27, %s7922_s24  ;;  %v381_v11 = vpop.permute.xlu1 %380 }
 0x10f   :  { %v401_v16 = vpop.permute.xlu2 %400 }
 0x110   :  { %v317_v13 = vpop.permute.xlu0 %316 }
 0x111   :  { %v556_v21 = vsel %vm552_vm5, %v539_v20, %v317_v13 }
 0x112   :  { %v572_v28 = vsel %vm31_vm0, %v556_v21, %v381_v11 }
 0x113   :  { %v589_v31 = vsel %vm585_vm6, %v572_v28, %v381_v11 }
 0x114   :  { %436 = vrot.lane.b32.xlu1 %v141_v7, %s7924_s28 }
 0x115   :  { %484 = vrot.lane.b32.xlu2 %v8532_v15, %s7926_s9  ;;  %s7929_s9 = smov 48  }
 0x116   :  { %388 = vrot.lane.b32.xlu0 %v8532_v15, %s7925_s8  ;;  %v429_v18 = vpop.permute.xlu1 %428 }
 0x117   :  { %v449_v32 = vpop.permute.xlu2 %448  ;;  %v606_v35 = vsel %vm602_vm7, %v589_v31, %v429_v18 }
 0x118   :  { %v495_v25 = vpop.permute.xlu0 %494 }
 0x119   :  { %v632_v10 = vsel %vm619_vm8, %v615_v62, %v495_v25 }
 0x11a   :  { %v649_v12 = vsel %vm636_vm9, %v632_v10, %v495_v25 }
 0x11b   :  { %v697_v29 = vsel %vm659_vm10, %v649_v12, 0 }
 0x11c   :  { %v8548_v17 = vand.u32 4294901760, %v697_v29 }
 0x11e   :  { %v8552_v27 = vsub.f32 %v697_v29, %v8548_v17  ;;  %952 = vmatmul.f32.gmra.mxu3 %v8548_v17  ;;  %v477_v22 = vpop.permute.xlu1 %476 }
 0x11f   :  { %v623_v36 = vsel %vm619_vm8, %v606_v35, %v477_v22  ;;  %v211_v3 = vpop.permute.xlu2 %210 }
 0x120   :  { %v273_v38 = vpop.permute.xlu0 %272  ;;  %v640_v39 = vsel %vm636_vm9, %v623_v36, %v477_v22  ;;  %v831_v41 = vand.u32 4294901760, %v8552_v27 }
 0x121   :  { %v670_v43 = vsel %vm659_vm10, %v640_v39, 0  ;;  %v532_v11 = vsel %vm518_vm4, %v8498_v40, %v273_v38 }
 0x122   :  { %v8560_v46 = vand.u32 4294901760, %v670_v43  ;;  %v832_v49 = vsub.f32 %v8552_v27, %v831_v41  ;;  %v549_v61 = vsel %vm535_vm3, %v532_v11, %v273_v38 }
 0x124   :  { %v8566_v52 = vsub.f32 %v670_v43, %v8560_v46  ;;  %v833_v54 = vand.u32 4294901760, %v832_v49  ;;  %916 = vmatmul.f32.gmra.mxu1 %v8560_v46 }
 0x126   :  { %834 = vmatmul.f32.gmra.mxu2 %v833_v54  ;;  %v337_v59 = vpop.permute.xlu1 %336  ;;  %v759_v63 = vand.u32 4294901760, %v8566_v52 }
 0x127   :  { %v566_v14 = vsel %vm552_vm5, %v549_v61, %v337_v59  ;;  %v193_v19 = vpop.permute.xlu2 %192 }
 0x128   :  { %v255_v5 = vpop.permute.xlu0 %254  ;;  %v760_v7 = vsub.f32 %v8566_v52, %v759_v63  ;;  %v582_v20 = vsel %vm31_vm0, %v566_v14, %v401_v16 }
 0x129   :  { %v523_v18 = vsel %vm518_vm4, %v191_v1, %v255_v5  ;;  %v599_v21 = vsel %vm585_vm6, %v582_v20, %v401_v16 }
 0x12a   :  { %v761_v8 = vand.u32 4294901760, %v760_v7  ;;  %v540_v62 = vsel %vm535_vm3, %v523_v18, %v255_v5  ;;  %v616_v40 = vsel %vm602_vm7, %v599_v21, %v449_v32 }
 0x12c   :  { %762 = vmatmul.f32.gmra.mxu0 %v761_v8 }
 0x12e   :  { %v383_v13 = vpop.permute.xlu1 %382 }
 0x12f   :  { %v403_v22 = vpop.permute.xlu2 %402 }
 0x130   :  { %v319_v47 = vpop.permute.xlu0 %318 }
 0x131   :  { %v557_v10 = vsel %vm552_vm5, %v540_v62, %v319_v47 }
 0x132   :  { %v573_v29 = vsel %vm31_vm0, %v557_v10, %v383_v13 }
 0x133   :  { %v590_v16 = vsel %vm585_vm6, %v573_v29, %v383_v13 }
 0x136   :  { %v431_v25 = vpop.permute.xlu1 %430 }
 0x137   :  { %v607_v38 = vsel %vm602_vm7, %v590_v16, %v431_v25  ;;  %v451_v61 = vpop.permute.xlu2 %450 }
 0x138   :  { %v497_v28 = vpop.permute.xlu0 %496 }
 0x139   :  { %v633_v12 = vsel %vm619_vm8, %v616_v40, %v497_v28 }
 0x13a   :  { %v650_v31 = vsel %vm636_vm9, %v633_v12, %v497_v28 }
 0x13b   :  { %v700_v35 = vsel %vm659_vm10, %v650_v31, 0 }
 0x13c   :  { %v8587_v1 = vand.u32 4294901760, %v700_v35 }
 0x13e   :  { %v8591_v36 = vsub.f32 %v700_v35, %v8587_v1  ;;  %956 = vmatmul.f32.gmra.mxu3 %v8587_v1  ;;  %v479_v32 = vpop.permute.xlu1 %478 }
 0x13f   :  { %v624_v39 = vsel %vm619_vm8, %v607_v38, %v479_v32  ;;  %v213_v40 = vpop.permute.xlu2 %212 }
 0x140   :  { %v275_v43 = vpop.permute.xlu0 %274  ;;  %v641_v49 = vsel %vm636_vm9, %v624_v39, %v479_v32  ;;  %v839_v54 = vand.u32 4294901760, %v8591_v36 }
 0x141   :  { %v673_v59 = vsel %vm659_vm10, %v641_v49, 0  ;;  %v533_v18 = vsel %vm518_vm4, %v211_v3, %v275_v43 }
 0x142   :  { %v8599_v5 = vand.u32 4294901760, %v673_v59  ;;  %v840_v7 = vsub.f32 %v8591_v36, %v839_v54  ;;  %v550_v62 = vsel %vm535_vm3, %v533_v18, %v275_v43 }
 0x144   :  { %v8605_v8 = vsub.f32 %v673_v59, %v8599_v5  ;;  %v841_v11 = vand.u32 4294901760, %v840_v7  ;;  %920 = vmatmul.f32.gmra.mxu1 %v8599_v5 }
 0x146   :  { %842 = vmatmul.f32.gmra.mxu2 %v841_v11  ;;  %v339_v13 = vpop.permute.xlu1 %338  ;;  %v767_v14 = vand.u32 4294901760, %v8605_v8 }
 0x147   :  { %v567_v10 = vsel %vm552_vm5, %v550_v62, %v339_v13  ;;  %v195_v43 = vpop.permute.xlu2 %194 }
 0x148   :  { %v257_v47 = vpop.permute.xlu0 %256  ;;  %v768_v20 = vsub.f32 %v8605_v8, %v767_v14  ;;  %v583_v12 = vsel %vm31_vm0, %v567_v10, %v403_v22 }
 0x149   :  { %v524_v29 = vsel %vm518_vm4, %v193_v19, %v257_v47  ;;  %v600_v31 = vsel %vm585_vm6, %v583_v12, %v403_v22 }
 0x14a   :  { %v769_v21 = vand.u32 4294901760, %v768_v20  ;;  %v541_v35 = vsel %vm535_vm3, %v524_v29, %v257_v47  ;;  %v617_v38 = vsel %vm602_vm7, %v600_v31, %v451_v61 }
 0x14c   :  { %770 = vmatmul.f32.gmra.mxu0 %v769_v21 }
 0x14e   :  { %v385_v25 = vpop.permute.xlu1 %384 }
 0x150   :  { %v321_v28 = vpop.permute.xlu0 %320 }
 0x151   :  { %v558_v3 = vsel %vm552_vm5, %v541_v35, %v321_v28  ;;  %v405_v28 = vpop.permute.xlu2 %404 }
 0x152   :  { %v574_v49 = vsel %vm31_vm0, %v558_v3, %v385_v25 }
 0x153   :  { %v591_v22 = vsel %vm585_vm6, %v574_v49, %v385_v25 }
 0x156   :  { %v433_v16 = vpop.permute.xlu1 %432 }
 0x157   :  { %v608_v13 = vsel %vm602_vm7, %v591_v22, %v433_v16 }
 0x158   :  { %v499_v32 = vpop.permute.xlu0 %498 }
 0x159   :  { %v634_v39 = vsel %vm619_vm8, %v617_v38, %v499_v32  ;;  %v453_v49 = vpop.permute.xlu2 %452 }
 0x15a   :  { %v651_v59 = vsel %vm636_vm9, %v634_v39, %v499_v32 }
 0x15b   :  { %v703_v7 = vsel %vm659_vm10, %v651_v59, 0 }
 0x15c   :  { %v8625_v19 = vand.u32 4294901760, %v703_v7 }
 0x15e   :  { %v8629_v11 = vsub.f32 %v703_v7, %v8625_v19  ;;  %960 = vmatmul.f32.gmra.mxu3 %v8625_v19  ;;  %v481_v61 = vpop.permute.xlu1 %480 }
 0x15f   :  { %v625_v47 = vsel %vm619_vm8, %v608_v13, %v481_v61 }
 0x160   :  { %v277_v20 = vpop.permute.xlu0 %276  ;;  %v642_v18 = vsel %vm636_vm9, %v625_v47, %v481_v61  ;;  %v847_v21 = vand.u32 4294901760, %v8629_v11 }
 0x161   :  { %v676_v62 = vsel %vm659_vm10, %v642_v18, 0  ;;  %v534_v38 = vsel %vm518_vm4, %v213_v40, %v277_v20 }
 0x162   :  { %v8637_v10 = vand.u32 4294901760, %v676_v62  ;;  %v848_v25 = vsub.f32 %v8629_v11, %v847_v21  ;;  %v551_v59 = vsel %vm535_vm3, %v534_v38, %v277_v20 }
 0x164   :  { %v8643_v12 = vsub.f32 %v676_v62, %v8637_v10  ;;  %v849_v29 = vand.u32 4294901760, %v848_v25  ;;  %924 = vmatmul.f32.gmra.mxu1 %v8637_v10  ;;  %v483_v25 = vpop.permute.xlu2 %482 }
 0x166   :  { %850 = vmatmul.f32.gmra.mxu2 %v849_v29  ;;  %v341_v31 = vpop.permute.xlu1 %340  ;;  %v775_v35 = vand.u32 4294901760, %v8643_v12 }
 0x167   :  { %v568_v22 = vsel %vm552_vm5, %v551_v59, %v341_v31 }
 0x168   :  { %v259_v16 = vpop.permute.xlu0 %258  ;;  %v776_v3 = vsub.f32 %v8643_v12, %v775_v35  ;;  %v584_v18 = vsel %vm31_vm0, %v568_v22, %v405_v28 }
 0x169   :  { %v525_v39 = vsel %vm518_vm4, %v195_v43, %v259_v16  ;;  %v601_v40 = vsel %vm585_vm6, %v584_v18, %v405_v28 }
 0x16a   :  { %v777_v32 = vand.u32 4294901760, %v776_v3  ;;  %v542_v13 = vsel %vm535_vm3, %v525_v39, %v259_v16  ;;  %v618_v3 = vsel %vm602_vm7, %v601_v40, %v453_v49 }
 0x16c   :  { %778 = vmatmul.f32.gmra.mxu0 %v777_v32 }
 0x16e   :  { %v387_v7 = vpop.permute.xlu1 %386 }
 0x170   :  { %v323_v61 = vpop.permute.xlu0 %322 }
 0x171   :  { %v559_v47 = vsel %vm552_vm5, %v542_v13, %v323_v61 }
 0x172   :  { %v575_v62 = vsel %vm31_vm0, %v559_v47, %v387_v7  ;;  %v325_v47 = vpop.permute.xlu2 %324 }
 0x173   :  { %v592_v43 = vsel %vm585_vm6, %v575_v62, %v387_v7 }
 0x176   :  { %v435_v29 = vpop.permute.xlu1 %434 }
 0x177   :  { %v609_v20 = vsel %vm602_vm7, %v592_v43, %v435_v29 }
 0x178   :  { %v501_v31 = vpop.permute.xlu0 %500  ;;  %v626_v16 = vsel %vm619_vm8, %v609_v20, %v483_v25 }
 0x179   :  { %v635_v38 = vsel %vm619_vm8, %v618_v3, %v501_v31  ;;  %v643_v32 = vsel %vm636_vm9, %v626_v16, %v483_v25 }
 0x17a   :  { %v652_v39 = vsel %vm636_vm9, %v635_v38, %v501_v31  ;;  %v679_v59 = vsel %vm659_vm10, %v643_v32, 0 }
 0x17b   :  { %v706_v28 = vsel %vm659_vm10, %v652_v39, 0  ;;  %v8668_v22 = vand.u32 4294901760, %v679_v59 }
 0x17c   :  { %v8670_v7 = vand.u32 4294901760, %v706_v28 }
 0x17d   :  { %v782_v13 = vsub.f32 %v679_v59, %v8668_v22  ;;  %928 = vmatmul.f32.gmra.mxu1 %v8668_v22  ;;  %v485_v59 = vpop.permute.xlu2 %484 }
 0x17e   :  { %v8675_v49 = vsub.f32 %v706_v28, %v8670_v7  ;;  %964 = vmatmul.f32.gmra.mxu3 %v8670_v7  ;;  %v261_v61 = vpop.permute.xlu1 %260 }
 0x17f   :  { %v783_v18 = vand.u32 4294901760, %v782_v13 }
 0x180   :  { %v197_v62 = vpop.permute.xlu0 %196  ;;  %v855_v40 = vand.u32 4294901760, %v8675_v49 }
 0x181   :  { %v784_v25 = vsub.f32 %v782_v13, %v783_v18  ;;  %v526_v43 = vsel %vm518_vm4, %v197_v62, %v261_v61 }
 0x182   :  { %v856_v29 = vsub.f32 %v8675_v49, %v855_v40  ;;  %v543_v31 = vsel %vm535_vm3, %v526_v43, %v261_v61 }
 0x183   :  { %v785_v20 = vand.u32 4294901760, %v784_v25  ;;  %v560_v16 = vsel %vm552_vm5, %v543_v31, %v325_v47  ;;  %vm3214_vm5 = vcmask 523264  }
 0x184   :  { %v857_v3 = vand.u32 4294901760, %v856_v29 }
 0x185   :  { %786 = vmatmul.f32.gmra.mxu0 %v785_v20 }
 0x186   :  { %858 = vmatmul.f32.gmra.mxu2 %v857_v3  ;;  %1099 = vmatmul.f32.vlgmr.msrb.gmra.mxu3 %v735_v9  ;;  %v437_v32 = vpop.permute.xlu1 %436 }
 0x188   :  { %v389_v38 = vpop.permute.xlu0 %388 }
 0x189   :  { %v576_v39 = vsel %vm31_vm0, %v560_v16, %v389_v38 }
 0x18a   :  { %v593_v28 = vsel %vm585_vm6, %v576_v39, %v389_v38  ;;  %vm3241_vm6 = vcmask 588800  }
 0x18b   :  { %v610_v62 = vsel %vm602_vm7, %v593_v28, %v437_v32 }
 0x18c   :  { %v627_v25 = vsel %vm619_vm8, %v610_v62, %v485_v59 }
 0x18d   :  { %v644_v61 = vsel %vm636_vm9, %v627_v25, %v485_v59 }
 0x18e   :  { %v682_v43 = vsel %vm659_vm10, %v644_v61, 0  ;;  %996 = vmatmul.f32.vlgmr.msrb.gmra.mxu2 %v8365_v6  ;;  %1105 = vmatmul.f32.gmra.mxu3 %v743_v60  ;;  %v8729_v6 = vpop.f32.mrf.mxu2 }
 0x18f   :  { %v789_v9 = vand.u32 4294901760, %v682_v43 }
 0x191   :  { %v790_v47 = vsub.f32 %v682_v43, %v789_v9  ;;  %932 = vmatmul.f32.gmra.mxu1 %v789_v9  ;;  %v7906_v43 = vld [vmem:[#allocation2 + $0x11] sm:$0xff] }
 0x193   :  { %v791_v29 = vand.u32 4294901760, %v790_v47 }
 0x195   :  { %v792_v20 = vsub.f32 %v790_v47, %v791_v29 }
 0x196   :  { %1001 = vmatmul.f32.gmra.mxu2 %v8439_v55  ;;  %1111 = vmatmul.f32.gmra.mxu3 %v751_v57  ;;  %v8734_v55 = vpop.f32.mrf.mxu1 }
 0x197   :  { %v793_v3 = vand.u32 4294901760, %v792_v20 }
 0x199   :  { %794 = vmatmul.f32.gmra.mxu0 %v793_v3  ;;  %1311 = vmatmul.f32.vlgmr.msrb.gmra.mxu1 %v8359_v4 }
 0x19e   :  { %1006 = vmatmul.f32.gmra.mxu2 %v8509_v50  ;;  %1117 = vmatmul.f32.gmra.mxu3 %v759_v63  ;;  %v8746_v60 = vpop.f32.mrf.mxu1 }
 0x1a1   :  { %1225 = vmatmul.f32.vlgmr.msrb.gmra.mxu0 %v8359_v4  ;;  %1315 = vmatmul.f32.gmra.mxu1 %v8433_v53  ;;  %v8722_v4 = vpop.f32.mrf.mxu3 }
 0x1a6   :  { %1011 = vmatmul.f32.gmra.mxu2 %v8566_v52  ;;  %1123 = vmatmul.f32.gmra.mxu3 %v767_v14  ;;  %v8759_v50 = vpop.f32.mrf.mxu1 }
 0x1a9   :  { %1229 = vmatmul.f32.gmra.mxu0 %v8433_v53  ;;  %1319 = vmatmul.f32.gmra.mxu1 %v8503_v48  ;;  %v8731_v53 = vpop.f32.mrf.mxu3 }
 0x1aa   :  { %13843 = vst [vmem:[#allocation4_spill] sm:$0xff] %v8731_v53 }
 0x1ae   :  { %1016 = vmatmul.f32.gmra.mxu2 %v8605_v8  ;;  %1129 = vmatmul.f32.gmra.mxu3 %v775_v35  ;;  %v8772_v57 = vpop.f32.mrf.mxu1 }
 0x1b1   :  { %1233 = vmatmul.f32.gmra.mxu0 %v8503_v48  ;;  %1323 = vmatmul.f32.gmra.mxu1 %v8560_v46 }
 0x1b6   :  { %1021 = vmatmul.f32.gmra.mxu2 %v8643_v12  ;;  %1135 = vmatmul.f32.gmra.mxu3 %v783_v18 }
 0x1b9   :  { %1237 = vmatmul.f32.gmra.mxu0 %v8560_v46  ;;  %1327 = vmatmul.f32.gmra.mxu1 %v8599_v5 }
 0x1be   :  { %1026 = vmatmul.f32.gmra.mxu2 %v782_v13  ;;  %1141 = vmatmul.f32.gmra.mxu3 %v791_v29 }
 0x1c1   :  { %1241 = vmatmul.f32.gmra.mxu0 %v8599_v5  ;;  %1331 = vmatmul.f32.gmra.mxu1 %v8637_v10  ;;  %v8785_v46 = vpop.f32.mrf.mxu1 }
 0x1c6   :  { %1031 = vmatmul.f32.gmra.mxu2 %v790_v47  ;;  %1147 = vmatmul.f32.gmra.mxu3 %v799_v26  ;;  %v8739_v26 = vpop.f32.mrf.mxu2 }
 0x1c9   :  { %1245 = vmatmul.f32.gmra.mxu0 %v8637_v10  ;;  %1335 = vmatmul.f32.gmra.mxu1 %v8668_v22 }
 0x1ce   :  { %1036 = vmatmul.f32.gmra.mxu2 %v8297_v24  ;;  %1153 = vmatmul.f32.gmra.mxu3 %v807_v2  ;;  %v8741_v24 = vpop.f32.mrf.mxu3  ;;  %v8744_v2 = vpop.f32.mrf.mxu0 }
 0x1cf   :  { %13844 = vst [vmem:[#allocation5_spill] sm:$0xff] %v8741_v24 }
 0x1d1   :  { %1249 = vmatmul.f32.gmra.mxu0 %v8668_v22  ;;  %1339 = vmatmul.f32.gmra.mxu1 %v789_v9 }
 0x1d6   :  { %1041 = vmatmul.f32.gmra.mxu2 %v8348_v58  ;;  %1159 = vmatmul.f32.gmra.mxu3 %v815_v51  ;;  %v8751_v58 = vpop.f32.mrf.mxu2  ;;  %v8753_v48 = vpop.f32.mrf.mxu3 }
 0x1d7   :  { %13845 = vst [vmem:[#allocation6_spill] sm:$0xff] %v8753_v48  ;;  %v8757_v51 = vpop.f32.mrf.mxu0 }
 0x1d9   :  { %1253 = vmatmul.f32.gmra.mxu0 %v789_v9  ;;  %1343 = vmatmul.f32.gmra.mxu1 %v8292_v23  ;;  %v1569_v9 = vsel %vm518_vm4, %v7906_v43, 0 }
 0x1da   :  { %v8876_v20 = vand.u32 4294901760, %v1569_v9 }
 0x1dc   :  { %13857 = vst [vmem:[#allocation18_spill] sm:$0xff] %v8876_v20 }
 0x1de   :  { %1046 = vmatmul.f32.gmra.mxu2 %v8422_v44  ;;  %1165 = vmatmul.f32.gmra.mxu3 %v823_v45  ;;  %v8764_v44 = vpop.f32.mrf.mxu2  ;;  %v8766_v45 = vpop.f32.mrf.mxu3 }
 0x1df   :  { %13846 = vst [vmem:[#allocation7_spill] sm:$0xff] %v8766_v45 }
 0x1e1   :  { %1257 = vmatmul.f32.gmra.mxu0 %v8292_v23  ;;  %1347 = vmatmul.f32.gmra.mxu1 %v8342_v56  ;;  %v8770_v23 = vpop.f32.mrf.mxu0  ;;  %v8798_v63 = vpop.f32.mrf.mxu1 }
 0x1e6   :  { %1051 = vmatmul.f32.gmra.mxu2 %v8492_v33  ;;  %1171 = vmatmul.f32.gmra.mxu3 %v831_v41  ;;  %v8777_v33 = vpop.f32.mrf.mxu2  ;;  %v8779_v41 = vpop.f32.mrf.mxu3 }
 0x1e7   :  { %13847 = vst [vmem:[#allocation8_spill] sm:$0xff] %v8777_v33 }
 0x1e8   :  { %13848 = vst [vmem:[#allocation9_spill] sm:$0xff] %v8779_v41 }
 0x1e9   :  { %1261 = vmatmul.f32.gmra.mxu0 %v8342_v56  ;;  %1351 = vmatmul.f32.gmra.mxu1 %v8415_v42  ;;  %v8783_v56 = vpop.f32.mrf.mxu0 }
 0x1ee   :  { %1056 = vmatmul.f32.gmra.mxu2 %v8552_v27  ;;  %1177 = vmatmul.f32.gmra.mxu3 %v839_v54  ;;  %v8790_v27 = vpop.f32.mrf.mxu2  ;;  %v8792_v52 = vpop.f32.mrf.mxu3 }
 0x1ef   :  { %13849 = vst [vmem:[#allocation10_spill] sm:$0xff] %v8790_v27 }
 0x1f0   :  { %13850 = vst [vmem:[#allocation11_spill] sm:$0xff] %v8792_v52 }
 0x1f1   :  { %1265 = vmatmul.f32.gmra.mxu0 %v8415_v42  ;;  %1355 = vmatmul.f32.gmra.mxu1 %v8485_v34  ;;  %v8796_v42 = vpop.f32.mrf.mxu0 }
 0x1f6   :  { %1061 = vmatmul.f32.gmra.mxu2 %v8591_v36  ;;  %1183 = vmatmul.f32.gmra.mxu3 %v847_v21  ;;  %v8803_v36 = vpop.f32.mrf.mxu2 }
 0x1f7   :  { %13851 = vst [vmem:[#allocation12_spill] sm:$0xff] %v8803_v36 }
 0x1f9   :  { %1269 = vmatmul.f32.gmra.mxu0 %v8485_v34  ;;  %1359 = vmatmul.f32.gmra.mxu1 %v8548_v17  ;;  %v8809_v34 = vpop.f32.mrf.mxu0 }
 0x1fa   :  { %v8811_v5 = vpop.f32.mrf.mxu1 }
 0x1fe   :  { %1066 = vmatmul.f32.gmra.mxu2 %v8629_v11  ;;  %1189 = vmatmul.f32.gmra.mxu3 %v855_v40 }
 0x201   :  { %v8805_v54 = vpop.f32.mrf.mxu3  ;;  %1273 = vmatmul.f32.gmra.mxu0 %v8548_v17  ;;  %1363 = vmatmul.f32.gmra.mxu1 %v8587_v1 }
 0x202   :  { %13852 = vst [vmem:[#allocation13_spill] sm:$0xff] %v8805_v54  ;;  %v8820_v11 = vpop.f32.mrf.mxu0  ;;  %v1622_v54 = vsub.f32 %v1569_v9, %v8876_v20 }
 0x204   :  { %v1623_v41 = vand.u32 4294901760, %v1622_v54 }
 0x206   :  { %1071 = vmatmul.f32.gmra.mxu2 %v8675_v49  ;;  %v1624_v43 = vsub.f32 %v1622_v54, %v1623_v41 }
 0x208   :  { %v1625_v24 = vand.u32 4294901760, %v1624_v43 }
 0x209   :  { %v8814_v8 = vpop.f32.mrf.mxu2  ;;  %v8816_v14 = vpop.f32.mrf.mxu3  ;;  %1277 = vmatmul.f32.gmra.mxu0 %v8587_v1  ;;  %1367 = vmatmul.f32.gmra.mxu1 %v8625_v19 }
 0x20a   :  { %13853 = vst [vmem:[#allocation14_spill] sm:$0xff] %v8814_v8 }
 0x20e   :  { %v8822_v21 = vpop.f32.mrf.mxu1 }
 0x211   :  { %v8824_v17 = vpop.f32.mrf.mxu2  ;;  %v8826_v10 = vpop.f32.mrf.mxu3  ;;  %1281 = vmatmul.f32.gmra.mxu0 %v8625_v19  ;;  %1371 = vmatmul.f32.gmra.mxu1 %v8670_v7 }
 0x216   :  { %v8830_v12 = vpop.f32.mrf.mxu0  ;;  %v8832_v35 = vpop.f32.mrf.mxu1 }
 0x219   :  { %v8834_v22 = vpop.f32.mrf.mxu2  ;;  %v8836_v1 = vpop.f32.mrf.mxu3  ;;  %1285 = vmatmul.f32.gmra.mxu0 %v8670_v7 }
 0x21e   :  { %v8839_v13 = vpop.f32.mrf.mxu0  ;;  %v8841_v49 = vpop.f32.mrf.mxu1 }
 0x221   :  { %v8843_v18 = vpop.f32.mrf.mxu2  ;;  %v8845_v40 = vpop.f32.mrf.mxu3 }
 0x226   :  { %v8847_v19 = vpop.f32.mrf.mxu0  ;;  %v8849_v31 = vpop.f32.mrf.mxu1 }
 0x229   :  { %v8851_v16 = vpop.f32.mrf.mxu2  ;;  %v8853_v38 = vpop.f32.mrf.mxu3 }
 0x22e   :  { %v8855_v32 = vpop.f32.mrf.mxu0  ;;  %v8857_v39 = vpop.f32.mrf.mxu1 }
 0x22f   :  { %13854 = vst [vmem:[#allocation15_spill] sm:$0xff] %v8857_v39 }
 0x231   :  { %v8859_v7 = vpop.f32.mrf.mxu2  ;;  %v8861_v59 = vpop.f32.mrf.mxu3 }
 0x236   :  { %v8863_v28 = vpop.f32.mrf.mxu0  ;;  %v8865_v62 = vpop.f32.mrf.mxu1 }
 0x237   :  { %13855 = vst [vmem:[#allocation16_spill] sm:$0xff] %v8865_v62  ;;  %v1567_v62 = vld [vmem:[%s13734_s2] sm:$0xf] }
 0x239   :  { %v8867_v25 = vpop.f32.mrf.mxu2  ;;  %v8869_v61 = vpop.f32.mrf.mxu3 }
 0x23e   :  { %v8872_v47 = vpop.f32.mrf.mxu0  ;;  %v8874_v29 = vpop.f32.mrf.mxu1 }
 0x23f   :  { %13856 = vst [vmem:[#allocation17_spill] sm:$0xff] %v8874_v29 }
 0x241   :  { %v8878_v3 = vpop.f32.mrf.mxu2  ;;  %v8880_v0 = vpop.f32.mrf.mxu3 }
 0x242   :  { %13858 = vst [vmem:[#allocation19_spill] sm:$0xff] %v8880_v0  ;;  %v1602_v0 = vsel %vm708_vm2, %v1567_v62, 0  ;;  %vm3180_vm2 = vcmask 392192  }
 0x246   :  { %v8883_v8 = vpop.f32.mrf.mxu0  ;;  %v8885_v52 = vpop.f32.mrf.mxu1 }
 0x247   :  { %13859 = vst [vmem:[#allocation20_spill] sm:$0xff] %v8883_v8  ;;  %v1619_v8 = vand.u32 4294901760, %v1602_v0 }
 0x248   :  { %13860 = vst [vmem:[#allocation21_spill] sm:$0xff] %v8885_v52  ;;  %v7907_v52 = vld [vmem:[#allocation2 + $0x21] sm:$0xff] }
 0x249   :  { %v8887_v36 = vpop.f32.mrf.mxu2  ;;  %v8889_v45 = vpop.f32.mrf.mxu3  ;;  %v1571_v27 = vsel %vm518_vm4, %v7907_v52, 0  ;;  %1620 = vmatpush.msra.mxu2 %v1619_v8  ;;  %v1766_v39 = vsub.f32 %v1602_v0, %v1619_v8  ;;  %1951 = vmatpush.msra.mxu1 %v1619_v8  ;;  %v7908_v0 = vld [vmem:[#allocation2 + $0x31] sm:$0xff] }
 0x24a   :  { %13861 = vst [vmem:[#allocation22_spill] sm:$0xff] %v8889_v45  ;;  %v8902_v45 = vand.u32 4294901760, %v1571_v27  ;;  %1626 = vmatmul.f32.vlgmr.msra.gmra.mxu2 %v1625_v24  ;;  %1955 = vmatmul.f32.vlgmr.msra.gmra.mxu1 %v1623_v41 }
 0x24b   :  { %v1767_v43 = vand.u32 4294901760, %v1766_v39  ;;  %1853 = vmatpush.msra.mxu0 %v1766_v39 }
 0x24c   :  { %13865 = vst [vmem:[#allocation26_spill] sm:$0xff] %v8902_v45  ;;  %1856 = vmatmul.f32.vlgmr.msra.gmra.mxu0 %v1622_v54  ;;  %v1630_v52 = vsub.f32 %v1571_v27, %v8902_v45 }
 0x24d   :  { %v1768_v62 = vsub.f32 %v1766_v39, %v1767_v43  ;;  %2067 = vmatpush.msrb.mxu2 %v1767_v43 }
 0x24e   :  { %v8891_v48 = vpop.f32.mrf.mxu0  ;;  %v8893_v29 = vpop.f32.mrf.mxu1 }
 0x24f   :  { %13862 = vst [vmem:[#allocation23_spill] sm:$0xff] %v8891_v48  ;;  %v1769_v24 = vand.u32 4294901760, %v1768_v62  ;;  %v7909_v62 = vld [vmem:[#allocation2 + $0x41] sm:$0xff] }
 0x250   :  { %13863 = vst [vmem:[#allocation24_spill] sm:$0xff] %v8893_v29 }
 0x251   :  { %v8898_v9 = vpop.f32.mrf.mxu2  ;;  %v8908_v33 = vpop.f32.mrf.mxu3  ;;  %1770 = vmatpush.msra.mxu3 %v1769_v24  ;;  %v1575_v24 = vsel %vm518_vm4, %v7909_v62, 0 }
 0x252   :  { %13864 = vst [vmem:[#allocation25_spill] sm:$0xff] %v8898_v9  ;;  %v1573_v9 = vsel %vm518_vm4, %v7908_v0, 0  ;;  %1772 = vmatmul.f32.vlgmr.msra.gmra.mxu3 %v8876_v20  ;;  %v8930_v20 = vld [vmem:[%s13735_s6] sm:$0x7] }
 0x253   :  { %13868 = vst [vmem:[#allocation29_spill] sm:$0xff] %v8908_v33  ;;  %v8914_v41 = vand.u32 4294901760, %v1573_v9  ;;  %2149 = vmatpush.msrb.mxu3 %v1619_v8  ;;  %v8932_v8 = vand.u32 4294901760, %v1575_v24 }
 0x254   :  { %1861 = vmatmul.f32.gmra.mxu0 %v1630_v52  ;;  %13872 = vst [vmem:[#allocation33_spill] sm:$0xff] %v8930_v20 }
 0x255   :  { %v1638_v27 = vsub.f32 %v1573_v9, %v8914_v41 }
 0x256   :  { %v8904_v29 = vpop.f32.mrf.mxu0  ;;  %v8906_v48 = vpop.f32.mrf.mxu1 }
 0x257   :  { %13866 = vst [vmem:[#allocation27_spill] sm:$0xff] %v8904_v29 }
 0x258   :  { %13867 = vst [vmem:[#allocation28_spill] sm:$0xff] %v8906_v48  ;;  %v1631_v48 = vand.u32 4294901760, %v1630_v52 }
 0x259   :  { %v8911_v53 = vpop.f32.mrf.mxu2  ;;  %v8925_v33 = vpop.f32.mrf.mxu3 }
 0x25a   :  { %v1632_v39 = vsub.f32 %v1630_v52, %v1631_v48  ;;  %1961 = vmatmul.f32.gmra.mxu1 %v1631_v48  ;;  %13871 = vst [vmem:[#allocation32_spill] sm:$0xff] %v8925_v33  ;;  %1776 = vmatmul.f32.gmra.mxu3 %v8902_v45  ;;  %v1639_v48 = vand.u32 4294901760, %v1638_v27 }
 0x25c   :  { %v1633_v0 = vand.u32 4294901760, %v1632_v39  ;;  %v8940_v39 = vperm.slane %v8930_v20, 0  ;;  %v1640_v62 = vsub.f32 %v1638_v27, %v1639_v48  ;;  %1866 = vmatmul.f32.gmra.mxu0 %v1638_v27  ;;  %v7910_v20 = vld [vmem:[#allocation2 + $0x51] sm:$0xff] }
 0x25e   :  { %v8917_v29 = vpop.f32.mrf.mxu0  ;;  %v8919_v54 = vpop.f32.mrf.mxu1  ;;  %1634 = vmatmul.f32.gmra.mxu2 %v1633_v0  ;;  %v1646_v0 = vsub.f32 %v1575_v24, %v8932_v8  ;;  %v740_v45 = vadd.f32 %v8744_v2, %v8940_v39  ;;  %v764_v24 = vadd.f32 %v8783_v56, %v8940_v39 }
 0x25f   :  { %13869 = vst [vmem:[#allocation30_spill] sm:$0xff] %v8917_v29  ;;  %v1641_v29 = vand.u32 4294901760, %v1640_v62 }
 0x260   :  { %13870 = vst [vmem:[#allocation31_spill] sm:$0xff] %v8919_v54  ;;  %v748_v54 = vadd.f32 %v8757_v51, %v8940_v39  ;;  %v906_v62 = vadd.f32 %v8734_v55, %v740_v45  ;;  %v1581_v55 = vsel %vm518_vm4, %v8480_v30, 0 }
 0x261   :  { %v8922_v43 = vpop.f32.mrf.mxu2  ;;  %v8952_v27 = vpop.f32.mrf.mxu3 }
 0x262   :  { %1967 = vmatmul.f32.gmra.mxu1 %v1639_v48  ;;  %13876 = vst [vmem:[#allocation37_spill] sm:$0xff] %v8952_v27  ;;  %v910_v51 = vadd.f32 %v8746_v60, %v748_v54  ;;  %1780 = vmatmul.f32.gmra.mxu3 %v8914_v41  ;;  %v1647_v48 = vand.u32 4294901760, %v1646_v0  ;;  %v1579_v60 = vsel %vm518_vm4, %v8410_v37, 0  ;;  %v998_v45 = vadd.f32 %v8824_v17, %v906_v62 }
 0x263   :  { %v8988_v17 = vand.u32 4294901760, %v1579_v60 }
 0x264   :  { %v1648_v56 = vsub.f32 %v1646_v0, %v1647_v48  ;;  %1871 = vmatmul.f32.gmra.mxu0 %v1646_v0  ;;  %v788_v0 = vadd.f32 %v8820_v11, %v8940_v39  ;;  %v1101_v11 = vadd.f32 %v8816_v14, %v998_v45  ;;  %v13879_v45 = vld [vmem:[#allocation8_spill] sm:$0xff] }
 0x266   :  { %v8935_v9 = vpop.f32.mrf.mxu0  ;;  %v8937_v52 = vpop.f32.mrf.mxu1  ;;  %1642 = vmatmul.f32.gmra.mxu2 %v1641_v29  ;;  %v772_v29 = vadd.f32 %v8796_v42, %v8940_v39 }
 0x267   :  { %13873 = vst [vmem:[#allocation34_spill] sm:$0xff] %v8935_v9  ;;  %v1577_v9 = vsel %vm518_vm4, %v7910_v20, 0  ;;  %v1003_v20 = vadd.f32 %v8834_v22, %v910_v51  ;;  %v918_v22 = vadd.f32 %v8772_v57, %v764_v24  ;;  %v796_v57 = vadd.f32 %v8830_v12, %v8940_v39 }
 0x268   :  { %13874 = vst [vmem:[#allocation35_spill] sm:$0xff] %v8937_v52  ;;  %v756_v52 = vadd.f32 %v8770_v23, %v8940_v39  ;;  %v8962_v23 = vand.u32 4294901760, %v1577_v9 }
 0x269   :  { %v8945_v33 = vpop.f32.mrf.mxu2  ;;  %v1107_v30 = vadd.f32 %v8826_v10, %v1003_v20  ;;  %v1013_v51 = vadd.f32 %v8851_v16, %v918_v22  ;;  %v9003_v62 = vpop.f32.mrf.mxu3  ;;  %v9031_v20 = vsel %vm518_vm4, %v8532_v15, 0  ;;  %v828_v15 = vadd.f32 %v8764_v44, %v8940_v39  ;;  %v13882_v44 = vld [vmem:[#allocation10_spill] sm:$0xff] }
 0x26a   :  { %13875 = vst [vmem:[#allocation36_spill] sm:$0xff] %v8945_v33  ;;  %v914_v2 = vadd.f32 %v8759_v50, %v756_v52  ;;  %1973 = vmatmul.f32.gmra.mxu1 %v1647_v48  ;;  %v780_v50 = vadd.f32 %v8809_v34, %v8940_v39  ;;  %v1649_v52 = vand.u32 4294901760, %v1648_v56  ;;  %v8983_v37 = vsub.f32 %v1577_v9, %v8962_v23 }
 0x26b   :  { %v922_v34 = vadd.f32 %v8785_v46, %v772_v29  ;;  %v1231_v9 = vadd.f32 %v8847_v19, %v1107_v30  ;;  %1784 = vmatmul.f32.gmra.mxu3 %v8932_v8  ;;  %v804_v46 = vadd.f32 %v8729_v6, %v8940_v39  ;;  %v930_v48 = vadd.f32 %v8811_v5, %v788_v0  ;;  %v13884_v30 = vld [vmem:[#allocation19_spill] sm:$0xff] }
 0x26c   :  { %v1008_v42 = vadd.f32 %v8843_v18, %v914_v2  ;;  %v8990_v18 = vand.u32 4294901760, %v1581_v55  ;;  %v926_v24 = vadd.f32 %v8798_v63, %v780_v50  ;;  %v1227_v63 = vadd.f32 %v8839_v13, %v1101_v11  ;;  %1876 = vmatmul.f32.gmra.mxu0 %v8983_v37  ;;  %v13878_v50 = vld [vmem:[#allocation4_spill] sm:$0xff] }
 0x26d   :  { %v1018_v16 = vadd.f32 %v8859_v7, %v922_v34  ;;  %v1119_v19 = vadd.f32 %v8845_v40, %v1013_v51  ;;  %v9013_v7 = vsub.f32 %v1579_v60, %v8988_v17  ;;  %v812_v6 = vadd.f32 %v8739_v26, %v8940_v39  ;;  %v13885_v34 = vld [vmem:[#allocation5_spill] sm:$0xff] }
 0x26e   :  { %v8960_v33 = vpop.f32.mrf.mxu0  ;;  %v8967_v27 = vpop.f32.mrf.mxu1  ;;  %1650 = vmatmul.f32.gmra.mxu2 %v1649_v52  ;;  %v1113_v10 = vadd.f32 %v8836_v1, %v1008_v42  ;;  %v1023_v1 = vadd.f32 %v8867_v25, %v926_v24  ;;  %v1028_v5 = vadd.f32 %v8878_v3, %v930_v48  ;;  %v934_v2 = vadd.f32 %v8822_v21, %v796_v57  ;;  %v13880_v42 = vld [vmem:[#allocation15_spill] sm:$0xff] }
 0x26f   :  { %v9020_v13 = vsub.f32 %v1581_v55, %v8990_v18  ;;  %v1239_v40 = vadd.f32 %v8863_v28, %v1119_v19  ;;  %v1125_v25 = vadd.f32 %v8853_v38, %v1018_v16  ;;  %v820_v26 = vadd.f32 %v8751_v58, %v8940_v39  ;;  %v13877_v55 = vld [vmem:[#allocation25_spill] sm:$0xff]  ;;  %v13883_v52 = vld [vmem:[#allocation23_spill] sm:$0xff]  ;;  %v13888_v19 = vld [vmem:[#allocation22_spill] sm:$0xff] }
 0x270   :  { %v1235_v14 = vadd.f32 %v8855_v32, %v1113_v10  ;;  %v9023_v32 = vadd.f32 %v8841_v49, %v1231_v9  ;;  %v1033_v21 = vadd.f32 %v8887_v36, %v934_v2  ;;  %v938_v3 = vadd.f32 %v8722_v4, %v804_v46  ;;  %v13886_v10 = vld [vmem:[#allocation16_spill] sm:$0xff] }
 0x271   :  { %v8978_v54 = vpop.f32.mrf.mxu2  ;;  %v9038_v49 = vadd.f32 %v8832_v35, %v1227_v63  ;;  %v1243_v38 = vadd.f32 %v8872_v47, %v1125_v25  ;;  %v1131_v60 = vadd.f32 %v8861_v59, %v1023_v1  ;;  %v1137_v58 = vadd.f32 %v8869_v61, %v1028_v5  ;;  %v13881_v47 = vld [vmem:[#allocation20_spill] sm:$0xff]  ;;  %v13887_v63 = vld [vmem:[#allocation27_spill] sm:$0xff]  ;;  %v1178_v5 = vpop.f32.mrf.mxu3 }
 0x272   :  { %v9041_v28 = vadd.f32 %v8849_v31, %v1235_v14  ;;  %v1038_v36 = vadd.f32 %v13877_v55, %v938_v3  ;;  %v942_v4 = vadd.f32 %v13878_v50, %v812_v6  ;;  %v836_v35 = vadd.f32 %v13879_v45, %v8940_v39  ;;  %v13891_v3 = vld [vmem:[#allocation7_spill] sm:$0xff]  ;;  %v13893_v55 = vld [vmem:[#allocation21_spill] sm:$0xff] }
 0x273   :  { %v1376_v31 = vsel %vm535_vm3, %v9023_v32, 0.0  ;;  %v9055_v22 = vadd.f32 %v13880_v42, %v1239_v40  ;;  %v1247_v59 = vadd.f32 %v13881_v47, %v1131_v60  ;;  %1788 = vmatmul.f32.gmra.mxu3 %v8962_v23  ;;  %v844_v61 = vadd.f32 %v13882_v44, %v8940_v39  ;;  %v13889_v40 = vld [vmem:[#allocation17_spill] sm:$0xff]  ;;  %v13896_v42 = vld [vmem:[#allocation36_spill] sm:$0xff] }
 0x274   :  { %v1251_v0 = vadd.f32 %v13883_v52, %v1137_v58  ;;  %v1143_v51 = vadd.f32 %v13884_v30, %v1033_v21  ;;  %v946_v57 = vadd.f32 %v13885_v34, %v820_v26  ;;  %v1375_v11 = vsel %vm535_vm3, %v9038_v49, 0.0  ;;  %1881 = vmatmul.f32.gmra.mxu0 %v9013_v7  ;;  %v13890_v26 = vld [vmem:[#allocation6_spill] sm:$0xff]  ;;  %v13895_v45 = vld [vmem:[#allocation29_spill] sm:$0xff]  ;;  %v13897_v44 = vld [vmem:[#allocation24_spill] sm:$0xff] }
 0x275   :  { %v1378_v9 = vsel %vm535_vm3, %v9041_v28, 0.0  ;;  %v9069_v16 = vadd.f32 %v13886_v10, %v1243_v38  ;;  %v1043_v46 = vadd.f32 %v8911_v53, %v942_v4  ;;  %v1377_v48 = vadd.f32 %v1376_v31, %v1375_v11  ;;  %v13892_v38 = vld [vmem:[#allocation12_spill] sm:$0xff] }
 0x276   :  { %v9005_v12 = vpop.f32.mrf.mxu0  ;;  %v9027_v29 = vpop.f32.mrf.mxu1  ;;  %v1255_v14 = vadd.f32 %v13887_v63, %v1143_v51  ;;  %v1149_v1 = vadd.f32 %v13888_v19, %v1038_v36  ;;  %v1048_v6 = vadd.f32 %v8922_v43, %v946_v57  ;;  %v1380_v2 = vsel %vm535_vm3, %v9055_v22, 0.0  ;;  %v13894_v36 = vld [vmem:[#allocation30_spill] sm:$0xff]  ;;  %v13898_v30 = vld [vmem:[#allocation32_spill] sm:$0xff] }
 0x277   :  { %v9079_v25 = vadd.f32 %v13889_v40, %v1247_v59  ;;  %v950_v21 = vadd.f32 %v13890_v26, %v828_v15  ;;  %v954_v53 = vadd.f32 %v13891_v3, %v836_v35  ;;  %v852_v60 = vadd.f32 %v13892_v38, %v8940_v39  ;;  %v13901_v19 = vld [vmem:[#allocation28_spill] sm:$0xff]  ;;  %v13903_v26 = vld [vmem:[#allocation37_spill] sm:$0xff] }
 0x278   :  { %v1379_v58 = vadd.f32 %v1378_v9, %v1377_v48  ;;  %v9086_v50 = vadd.f32 %v13893_v55, %v1251_v0  ;;  %v1259_v43 = vadd.f32 %v13894_v36, %v1149_v1  ;;  %v1382_v4 = vsel %vm535_vm3, %v9069_v16, 0.0  ;;  %v13899_v0 = vld [vmem:[#allocation9_spill] sm:$0xff]  ;;  %v13900_v9 = vld [vmem:[#allocation34_spill] sm:$0xff] }
 0x279   :  { %v1062_v56 = vpop.f32.mrf.mxu2  ;;  %v1155_v31 = vadd.f32 %v13895_v45, %v1043_v46  ;;  %v1053_v47 = vadd.f32 %v13896_v42, %v950_v21  ;;  %v1655_v15 = vand.u32 4294901760, %v8983_v37  ;;  %v9095_v52 = vadd.f32 %v13897_v44, %v1255_v14  ;;  %v13906_v42 = vld [vmem:[#allocation35_spill] sm:$0xff] }
 0x27a   :  { %v1381_v35 = vadd.f32 %v1380_v2, %v1379_v58  ;;  %v1161_v51 = vadd.f32 %v13898_v30, %v1048_v6  ;;  %v958_v34 = vadd.f32 %v13899_v0, %v844_v61  ;;  %v1384_v11 = vsel %vm535_vm3, %v9079_v25, 0.0  ;;  %v13902_v61 = vld [vmem:[#allocation11_spill] sm:$0xff] }
 0x27b   :  { %v1263_v10 = vadd.f32 %v13900_v9, %v1155_v31  ;;  %v1058_v46 = vadd.f32 %v8978_v54, %v954_v53  ;;  %v1656_v48 = vsub.f32 %v8983_v37, %v1655_v15  ;;  %1792 = vmatmul.f32.gmra.mxu3 %v8988_v17  ;;  %1979 = vmatmul.f32.gmra.mxu1 %v1655_v15  ;;  %v1386_v14 = vsel %vm535_vm3, %v9086_v50, 0.0  ;;  %v13904_v58 = vld [vmem:[#allocation31_spill] sm:$0xff]  ;;  %v1184_v31 = vpop.f32.mrf.mxu3 }
 0x27c   :  { %v1383_v63 = vadd.f32 %v1382_v4, %v1381_v35  ;;  %v9108_v1 = vadd.f32 %v13901_v19, %v1259_v43  ;;  %v962_v6 = vadd.f32 %v13902_v61, %v852_v60  ;;  %v1267_v40 = vadd.f32 %v8960_v33, %v1161_v51  ;;  %1886 = vmatmul.f32.gmra.mxu0 %v9020_v13 }
 0x27d   :  { %v1167_v21 = vadd.f32 %v13903_v26, %v1053_v47  ;;  %v1063_v54 = vadd.f32 %v1062_v56, %v958_v34  ;;  %v1657_v3 = vand.u32 4294901760, %v1656_v48  ;;  %v9115_v37 = vand.u32 4294901760, %v9031_v20  ;;  %v13905_v56 = vld [vmem:[#allocation14_spill] sm:$0xff]  ;;  %v7911_v34 = vld [vmem:[#allocation2 + $0xa1] sm:$0xff] }
 0x27e   :  { %v1274_v24 = vpop.f32.mrf.mxu0  ;;  %v1364_v59 = vpop.f32.mrf.mxu1  ;;  %v1385_v53 = vadd.f32 %v1384_v11, %v1383_v63  ;;  %v1388_v38 = vsel %vm535_vm3, %v9095_v52, 0.0  ;;  %v9120_v55 = vadd.f32 %v13904_v58, %v1263_v10  ;;  %v1173_v33 = vadd.f32 %v9003_v62, %v1058_v46 }
 0x27f   :  { %v1271_v60 = vadd.f32 %v9005_v12, %v1167_v21  ;;  %1658 = vmatmul.f32.gmra.mxu2 %v1657_v3  ;;  %v860_v43 = vadd.f32 %v13905_v56, %v8940_v39  ;;  %v1390_v45 = vsel %vm535_vm3, %v9108_v1, 0.0  ;;  %v9129_v47 = vadd.f32 %v13906_v42, %v1267_v40 }
 0x280   :  { %v1387_v4 = vadd.f32 %v1386_v14, %v1385_v53  ;;  %v1275_v15 = vadd.f32 %v1274_v24, %v1173_v33  ;;  %v1179_v35 = vadd.f32 %v1178_v5, %v1063_v54  ;;  %v9133_v12 = vsub.f32 %v9031_v20, %v9115_v37 }
 0x281   :  { %v1067_v57 = vpop.f32.mrf.mxu2  ;;  %v1392_v44 = vsel %vm535_vm3, %v9120_v55, 0.0  ;;  %v9138_v39 = vadd.f32 %v8967_v27, %v1271_v60  ;;  %v1585_v24 = vsel %vm518_vm4, %v7911_v34, 0  ;;  %v7928_v20 = vmov 128.0   ;;  %v13907_v27 = vld [vmem:[#allocation13_spill] sm:$0xff]  ;;  %v7912_v60 = vld [vmem:[#allocation2 + $0xb1] sm:$0xff] }
 0x282   :  { %v1068_v36 = vadd.f32 %v1067_v57, %v962_v6  ;;  %v1389_v62 = vadd.f32 %v1388_v38, %v1387_v4  ;;  %7894 = vrcp.f32 %v7928_v20  ;;  %v1394_v9 = vsel %vm535_vm3, %v9129_v47, 0.0 }
 0x283   :  { %1796 = vmatmul.f32.gmra.mxu3 %v8990_v18  ;;  %v9145_v10 = vadd.f32 %v9027_v29, %v1275_v15  ;;  %v966_v46 = vadd.f32 %v13907_v27, %v860_v43  ;;  %v9149_v14 = vand.u32 4294901760, %v1585_v24  ;;  %v1396_v19 = vsel %vm535_vm3, %v9138_v39, 0.0  ;;  %v1190_v3 = vpop.f32.mrf.mxu3 }
 0x284   :  { %v1185_v0 = vadd.f32 %v1184_v31, %v1068_v36  ;;  %v1391_v5 = vadd.f32 %v1390_v45, %v1389_v62  ;;  %1891 = vmatmul.f32.gmra.mxu0 %v9133_v12  ;;  %v1663_v40 = vand.u32 4294901760, %v9013_v7  ;;  %v1587_v33 = vsel %vm518_vm4, %v7912_v60, 0 }
 0x285   :  { %v1398_v29 = vsel %vm535_vm3, %v9145_v10, 0.0  ;;  %v9162_v38 = vsub.f32 %v1585_v24, %v9149_v14  ;;  %v9171_v15 = vand.u32 4294901760, %v1587_v33 }
 0x286   :  { %v1278_v2 = vpop.f32.mrf.mxu0  ;;  %v1368_v51 = vpop.f32.mrf.mxu1  ;;  %v1393_v63 = vadd.f32 %v1392_v44, %v1391_v5  ;;  %v1664_v53 = vsub.f32 %v9013_v7, %v1663_v40  ;;  %1985 = vmatmul.f32.gmra.mxu1 %v1663_v40  ;;  %v1671_v44 = vand.u32 4294901760, %v9020_v13  ;;  %v7913_v5 = vld [vmem:[#allocation2 + $0xc1] sm:$0xff]  ;;  %v7914_v40 = vld [vmem:[#allocation2 + $0xd1] sm:$0xff] }
 0x287   :  { %v1279_v30 = vadd.f32 %v1278_v2, %v1179_v35  ;;  %v9180_v24 = vsub.f32 %v1587_v33, %v9171_v15  ;;  %v1687_v60 = vand.u32 4294901760, %v9162_v38 }
 0x288   :  { %v1395_v2 = vadd.f32 %v1394_v9, %v1393_v63  ;;  %v7895_v21 = vpop.eup %7894  ;;  %v1665_v43 = vand.u32 4294901760, %v1664_v53  ;;  %v1672_v34 = vsub.f32 %v9020_v13, %v1671_v44  ;;  %v1679_v13 = vand.u32 4294901760, %v9133_v12 }
 0x289   :  { %v1072_v57 = vpop.f32.mrf.mxu2  ;;  %v9153_v61 = vadd.f32 %v1364_v59, %v1279_v30  ;;  %v1413_v45 = vmul.f32 128.0, %v7895_v21  ;;  %vm1417_vm11 = vweird.f32 %v7895_v21 }
 0x28a   :  { %v1073_v6 = vadd.f32 %v1072_v57, %v966_v46  ;;  %v1397_v54 = vadd.f32 %v1396_v19, %v1395_v2  ;;  %1666 = vmatmul.f32.gmra.mxu2 %v1665_v43  ;;  %v1589_v57 = vsel %vm518_vm4, %v7913_v5, 0  ;;  %v1673_v20 = vand.u32 4294901760, %v1672_v34 }
 0x28b   :  { %v1400_v59 = vsel %vm535_vm3, %v9153_v61, 0.0  ;;  %1800 = vmatmul.f32.gmra.mxu3 %v9115_v37  ;;  %v9185_v46 = vand.u32 4294901760, %v1589_v57 }
 0x28c   :  { %v1191_v58 = vadd.f32 %v1190_v3, %v1073_v6  ;;  %v1399_v36 = vadd.f32 %v1398_v29, %v1397_v54  ;;  %1896 = vmatmul.f32.gmra.mxu0 %v9162_v38  ;;  %v1680_v6 = vsub.f32 %v9133_v12, %v1679_v13  ;;  %v1591_v29 = vsel %vm518_vm4, %v7914_v40, 0 }
 0x28d   :  { %v9190_v2 = vsub.f32 %v1589_v57, %v9185_v46 }
 0x28e   :  { %v1282_v11 = vpop.f32.mrf.mxu0  ;;  %v1401_v31 = vadd.f32 %v1400_v59, %v1399_v36  ;;  %v1372_v42 = vpop.f32.mrf.mxu1  ;;  %1991 = vmatmul.f32.gmra.mxu1 %v1671_v44  ;;  %v1681_v3 = vand.u32 4294901760, %v1680_v6 }
 0x28f   :  { %v1283_v48 = vadd.f32 %v1282_v11, %v1185_v0 }
 0x291   :  { %v9158_v26 = vadd.f32 %v1368_v51, %v1283_v48  ;;  %v1414_v51 = vsub.f32 1.0, %v1413_v45 }
 0x292   :  { %1674 = vmatmul.f32.gmra.mxu2 %v1673_v20 }
 0x293   :  { %v1402_v4 = vsel %vm535_vm3, %v9158_v26, 0.0  ;;  %1804 = vmatmul.f32.gmra.mxu3 %v9149_v14  ;;  %v1415_v9 = vmul.f32 %v7895_v21, %v1414_v51 }
 0x294   :  { %v1403_v62 = vadd.f32 %v1402_v4, %v1401_v31  ;;  %1901 = vmatmul.f32.gmra.mxu0 %v9180_v24 }
 0x295   :  { %v1416_v63 = vadd.f32 %v7895_v21, %v1415_v9 }
 0x296   :  { %v1286_v56 = vpop.f32.mrf.mxu0  ;;  %1997 = vmatmul.f32.gmra.mxu1 %v1679_v13 }
 0x297   :  { %v1287_v7 = vadd.f32 %v1286_v56, %v1191_v58  ;;  %v9194_v53 = vsel %vm1417_vm11, %v7895_v21, %v1416_v63  ;;  %v9197_v58 = vand.u32 4294901760, %v1591_v29  ;;  %v7915_v56 = vld [vmem:[#allocation2 + $0xe1] sm:$0xff] }
 0x298   :  { %13908 = vst [vmem:[#allocation25_spill] sm:$0xff] %v9194_v53  ;;  %v1593_v43 = vsel %vm518_vm4, %v7915_v56, 0 }
 0x299   :  { %v9173_v35 = vadd.f32 %v1372_v42, %v1287_v7  ;;  %v9212_v21 = vsub.f32 %v1591_v29, %v9197_v58  ;;  %v9229_v45 = vand.u32 4294901760, %v1593_v43 }
 0x29a   :  { %1682 = vmatmul.f32.gmra.mxu2 %v1681_v3 }
 0x29b   :  { %v1404_v30 = vsel %vm535_vm3, %v9173_v35, 0.0  ;;  %1808 = vmatmul.f32.gmra.mxu3 %v9171_v15 }
 0x29c   :  { %v1405_v0 = vadd.f32 %v1404_v30, %v1403_v62  ;;  %1906 = vmatmul.f32.gmra.mxu0 %v9190_v2  ;;  %v9246_v30 = vsub.f32 %v1593_v43, %v9229_v45 }
 0x29e   :  { %v1406_v11 = vrot.slane %v1405_v0, 4  ;;  %2003 = vmatmul.f32.gmra.mxu1 %v1687_v60 }
 0x2a0   :  { %v1407_v27 = vadd.f32 %v1406_v11, %v1405_v0 }
 0x2a2   :  { %v1408_v48 = vrot.slane %v1407_v27, 2 }
 0x2a3   :  { %1812 = vmatmul.f32.gmra.mxu3 %v9185_v46 }
 0x2a4   :  { %v1409_v19 = vadd.f32 %v1408_v48, %v1407_v27  ;;  %1911 = vmatmul.f32.gmra.mxu0 %v9212_v21  ;;  %v1695_v27 = vand.u32 4294901760, %v9180_v24 }
 0x2a6   :  { %v1410_v54 = vrot.slane %v1409_v19, 1  ;;  %2009 = vmatmul.f32.gmra.mxu1 %v1695_v27 }
 0x2a8   :  { %v1411_v59 = vadd.f32 %v1410_v54, %v1409_v19 }
 0x2aa   :  { %v9200_v12 = vmul.f32 %v9194_v53, %v1411_v59 }
 0x2ab   :  { %1816 = vmatmul.f32.gmra.mxu3 %v9197_v58 }
 0x2ac   :  { %v9205_v33 = vsub.f32 %v9038_v49, %v9200_v12  ;;  %v9209_v36 = vsub.f32 %v9023_v32, %v9200_v12  ;;  %v9218_v4 = vsub.f32 %v9041_v28, %v9200_v12  ;;  %v9223_v49 = vsub.f32 %v9055_v22, %v9200_v12  ;;  %1916 = vmatmul.f32.gmra.mxu0 %v9246_v30 }
 0x2ad   :  { %v9233_v31 = vsub.f32 %v9069_v16, %v9200_v12  ;;  %v9239_v42 = vsub.f32 %v9079_v25, %v9200_v12  ;;  %v7916_v16 = vld [vmem:[#allocation2 + $0xf1] sm:$0xff]  ;;  %v9252_v25 = vsub.f32 %v9086_v50, %v9200_v12  ;;  %v9259_v57 = vsub.f32 %v9095_v52, %v9200_v12 }
 0x2ae   :  { %v1436_v32 = vmul.f32 %v9205_v33, %v9205_v33  ;;  %v1437_v7 = vmul.f32 %v9209_v36, %v9209_v36  ;;  %v1438_v28 = vmul.f32 %v9218_v4, %v9218_v4  ;;  %v1439_v22 = vmul.f32 %v9223_v49, %v9223_v49 }
 0x2af   :  { %v1595_v0 = vsel %vm518_vm4, %v7916_v16, 0  ;;  %v1440_v34 = vmul.f32 %v9233_v31, %v9233_v31  ;;  %v1441_v20 = vmul.f32 %v9239_v42, %v9239_v42  ;;  %v1688_v50 = vsub.f32 %v9162_v38, %v1687_v60  ;;  %v7917_v60 = vld [vmem:[#allocation2 + $0x101] sm:$0xff] }
 0x2b0   :  { %v1452_v62 = vsel %vm535_vm3, %v1436_v32, 0.0  ;;  %v1453_v44 = vsel %vm535_vm3, %v1437_v7, 0.0  ;;  %v1455_v5 = vsel %vm535_vm3, %v1438_v28, 0.0  ;;  %v1457_v9 = vsel %vm535_vm3, %v1439_v22, 0.0 }
 0x2b1   :  { %v1454_v51 = vadd.f32 %v1453_v44, %v1452_v62  ;;  %v9267_v48 = vand.u32 4294901760, %v1595_v0  ;;  %v9271_v63 = vsub.f32 %v9108_v1, %v9200_v12  ;;  %v1442_v52 = vmul.f32 %v9252_v25, %v9252_v25 }
 0x2b2   :  { %v1459_v19 = vsel %vm535_vm3, %v1440_v34, 0.0  ;;  %v1689_v6 = vand.u32 4294901760, %v1688_v50  ;;  %v9278_v38 = vsub.f32 %v9120_v55, %v9200_v12  ;;  %v1443_v29 = vmul.f32 %v9259_v57, %v9259_v57 }
 0x2b3   :  { %v1456_v11 = vadd.f32 %v1455_v5, %v1454_v51  ;;  %v1461_v54 = vsel %vm535_vm3, %v1441_v20, 0.0  ;;  %v1696_v1 = vsub.f32 %v9180_v24, %v1695_v27  ;;  %v9285_v3 = vsub.f32 %v1595_v0, %v9267_v48  ;;  %1820 = vmatmul.f32.gmra.mxu3 %v9229_v45  ;;  %v7918_v27 = vld [vmem:[#allocation2 + $0x111] sm:$0xff] }
 0x2b4   :  { %1690 = vmatmul.f32.gmra.mxu2 %v1689_v6  ;;  %v1597_v56 = vsel %vm518_vm4, %v7917_v60, 0  ;;  %v9291_v55 = vsub.f32 %v9129_v47, %v9200_v12  ;;  %v1444_v43 = vmul.f32 %v9271_v63, %v9271_v63  ;;  %v1463_v32 = vsel %vm535_vm3, %v1442_v52, 0.0 }
 0x2b5   :  { %v1458_v13 = vadd.f32 %v1457_v9, %v1456_v11  ;;  %v9298_v24 = vsub.f32 %v9138_v39, %v9200_v12  ;;  %1921 = vmatmul.f32.gmra.mxu0 %v9285_v3  ;;  %v1445_v28 = vmul.f32 %v9278_v38, %v9278_v38  ;;  %v1465_v22 = vsel %vm535_vm3, %v1443_v29, 0.0 }
 0x2b6   :  { %v1697_v62 = vand.u32 4294901760, %v1696_v1  ;;  %v1703_v47 = vand.u32 4294901760, %v9190_v2  ;;  %v9305_v44 = vand.u32 4294901760, %v1597_v56  ;;  %v9309_v16 = vsub.f32 %v9145_v10, %v9200_v12 }
 0x2b7   :  { %v1460_v40 = vadd.f32 %v1459_v19, %v1458_v13  ;;  %v1446_v39 = vmul.f32 %v9291_v55, %v9291_v55  ;;  %v1467_v0 = vsel %vm535_vm3, %v1444_v43, 0.0  ;;  %v9316_v5 = vsub.f32 %v9153_v61, %v9200_v12 }
 0x2b8   :  { %2015 = vmatmul.f32.gmra.mxu1 %v1703_v47  ;;  %v1447_v11 = vmul.f32 %v9298_v24, %v9298_v24  ;;  %v1469_v20 = vsel %vm535_vm3, %v1445_v28, 0.0  ;;  %v1704_v10 = vsub.f32 %v9190_v2, %v1703_v47  ;;  %v9323_v9 = vsub.f32 %v1597_v56, %v9305_v44 }
 0x2b9   :  { %v1462_v59 = vadd.f32 %v1461_v54, %v1460_v40  ;;  %v1599_v13 = vsel %vm518_vm4, %v7918_v27, 0  ;;  %v9329_v61 = vsub.f32 %v9158_v26, %v9200_v12  ;;  %v1448_v52 = vmul.f32 %v9309_v16, %v9309_v16 }
 0x2ba   :  { %v1471_v19 = vsel %vm535_vm3, %v1446_v39, 0.0  ;;  %v9336_v2 = vsub.f32 %v9173_v35, %v9200_v12  ;;  %v1449_v40 = vmul.f32 %v9316_v5, %v9316_v5  ;;  %v1473_v29 = vsel %vm535_vm3, %v1447_v11, 0.0 }
 0x2bb   :  { %v1464_v7 = vadd.f32 %v1463_v32, %v1462_v59  ;;  %1824 = vmatmul.f32.gmra.mxu3 %v9267_v48  ;;  %v1705_v54 = vand.u32 4294901760, %v1704_v10  ;;  %v1711_v26 = vand.u32 4294901760, %v9212_v21  ;;  %v9343_v1 = vand.u32 4294901760, %v1599_v13 }
 0x2bc   :  { %1698 = vmatmul.f32.gmra.mxu2 %v1697_v62  ;;  %v1450_v60 = vmul.f32 %v9329_v61, %v9329_v61  ;;  %v1475_v35 = vsel %vm535_vm3, %v1448_v52, 0.0  ;;  %v13909_v56 = vmov 0.0   ;;  %v1451_v43 = vmul.f32 %v9336_v2, %v9336_v2 }
 0x2bd   :  { %v1466_v51 = vadd.f32 %v1465_v22, %v1464_v7  ;;  %1926 = vmatmul.f32.gmra.mxu0 %v9323_v9  ;;  %2412 = vst.msk [vmem:[#allocation3 + $0xd8] sm:$0x3] %vm2385_vm12, %v13909_v56  ;;  %v1477_v32 = vsel %vm535_vm3, %v1449_v40, 0.0  ;;  %v1712_v7 = vsub.f32 %v9212_v21, %v1711_v26  ;;  %v9357_v28 = vsub.f32 %v1599_v13, %v9343_v1 }
 0x2be   :  { %2418 = vst.msk [vmem:[#allocation3 + $0x108] sm:$0x3] %vm2385_vm12, %v13909_v56  ;;  %v1479_v62 = vsel %vm535_vm3, %v1450_v60, 0.0  ;;  %v1481_v21 = vsel %vm535_vm3, %v1451_v43, 0.0  ;;  %v1719_v39 = vand.u32 4294901760, %v9246_v30  ;;  %v1727_v27 = vand.u32 4294901760, %v9285_v3 }
 0x2bf   :  { %v1468_v34 = vadd.f32 %v1467_v0, %v1466_v51  ;;  %2420 = vst.msk [vmem:[#allocation3 + $0x118] sm:$0x3] %vm2385_vm12, %v13909_v56  ;;  %v1713_v51 = vand.u32 4294901760, %v1712_v7  ;;  %v13911_v43 = vld [vmem:[#allocation26_spill] sm:$0xff]  ;;  %v1743_v7 = vand.u32 4294901760, %v9357_v28  ;;  %vm3197_vm4 = vcmask 457728  }
 0x2c0   :  { %2021 = vmatmul.f32.gmra.mxu1 %v1711_v26  ;;  %2422 = vst.msk [vmem:[#allocation3 + $0x128] sm:$0x3] %vm2385_vm12, %v13909_v56  ;;  %v1720_v11 = vsub.f32 %v9246_v30, %v1719_v39  ;;  %v1735_v26 = vand.u32 4294901760, %v9323_v9 }
 0x2c1   :  { %v1470_v50 = vadd.f32 %v1469_v20, %v1468_v34  ;;  %2386 = vst.msk [vmem:[#allocation3 + $0x8] sm:$0x3] %vm2385_vm12, %v13909_v56 }
 0x2c2   :  { %2388 = vst.msk [vmem:[#allocation3 + $0x18] sm:$0x3] %vm2385_vm12, %v13909_v56  ;;  %v1736_v60 = vsub.f32 %v9323_v9, %v1735_v26  ;;  %v1744_v9 = vsub.f32 %v9357_v28, %v1743_v7 }
 0x2c3   :  { %v1472_v6 = vadd.f32 %v1471_v19, %v1470_v50  ;;  %1828 = vmatmul.f32.gmra.mxu3 %v9305_v44  ;;  %2390 = vst.msk [vmem:[#allocation3 + $0x28] sm:$0x3] %vm2385_vm12, %v13909_v56  ;;  %v1721_v50 = vand.u32 4294901760, %v1720_v11  ;;  %v1728_v19 = vsub.f32 %v9285_v3, %v1727_v27 }
 0x2c4   :  { %1706 = vmatmul.f32.gmra.mxu2 %v1705_v54  ;;  %2392 = vst.msk [vmem:[#allocation3 + $0x38] sm:$0x3] %vm2385_vm12, %v13909_v56 }
 0x2c5   :  { %v1474_v59 = vadd.f32 %v1473_v29, %v1472_v6  ;;  %1931 = vmatmul.f32.gmra.mxu0 %v9357_v28  ;;  %2394 = vst.msk [vmem:[#allocation3 + $0x48] sm:$0x3] %vm2385_vm12, %v13909_v56  ;;  %v13910_v29 = vld [vmem:[#allocation18_spill] sm:$0xff]  ;;  %v1729_v3 = vand.u32 4294901760, %v1728_v19 }
 0x2c6   :  { %2396 = vst.msk [vmem:[#allocation3 + $0x58] sm:$0x3] %vm2385_vm12, %v13909_v56 }
 0x2c7   :  { %v1476_v12 = vadd.f32 %v1475_v35, %v1474_v59  ;;  %2398 = vst.msk [vmem:[#allocation3 + $0x68] sm:$0x3] %vm2385_vm12, %v13909_v56  ;;  %v2546_v35 = vld [vmem:[#allocation3 + $0x90] sm:$0xff] }
 0x2c8   :  { %2027 = vmatmul.f32.gmra.mxu1 %v1719_v39  ;;  %2400 = vst.msk [vmem:[#allocation3 + $0x78] sm:$0x3] %vm2385_vm12, %v13909_v56  ;;  %v2458_v52 = vld [vmem:[#allocation3 + $0x1] sm:$0xff] }
 0x2c9   :  { %v1478_v22 = vadd.f32 %v1477_v32, %v1476_v12  ;;  %2402 = vst.msk [vmem:[#allocation3 + $0x88] sm:$0x3] %vm2385_vm12, %v13909_v56  ;;  %2603 = vrot.lane.b32.xlu0 %v2458_v52, %s7923_s27  ;;  %v2474_v6 = vld [vmem:[#allocation3 + $0x2] sm:$0xff]  ;;  %v1737_v32 = vand.u32 4294901760, %v1736_v60 }
 0x2ca   :  { %2404 = vst.msk [vmem:[#allocation3 + $0x98] sm:$0x3] %vm2385_vm12, %v13909_v56  ;;  %2667 = vrot.lane.b32.xlu1 %v2474_v6, %s7925_s8 }
 0x2cb   :  { %v1480_v47 = vadd.f32 %v1479_v62, %v1478_v22  ;;  %1832 = vmatmul.f32.gmra.mxu3 %v9343_v1  ;;  %2406 = vst.msk [vmem:[#allocation3 + $0xa8] sm:$0x3] %vm2385_vm12, %v13909_v56 }
 0x2cc   :  { %1714 = vmatmul.f32.gmra.mxu2 %v1713_v51  ;;  %2408 = vst.msk [vmem:[#allocation3 + $0xb8] sm:$0x3] %vm2385_vm12, %v13909_v56 }
 0x2cd   :  { %v1482_v0 = vadd.f32 %v1481_v21, %v1480_v47  ;;  %2410 = vst.msk [vmem:[#allocation3 + $0xc8] sm:$0x3] %vm2385_vm12, %v13909_v56  ;;  %v9427_v28 = vpop.f32.mrf.mxu2 }
 0x2ce   :  { %2414 = vst.msk [vmem:[#allocation3 + $0xe8] sm:$0x3] %vm2385_vm12, %v13909_v56 }
 0x2cf   :  { %v1483_v34 = vrot.slane %v1482_v0, 4  ;;  %2416 = vst.msk [vmem:[#allocation3 + $0xf8] sm:$0x3] %vm2385_vm12, %v13909_v56 }
 0x2d0   :  { %2033 = vmatmul.f32.gmra.mxu1 %v1727_v27  ;;  %2424 = vst.msk [vmem:[#allocation3 + $0x138] sm:$0x3] %vm2385_vm12, %v13909_v56 }
 0x2d1   :  { %v1484_v20 = vadd.f32 %v1483_v34, %v1482_v0  ;;  %4223 = vst.msk [vmem:[#allocation3 + $0x8] sm:$0x3] %vm2385_vm12, %v13909_v56  ;;  %v2562_v12 = vld [vmem:[#allocation3 + $0x91] sm:$0xff] }
 0x2d2   :  { %2937 = vrot.lane.b32.xlu1 %v2546_v35, %s7929_s9  ;;  %3001 = vrot.lane.b32.xlu2 %v2562_v12, %s7930_s12  ;;  %v2466_v21 = vld [vmem:[#allocation3 + $0xa1] sm:$0xff]  ;;  %v2578_v51 = vld [vmem:[#allocation3 + $0x92] sm:$0xff] }
 0x2d3   :  { %v1485_v10 = vrot.slane %v1484_v20, 2  ;;  %2151 = vmatmul.f32.vlgmr.msrb.gmra.mxu3 %v13910_v29  ;;  %v2482_v39 = vld [vmem:[#allocation3 + $0xa2] sm:$0xff]  ;;  %4240 = vst.msk [vmem:[#allocation3 + $0x90] sm:$0xff] %vm535_vm3, %v13909_v56  ;;  %3065 = vrot.lane.b32.xlu0 %v2578_v51, %s7931_s14 }
 0x2d4   :  { %1722 = vmatmul.f32.gmra.mxu2 %v1721_v50  ;;  %4241 = vst.msk [vmem:[#allocation3 + $0x98] sm:$0x3] %vm2385_vm12, %v13909_v56 }
 0x2d5   :  { %v1486_v30 = vadd.f32 %v1485_v10, %v1484_v20  ;;  %v9422_v34 = vpop.f32.mrf.mxu3  ;;  %v1745_v20 = vand.u32 4294901760, %v1744_v9  ;;  %4243 = vst.msk [vmem:[#allocation3 + $0xa8] sm:$0x3] %vm2385_vm12, %v13909_v56 }
 0x2d7   :  { %v1487_v13 = vrot.slane %v1486_v30, 1 }
 0x2d8   :  { %2039 = vmatmul.f32.gmra.mxu1 %v1735_v26 }
 0x2d9   :  { %v1488_v40 = vadd.f32 %v1487_v13, %v1486_v30  ;;  %v13912_v13 = vld [vmem:[#allocation33_spill] sm:$0xff] }
 0x2da   :  { %2619 = vrot.lane.b32.xlu1 %v2466_v21, %s7923_s27  ;;  %2683 = vrot.lane.b32.xlu2 %v2482_v39, %s7925_s8  ;;  %v9434_v52 = vperm.slane %v13912_v13, 1 }
 0x2db   :  { %v1489_v54 = vmul.f32 %v1488_v40, %v9194_v53  ;;  %2155 = vmatmul.f32.gmra.mxu3 %v13911_v43 }
 0x2dc   :  { %1730 = vmatmul.f32.gmra.mxu2 %v1729_v3 }
 0x2dd   :  { %v1490_v59 = vadd.f32 1e-05, %v1489_v54  ;;  %v9437_v19 = vpop.f32.mrf.mxu3 }
 0x2df   :  { %7896 = vrsqrt.f32 %v1490_v59  ;;  %vm1497_vm14 = vweird.f32 %v1490_v59 }
 0x2e0   :  { %2045 = vmatmul.f32.gmra.mxu1 %v1743_v7 }
 0x2e1   :  { %v9450_v35 = vpop.f32.mrf.mxu2 }
 0x2e3   :  { %2159 = vmatmul.f32.gmra.mxu3 %v8914_v41 }
 0x2e4   :  { %1738 = vmatmul.f32.gmra.mxu2 %v1737_v32 }
 0x2e5   :  { %v7897_v22 = vpop.eup %7896  ;;  %v9470_v21 = vpop.f32.mrf.mxu3 }
 0x2e6   :  { %v1492_v62 = vmul.f32 %v7897_v22, %v1490_v59  ;;  %vm1498_vm13 = vweird.f32 %v7897_v22 }
 0x2e7   :  { %vm1499_vm15 = vmor %vm1497_vm14, %vm1498_vm13 }
 0x2e8   :  { %v1493_v47 = vmul.f32 %v7897_v22, %v1492_v62 }
 0x2ea   :  { %v1494_v0 = vmul.f32 0.5, %v1493_v47 }
 0x2eb   :  { %2163 = vmatmul.f32.gmra.mxu3 %v8932_v8 }
 0x2ec   :  { %v1495_v11 = vsub.f32 1.5, %v1494_v0  ;;  %1746 = vmatmul.f32.gmra.mxu2 %v1745_v20 }
 0x2ee   :  { %v1496_v10 = vmul.f32 %v7897_v22, %v1495_v11 }
 0x2f0   :  { %v1500_v50 = vsel %vm1499_vm15, %v7897_v22, %v1496_v10 }
 0x2f1   :  { %v1501_v27 = vmul.f32 %v1500_v50, %v9205_v33  ;;  %v1502_v30 = vmul.f32 %v1500_v50, %v9209_v36  ;;  %v1505_v6 = vmul.f32 %v1500_v50, %v9233_v31  ;;  %v1511_v40 = vmul.f32 %v1500_v50, %v9291_v55 }
 0x2f2   :  { %v1514_v54 = vmul.f32 %v1500_v50, %v9316_v5  ;;  %v1515_v3 = vmul.f32 %v1500_v50, %v9329_v61  ;;  %v1516_v26 = vmul.f32 %v1500_v50, %v9336_v2  ;;  %v9445_v33 = vperm.slane %v13912_v13, 2 }
 0x2f3   :  { %v1507_v36 = vmul.f32 %v1500_v50, %v9252_v25  ;;  %v1518_v59 = vmul.f32 %v9434_v52, %v1501_v27  ;;  %v1519_v60 = vmul.f32 %v9434_v52, %v1502_v30  ;;  %v1508_v31 = vmul.f32 %v1500_v50, %v9259_v57  ;;  %2167 = vmatmul.f32.gmra.mxu3 %v8962_v23 }
 0x2f4   :  { %v1509_v55 = vmul.f32 %v1500_v50, %v9271_v63  ;;  %v1510_v5 = vmul.f32 %v1500_v50, %v9278_v38  ;;  %v1522_v61 = vmul.f32 %v9434_v52, %v1505_v6  ;;  %v1528_v2 = vmul.f32 %v9434_v52, %v1511_v40  ;;  %2069 = vmatmul.f32.vlgmr.msrb.gmra.mxu2 %v13910_v29 }
 0x2f5   :  { %v1531_v12 = vmul.f32 %v9434_v52, %v1514_v54  ;;  %v1532_v25 = vmul.f32 %v9434_v52, %v1515_v3  ;;  %v1533_v32 = vmul.f32 %v9434_v52, %v1516_v26  ;;  %v1535_v7 = vadd.f32 %v9445_v33, %v1518_v59 }
 0x2f6   :  { %v1512_v57 = vmul.f32 %v1500_v50, %v9298_v24  ;;  %v1524_v63 = vmul.f32 %v9434_v52, %v1507_v36  ;;  %v1536_v38 = vadd.f32 %v9445_v33, %v1519_v60  ;;  %v1503_v22 = vmul.f32 %v1500_v50, %v9218_v4 }
 0x2f7   :  { %v1513_v62 = vmul.f32 %v1500_v50, %v9309_v16  ;;  %v1525_v47 = vmul.f32 %v9434_v52, %v1508_v31  ;;  %v1545_v9 = vadd.f32 %v9445_v33, %v1528_v2  ;;  %v1526_v29 = vmul.f32 %v9434_v52, %v1509_v55  ;;  %v9499_v2 = vpop.f32.mrf.mxu3 }
 0x2f8   :  { %v1527_v24 = vmul.f32 %v9434_v52, %v1510_v5  ;;  %v1548_v51 = vadd.f32 %v9445_v33, %v1531_v12  ;;  %v1549_v39 = vadd.f32 %v9445_v33, %v1532_v25  ;;  %v1539_v0 = vadd.f32 %v9445_v33, %v1522_v61 }
 0x2f9   :  { %v1550_v4 = vadd.f32 %v9445_v33, %v1533_v32  ;;  %v1551_v11 = vmax.f32 %v1535_v7, 0.0  ;;  %v1552_v16 = vmax.f32 %v1536_v38, 0.0  ;;  %v1504_v20 = vmul.f32 %v1500_v50, %v9223_v49  ;;  %v9487_v49 = vpop.f32.mrf.mxu2 }
 0x2fa   :  { %v1529_v10 = vmul.f32 %v9434_v52, %v1512_v57  ;;  %v1541_v27 = vadd.f32 %v9445_v33, %v1524_v63  ;;  %v1530_v30 = vmul.f32 %v9434_v52, %v1513_v62  ;;  %v1542_v13 = vadd.f32 %v9445_v33, %v1525_v47 }
 0x2fb   :  { %v1561_v6 = vmax.f32 %v1545_v9, 0.0  ;;  %v1564_v40 = vmax.f32 %v1548_v51, 0.0  ;;  %2426 = vst.msk [vmem:[#allocation3 + $0x11] sm:$0xff] %vm535_vm3, %v1551_v11  ;;  %v1506_v54 = vmul.f32 %v1500_v50, %v9239_v42  ;;  %v1543_v3 = vadd.f32 %v9445_v33, %v1526_v29  ;;  %2171 = vmatmul.f32.gmra.mxu3 %v8988_v17 }
 0x2fc   :  { %v1565_v26 = vmax.f32 %v1549_v39, 0.0  ;;  %v1566_v36 = vmax.f32 %v1550_v4, 0.0  ;;  %2427 = vst.msk [vmem:[#allocation3 + $0x21] sm:$0xff] %vm535_vm3, %v1552_v16  ;;  %v1544_v59 = vadd.f32 %v9445_v33, %v1527_v24  ;;  %v1555_v60 = vmax.f32 %v1539_v0, 0.0  ;;  %2073 = vmatmul.f32.gmra.mxu2 %v13911_v43 }
 0x2fd   :  { %2436 = vst.msk [vmem:[#allocation3 + $0xd1] sm:$0xff] %vm535_vm3, %v1561_v6  ;;  %v1520_v31 = vmul.f32 %v9434_v52, %v1503_v22  ;;  %v1546_v55 = vadd.f32 %v9445_v33, %v1529_v10  ;;  %v1557_v42 = vmax.f32 %v1541_v27, 0.0  ;;  %v1521_v50 = vmul.f32 %v9434_v52, %v1504_v20 }
 0x2fe   :  { %2439 = vst.msk [vmem:[#allocation3 + $0x101] sm:$0xff] %vm535_vm3, %v1564_v40  ;;  %v1547_v5 = vadd.f32 %v9445_v33, %v1530_v30  ;;  %v1558_v61 = vmax.f32 %v1542_v13, 0.0  ;;  %v1523_v43 = vmul.f32 %v9434_v52, %v1506_v54  ;;  %v1559_v12 = vmax.f32 %v1543_v3, 0.0 }
 0x2ff   :  { %2440 = vst.msk [vmem:[#allocation3 + $0x111] sm:$0xff] %vm535_vm3, %v1565_v26  ;;  %v1560_v25 = vmax.f32 %v1544_v59, 0.0  ;;  %v1537_v32 = vadd.f32 %v9445_v33, %v1520_v31  ;;  %v1562_v7 = vmax.f32 %v1546_v55, 0.0  ;;  %v1538_v52 = vadd.f32 %v9445_v33, %v1521_v50 }
 0x300   :  { %2441 = vst.msk [vmem:[#allocation3 + $0x121] sm:$0xff] %vm535_vm3, %v1566_v36  ;;  %v1563_v22 = vmax.f32 %v1547_v5, 0.0  ;;  %v1540_v62 = vadd.f32 %v9445_v33, %v1523_v43  ;;  %v9523_v33 = vpop.f32.mrf.mxu3 }
 0x301   :  { %2430 = vst.msk [vmem:[#allocation3 + $0x51] sm:$0xff] %vm535_vm3, %v1555_v60  ;;  %v1553_v47 = vmax.f32 %v1537_v32, 0.0  ;;  %v9519_v9 = vpop.f32.mrf.mxu2  ;;  %v1554_v29 = vmax.f32 %v1538_v52, 0.0 }
 0x302   :  { %2432 = vst.msk [vmem:[#allocation3 + $0x71] sm:$0xff] %vm535_vm3, %v1557_v42  ;;  %v2522_v57 = vld [vmem:[#allocation3 + $0x12] sm:$0xff]  ;;  %v1556_v24 = vmax.f32 %v1540_v62, 0.0 }
 0x303   :  { %v2506_v63 = vld [vmem:[#allocation3 + $0x11] sm:$0xff]  ;;  %2433 = vst.msk [vmem:[#allocation3 + $0x81] sm:$0xff] %vm535_vm3, %v1558_v61  ;;  %2859 = vrot.lane.b32.xlu1 %v2522_v57, %s7932_s15  ;;  %2175 = vmatmul.f32.gmra.mxu3 %v8990_v18  ;;  %v9527_v51 = vld [vmem:[#allocation3 + $0x22] sm:$0xff] }
 0x304   :  { %v9506_v38 = vld [vmem:[#allocation3 + $0x10] sm:$0xff]  ;;  %2795 = vrot.lane.b32.xlu0 %v2506_v63, %s7933_s16  ;;  %2434 = vst.msk [vmem:[#allocation3 + $0xb1] sm:$0xff] %vm535_vm3, %v1559_v12  ;;  %2077 = vmatmul.f32.gmra.mxu2 %v8914_v41  ;;  %v9529_v39 = vld [vmem:[#allocation3 + $0x21] sm:$0xff] }
 0x305   :  { %2731 = vrot.lane.b32.xlu2 %v9506_v38, %s7934_s17  ;;  %2435 = vst.msk [vmem:[#allocation3 + $0xc1] sm:$0xff] %vm535_vm3, %v1560_v25  ;;  %v9538_v41 = vld [vmem:[#allocation3 + $0x20] sm:$0xff]  ;;  %v9626_v61 = vld [vmem:[#allocation3 + $0xd2] sm:$0xff] }
 0x306   :  { %2437 = vst.msk [vmem:[#allocation3 + $0xe1] sm:$0xff] %vm535_vm3, %v1562_v7  ;;  %v9628_v43 = vld [vmem:[#allocation3 + $0xd1] sm:$0xff]  ;;  %v9664_v62 = vld [vmem:[#allocation3 + $0x102] sm:$0xff] }
 0x307   :  { %2438 = vst.msk [vmem:[#allocation3 + $0xf1] sm:$0xff] %vm535_vm3, %v1563_v22  ;;  %v9680_v53 = vld [vmem:[#allocation3 + $0x111] sm:$0xff] }
 0x308   :  { %4225 = vst.msk [vmem:[#allocation3 + $0x18] sm:$0x3] %vm2385_vm12, %v13909_v56  ;;  %v9543_v0 = vld [vmem:[#allocation3 + $0x52] sm:$0xff]  ;;  %v9558_v20 = vpop.f32.mrf.mxu3 }
 0x309   :  { %2428 = vst.msk [vmem:[#allocation3 + $0x31] sm:$0xff] %vm535_vm3, %v1553_v47  ;;  %v9545_v4 = vld [vmem:[#allocation3 + $0x51] sm:$0xff]  ;;  %v9562_v10 = vpop.f32.mrf.mxu2 }
 0x30a   :  { %4227 = vst.msk [vmem:[#allocation3 + $0x28] sm:$0x3] %vm2385_vm12, %v13909_v56  ;;  %v9554_v11 = vld [vmem:[#allocation3 + $0x71] sm:$0xff]  ;;  %v9572_v30 = vld [vmem:[#allocation3 + $0x82] sm:$0xff] }
 0x30b   :  { %3051 = vrot.lane.b32.xlu1 %v9527_v51, %s7931_s14  ;;  %2429 = vst.msk [vmem:[#allocation3 + $0x41] sm:$0xff] %vm535_vm3, %v1554_v29  ;;  %2179 = vmatmul.f32.gmra.mxu3 %v9115_v37  ;;  %v9556_v16 = vld [vmem:[#allocation3 + $0x72] sm:$0xff]  ;;  %v9574_v13 = vld [vmem:[#allocation3 + $0x81] sm:$0xff] }
 0x30c   :  { %2987 = vrot.lane.b32.xlu0 %v9529_v39, %s7930_s12  ;;  %2431 = vst.msk [vmem:[#allocation3 + $0x61] sm:$0xff] %vm535_vm3, %v1556_v24  ;;  %2081 = vmatmul.f32.gmra.mxu2 %v8932_v8  ;;  %v9576_v6 = vld [vmem:[#allocation3 + $0x80] sm:$0xff]  ;;  %v9608_v31 = vld [vmem:[#allocation3 + $0xb1] sm:$0xff] }
 0x30d   :  { %2923 = vrot.lane.b32.xlu2 %v9538_v41, %s7929_s9  ;;  %4233 = vst.msk [vmem:[#allocation3 + $0x58] sm:$0x3] %vm2385_vm12, %v13909_v56  ;;  %v9610_v55 = vld [vmem:[#allocation3 + $0xb2] sm:$0xff]  ;;  %v9616_v42 = vld [vmem:[#allocation3 + $0xc2] sm:$0xff] }
 0x30e   :  { %4224 = vst.msk [vmem:[#allocation3 + $0x10] sm:$0xff] %vm535_vm3, %v13909_v56  ;;  %v9620_v50 = vld [vmem:[#allocation3 + $0x50] sm:$0xff]  ;;  %v9649_v7 = vld [vmem:[#allocation3 + $0xe1] sm:$0xff] }
 0x30f   :  { %4237 = vst.msk [vmem:[#allocation3 + $0x78] sm:$0x3] %vm2385_vm12, %v13909_v56  ;;  %v9644_v32 = vld [vmem:[#allocation3 + $0x70] sm:$0xff]  ;;  %v9670_v47 = vld [vmem:[#allocation3 + $0xc0] sm:$0xff] }
 0x310   :  { %v9564_v8 = vld [vmem:[#allocation3 + $0x32] sm:$0xff]  ;;  %4226 = vst.msk [vmem:[#allocation3 + $0x20] sm:$0xff] %vm535_vm3, %v13909_v56  ;;  %v9606_v60 = vpop.f32.mrf.mxu3 }
 0x311   :  { %v9566_v27 = vld [vmem:[#allocation3 + $0x31] sm:$0xff]  ;;  %4238 = vst.msk [vmem:[#allocation3 + $0x80] sm:$0xff] %vm535_vm3, %v13909_v56  ;;  %v9624_v5 = vpop.f32.mrf.mxu2 }
 0x312   :  { %4229 = vst.msk [vmem:[#allocation3 + $0x38] sm:$0x3] %vm2385_vm12, %v13909_v56  ;;  %v9578_v40 = vld [vmem:[#allocation3 + $0x41] sm:$0xff]  ;;  %v9596_v36 = vld [vmem:[#allocation3 + $0x30] sm:$0xff] }
 0x313   :  { %v9580_v54 = vld [vmem:[#allocation3 + $0x42] sm:$0xff]  ;;  %2733 = vrot.lane.b32.xlu1 %v9538_v41, %s7934_s17  ;;  %13913 = vst [vmem:[#allocation4_spill] sm:$0xff] %v9596_v36  ;;  %2183 = vmatmul.f32.gmra.mxu3 %v9149_v14  ;;  %v9658_v22 = vld [vmem:[#allocation3 + $0xf2] sm:$0xff] }
 0x314   :  { %2669 = vrot.lane.b32.xlu0 %v2522_v57, %s7925_s8  ;;  %4231 = vst.msk [vmem:[#allocation3 + $0x48] sm:$0x3] %vm2385_vm12, %v13909_v56  ;;  %v9589_v3 = vld [vmem:[#allocation3 + $0x62] sm:$0xff]  ;;  %2085 = vmatmul.f32.gmra.mxu2 %v8962_v23  ;;  %v9674_v29 = vld [vmem:[#allocation3 + $0xb0] sm:$0xff] }
 0x315   :  { %v9591_v26 = vld [vmem:[#allocation3 + $0x61] sm:$0xff]  ;;  %2605 = vrot.lane.b32.xlu2 %v2506_v63, %s7923_s27  ;;  %4239 = vst.msk [vmem:[#allocation3 + $0x88] sm:$0x3] %vm2385_vm12, %v13909_v56  ;;  %v9656_v63 = vld [vmem:[#allocation3 + $0xf1] sm:$0xff] }
 0x316   :  { %4235 = vst.msk [vmem:[#allocation3 + $0x68] sm:$0x3] %vm2385_vm12, %v13909_v56  ;;  %v9601_v59 = vld [vmem:[#allocation3 + $0x40] sm:$0xff]  ;;  %v9678_v24 = vld [vmem:[#allocation3 + $0xb0] sm:$0xff] }
 0x317   :  { %13914 = vst [vmem:[#allocation8_spill] sm:$0xff] %v9601_v59  ;;  %v9614_v23 = vld [vmem:[#allocation3 + $0xc1] sm:$0xff] }
 0x318   :  { %4228 = vst.msk [vmem:[#allocation3 + $0x30] sm:$0xff] %vm535_vm3, %v13909_v56  ;;  %v9636_v12 = vld [vmem:[#allocation3 + $0x60] sm:$0xff]  ;;  %v9662_v52 = vpop.f32.mrf.mxu3 }
 0x319   :  { %13915 = vst [vmem:[#allocation15_spill] sm:$0xff] %v9606_v60  ;;  %v9640_v25 = vld [vmem:[#allocation3 + $0x60] sm:$0xff] }
 0x31a   :  { %13916 = vst [vmem:[#allocation20_spill] sm:$0xff] %v9610_v55  ;;  %v9651_v57 = vld [vmem:[#allocation3 + $0xe2] sm:$0xff] }
 0x31b   :  { %4230 = vst.msk [vmem:[#allocation3 + $0x40] sm:$0xff] %vm535_vm3, %v13909_v56  ;;  %2925 = vrot.lane.b32.xlu1 %v9596_v36, %s7929_s9  ;;  %2187 = vmatmul.f32.gmra.mxu3 %v9171_v15 }
 0x31c   :  { %13917 = vst [vmem:[#allocation10_spill] sm:$0xff] %v9614_v23  ;;  %2861 = vrot.lane.b32.xlu0 %v9527_v51, %s7932_s15  ;;  %2089 = vmatmul.f32.gmra.mxu2 %v8988_v17  ;;  %v9666_v17 = vld [vmem:[#allocation3 + $0x101] sm:$0xff] }
 0x31d   :  { %13918 = vst [vmem:[#allocation23_spill] sm:$0xff] %v9616_v42  ;;  %2797 = vrot.lane.b32.xlu2 %v9529_v39, %s7933_s16 }
 0x31e   :  { %4245 = vst.msk [vmem:[#allocation3 + $0xb8] sm:$0x3] %vm2385_vm12, %v13909_v56 }
 0x31f   :  { %13919 = vst [vmem:[#allocation19_spill] sm:$0xff] %v9620_v50 }
 0x320   :  { %4247 = vst.msk [vmem:[#allocation3 + $0xc8] sm:$0x3] %vm2385_vm12, %v13909_v56 }
 0x321   :  { %13920 = vst [vmem:[#allocation5_spill] sm:$0xff] %v9626_v61  ;;  %v9911_v61 = vpop.f32.mrf.mxu0 }
 0x322   :  { %13921 = vst [vmem:[#allocation16_spill] sm:$0xff] %v9628_v43 }
 0x323   :  { %4232 = vst.msk [vmem:[#allocation3 + $0x50] sm:$0xff] %vm535_vm3, %v13909_v56  ;;  %2607 = vrot.lane.b32.xlu1 %v9529_v39, %s7923_s27  ;;  %v9705_v39 = vld [vmem:[#allocation3 + $0xd0] sm:$0xff]  ;;  %2191 = vmatmul.f32.gmra.mxu3 %v9185_v46 }
 0x324   :  { %4249 = vst.msk [vmem:[#allocation3 + $0xd8] sm:$0x3] %vm2385_vm12, %v13909_v56  ;;  %3053 = vrot.lane.b32.xlu0 %v9564_v8, %s7931_s14  ;;  %2093 = vmatmul.f32.gmra.mxu2 %v8990_v18  ;;  %v9722_v18 = vld [vmem:[#allocation3 + $0xe0] sm:$0xff] }
 0x325   :  { %13922 = vst [vmem:[#allocation27_spill] sm:$0xff] %v9640_v25  ;;  %v9692_v25 = vld [vmem:[#allocation3 + $0x120] sm:$0xff]  ;;  %2989 = vrot.lane.b32.xlu2 %v9566_v27, %s7930_s12 }
 0x326   :  { %4234 = vst.msk [vmem:[#allocation3 + $0x60] sm:$0xff] %vm535_vm3, %v13909_v56 }
 0x327   :  { %13923 = vst [vmem:[#allocation22_spill] sm:$0xff] %v9649_v7 }
 0x328   :  { %13924 = vst [vmem:[#allocation17_spill] sm:$0xff] %v9651_v57 }
 0x329   :  { %4236 = vst.msk [vmem:[#allocation3 + $0x70] sm:$0xff] %vm535_vm3, %v13909_v56 }
 0x32a   :  { %13925 = vst [vmem:[#allocation6_spill] sm:$0xff] %v9656_v63  ;;  %v9794_v63 = vld [vmem:[#allocation3 + $0xa0] sm:$0xff] }
 0x32b   :  { %13926 = vst [vmem:[#allocation7_spill] sm:$0xff] %v9658_v22  ;;  %v9694_v22 = vld [vmem:[#allocation3 + $0x122] sm:$0xff]  ;;  %2799 = vrot.lane.b32.xlu1 %v9566_v27, %s7933_s16  ;;  %2195 = vmatmul.f32.gmra.mxu3 %v9197_v58 }
 0x32c   :  { %4251 = vst.msk [vmem:[#allocation3 + $0xe8] sm:$0x3] %vm2385_vm12, %v13909_v56  ;;  %2735 = vrot.lane.b32.xlu0 %v9596_v36, %s7934_s17  ;;  %2097 = vmatmul.f32.gmra.mxu2 %v9115_v37  ;;  %v1956_v36 = vpop.f32.mrf.mxu1 }
 0x32d   :  { %13927 = vst [vmem:[#allocation12_spill] sm:$0xff] %v9662_v52  ;;  %2671 = vrot.lane.b32.xlu2 %v9527_v51, %s7925_s8 }
 0x32e   :  { %13928 = vst [vmem:[#allocation21_spill] sm:$0xff] %v9664_v62  ;;  %v9682_v62 = vld [vmem:[#allocation3 + $0x112] sm:$0xff] }
 0x32f   :  { %13929 = vst [vmem:[#allocation30_spill] sm:$0xff] %v9666_v17  ;;  %v9690_v17 = vld [vmem:[#allocation3 + $0x121] sm:$0xff] }
 0x330   :  { %4253 = vst.msk [vmem:[#allocation3 + $0xf8] sm:$0x3] %vm2385_vm12, %v13909_v56 }
 0x331   :  { %13930 = vst [vmem:[#allocation29_spill] sm:$0xff] %v9670_v47 }
 0x332   :  { %4255 = vst.msk [vmem:[#allocation3 + $0x108] sm:$0x3] %vm2385_vm12, %v13909_v56 }
 0x333   :  { %13931 = vst [vmem:[#allocation36_spill] sm:$0xff] %v9674_v29  ;;  %2991 = vrot.lane.b32.xlu1 %v9578_v40, %s7930_s12  ;;  %2199 = vmatmul.f32.gmra.mxu3 %v9229_v45 }
 0x334   :  { %4246 = vst.msk [vmem:[#allocation3 + $0xc0] sm:$0xff] %vm535_vm3, %v13909_v56  ;;  %2927 = vrot.lane.b32.xlu0 %v9601_v59, %s7929_s9  ;;  %2101 = vmatmul.f32.gmra.mxu2 %v9149_v14  ;;  %v1962_v60 = vpop.f32.mrf.mxu1 }
 0x335   :  { %13932 = vst [vmem:[#allocation24_spill] sm:$0xff] %v9678_v24  ;;  %v9700_v24 = vpop.f32.mrf.mxu2  ;;  %2863 = vrot.lane.b32.xlu2 %v9564_v8, %s7932_s15 }
 0x336   :  { %13933 = vst [vmem:[#allocation32_spill] sm:$0xff] %v9680_v53  ;;  %v9724_v53 = vld [vmem:[#allocation3 + $0x100] sm:$0xff] }
 0x337   :  { %13934 = vst [vmem:[#allocation9_spill] sm:$0xff] %v9682_v62  ;;  %v9718_v62 = vld [vmem:[#allocation3 + $0xe0] sm:$0xff] }
 0x338   :  { %4244 = vst.msk [vmem:[#allocation3 + $0xb0] sm:$0xff] %vm535_vm3, %v13909_v56 }
 0x339   :  { %13935 = vst [vmem:[#allocation34_spill] sm:$0xff] %v9690_v17  ;;  %v9716_v17 = vpop.f32.mrf.mxu3 }
 0x33a   :  { %13936 = vst [vmem:[#allocation28_spill] sm:$0xff] %v9692_v25  ;;  %v9709_v25 = vld [vmem:[#allocation3 + $0xd0] sm:$0xff] }
 0x33b   :  { %13937 = vst [vmem:[#allocation11_spill] sm:$0xff] %v9694_v22  ;;  %v9712_v22 = vld [vmem:[#allocation3 + $0xf0] sm:$0xff]  ;;  %2673 = vrot.lane.b32.xlu1 %v9564_v8, %s7925_s8  ;;  %2203 = vmatmul.f32.gmra.mxu3 %v9267_v48 }
 0x33c   :  { %4257 = vst.msk [vmem:[#allocation3 + $0x118] sm:$0x3] %vm2385_vm12, %v13909_v56  ;;  %2609 = vrot.lane.b32.xlu0 %v9566_v27, %s7923_s27  ;;  %2105 = vmatmul.f32.gmra.mxu2 %v9171_v15  ;;  %v9786_v27 = vpop.permute.xlu2 %3001 }
 0x33d   :  { %4258 = vst.msk [vmem:[#allocation3 + $0x120] sm:$0xff] %vm535_vm3, %v13909_v56  ;;  %3055 = vrot.lane.b32.xlu2 %v9580_v54, %s7931_s14 }
 0x33e   :  { %13938 = vst [vmem:[#allocation37_spill] sm:$0xff] %v9705_v39 }
 0x33f   :  { %4259 = vst.msk [vmem:[#allocation3 + $0x128] sm:$0x3] %vm2385_vm12, %v13909_v56 }
 0x340   :  { %13939 = vst [vmem:[#allocation31_spill] sm:$0xff] %v9709_v25  ;;  %v9728_v25 = vld [vmem:[#allocation3 + $0x110] sm:$0xff] }
 0x341   :  { %13940 = vst [vmem:[#allocation14_spill] sm:$0xff] %v9712_v22 }
 0x342   :  { %4248 = vst.msk [vmem:[#allocation3 + $0xd0] sm:$0xff] %vm535_vm3, %v13909_v56 }
 0x343   :  { %13941 = vst [vmem:[#allocation35_spill] sm:$0xff] %v9716_v17  ;;  %2865 = vrot.lane.b32.xlu1 %v9580_v54, %s7932_s15  ;;  %2207 = vmatmul.f32.gmra.mxu3 %v9305_v44 }
 0x344   :  { %13942 = vst [vmem:[#allocation13_spill] sm:$0xff] %v9718_v62  ;;  %2801 = vrot.lane.b32.xlu0 %v9578_v40, %s7933_s16  ;;  %2109 = vmatmul.f32.gmra.mxu2 %v9185_v46 }
 0x345   :  { %4252 = vst.msk [vmem:[#allocation3 + $0xf0] sm:$0xff] %vm535_vm3, %v13909_v56  ;;  %2737 = vrot.lane.b32.xlu2 %v9601_v59, %s7934_s17 }
 0x346   :  { %13943 = vst [vmem:[#allocation18_spill] sm:$0xff] %v9722_v18  ;;  %v9741_v18 = vpop.f32.mrf.mxu2 }
 0x347   :  { %13944 = vst [vmem:[#allocation26_spill] sm:$0xff] %v9724_v53  ;;  %v9752_v53 = vld [vmem:[#allocation3] sm:$0xff] }
 0x348   :  { %4250 = vst.msk [vmem:[#allocation3 + $0xe0] sm:$0xff] %vm535_vm3, %v13909_v56 }
 0x349   :  { %13945 = vst [vmem:[#allocation33_spill] sm:$0xff] %v9728_v25  ;;  %v9744_v25 = vpop.f32.mrf.mxu3 }
 0x34a   :  { %4254 = vst.msk [vmem:[#allocation3 + $0x100] sm:$0xff] %vm535_vm3, %v13909_v56 }
 0x34b   :  { %4256 = vst.msk [vmem:[#allocation3 + $0x110] sm:$0xff] %vm535_vm3, %v13909_v56  ;;  %3057 = vrot.lane.b32.xlu1 %v9543_v0, %s7931_s14  ;;  %2211 = vmatmul.f32.gmra.mxu3 %v9343_v1 }
 0x34c   :  { %13946 = vst [vmem:[#allocation38_spill] sm:$0xff] %v9741_v18  ;;  %2993 = vrot.lane.b32.xlu0 %v9545_v4, %s7930_s12  ;;  %2113 = vmatmul.f32.gmra.mxu2 %v9197_v58  ;;  %v9820_v58 = vpop.permute.xlu2 %2683 }
 0x34d   :  { %13947 = vst [vmem:[#allocation39_spill] sm:$0xff] %v9744_v25  ;;  %2929 = vrot.lane.b32.xlu2 %v9620_v50, %s7929_s9 }
 0x34e   :  { %4222 = vst.msk [vmem:[#allocation3] sm:$0xff] %vm535_vm3, %v13909_v56  ;;  %v9760_v51 = vpop.f32.mrf.mxu2 }
 0x34f   :  { %13949 = vst [vmem:[#allocation41_spill] sm:$0xff] %v9760_v51 }
 0x350   :  { %13954 = vst [vmem:[#allocation46_spill] sm:$0xff] %v9786_v27  ;;  %v3239_v27 = vld [vmem:[%s13736_s3 + $0x40] sm:$0xff] }
 0x351   :  { %v9758_v37 = vpop.f32.mrf.mxu3  ;;  %13955 = vst [vmem:[#allocation47_spill] sm:$0xff] %v9794_v63  ;;  %v9807_v7 = vand.u32 4294901760, %v3239_v27 }
 0x352   :  { %13948 = vst [vmem:[#allocation40_spill] sm:$0xff] %v9758_v37 }
 0x353   :  { %4242 = vst.msk [vmem:[#allocation3 + $0xa0] sm:$0xff] %vm535_vm3, %v13909_v56  ;;  %3693 = vmatpush.msra.mxu3 %v9807_v7  ;;  %3298 = vmatpush.msrb.mxu0 %v9807_v7 }
 0x354   :  { %2739 = vrot.lane.b32.xlu1 %v9620_v50, %s7934_s17  ;;  %2675 = vrot.lane.b32.xlu0 %v9580_v54, %s7925_s8  ;;  %13958 = vst [vmem:[#allocation50_spill] sm:$0xff] %v9820_v58  ;;  %v9833_v50 = vpop.permute.xlu1 %2667 }
 0x355   :  { %2611 = vrot.lane.b32.xlu2 %v9578_v40, %s7923_s27  ;;  %2117 = vmatmul.f32.gmra.mxu2 %v9229_v45  ;;  %v3236_v45 = vld [vmem:[%s13736_s3 + $0x28] sm:$0xff] }
 0x356   :  { %v9772_v22 = vpop.f32.mrf.mxu2  ;;  %v9855_v62 = vand.u32 4294901760, %v3236_v45 }
 0x357   :  { %13951 = vst [vmem:[#allocation43_spill] sm:$0xff] %v9772_v22 }
 0x358   :  { %v9865_v25 = vsub.f32 %v3236_v45, %v9855_v62 }
 0x359   :  { %v9770_v14 = vpop.f32.mrf.mxu3 }
 0x35a   :  { %13950 = vst [vmem:[#allocation42_spill] sm:$0xff] %v9770_v14  ;;  %v13961_v22 = vand.u32 4294901760, %v9865_v25 }
 0x35c   :  { %2931 = vrot.lane.b32.xlu1 %v9636_v12, %s7929_s9  ;;  %2867 = vrot.lane.b32.xlu0 %v9543_v0, %s7932_s15 }
 0x35d   :  { %2803 = vrot.lane.b32.xlu2 %v9545_v4, %s7933_s16  ;;  %2121 = vmatmul.f32.gmra.mxu2 %v9267_v48 }
 0x35e   :  { %v9784_v8 = vpop.f32.mrf.mxu2 }
 0x35f   :  { %13953 = vst [vmem:[#allocation45_spill] sm:$0xff] %v9784_v8  ;;  %v9890_v43 = vpop.permute.xlu2 %2731 }
 0x361   :  { %v9782_v15 = vpop.f32.mrf.mxu3 }
 0x362   :  { %13952 = vst [vmem:[#allocation44_spill] sm:$0xff] %v9782_v15  ;;  %v9810_v15 = vsub.f32 %v3239_v27, %v9807_v7  ;;  %v3238_v27 = vld [vmem:[%s13736_s3 + $0x38] sm:$0xff] }
 0x363   :  { %v9828_v63 = vand.u32 4294901760, %v3238_v27 }
 0x364   :  { %v13766_v56 = vand.u32 4294901760, %v9810_v15  ;;  %3579 = vmatpush.msra.mxu2 %v9810_v15  ;;  %2613 = vrot.lane.b32.xlu1 %v9545_v4, %s7923_s27 }
 0x365   :  { %v9838_v58 = vsub.f32 %v3238_v27, %v9828_v63  ;;  %3695 = vmatpush.msra.mxu3 %v9828_v63  ;;  %3300 = vmatpush.msrb.mxu0 %v9828_v63 }
 0x366   :  { %v9805_v57 = vpop.f32.mrf.mxu2  ;;  %v3454_v54 = vsub.f32 %v9810_v15, %v13766_v56  ;;  %v3235_v56 = vld [vmem:[%s13736_s3 + $0x20] sm:$0xff]  ;;  %3059 = vrot.lane.b32.xlu0 %v9589_v3, %s7931_s14  ;;  %2995 = vrot.lane.b32.xlu2 %v9591_v26, %s7930_s12 }
 0x367   :  { %13957 = vst [vmem:[#allocation49_spill] sm:$0xff] %v9805_v57  ;;  %v9857_v57 = vand.u32 4294901760, %v3235_v56  ;;  %v13769_v37 = vand.u32 4294901760, %v9838_v58  ;;  %3582 = vmatpush.msra.mxu2 %v9838_v58 }
 0x368   :  { %v3455_v27 = vand.u32 4294901760, %v3454_v54  ;;  %2125 = vmatmul.f32.gmra.mxu2 %v9305_v44 }
 0x369   :  { %v9800_v46 = vpop.f32.mrf.mxu3  ;;  %v3460_v54 = vsub.f32 %v9838_v58, %v13769_v37 }
 0x36a   :  { %13956 = vst [vmem:[#allocation48_spill] sm:$0xff] %v9800_v46  ;;  %v3237_v46 = vld [vmem:[%s13736_s3 + $0x30] sm:$0xff]  ;;  %3456 = vmatpush.msrb.mxu1 %v3455_v27  ;;  %v3234_v27 = vld [vmem:[%s13736_s3 + $0x18] sm:$0xff] }
 0x36b   :  { %v9853_v14 = vand.u32 4294901760, %v3237_v46  ;;  %v3461_v8 = vand.u32 4294901760, %v3460_v54  ;;  %v9888_v37 = vand.u32 4294901760, %v3234_v27 }
 0x36c   :  { %2805 = vrot.lane.b32.xlu1 %v9591_v26, %s7933_s16 }
 0x36d   :  { %v9862_v59 = vsub.f32 %v3237_v46, %v9853_v14  ;;  %3697 = vmatpush.msra.mxu3 %v9853_v14  ;;  %3302 = vmatpush.msrb.mxu0 %v9853_v14  ;;  %v9906_v54 = vsub.f32 %v3234_v27, %v9888_v37 }
 0x36e   :  { %3462 = vmatpush.msrb.mxu1 %v3461_v8  ;;  %2741 = vrot.lane.b32.xlu0 %v9636_v12, %s7934_s17 }
 0x36f   :  { %v13771_v46 = vand.u32 4294901760, %v9862_v59  ;;  %3585 = vmatpush.msra.mxu2 %v9862_v59  ;;  %3699 = vmatpush.msra.mxu3 %v9855_v62  ;;  %v13774_v8 = vand.u32 4294901760, %v9906_v54 }
 0x370   :  { %3304 = vmatpush.msrb.mxu0 %v9855_v62  ;;  %2677 = vrot.lane.b32.xlu2 %v9543_v0, %s7925_s8 }
 0x371   :  { %v9835_v40 = vpop.f32.mrf.mxu3  ;;  %v3466_v45 = vsub.f32 %v9862_v59, %v13771_v46  ;;  %3588 = vmatpush.msra.mxu2 %v9865_v25  ;;  %3701 = vmatpush.msra.mxu3 %v9857_v57 }
 0x372   :  { %13959 = vst [vmem:[#allocation51_spill] sm:$0xff] %v9835_v40  ;;  %v9851_v40 = vpop.f32.mrf.mxu2  ;;  %3306 = vmatpush.msrb.mxu0 %v9857_v57  ;;  %2129 = vmatmul.f32.gmra.mxu2 %v9343_v1 }
 0x373   :  { %13960 = vst [vmem:[#allocation52_spill] sm:$0xff] %v9851_v40  ;;  %v9868_v40 = vsub.f32 %v3235_v56, %v9857_v57  ;;  %v3472_v56 = vsub.f32 %v9865_v25, %v13961_v22  ;;  %v3467_v39 = vand.u32 4294901760, %v3466_v45  ;;  %v3484_v45 = vsub.f32 %v9906_v54, %v13774_v8  ;;  %3703 = vmatpush.msra.mxu3 %v9888_v37  ;;  %v9939_v8 = vpop.permute.xlu2 %2923 }
 0x374   :  { %3308 = vmatpush.msrb.mxu0 %v9888_v37  ;;  %2997 = vrot.lane.b32.xlu1 %v9554_v11, %s7930_s12 }
 0x375   :  { %v13962_v17 = vand.u32 4294901760, %v9868_v40  ;;  %v3473_v22 = vand.u32 4294901760, %v3472_v56  ;;  %3591 = vmatpush.msra.mxu2 %v9868_v40  ;;  %3468 = vmatpush.msrb.mxu1 %v3467_v39  ;;  %v27_v56 = vld [vmem:[%s13735_s6 + $0x4] sm:$0x7]  ;;  %v3233_v39 = vld [vmem:[%s13736_s3 + $0x10] sm:$0xff]  ;;  %v3485_v4 = vand.u32 4294901760, %v3484_v45 }
 0x376   :  { %2933 = vrot.lane.b32.xlu0 %v9644_v32, %s7929_s9 }
 0x377   :  { %v3478_v51 = vsub.f32 %v9868_v40, %v13962_v17  ;;  %v9915_v17 = vpop.permute.xlu1 %2937  ;;  %3594 = vmatpush.msra.mxu2 %v9906_v54  ;;  %3474 = vmatpush.msrb.mxu1 %v3473_v22  ;;  %v9945_v22 = vperm.slane %v27_v56, 0 }
 0x378   :  { %13965 = vst [vmem:[#allocation55_spill] sm:$0xff] %v9915_v17  ;;  %v3232_v17 = vld [vmem:[%s13736_s3 + $0x8] sm:$0xff]  ;;  %2869 = vrot.lane.b32.xlu2 %v9589_v3, %s7932_s15 }
 0x379   :  { %v9903_v48 = vpop.f32.mrf.mxu3  ;;  %v3479_v27 = vand.u32 4294901760, %v3478_v51  ;;  %v9936_v51 = vand.u32 4294901760, %v3233_v39  ;;  %v9950_v44 = vand.u32 4294901760, %v3232_v17 }
 0x37a   :  { %13963 = vst [vmem:[#allocation53_spill] sm:$0xff] %v9903_v48  ;;  %v9909_v46 = vpop.f32.mrf.mxu2  ;;  %v2604_v48 = vpop.permute.xlu0 %2603 }
 0x37b   :  { %13964 = vst [vmem:[#allocation54_spill] sm:$0xff] %v9909_v46  ;;  %3480 = vmatpush.msrb.mxu1 %v3479_v27  ;;  %v9948_v46 = vsub.f32 %v3233_v39, %v9936_v51  ;;  %3705 = vmatpush.msra.mxu3 %v9936_v51  ;;  %v3231_v27 = vld [vmem:[%s13736_s3] sm:$0xff]  ;;  %v9961_v42 = vsub.f32 %v3232_v17, %v9950_v44 }
 0x37c   :  { %v9966_v47 = vand.u32 4294901760, %v3231_v27  ;;  %3310 = vmatpush.msrb.mxu0 %v9936_v51  ;;  %2679 = vrot.lane.b32.xlu1 %v9589_v3, %s7925_s8 }
 0x37d   :  { %3486 = vmatpush.msrb.mxu1 %v3485_v4  ;;  %3597 = vmatpush.msra.mxu2 %v9948_v46  ;;  %v1862_v4 = vpop.f32.mrf.mxu0  ;;  %v13969_v52 = vand.u32 4294901760, %v9948_v46  ;;  %v13780_v29 = vand.u32 4294901760, %v9961_v42 }
 0x37e   :  { %3707 = vmatpush.msra.mxu3 %v9950_v44  ;;  %v9985_v23 = vsub.f32 %v3231_v27, %v9966_v47  ;;  %3312 = vmatpush.msrb.mxu0 %v9950_v44 }
 0x37f   :  { %v9976_v17 = vpop.permute.xlu1 %2619  ;;  %v3490_v55 = vsub.f32 %v9948_v46, %v13969_v52  ;;  %3600 = vmatpush.msra.mxu2 %v9961_v42  ;;  %v3496_v12 = vsub.f32 %v9961_v42, %v13780_v29  ;;  %v9996_v52 = vpop.permute.xlu2 %2605  ;;  %2615 = vrot.lane.b32.xlu0 %v9591_v26, %s7923_s27 }
 0x380   :  { %13967 = vst [vmem:[#allocation57_spill] sm:$0xff] %v9976_v17  ;;  %3709 = vmatpush.msra.mxu3 %v9966_v47  ;;  %3314 = vmatpush.msrb.mxu0 %v9966_v47  ;;  %v1636_v17 = vadd.f32 %v9450_v35, %v9945_v22 }
 0x381   :  { %v9964_v39 = vpop.f32.mrf.mxu3  ;;  %3603 = vmatpush.msra.mxu2 %v9985_v23  ;;  %v3497_v27 = vand.u32 4294901760, %v3496_v12  ;;  %3061 = vrot.lane.b32.xlu2 %v9556_v16, %s7931_s14 }
 0x382   :  { %v9953_v45 = vpop.f32.mrf.mxu2  ;;  %v9978_v56 = vpop.permute.xlu0 %3065  ;;  %v1778_v35 = vadd.f32 %v9437_v19, %v1636_v17  ;;  %v13972_v19 = vand.u32 4294901760, %v9862_v59 }
 0x383   :  { %13966 = vst [vmem:[#allocation56_spill] sm:$0xff] %v9953_v45  ;;  %v1628_v45 = vadd.f32 %v9427_v28, %v9945_v22  ;;  %v3491_v28 = vand.u32 4294901760, %v3490_v55  ;;  %v3099_v55 = vsel %vm535_vm3, %v9752_v53, %v2604_v48  ;;  %v1968_v17 = vpop.f32.mrf.mxu1 }
 0x384   :  { %13968 = vst [vmem:[#allocation58_spill] sm:$0xff] %v9978_v56  ;;  %v3501_v56 = vand.u32 4294901760, %v9985_v23  ;;  %v3115_v12 = vsel %vm31_vm0, %v3099_v55, %v9833_v50  ;;  %v13971_v50 = vand.u32 4294901760, %v9838_v58  ;;  %v1863_v58 = vadd.f32 %v1862_v4, %v1778_v35  ;;  %2871 = vrot.lane.b32.xlu1 %v9556_v16, %s7932_s15 }
 0x385   :  { %v1774_v0 = vadd.f32 %v9422_v34, %v1628_v45  ;;  %3492 = vmatpush.msrb.mxu1 %v3491_v28  ;;  %v13970_v45 = vand.u32 4294901760, %v9810_v15  ;;  %v1867_v28 = vpop.f32.mrf.mxu0 }
 0x386   :  { %v3502_v1 = vsub.f32 %v9985_v23, %v3501_v56  ;;  %v1963_v3 = vadd.f32 %v1962_v60, %v1863_v58 }
 0x387   :  { %3498 = vmatpush.msrb.mxu1 %v3497_v27  ;;  %3817 = vmatpush.msra.mxu0 %v13970_v45  ;;  %v1858_v53 = vadd.f32 %v9911_v61, %v1774_v0  ;;  %v2860_v15 = vpop.permute.xlu1 %2859  ;;  %v3131_v27 = vsel %vm602_vm7, %v3115_v12, %v9890_v43  ;;  %v13973_v43 = vand.u32 4294901760, %v9865_v25  ;;  %v13974_v45 = vand.u32 4294901760, %v9868_v40 }
 0x388   :  { %v3503_v18 = vand.u32 4294901760, %v3502_v1  ;;  %v10030_v1 = vpop.permute.xlu2 %2797  ;;  %v1652_v40 = vadd.f32 %v9519_v9, %v9945_v22  ;;  %2807 = vrot.lane.b32.xlu0 %v9554_v11, %s7933_s16 }
 0x389   :  { %v10011_v34 = vpop.f32.mrf.mxu3  ;;  %3821 = vmatpush.msra.mxu0 %v13971_v50  ;;  %v1957_v0 = vadd.f32 %v1956_v36, %v1858_v53  ;;  %v13975_v53 = vand.u32 4294901760, %v9906_v54  ;;  %2743 = vrot.lane.b32.xlu2 %v9644_v32, %s7934_s17 }
 0x38a   :  { %v10006_v29 = vpop.f32.mrf.mxu2  ;;  %3504 = vmatpush.msrb.mxu1 %v3503_v18  ;;  %v2796_v48 = vpop.permute.xlu0 %2795 }
 0x38b   :  { %v3147_v61 = vsel %vm636_vm9, %v3131_v27, %v2796_v48  ;;  %3825 = vmatpush.msra.mxu0 %v13972_v19  ;;  %v1974_v48 = vpop.f32.mrf.mxu1 }
 0x38c   :  { %3923 = vmatpush.msra.mxu1 %v9807_v7  ;;  %v1644_v7 = vadd.f32 %v9487_v49, %v9945_v22  ;;  %v3164_v36 = vsel %vm3163_vm1, %v3147_v61, %v2860_v15  ;;  %3063 = vrot.lane.b32.xlu1 %v9572_v30, %s7931_s14 }
 0x38d   :  { %3829 = vmatpush.msra.mxu0 %v13973_v43  ;;  %v3181_v4 = vsel %vm3180_vm2, %v3164_v36, %v9939_v8 }
 0x38e   :  { %3925 = vmatpush.msra.mxu1 %v9828_v63  ;;  %v1872_v63 = vpop.f32.mrf.mxu0  ;;  %v1782_v59 = vadd.f32 %v9470_v21, %v1644_v7 }
 0x38f   :  { %v3052_v25 = vpop.permute.xlu1 %3051  ;;  %3833 = vmatpush.msra.mxu0 %v13974_v45 }
 0x390   :  { %3927 = vmatpush.msra.mxu1 %v9853_v14  ;;  %v10057_v12 = vpop.permute.xlu2 %2989  ;;  %2999 = vrot.lane.b32.xlu0 %v9574_v13, %s7930_s12 }
 0x391   :  { %v10038_v55 = vpop.f32.mrf.mxu3  ;;  %3837 = vmatpush.msra.mxu0 %v13975_v53  ;;  %2935 = vrot.lane.b32.xlu2 %v9576_v6, %s7929_s9 }
 0x392   :  { %v2070_v18 = vpop.f32.mrf.mxu2  ;;  %3929 = vmatpush.msra.mxu1 %v9855_v62  ;;  %v2988_v14 = vpop.permute.xlu0 %2987 }
 0x393   :  { %v2071_v49 = vadd.f32 %v2070_v18, %v1957_v0  ;;  %v3198_v26 = vsel %vm3197_vm4, %v3181_v4, %v2988_v14  ;;  %v13977_v18 = vand.u32 4294901760, %v9961_v42  ;;  %v1660_v42 = vadd.f32 %v9562_v10, %v9945_v22 }
 0x394   :  { %3931 = vmatpush.msra.mxu1 %v9857_v57  ;;  %v3215_v62 = vsel %vm3214_vm5, %v3198_v26, %v3052_v25  ;;  %v1868_v57 = vadd.f32 %v1867_v28, %v1782_v59  ;;  %v1980_v59 = vpop.f32.mrf.mxu1  ;;  %2745 = vrot.lane.b32.xlu1 %v9576_v6, %s7934_s17 }
 0x395   :  { %v10062_v21 = vadd.f32 %v9964_v39, %v2071_v49  ;;  %v3243_v8 = vsel %vm3241_vm6, %v3215_v62, 0  ;;  %v13976_v39 = vand.u32 4294901760, %v9948_v46  ;;  %v1786_v46 = vadd.f32 %v9499_v2, %v1652_v40 }
 0x396   :  { %3933 = vmatpush.msra.mxu1 %v9888_v37  ;;  %v10070_v35 = vand.u32 4294901760, %v3243_v8  ;;  %v1877_v27 = vpop.f32.mrf.mxu0  ;;  %v1969_v19 = vadd.f32 %v1968_v17, %v1868_v57  ;;  %v3100_v2 = vsel %vm535_vm3, %v9506_v38, %v9996_v52  ;;  %v1790_v10 = vadd.f32 %v9523_v33, %v1660_v42 }
 0x397   :  { %3841 = vmatpush.msra.mxu0 %v13976_v39  ;;  %v2215_v37 = vsel %vm535_vm3, %v10062_v21, 0.0  ;;  %v2734_v28 = vpop.permute.xlu1 %2733  ;;  %v1668_v62 = vadd.f32 %v9624_v5, %v9945_v22 }
 0x398   :  { %3935 = vmatpush.msra.mxu1 %v9936_v51  ;;  %v3316_v54 = vsub.f32 %v3243_v8, %v10070_v35  ;;  %v1878_v33 = vadd.f32 %v1877_v27, %v1790_v10  ;;  %2681 = vrot.lane.b32.xlu0 %v9556_v16, %s7925_s8 }
 0x399   :  { %v2164_v50 = vpop.f32.mrf.mxu3  ;;  %3506 = vmatmul.f32.vlgmr.msrb.gmra.mxu1 %v10070_v35  ;;  %3845 = vmatpush.msra.mxu0 %v13977_v18  ;;  %v1794_v5 = vadd.f32 %v9558_v20, %v1668_v62  ;;  %v1676_v20 = vadd.f32 %v9700_v24, %v9945_v22  ;;  %v13983_v62 = vld [vmem:[#allocation12_spill] sm:$0xff] }
 0x39a   :  { %v2074_v60 = vpop.f32.mrf.mxu2  ;;  %v3317_v51 = vand.u32 4294901760, %v3316_v54  ;;  %v2670_v61 = vpop.permute.xlu0 %2669  ;;  %3606 = vmatmul.f32.vlgmr.msra.gmra.mxu2 %v3316_v54  ;;  %3937 = vmatpush.msra.mxu1 %v9950_v44  ;;  %v1873_v44 = vadd.f32 %v1872_v63, %v1786_v46 }
 0x39b   :  { %v2075_v15 = vadd.f32 %v2074_v60, %v1963_v3  ;;  %3849 = vmatpush.msra.mxu0 %v3501_v56  ;;  %v3116_v43 = vsel %vm31_vm0, %v3100_v2, %v2670_v61  ;;  %2617 = vrot.lane.b32.xlu2 %v9554_v11, %s7923_s27  ;;  %v13978_v2 = vld [vmem:[#allocation15_spill] sm:$0xff] }
 0x39c   :  { %v3318_v58 = vsub.f32 %v3316_v54, %v3317_v51  ;;  %3713 = vmatmul.f32.vlgmr.msra.gmra.mxu3 %v3317_v51  ;;  %3939 = vmatpush.msra.mxu1 %v9966_v47  ;;  %v3132_v38 = vsel %vm602_vm7, %v3116_v43, %v2734_v28  ;;  %v1975_v63 = vadd.f32 %v1974_v48, %v1873_v44  ;;  %v1986_v8 = vpop.f32.mrf.mxu1 }
 0x39d   :  { %v10083_v9 = vadd.f32 %v10011_v34, %v2075_v15  ;;  %v10093_v34 = vpop.permute.xlu2 %2671  ;;  %v3148_v4 = vsel %vm636_vm9, %v3132_v38, %v10030_v1  ;;  %v1981_v54 = vadd.f32 %v1980_v59, %v1878_v33  ;;  %2811 = vrot.lane.b32.xlu1 %v9608_v31, %s7933_s16 }
 0x39e   :  { %v3319_v36 = vand.u32 4294901760, %v3318_v58  ;;  %v1882_v14 = vpop.f32.mrf.mxu0  ;;  %v1798_v58 = vadd.f32 %v13978_v2, %v1676_v20 }
 0x39f   :  { %v2216_v0 = vsel %vm535_vm3, %v10083_v9, 0.0  ;;  %v2926_v47 = vpop.permute.xlu1 %2925  ;;  %v1883_v28 = vadd.f32 %v1882_v14, %v1794_v5  ;;  %v13979_v14 = vld [vmem:[#allocation38_spill] sm:$0xff] }
 0x3a0   :  { %v2217_v7 = vadd.f32 %v2216_v0, %v2215_v37  ;;  %3320 = vmatmul.f32.vlgmr.msrb.gmra.mxu0 %v3319_v36  ;;  %2873 = vrot.lane.b32.xlu0 %v9572_v30, %s7932_s15  ;;  %v1684_v38 = vadd.f32 %v13979_v14, %v9945_v22 }
 0x3a1   :  { %v2168_v25 = vpop.f32.mrf.mxu3  ;;  %v1987_v42 = vadd.f32 %v1986_v8, %v1883_v28  ;;  %v13984_v28 = vld [vmem:[#allocation29_spill] sm:$0xff] }
 0x3a2   :  { %v2078_v17 = vpop.f32.mrf.mxu2  ;;  %v2862_v56 = vpop.permute.xlu0 %2861 }
 0x3a3   :  { %v2079_v49 = vadd.f32 %v2078_v17, %v1969_v19  ;;  %2809 = vrot.lane.b32.xlu2 %v9574_v13, %s7933_s16 }
 0x3a4   :  { %v1992_v61 = vpop.f32.mrf.mxu1 }
 0x3a5   :  { %v10111_v23 = vadd.f32 %v10038_v55, %v2079_v49  ;;  %v10120_v3 = vpop.permute.xlu2 %2863  ;;  %v3165_v55 = vsel %vm3163_vm1, %v3148_v4, %v2862_v56  ;;  %v13980_v4 = vld [vmem:[#allocation10_spill] sm:$0xff] }
 0x3a6   :  { %v3182_v40 = vsel %vm3180_vm2, %v3165_v55, %v2926_v47  ;;  %v1887_v15 = vpop.f32.mrf.mxu0  ;;  %3003 = vrot.lane.b32.xlu1 %v13980_v4, %s7930_s12 }
 0x3a7   :  { %v2218_v52 = vsel %vm535_vm3, %v10111_v23, 0.0  ;;  %v2608_v57 = vpop.permute.xlu1 %2607  ;;  %v3199_v39 = vsel %vm3197_vm4, %v3182_v40, %v10057_v12  ;;  %v1888_v47 = vadd.f32 %v1887_v15, %v1798_v58 }
 0x3a8   :  { %v2219_v45 = vadd.f32 %v2218_v52, %v2217_v7  ;;  %v3101_v18 = vsel %vm535_vm3, %v9538_v41, %v2608_v57 }
 0x3a9   :  { %v2172_v60 = vpop.f32.mrf.mxu3  ;;  %v3117_v36 = vsel %vm31_vm0, %v3101_v18, %v10093_v34  ;;  %v1993_v5 = vadd.f32 %v1992_v61, %v1888_v47  ;;  %v13985_v61 = vld [vmem:[#allocation23_spill] sm:$0xff] }
 0x3aa   :  { %v2082_v26 = vpop.f32.mrf.mxu2  ;;  %v3054_v48 = vpop.permute.xlu0 %3053 }
 0x3ab   :  { %v2083_v53 = vadd.f32 %v2082_v26, %v1975_v63  ;;  %v3216_v6 = vsel %vm3214_vm5, %v3199_v39, %v3054_v48  ;;  %v13982_v26 = vld [vmem:[#allocation20_spill] sm:$0xff] }
 0x3ac   :  { %v1998_v56 = vpop.f32.mrf.mxu1  ;;  %2875 = vrot.lane.b32.xlu2 %v13982_v26, %s7932_s15 }
 0x3ad   :  { %v10130_v1 = vadd.f32 %v2164_v50, %v2083_v53  ;;  %v3056_v37 = vpop.permute.xlu2 %3055  ;;  %v3246_v50 = vsel %vm3241_vm6, %v3216_v6, 0  ;;  %v1802_v53 = vadd.f32 %v13983_v62, %v1684_v38 }
 0x3ae   :  { %v10141_v46 = vand.u32 4294901760, %v3246_v50  ;;  %v1892_v19 = vpop.f32.mrf.mxu0  ;;  %2685 = vrot.lane.b32.xlu1 %v13982_v26, %s7925_s8 }
 0x3af   :  { %v2220_v27 = vsel %vm535_vm3, %v10130_v1, 0.0  ;;  %v2800_v43 = vpop.permute.xlu1 %2799 }
 0x3b0   :  { %v2221_v16 = vadd.f32 %v2220_v27, %v2219_v45  ;;  %v3324_v0 = vsub.f32 %v3246_v50, %v10141_v46  ;;  %3510 = vmatmul.f32.gmra.mxu1 %v10141_v46  ;;  %v13981_v45 = vld [vmem:[#allocation36_spill] sm:$0xff]  ;;  %v1893_v50 = vadd.f32 %v1892_v19, %v1802_v53 }
 0x3b1   :  { %v2176_v12 = vpop.f32.mrf.mxu3  ;;  %2747 = vrot.lane.b32.xlu0 %v13981_v45, %s7934_s17 }
 0x3b2   :  { %v2086_v11 = vpop.f32.mrf.mxu2  ;;  %3611 = vmatmul.f32.gmra.mxu2 %v3324_v0  ;;  %v3325_v24 = vand.u32 4294901760, %v3324_v0  ;;  %v2736_v17 = vpop.permute.xlu0 %2735  ;;  %v1999_v2 = vadd.f32 %v1998_v56, %v1893_v50 }
 0x3b3   :  { %v2087_v51 = vadd.f32 %v2086_v11, %v1981_v54  ;;  %v3133_v13 = vsel %vm602_vm7, %v3117_v36, %v2736_v17 }
 0x3b4   :  { %3719 = vmatmul.f32.gmra.mxu3 %v3325_v24  ;;  %v3326_v44 = vsub.f32 %v3324_v0, %v3325_v24  ;;  %v3149_v63 = vsel %vm636_vm9, %v3133_v13, %v2800_v43  ;;  %v10187_v11 = vpop.f32.mrf.mxu1  ;;  %3067 = vrot.lane.b32.xlu2 %v13985_v61, %s7931_s14 }
 0x3b5   :  { %v10153_v7 = vadd.f32 %v2168_v25, %v2087_v51  ;;  %v10162_v49 = vpop.permute.xlu2 %2737  ;;  %v3166_v40 = vsel %vm3163_vm1, %v3149_v63, %v10120_v3 }
 0x3b6   :  { %v3327_v59 = vand.u32 4294901760, %v3326_v44  ;;  %v10168_v34 = vpop.f32.mrf.mxu0  ;;  %2877 = vrot.lane.b32.xlu1 %v13985_v61, %s7932_s15 }
 0x3b7   :  { %v2222_v41 = vsel %vm535_vm3, %v10153_v7, 0.0  ;;  %v2992_v33 = vpop.permute.xlu1 %2991 }
 0x3b8   :  { %v2223_v30 = vadd.f32 %v2222_v41, %v2221_v16  ;;  %3328 = vmatmul.f32.gmra.mxu0 %v3327_v59  ;;  %v13986_v41 = vld [vmem:[#allocation4_spill] sm:$0xff] }
 0x3b9   :  { %v2180_v52 = vpop.f32.mrf.mxu3  ;;  %2939 = vrot.lane.b32.xlu0 %v13984_v28, %s7929_s9 }
 0x3ba   :  { %v2090_v25 = vpop.f32.mrf.mxu2  ;;  %v2928_v8 = vpop.permute.xlu0 %2927 }
 0x3bb   :  { %v2091_v10 = vadd.f32 %v2090_v25, %v1987_v42  ;;  %v3183_v57 = vsel %vm3180_vm2, %v3166_v40, %v2928_v8  ;;  %v13988_v8 = vld [vmem:[#allocation37_spill] sm:$0xff] }
 0x3bc   :  { %v10209_v44 = vpop.f32.mrf.mxu1  ;;  %2749 = vrot.lane.b32.xlu2 %v13984_v28, %s7934_s17 }
 0x3bd   :  { %v10174_v55 = vadd.f32 %v2172_v60, %v2091_v10  ;;  %v2930_v48 = vpop.permute.xlu2 %2929  ;;  %v3200_v60 = vsel %vm3197_vm4, %v3183_v57, %v2992_v33  ;;  %v13987_v33 = vld [vmem:[#allocation5_spill] sm:$0xff] }
 0x3be   :  { %v3217_v27 = vsel %vm3214_vm5, %v3200_v60, %v3056_v37  ;;  %v10193_v51 = vpop.f32.mrf.mxu0  ;;  %3069 = vrot.lane.b32.xlu1 %v13987_v33, %s7931_s14 }
 0x3bf   :  { %v2224_v15 = vsel %vm535_vm3, %v10174_v55, 0.0  ;;  %v3249_v6 = vsel %vm3241_vm6, %v3217_v27, 0  ;;  %v2674_v19 = vpop.permute.xlu1 %2673  ;;  %v13989_v27 = vld [vmem:[#allocation41_spill] sm:$0xff] }
 0x3c0   :  { %v2225_v39 = vadd.f32 %v2224_v15, %v2223_v30  ;;  %v10191_v20 = vand.u32 4294901760, %v3249_v6 }
 0x3c1   :  { %v10189_v3 = vpop.f32.mrf.mxu3  ;;  %2621 = vrot.lane.b32.xlu0 %v9608_v31, %s7923_s27 }
 0x3c2   :  { %v2094_v54 = vpop.f32.mrf.mxu2  ;;  %3514 = vmatmul.f32.gmra.mxu1 %v10191_v20  ;;  %v3332_v0 = vsub.f32 %v3249_v6, %v10191_v20  ;;  %v2610_v18 = vpop.permute.xlu0 %2609 }
 0x3c3   :  { %v2095_v16 = vadd.f32 %v2094_v54, %v1993_v5  ;;  %v1692_v54 = vadd.f32 %v13989_v27, %v9945_v22  ;;  %v13997_v27 = vld [vmem:[#allocation49_spill] sm:$0xff] }
 0x3c4   :  { %3616 = vmatmul.f32.gmra.mxu2 %v3332_v0  ;;  %v3333_v43 = vand.u32 4294901760, %v3332_v0  ;;  %v10231_v62 = vpop.f32.mrf.mxu1  ;;  %2941 = vrot.lane.b32.xlu2 %v13988_v8, %s7929_s9 }
 0x3c5   :  { %v10199_v37 = vadd.f32 %v2176_v12, %v2095_v16  ;;  %v2612_v58 = vpop.permute.xlu2 %2611  ;;  %v3102_v12 = vsel %vm535_vm3, %v13986_v41, %v2610_v18  ;;  %v13990_v18 = vld [vmem:[#allocation35_spill] sm:$0xff] }
 0x3c6   :  { %3725 = vmatmul.f32.gmra.mxu3 %v3333_v43  ;;  %v3334_v42 = vsub.f32 %v3332_v0, %v3333_v43  ;;  %v3118_v25 = vsel %vm31_vm0, %v3102_v12, %v2674_v19  ;;  %v10222_v38 = vpop.f32.mrf.mxu0  ;;  %2751 = vrot.lane.b32.xlu1 %v13988_v8, %s7934_s17  ;;  %v13992_v43 = vld [vmem:[#allocation16_spill] sm:$0xff] }
 0x3c7   :  { %v2226_v24 = vsel %vm535_vm3, %v10199_v37, 0.0  ;;  %v2866_v10 = vpop.permute.xlu1 %2865  ;;  %v3134_v63 = vsel %vm602_vm7, %v3118_v25, %v10162_v49 }
 0x3c8   :  { %v2227_v17 = vadd.f32 %v2226_v24, %v2225_v39  ;;  %v3335_v13 = vand.u32 4294901760, %v3334_v42  ;;  %v1806_v24 = vadd.f32 %v13990_v18, %v1692_v54  ;;  %v1716_v54 = vadd.f32 %v13997_v27, %v9945_v22 }
 0x3c9   :  { %v10211_v59 = vpop.f32.mrf.mxu3  ;;  %2813 = vrot.lane.b32.xlu0 %v13980_v4, %s7933_s16 }
 0x3ca   :  { %v2098_v36 = vpop.f32.mrf.mxu2  ;;  %3336 = vmatmul.f32.gmra.mxu0 %v3335_v13  ;;  %v2802_v47 = vpop.permute.xlu0 %2801 }
 0x3cb   :  { %v2099_v30 = vadd.f32 %v2098_v36, %v1999_v2  ;;  %v3150_v31 = vsel %vm636_vm9, %v3134_v63, %v2802_v47  ;;  %v13993_v36 = vld [vmem:[#allocation45_spill] sm:$0xff] }
 0x3cc   :  { %v3167_v53 = vsel %vm3163_vm1, %v3150_v31, %v2866_v10  ;;  %v10252_v19 = vpop.f32.mrf.mxu1  ;;  %2623 = vrot.lane.b32.xlu2 %v13980_v4, %s7923_s27  ;;  %v13994_v10 = vld [vmem:[#allocation39_spill] sm:$0xff]  ;;  %v1898_v4 = vadd.f32 %v10168_v34, %v1806_v24  ;;  %v13998_v34 = vld [vmem:[#allocation13_spill] sm:$0xff] }
 0x3cd   :  { %v10218_v14 = vadd.f32 %v2180_v52, %v2099_v30  ;;  %v2804_v45 = vpop.permute.xlu2 %2803  ;;  %v3184_v5 = vsel %vm3180_vm2, %v3167_v53, %v2930_v48  ;;  %v13991_v48 = vld [vmem:[#allocation43_spill] sm:$0xff]  ;;  %v1708_v30 = vadd.f32 %v13993_v36, %v9945_v22 }
 0x3ce   :  { %v1912_v60 = vpop.f32.mrf.mxu0  ;;  %v1700_v2 = vadd.f32 %v13991_v48, %v9945_v22  ;;  %2943 = vrot.lane.b32.xlu1 %v13998_v34, %s7929_s9 }
 0x3cf   :  { %v2228_v56 = vsel %vm535_vm3, %v10218_v14, 0.0  ;;  %v3058_v40 = vpop.permute.xlu1 %3057 }
 0x3d0   :  { %v10228_v26 = vadd.f32 %v2228_v56, %v2227_v17  ;;  %v1810_v47 = vadd.f32 %v13994_v10, %v1700_v2  ;;  %v13995_v56 = vld [vmem:[#allocation8_spill] sm:$0xff] }
 0x3d1   :  { %v10240_v49 = vpop.f32.mrf.mxu3  ;;  %3005 = vrot.lane.b32.xlu0 %v13992_v43, %s7930_s12  ;;  %v3103_v63 = vsel %vm535_vm3, %v13995_v56, %v2612_v58  ;;  %v13999_v2 = vld [vmem:[#allocation52_spill] sm:$0xff] }
 0x3d2   :  { %v2102_v52 = vpop.f32.mrf.mxu2  ;;  %v2994_v15 = vpop.permute.xlu0 %2993  ;;  %v14001_v56 = vld [vmem:[#allocation44_spill] sm:$0xff] }
 0x3d3   :  { %v3201_v57 = vsel %vm3197_vm4, %v3184_v5, %v2994_v15  ;;  %v13996_v5 = vld [vmem:[#allocation40_spill] sm:$0xff] }
 0x3d4   :  { %v3218_v6 = vsel %vm3214_vm5, %v3201_v57, %v3058_v40  ;;  %v1814_v57 = vadd.f32 %v13996_v5, %v1708_v30  ;;  %2815 = vrot.lane.b32.xlu2 %v13992_v43, %s7933_s16  ;;  %v2028_v18 = vpop.f32.mrf.mxu1  ;;  %v14003_v5 = vld [vmem:[#allocation22_spill] sm:$0xff] }
 0x3d5   :  { %v10244_v39 = vpop.permute.xlu2 %2995  ;;  %v3252_v16 = vsel %vm3241_vm6, %v3218_v6, 0  ;;  %v2005_v6 = vadd.f32 %v10187_v11, %v1898_v4  ;;  %v1724_v11 = vadd.f32 %v13999_v2, %v9945_v22  ;;  %v14002_v4 = vld [vmem:[#allocation54_spill] sm:$0xff] }
 0x3d6   :  { %v10250_v0 = vand.u32 4294901760, %v3252_v16  ;;  %v1917_v40 = vpop.f32.mrf.mxu0  ;;  %2625 = vrot.lane.b32.xlu1 %v13992_v43, %s7923_s27 }
 0x3d7   :  { %v2740_v41 = vpop.permute.xlu1 %2739  ;;  %v2103_v36 = vadd.f32 %v2102_v52, %v2005_v6 }
 0x3d8   :  { %v3340_v17 = vsub.f32 %v3252_v16, %v10250_v0  ;;  %3518 = vmatmul.f32.gmra.mxu1 %v10250_v0  ;;  %v1903_v16 = vadd.f32 %v10193_v51, %v1810_v47  ;;  %v1908_v51 = vadd.f32 %v10222_v38, %v1814_v57 }
 0x3d9   :  { %v10269_v25 = vpop.f32.mrf.mxu3  ;;  %2687 = vrot.lane.b32.xlu0 %v13985_v61, %s7925_s8 }
 0x3da   :  { %v2106_v50 = vpop.f32.mrf.mxu2  ;;  %v2676_v12 = vpop.permute.xlu0 %2675  ;;  %3621 = vmatmul.f32.gmra.mxu2 %v3340_v17  ;;  %v3341_v42 = vand.u32 4294901760, %v3340_v17  ;;  %v2011_v61 = vadd.f32 %v10209_v44, %v1903_v16 }
 0x3db   :  { %v3119_v53 = vsel %vm31_vm0, %v3103_v63, %v2676_v12  ;;  %v14000_v12 = vld [vmem:[#allocation42_spill] sm:$0xff]  ;;  %v1822_v63 = vadd.f32 %v14001_v56, %v1724_v11 }
 0x3dc   :  { %3731 = vmatmul.f32.gmra.mxu3 %v3341_v42  ;;  %v3342_v31 = vsub.f32 %v3340_v17, %v3341_v42  ;;  %v3135_v58 = vsel %vm602_vm7, %v3119_v53, %v2740_v41  ;;  %v1818_v42 = vadd.f32 %v14000_v12, %v1716_v54  ;;  %v2107_v52 = vadd.f32 %v2106_v50, %v2011_v61  ;;  %v14004_v54 = vld [vmem:[#allocation48_spill] sm:$0xff] }
 0x3dd   :  { %v10267_v13 = vpop.permute.xlu2 %2677  ;;  %v3151_v17 = vsel %vm636_vm9, %v3135_v58, %v2804_v45  ;;  %v2017_v45 = vadd.f32 %v10231_v62, %v1908_v51  ;;  %3007 = vrot.lane.b32.xlu2 %v14003_v5, %s7930_s12  ;;  %v1918_v43 = vadd.f32 %v1917_v40, %v1822_v63  ;;  %v2034_v58 = vpop.f32.mrf.mxu1  ;;  %v14008_v63 = vld [vmem:[#allocation51_spill] sm:$0xff] }
 0x3de   :  { %v3343_v15 = vand.u32 4294901760, %v3342_v31  ;;  %v1732_v31 = vadd.f32 %v14002_v4, %v9945_v22  ;;  %v1922_v53 = vpop.f32.mrf.mxu0  ;;  %v1913_v44 = vadd.f32 %v1912_v60, %v1818_v42  ;;  %2817 = vrot.lane.b32.xlu1 %v14003_v5, %s7933_s16 }
 0x3df   :  { %v2932_v24 = vpop.permute.xlu1 %2931 }
 0x3e0   :  { %3344 = vmatmul.f32.gmra.mxu0 %v3343_v15  ;;  %v10305_v15 = vadd.f32 %v10189_v3, %v2103_v36  ;;  %v1826_v6 = vadd.f32 %v14004_v54, %v1732_v31  ;;  %v2023_v2 = vadd.f32 %v10252_v19, %v1913_v44  ;;  %v14006_v36 = vld [vmem:[#allocation19_spill] sm:$0xff] }
 0x3e1   :  { %v10297_v47 = vpop.f32.mrf.mxu3  ;;  %2879 = vrot.lane.b32.xlu0 %v13987_v33, %s7932_s15 }
 0x3e2   :  { %v2110_v8 = vpop.f32.mrf.mxu2  ;;  %v2868_v48 = vpop.permute.xlu0 %2867  ;;  %v2230_v60 = vsel %vm535_vm3, %v10305_v15, 0.0 }
 0x3e3   :  { %v3168_v30 = vsel %vm3163_vm1, %v3151_v17, %v2868_v48  ;;  %v2111_v3 = vadd.f32 %v2110_v8, %v2017_v45  ;;  %v14005_v8 = vld [vmem:[#allocation56_spill] sm:$0xff]  ;;  %v2231_v17 = vadd.f32 %v2230_v60, %v10228_v26  ;;  %v14007_v26 = vld [vmem:[#allocation17_spill] sm:$0xff] }
 0x3e4   :  { %v3185_v38 = vsel %vm3180_vm2, %v3168_v30, %v2932_v24  ;;  %v10322_v24 = vadd.f32 %v10211_v59, %v2107_v52  ;;  %v1740_v51 = vadd.f32 %v14005_v8, %v9945_v22  ;;  %v2029_v59 = vadd.f32 %v2028_v18, %v1918_v43 }
 0x3e5   :  { %v10292_v41 = vpop.permute.xlu2 %2869  ;;  %v3202_v62 = vsel %vm3197_vm4, %v3185_v38, %v10244_v39  ;;  %v10332_v40 = vadd.f32 %v10240_v49, %v2111_v3  ;;  %v1923_v49 = vadd.f32 %v1922_v53, %v1826_v6  ;;  %2689 = vrot.lane.b32.xlu2 %v13987_v33, %s7925_s8  ;;  %v2040_v3 = vpop.f32.mrf.mxu1 }
 0x3e6   :  { %v2232_v19 = vsel %vm535_vm3, %v10322_v24, 0.0  ;;  %v1927_v56 = vpop.f32.mrf.mxu0  ;;  %v1830_v4 = vadd.f32 %v14008_v63, %v1740_v51 }
 0x3e7   :  { %v2614_v57 = vpop.permute.xlu1 %2613  ;;  %v2233_v45 = vadd.f32 %v2232_v19, %v2231_v17 }
 0x3e8   :  { %v3104_v61 = vsel %vm535_vm3, %v14006_v36, %v2614_v57  ;;  %v1928_v43 = vadd.f32 %v1927_v56, %v1830_v4 }
 0x3e9   :  { %v2204_v42 = vpop.f32.mrf.mxu3  ;;  %3071 = vrot.lane.b32.xlu0 %v14007_v26, %s7931_s14  ;;  %v3120_v52 = vsel %vm31_vm0, %v3104_v61, %v10267_v13 }
 0x3ea   :  { %v2114_v10 = vpop.f32.mrf.mxu2  ;;  %v3060_v27 = vpop.permute.xlu0 %3059 }
 0x3eb   :  { %v3219_v50 = vsel %vm3214_vm5, %v3202_v62, %v3060_v27  ;;  %v2115_v30 = vadd.f32 %v2114_v10, %v2023_v2  ;;  %v2234_v10 = vsel %vm535_vm3, %v10332_v40, 0.0  ;;  %v2035_v62 = vadd.f32 %v2034_v58, %v1923_v49  ;;  %v14009_v2 = vld [vmem:[#allocation6_spill] sm:$0xff] }
 0x3ec   :  { %v3255_v48 = vsel %vm3241_vm6, %v3219_v50, 0  ;;  %v1748_v50 = vadd.f32 %v10006_v29, %v9945_v22  ;;  %v2235_v60 = vadd.f32 %v2234_v10, %v2233_v45  ;;  %3009 = vrot.lane.b32.xlu1 %v14009_v2, %s7930_s12  ;;  %v14010_v22 = vld [vmem:[#allocation53_spill] sm:$0xff] }
 0x3ed   :  { %v10317_v16 = vpop.permute.xlu2 %3061  ;;  %v10326_v39 = vand.u32 4294901760, %v3255_v48  ;;  %v10354_v33 = vadd.f32 %v10269_v25, %v2115_v30  ;;  %2881 = vrot.lane.b32.xlu2 %v14007_v26, %s7932_s15 }
 0x3ee   :  { %v1932_v36 = vpop.f32.mrf.mxu0 }
 0x3ef   :  { %v3348_v12 = vsub.f32 %v3255_v48, %v10326_v39  ;;  %3522 = vmatmul.f32.gmra.mxu1 %v10326_v39  ;;  %v2806_v31 = vpop.permute.xlu1 %2805  ;;  %v2236_v48 = vsel %vm535_vm3, %v10354_v33, 0.0 }
 0x3f1   :  { %3626 = vmatmul.f32.gmra.mxu2 %v3348_v12  ;;  %v3349_v18 = vand.u32 4294901760, %v3348_v12  ;;  %2753 = vrot.lane.b32.xlu0 %v13998_v34, %s7934_s17  ;;  %v2208_v29 = vpop.f32.mrf.mxu3 }
 0x3f2   :  { %v2118_v11 = vpop.f32.mrf.mxu2  ;;  %v2742_v38 = vpop.permute.xlu0 %2741 }
 0x3f3   :  { %3737 = vmatmul.f32.gmra.mxu3 %v3349_v18  ;;  %v3350_v53 = vsub.f32 %v3348_v12, %v3349_v18  ;;  %v3136_v57 = vsel %vm602_vm7, %v3120_v52, %v2742_v38  ;;  %v2119_v27 = vadd.f32 %v2118_v11, %v2029_v59  ;;  %v1834_v11 = vadd.f32 %v14010_v22, %v1748_v50  ;;  %v2046_v38 = vpop.f32.mrf.mxu1 }
 0x3f4   :  { %v3152_v13 = vsel %vm636_vm9, %v3136_v57, %v2806_v31  ;;  %v2237_v12 = vadd.f32 %v2236_v48, %v2235_v60  ;;  %2691 = vrot.lane.b32.xlu1 %v14007_v26, %s7925_s8 }
 0x3f5   :  { %v10351_v44 = vpop.permute.xlu2 %2743  ;;  %v3351_v54 = vand.u32 4294901760, %v3350_v53  ;;  %v10363_v25 = vadd.f32 %v10297_v47, %v2119_v27  ;;  %v3169_v17 = vsel %vm3163_vm1, %v3152_v13, %v10292_v41  ;;  %v2041_v47 = vadd.f32 %v2040_v3, %v1928_v43  ;;  %v14013_v3 = vld [vmem:[#allocation27_spill] sm:$0xff] }
 0x3f6   :  { %v1933_v63 = vadd.f32 %v1932_v36, %v1834_v11 }
 0x3f7   :  { %3352 = vmatmul.f32.gmra.mxu0 %v3351_v54  ;;  %v2998_v8 = vpop.permute.xlu1 %2997  ;;  %v2238_v34 = vsel %vm535_vm3, %v10363_v25, 0.0 }
 0x3f8   :  { %v2239_v4 = vadd.f32 %v2238_v34, %v2237_v12  ;;  %v2047_v27 = vadd.f32 %v2046_v38, %v1933_v63 }
 0x3f9   :  { %v2212_v13 = vpop.f32.mrf.mxu3 }
 0x3fa   :  { %v2122_v6 = vpop.f32.mrf.mxu2  ;;  %v2934_v51 = vpop.permute.xlu0 %2933 }
 0x3fb   :  { %v2123_v58 = vadd.f32 %v2122_v6, %v2035_v62  ;;  %v3186_v59 = vsel %vm3180_vm2, %v3169_v17, %v2934_v51 }
 0x3fc   :  { %v3203_v61 = vsel %vm3197_vm4, %v3186_v59, %v2998_v8 }
 0x3fd   :  { %v2936_v19 = vpop.permute.xlu2 %2935  ;;  %v10378_v30 = vadd.f32 %v2204_v42, %v2123_v58  ;;  %v3220_v49 = vsel %vm3214_vm5, %v3203_v61, %v10317_v16  ;;  %v14011_v42 = vld [vmem:[#allocation14_spill] sm:$0xff]  ;;  %v14012_v16 = vld [vmem:[#allocation7_spill] sm:$0xff] }
 0x3fe   :  { %v3258_v56 = vsel %vm3241_vm6, %v3220_v49, 0  ;;  %2945 = vrot.lane.b32.xlu0 %v14011_v42, %s7929_s9  ;;  %3073 = vrot.lane.b32.xlu2 %v14012_v16, %s7931_s14  ;;  %v14014_v49 = vld [vmem:[#allocation21_spill] sm:$0xff] }
 0x3ff   :  { %v10383_v31 = vand.u32 4294901760, %v3258_v56  ;;  %v2240_v45 = vsel %vm535_vm3, %v10378_v30, 0.0  ;;  %v2680_v53 = vpop.permute.xlu1 %2679  ;;  %2883 = vrot.lane.b32.xlu1 %v14012_v16, %s7932_s15 }
 0x400   :  { %v2241_v62 = vadd.f32 %v2240_v45, %v2239_v4 }
 0x401   :  { %3526 = vmatmul.f32.gmra.mxu1 %v10383_v31  ;;  %v3356_v52 = vsub.f32 %v3258_v56, %v10383_v31  ;;  %v14015_v56 = vld [vmem:[#allocation26_spill] sm:$0xff] }
 0x402   :  { %v2126_v18 = vpop.f32.mrf.mxu2  ;;  %v2616_v57 = vpop.permute.xlu0 %2615 }
 0x403   :  { %v2127_v41 = vadd.f32 %v2126_v18, %v2041_v47  ;;  %3631 = vmatmul.f32.gmra.mxu2 %v3356_v52  ;;  %v3357_v26 = vand.u32 4294901760, %v3356_v52  ;;  %v3105_v50 = vsel %vm535_vm3, %v14013_v3, %v2616_v57 }
 0x404   :  { %v3121_v22 = vsel %vm31_vm0, %v3105_v50, %v2680_v53 }
 0x405   :  { %v10391_v10 = vadd.f32 %v2208_v29, %v2127_v41  ;;  %v10397_v54 = vpop.permute.xlu2 %2617  ;;  %3743 = vmatmul.f32.gmra.mxu3 %v3357_v26  ;;  %v3358_v43 = vsub.f32 %v3356_v52, %v3357_v26  ;;  %v3137_v47 = vsel %vm602_vm7, %v3121_v22, %v10351_v44  ;;  %v14016_v26 = vld [vmem:[#allocation30_spill] sm:$0xff] }
 0x406   :  { %2627 = vrot.lane.b32.xlu0 %v14003_v5, %s7923_s27  ;;  %2755 = vrot.lane.b32.xlu2 %v14011_v42, %s7934_s17 }
 0x407   :  { %v2242_v6 = vsel %vm535_vm3, %v10391_v10, 0.0  ;;  %v3359_v29 = vand.u32 4294901760, %v3358_v43  ;;  %v2872_v8 = vpop.permute.xlu1 %2871  ;;  %3075 = vrot.lane.b32.xlu1 %v14014_v49, %s7931_s14 }
 0x408   :  { %v2243_v58 = vadd.f32 %v2242_v6, %v2241_v62  ;;  %v14017_v6 = vld [vmem:[#allocation25_spill] sm:$0xff] }
 0x409   :  { %3360 = vmatmul.f32.gmra.mxu0 %v3359_v29 }
 0x40a   :  { %v2130_v60 = vpop.f32.mrf.mxu2  ;;  %v2808_v51 = vpop.permute.xlu0 %2807 }
 0x40b   :  { %v2131_v48 = vadd.f32 %v2130_v60, %v2047_v27  ;;  %v3153_v36 = vsel %vm636_vm9, %v3137_v47, %v2808_v51 }
 0x40c   :  { %v3170_v34 = vsel %vm3163_vm1, %v3153_v36, %v2872_v8 }
 0x40d   :  { %v10408_v11 = vadd.f32 %v2212_v13, %v2131_v48  ;;  %v10416_v12 = vpop.permute.xlu2 %2809  ;;  %v3187_v63 = vsel %vm3180_vm2, %v3170_v34, %v2936_v19 }
 0x40e   :  { %2819 = vrot.lane.b32.xlu0 %v14009_v2, %s7933_s16  ;;  %2947 = vrot.lane.b32.xlu2 %v14015_v56, %s7929_s9 }
 0x40f   :  { %v2244_v17 = vsel %vm535_vm3, %v10408_v11, 0.0  ;;  %v3064_v44 = vpop.permute.xlu1 %3063  ;;  %2757 = vrot.lane.b32.xlu1 %v14015_v56, %s7934_s17 }
 0x410   :  { %v2245_v59 = vadd.f32 %v2244_v17, %v2243_v58 }
 0x412   :  { %v2246_v5 = vrot.slane %v2245_v59, 4  ;;  %v3000_v41 = vpop.permute.xlu0 %2999 }
 0x413   :  { %v3204_v38 = vsel %vm3197_vm4, %v3187_v63, %v3000_v41  ;;  %v3106_v63 = vsel %vm535_vm3, %v9644_v32, %v10397_v54 }
 0x414   :  { %v2247_v61 = vadd.f32 %v2246_v5, %v2245_v59  ;;  %v3221_v52 = vsel %vm3214_vm5, %v3204_v38, %v3064_v44  ;;  %v14025_v44 = vld [vmem:[#allocation47_spill] sm:$0xff] }
 0x415   :  { %v10428_v45 = vpop.permute.xlu2 %2875  ;;  %v3261_v57 = vsel %vm3241_vm6, %v3221_v52, 0 }
 0x416   :  { %v2248_v18 = vrot.slane %v2247_v61, 2  ;;  %v10432_v27 = vand.u32 4294901760, %v3261_v57  ;;  %3011 = vrot.lane.b32.xlu0 %v14016_v26, %s7930_s12  ;;  %2629 = vrot.lane.b32.xlu2 %v14009_v2, %s7923_s27 }
 0x417   :  { %v2746_v50 = vpop.permute.xlu1 %2745 }
 0x418   :  { %v2249_v4 = vadd.f32 %v2248_v18, %v2247_v61  ;;  %v3364_v19 = vsub.f32 %v3261_v57, %v10432_v27  ;;  %3530 = vmatmul.f32.gmra.mxu1 %v10432_v27  ;;  %v14024_v18 = vld [vmem:[#allocation57_spill] sm:$0xff] }
 0x419   :  { %v3107_v41 = vsel %vm535_vm3, %v14025_v44, %v14024_v18 }
 0x41a   :  { %v2250_v53 = vrot.slane %v2249_v4, 1  ;;  %v2682_v43 = vpop.permute.xlu0 %2681  ;;  %3636 = vmatmul.f32.gmra.mxu2 %v3364_v19  ;;  %v3365_v60 = vand.u32 4294901760, %v3364_v19 }
 0x41b   :  { %v3122_v57 = vsel %vm31_vm0, %v3106_v63, %v2682_v43 }
 0x41c   :  { %v2251_v62 = vadd.f32 %v2250_v53, %v2249_v4  ;;  %3749 = vmatmul.f32.gmra.mxu3 %v3365_v60 }
 0x41d   :  { %v10461_v29 = vpop.permute.xlu2 %3067 }
 0x41e   :  { %v10440_v3 = vmul.f32 %v2251_v62, %v14017_v6  ;;  %2693 = vrot.lane.b32.xlu0 %v14012_v16, %s7925_s8  ;;  %2821 = vrot.lane.b32.xlu2 %v14016_v26, %s7933_s16 }
 0x420   :  { %v10447_v13 = vsub.f32 %v10062_v21, %v10440_v3  ;;  %v10451_v48 = vsub.f32 %v10083_v9, %v10440_v3  ;;  %v10455_v58 = vsub.f32 %v10111_v23, %v10440_v3  ;;  %v10459_v2 = vsub.f32 %v10130_v1, %v10440_v3 }
 0x421   :  { %v10465_v22 = vsub.f32 %v10153_v7, %v10440_v3  ;;  %v10469_v21 = vsub.f32 %v10174_v55, %v10440_v3  ;;  %v10473_v9 = vsub.f32 %v10199_v37, %v10440_v3  ;;  %v10477_v23 = vsub.f32 %v10218_v14, %v10440_v3  ;;  %v14023_v55 = vld [vmem:[#allocation33_spill] sm:$0xff]  ;;  %v2812_v14 = vpop.permute.xlu1 %2811 }
 0x422   :  { %14018 = vst [vmem:[#allocation15_spill] sm:$0xff] %v10447_v13  ;;  %v2269_v1 = vmul.f32 %v10447_v13, %v10447_v13  ;;  %v2270_v7 = vmul.f32 %v10451_v48, %v10451_v48  ;;  %v2271_v8 = vmul.f32 %v10455_v58, %v10455_v58  ;;  %2949 = vrot.lane.b32.xlu1 %v14023_v55, %s7929_s9  ;;  %v2874_v51 = vpop.permute.xlu0 %2873 }
 0x423   :  { %14019 = vst [vmem:[#allocation38_spill] sm:$0xff] %v10451_v48  ;;  %v2272_v37 = vmul.f32 %v10459_v2, %v10459_v2  ;;  %v2273_v17 = vmul.f32 %v10465_v22, %v10465_v22  ;;  %v2274_v16 = vmul.f32 %v10469_v21, %v10469_v21  ;;  %v10511_v38 = vsub.f32 %v10305_v15, %v10440_v3 }
 0x424   :  { %14020 = vst [vmem:[#allocation10_spill] sm:$0xff] %v10455_v58  ;;  %v2285_v47 = vsel %vm535_vm3, %v2269_v1, 0.0  ;;  %v2286_v59 = vsel %vm535_vm3, %v2270_v7, 0.0  ;;  %v2288_v36 = vsel %vm535_vm3, %v2271_v8, 0.0  ;;  %v2275_v52 = vmul.f32 %v10473_v9, %v10473_v9 }
 0x425   :  { %14021 = vst [vmem:[#allocation36_spill] sm:$0xff] %v10459_v2  ;;  %v10498_v5 = vpop.permute.xlu2 %2749  ;;  %v2287_v34 = vadd.f32 %v2286_v59, %v2285_v47  ;;  %v2290_v61 = vsel %vm535_vm3, %v2272_v37, 0.0  ;;  %v2292_v53 = vsel %vm535_vm3, %v2273_v17, 0.0  ;;  %v3138_v1 = vsel %vm602_vm7, %v3122_v57, %v2746_v50  ;;  %v14027_v37 = vld [vmem:[#allocation50_spill] sm:$0xff] }
 0x426   :  { %14022 = vst [vmem:[#allocation20_spill] sm:$0xff] %v10465_v22  ;;  %v3366_v7 = vsub.f32 %v3364_v19, %v3365_v60  ;;  %v10522_v32 = vsub.f32 %v10322_v24, %v10440_v3  ;;  %v2276_v15 = vmul.f32 %v10477_v23, %v10477_v23  ;;  %v2294_v54 = vsel %vm535_vm3, %v2274_v16, 0.0  ;;  %2885 = vrot.lane.b32.xlu0 %v14014_v49, %s7932_s15 }
 0x427   :  { %v2289_v4 = vadd.f32 %v2288_v36, %v2287_v34  ;;  %v3154_v8 = vsel %vm636_vm9, %v3138_v1, %v10416_v12  ;;  %v3123_v17 = vsel %vm31_vm0, %v3107_v41, %v14027_v37  ;;  %v10538_v47 = vsub.f32 %v10332_v40, %v10440_v3  ;;  %v14028_v36 = vld [vmem:[#allocation55_spill] sm:$0xff] }
 0x428   :  { %v3367_v19 = vand.u32 4294901760, %v3366_v7  ;;  %v3171_v43 = vsel %vm3163_vm1, %v3154_v8, %v2874_v51  ;;  %v2277_v12 = vmul.f32 %v10511_v38, %v10511_v38  ;;  %v2296_v59 = vsel %vm535_vm3, %v2275_v52, 0.0 }
 0x429   :  { %v2291_v62 = vadd.f32 %v2290_v61, %v2289_v4  ;;  %v3004_v24 = vpop.permute.xlu1 %3003  ;;  %v3188_v51 = vsel %vm3180_vm2, %v3171_v43, %v14028_v36  ;;  %v14029_v61 = vld [vmem:[#allocation46_spill] sm:$0xff]  ;;  %v10552_v40 = vsub.f32 %v10354_v33, %v10440_v3  ;;  %v2278_v41 = vmul.f32 %v10522_v32, %v10522_v32 }
 0x42a   :  { %2631 = vrot.lane.b32.xlu1 %v14016_v26, %s7923_s27  ;;  %v14026_v26 = vld [vmem:[#allocation32_spill] sm:$0xff]  ;;  %v2748_v60 = vpop.permute.xlu0 %2747  ;;  %3368 = vmatmul.f32.gmra.mxu0 %v3367_v19  ;;  %v3205_v18 = vsel %vm3197_vm4, %v3188_v51, %v14029_v61  ;;  %v2298_v63 = vsel %vm535_vm3, %v2276_v15, 0.0  ;;  %v14030_v4 = vld [vmem:[#allocation58_spill] sm:$0xff]  ;;  %v2279_v1 = vmul.f32 %v10538_v47, %v10538_v47  ;;  %v2300_v33 = vsel %vm535_vm3, %v2277_v12, 0.0 }
 0x42b   :  { %v2293_v50 = vadd.f32 %v2292_v53, %v2291_v62  ;;  %3013 = vrot.lane.b32.xlu2 %v14026_v26, %s7930_s12  ;;  %v3139_v44 = vsel %vm602_vm7, %v3123_v17, %v2748_v60  ;;  %v3222_v52 = vsel %vm3214_vm5, %v3205_v18, %v14030_v4  ;;  %v10561_v53 = vsub.f32 %v10363_v25, %v10440_v3 }
 0x42c   :  { %v3264_v62 = vsel %vm3241_vm6, %v3222_v52, 0  ;;  %v3155_v7 = vsel %vm636_vm9, %v3139_v44, %v2812_v14  ;;  %v10574_v25 = vsub.f32 %v10378_v30, %v10440_v3  ;;  %v2280_v8 = vmul.f32 %v10552_v40, %v10552_v40  ;;  %v14031_v14 = vld [vmem:[#allocation9_spill] sm:$0xff] }
 0x42d   :  { %v10545_v34 = vpop.permute.xlu2 %2941  ;;  %v2295_v16 = vadd.f32 %v2294_v54, %v2293_v50  ;;  %v10568_v54 = vand.u32 4294901760, %v3264_v62  ;;  %v2302_v50 = vsel %vm535_vm3, %v2278_v41, 0.0  ;;  %v10585_v43 = vsub.f32 %v10391_v10, %v10440_v3 }
 0x42e   :  { %3077 = vrot.lane.b32.xlu0 %v14031_v14, %s7931_s14  ;;  %v3172_v17 = vsel %vm3163_vm1, %v3155_v7, %v10428_v45  ;;  %v2281_v12 = vmul.f32 %v10561_v53, %v10561_v53  ;;  %v2282_v45 = vmul.f32 %v10574_v25, %v10574_v25  ;;  %v2306_v18 = vsel %vm535_vm3, %v2280_v8, 0.0 }
 0x42f   :  { %v2297_v57 = vadd.f32 %v2296_v59, %v2295_v16  ;;  %3534 = vmatmul.f32.gmra.mxu1 %v10568_v54  ;;  %v3372_v19 = vsub.f32 %v3264_v62, %v10568_v54  ;;  %v2304_v59 = vsel %vm535_vm3, %v2279_v1, 0.0  ;;  %v10599_v16 = vsub.f32 %v10408_v11, %v10440_v3  ;;  %v14032_v62 = vld [vmem:[#allocation34_spill] sm:$0xff] }
 0x430   :  { %v2283_v11 = vmul.f32 %v10585_v43, %v10585_v43  ;;  %v2308_v3 = vsel %vm535_vm3, %v2281_v12, 0.0 }
 0x431   :  { %v2299_v15 = vadd.f32 %v2298_v63, %v2297_v57  ;;  %v2686_v30 = vpop.permute.xlu1 %2685  ;;  %3641 = vmatmul.f32.gmra.mxu2 %v3372_v19  ;;  %v3373_v36 = vand.u32 4294901760, %v3372_v19  ;;  %v2284_v1 = vmul.f32 %v10599_v16, %v10599_v16 }
 0x432   :  { %2823 = vrot.lane.b32.xlu1 %v14026_v26, %s7933_s16  ;;  %v2940_v37 = vpop.permute.xlu0 %2939 }
 0x433   :  { %v2301_v60 = vadd.f32 %v2300_v33, %v2299_v15  ;;  %2695 = vrot.lane.b32.xlu2 %v14014_v49, %s7925_s8  ;;  %v3189_v51 = vsel %vm3180_vm2, %v3172_v17, %v2940_v37  ;;  %3755 = vmatmul.f32.gmra.mxu3 %v3373_v36  ;;  %v3374_v41 = vsub.f32 %v3372_v19, %v3373_v36  ;;  %v2314_v37 = vsel %vm535_vm3, %v2284_v1, 0.0  ;;  %v14033_v17 = vld [vmem:[#allocation24_spill] sm:$0xff] }
 0x434   :  { %v3206_v61 = vsel %vm3197_vm4, %v3189_v51, %v3004_v24 }
 0x435   :  { %v10595_v10 = vpop.permute.xlu2 %2623  ;;  %v2303_v49 = vadd.f32 %v2302_v50, %v2301_v60  ;;  %v3223_v44 = vsel %vm3214_vm5, %v3206_v61, %v10461_v29  ;;  %v3375_v52 = vand.u32 4294901760, %v3374_v41  ;;  %v2310_v29 = vsel %vm535_vm3, %v2282_v45, 0.0  ;;  %v14035_v41 = vld [vmem:[#allocation11_spill] sm:$0xff] }
 0x436   :  { %v3267_v4 = vsel %vm3241_vm6, %v3223_v44, 0  ;;  %2759 = vrot.lane.b32.xlu0 %v14023_v55, %s7934_s17  ;;  %v2312_v50 = vsel %vm535_vm3, %v2283_v11, 0.0 }
 0x437   :  { %v2305_v63 = vadd.f32 %v2304_v59, %v2303_v49  ;;  %v10611_v24 = vand.u32 4294901760, %v3267_v4  ;;  %3376 = vmatmul.f32.gmra.mxu0 %v3375_v52 }
 0x439   :  { %v2307_v57 = vadd.f32 %v2306_v18, %v2305_v63  ;;  %v3380_v33 = vsub.f32 %v3267_v4, %v10611_v24  ;;  %3538 = vmatmul.f32.gmra.mxu1 %v10611_v24  ;;  %v2878_v15 = vpop.permute.xlu1 %2877  ;;  %v14034_v18 = vld [vmem:[#allocation28_spill] sm:$0xff] }
 0x43a   :  { %3015 = vrot.lane.b32.xlu1 %v14032_v62, %s7930_s12  ;;  %v2622_v8 = vpop.permute.xlu0 %2621 }
 0x43b   :  { %v2309_v7 = vadd.f32 %v2308_v3, %v2307_v57  ;;  %2887 = vrot.lane.b32.xlu2 %v14031_v14, %s7932_s15  ;;  %3646 = vmatmul.f32.gmra.mxu2 %v3380_v33  ;;  %v3381_v19 = vand.u32 4294901760, %v3380_v33  ;;  %v3108_v12 = vsel %vm535_vm3, %v14033_v17, %v2622_v8  ;;  %v2570_v8 = vld [vmem:[#allocation3 + $0x131] sm:$0xff] }
 0x43c   :  { %v3124_v45 = vsel %vm31_vm0, %v3108_v12, %v2686_v30 }
 0x43d   :  { %v2311_v60 = vadd.f32 %v2310_v29, %v2309_v7  ;;  %v10628_v59 = vpop.permute.xlu2 %2815  ;;  %3761 = vmatmul.f32.gmra.mxu3 %v3381_v19  ;;  %v3382_v36 = vsub.f32 %v3380_v33, %v3381_v19  ;;  %v3140_v11 = vsel %vm602_vm7, %v3124_v45, %v10498_v5  ;;  %v14036_v19 = vmov 0.0  }
 0x43e   :  { %2951 = vrot.lane.b32.xlu0 %v14034_v18, %s7929_s9 }
 0x43f   :  { %v2313_v51 = vadd.f32 %v2312_v50, %v2311_v60  ;;  %v3383_v49 = vand.u32 4294901760, %v3382_v36 }
 0x441   :  { %v2315_v61 = vadd.f32 %v2314_v37, %v2313_v51  ;;  %3384 = vmatmul.f32.gmra.mxu0 %v3383_v49  ;;  %v3070_v63 = vpop.permute.xlu1 %3069 }
 0x442   :  { %2697 = vrot.lane.b32.xlu1 %v14031_v14, %s7925_s8  ;;  %v2814_v4 = vpop.permute.xlu0 %2813 }
 0x443   :  { %v2316_v44 = vrot.slane %v2315_v61, 4  ;;  %3079 = vrot.lane.b32.xlu2 %v14035_v41, %s7931_s14  ;;  %v3156_v52 = vsel %vm636_vm9, %v3140_v11, %v2814_v4 }
 0x444   :  { %v3173_v57 = vsel %vm3163_vm1, %v3156_v52, %v2878_v15  ;;  %v2586_v15 = vld [vmem:[#allocation3 + $0x132] sm:$0xff] }
 0x445   :  { %v2317_v3 = vadd.f32 %v2316_v44, %v2315_v61  ;;  %v10641_v14 = vpop.permute.xlu2 %3007  ;;  %v3190_v7 = vsel %vm3180_vm2, %v3173_v57, %v10545_v34  ;;  %4261 = vst.msk [vmem:[#allocation3 + $0x138] sm:$0x3] %vm2385_vm12, %v14036_v19  ;;  %v2554_v44 = vld [vmem:[#allocation3 + $0x130] sm:$0xff]  ;;  %v3109_v57 = vsel %vm535_vm3, %v13984_v28, %v10595_v10 }
 0x446   :  { %2633 = vrot.lane.b32.xlu0 %v14026_v26, %s7923_s27  ;;  %4260 = vst.msk [vmem:[#allocation3 + $0x130] sm:$0xff] %vm535_vm3, %v14036_v19 }
 0x447   :  { %v2318_v30 = vrot.slane %v2317_v3, 2 }
 0x449   :  { %v2319_v1 = vadd.f32 %v2318_v30, %v2317_v3  ;;  %v2752_v5 = vpop.permute.xlu1 %2751 }
 0x44a   :  { %2889 = vrot.lane.b32.xlu1 %v14035_v41, %s7932_s15  ;;  %v3006_v33 = vpop.permute.xlu0 %3005 }
 0x44b   :  { %v2320_v29 = vrot.slane %v2319_v1, 1  ;;  %2761 = vrot.lane.b32.xlu2 %v14034_v18, %s7934_s17  ;;  %v3207_v50 = vsel %vm3197_vm4, %v3190_v7, %v3006_v33 }
 0x44c   :  { %v3224_v37 = vsel %vm3214_vm5, %v3207_v50, %v3070_v63 }
 0x44d   :  { %v2321_v60 = vadd.f32 %v2320_v29, %v2319_v1  ;;  %v3270_v26 = vsel %vm3241_vm6, %v3224_v37, 0  ;;  %v2690_v51 = vpop.permute.xlu2 %2689 }
 0x44e   :  { %v10657_v12 = vand.u32 4294901760, %v3270_v26  ;;  %2825 = vrot.lane.b32.xlu0 %v14032_v62, %s7933_s16 }
 0x44f   :  { %v2322_v17 = vmul.f32 %v2321_v60, %v14017_v6 }
 0x450   :  { %3542 = vmatmul.f32.gmra.mxu1 %v10657_v12  ;;  %v3388_v34 = vsub.f32 %v3270_v26, %v10657_v12 }
 0x451   :  { %v2323_v36 = vadd.f32 1e-05, %v2322_v17  ;;  %v2944_v49 = vpop.permute.xlu1 %2943 }
 0x452   :  { %3081 = vrot.lane.b32.xlu1 %v2586_v15, %s7931_s14  ;;  %v2688_v61 = vpop.permute.xlu0 %2687  ;;  %3651 = vmatmul.f32.gmra.mxu2 %v3388_v34  ;;  %v3389_v45 = vand.u32 4294901760, %v3388_v34 }
 0x453   :  { %7898 = vrsqrt.f32 %v2323_v36  ;;  %2953 = vrot.lane.b32.xlu2 %v2554_v44, %s7929_s9  ;;  %vm2330_vm8 = vweird.f32 %v2323_v36  ;;  %v3125_v1 = vsel %vm31_vm0, %v3109_v57, %v2688_v61  ;;  %v14049_v61 = vld [vmem:[#allocation31_spill] sm:$0xff] }
 0x454   :  { %3767 = vmatmul.f32.gmra.mxu3 %v3389_v45  ;;  %v3390_v18 = vsub.f32 %v3388_v34, %v3389_v45  ;;  %v3141_v7 = vsel %vm602_vm7, %v3125_v1, %v2752_v5 }
 0x455   :  { %v2882_v52 = vpop.permute.xlu2 %2881  ;;  %v3157_v60 = vsel %vm636_vm9, %v3141_v7, %v10628_v59 }
 0x456   :  { %v3391_v41 = vand.u32 4294901760, %v3390_v18  ;;  %3017 = vrot.lane.b32.xlu0 %v2570_v8, %s7930_s12 }
 0x458   :  { %3392 = vmatmul.f32.gmra.mxu0 %v3391_v41 }
 0x459   :  { %v7899_v63 = vpop.eup %7898  ;;  %v2626_v62 = vpop.permute.xlu1 %2625 }
 0x45a   :  { %v2325_v4 = vmul.f32 %v7899_v63, %v2323_v36  ;;  %v2880_v11 = vpop.permute.xlu0 %2879  ;;  %vm2331_vm10 = vweird.f32 %v7899_v63 }
 0x45b   :  { %vm2332_vm11 = vmor %vm2330_vm8, %vm2331_vm10  ;;  %v3174_v5 = vsel %vm3163_vm1, %v3157_v60, %v2880_v11 }
 0x45c   :  { %v2326_v3 = vmul.f32 %v7899_v63, %v2325_v4  ;;  %v3191_v36 = vsel %vm3180_vm2, %v3174_v5, %v2944_v49  ;;  %v14050_v5 = vld [vmem:[#allocation18_spill] sm:$0xff] }
 0x45d   :  { %v3074_v26 = vpop.permute.xlu2 %3073  ;;  %v3208_v45 = vsel %vm3197_vm4, %v3191_v36, %v10641_v14 }
 0x45e   :  { %v2327_v30 = vmul.f32 0.5, %v2326_v3 }
 0x460   :  { %v2328_v29 = vsub.f32 1.5, %v2327_v30 }
 0x461   :  { %v2818_v15 = vpop.permute.xlu1 %2817 }
 0x462   :  { %v2329_v33 = vmul.f32 %v7899_v63, %v2328_v29  ;;  %v3072_v8 = vpop.permute.xlu0 %3071 }
 0x464   :  { %v10673_v50 = vsel %vm2332_vm11, %v7899_v63, %v2329_v33 }
 0x465   :  { %14037 = vst [vmem:[#allocation12_spill] sm:$0xff] %v10673_v50  ;;  %v10679_v37 = vmul.f32 %v10673_v50, %v10469_v21  ;;  %v10683_v28 = vmul.f32 %v10673_v50, %v10473_v9  ;;  %v10687_v10 = vmul.f32 %v10673_v50, %v10477_v23  ;;  %v10692_v17 = vmul.f32 %v10673_v50, %v10511_v38  ;;  %v2756_v18 = vpop.permute.xlu2 %2755 }
 0x466   :  { %v10696_v59 = vmul.f32 %v10673_v50, %v10522_v32  ;;  %v10700_v21 = vmul.f32 %v10673_v50, %v10538_v47  ;;  %v10704_v9 = vmul.f32 %v10673_v50, %v10552_v40  ;;  %v10708_v23 = vmul.f32 %v10673_v50, %v10561_v53 }
 0x467   :  { %14038 = vst [vmem:[#allocation29_spill] sm:$0xff] %v10679_v37  ;;  %v10712_v38 = vmul.f32 %v10673_v50, %v10574_v25  ;;  %v10716_v32 = vmul.f32 %v10673_v50, %v10585_v43  ;;  %v10720_v47 = vmul.f32 %v10673_v50, %v10599_v16  ;;  %v3110_v53 = vsel %vm535_vm3, %v14049_v61, %v2626_v62 }
 0x468   :  { %14039 = vst [vmem:[#allocation23_spill] sm:$0xff] %v10683_v28  ;;  %v3225_v25 = vsel %vm3214_vm5, %v3208_v45, %v3072_v8  ;;  %v3126_v43 = vsel %vm31_vm0, %v3110_v53, %v2690_v51 }
 0x469   :  { %14040 = vst [vmem:[#allocation4_spill] sm:$0xff] %v10687_v10  ;;  %v3010_v40 = vpop.permute.xlu1 %3009  ;;  %v3273_v44 = vsel %vm3241_vm6, %v3225_v25, 0 }
 0x46a   :  { %14041 = vst [vmem:[#allocation5_spill] sm:$0xff] %v10692_v17  ;;  %v2754_v34 = vpop.permute.xlu0 %2753  ;;  %v10731_v41 = vand.u32 4294901760, %v3273_v44 }
 0x46b   :  { %14042 = vst [vmem:[#allocation37_spill] sm:$0xff] %v10696_v59  ;;  %v3142_v16 = vsel %vm602_vm7, %v3126_v43, %v2754_v34 }
 0x46c   :  { %14043 = vst [vmem:[#allocation41_spill] sm:$0xff] %v10700_v21  ;;  %v3158_v49 = vsel %vm636_vm9, %v3142_v16, %v2818_v15  ;;  %v3396_v11 = vsub.f32 %v3273_v44, %v10731_v41  ;;  %3546 = vmatmul.f32.gmra.mxu1 %v10731_v41 }
 0x46d   :  { %14044 = vst [vmem:[#allocation35_spill] sm:$0xff] %v10704_v9  ;;  %v3175_v62 = vsel %vm3163_vm1, %v3158_v49, %v2882_v52  ;;  %v2948_v33 = vpop.permute.xlu2 %2947 }
 0x46e   :  { %14045 = vst [vmem:[#allocation43_spill] sm:$0xff] %v10708_v23  ;;  %3656 = vmatmul.f32.gmra.mxu2 %v3396_v11  ;;  %v3397_v3 = vand.u32 4294901760, %v3396_v11 }
 0x46f   :  { %14046 = vst [vmem:[#allocation16_spill] sm:$0xff] %v10712_v38 }
 0x470   :  { %14047 = vst [vmem:[#allocation45_spill] sm:$0xff] %v10716_v32  ;;  %3773 = vmatmul.f32.gmra.mxu3 %v3397_v3  ;;  %v3398_v1 = vsub.f32 %v3396_v11, %v3397_v3 }
 0x471   :  { %14048 = vst [vmem:[#allocation39_spill] sm:$0xff] %v10720_v47  ;;  %v2692_v63 = vpop.permute.xlu1 %2691 }
 0x472   :  { %v2946_v4 = vpop.permute.xlu0 %2945  ;;  %v3399_v52 = vand.u32 4294901760, %v3398_v1 }
 0x473   :  { %v3192_v14 = vsel %vm3180_vm2, %v3175_v62, %v2946_v4 }
 0x474   :  { %v3209_v51 = vsel %vm3197_vm4, %v3192_v14, %v3010_v40  ;;  %3400 = vmatmul.f32.gmra.mxu0 %v3399_v52 }
 0x475   :  { %v3226_v30 = vsel %vm3214_vm5, %v3209_v51, %v3074_v26  ;;  %v2630_v45 = vpop.permute.xlu2 %2629 }
 0x476   :  { %v3276_v57 = vsel %vm3241_vm6, %v3226_v30, 0 }
 0x477   :  { %v10741_v29 = vand.u32 4294901760, %v3276_v57 }
 0x479   :  { %v3404_v7 = vsub.f32 %v3276_v57, %v10741_v29  ;;  %v2884_v15 = vpop.permute.xlu1 %2883  ;;  %3550 = vmatmul.f32.gmra.mxu1 %v10741_v29 }
 0x47a   :  { %v2628_v8 = vpop.permute.xlu0 %2627 }
 0x47b   :  { %v3405_v60 = vand.u32 4294901760, %v3404_v7  ;;  %v3111_v36 = vsel %vm535_vm3, %v14050_v5, %v2628_v8  ;;  %3661 = vmatmul.f32.gmra.mxu2 %v3404_v7 }
 0x47c   :  { %v3127_v34 = vsel %vm31_vm0, %v3111_v36, %v2692_v63 }
 0x47d   :  { %v3406_v26 = vsub.f32 %v3404_v7, %v3405_v60  ;;  %3779 = vmatmul.f32.gmra.mxu3 %v3405_v60  ;;  %v3143_v25 = vsel %vm602_vm7, %v3127_v34, %v2756_v18  ;;  %v2822_v14 = vpop.permute.xlu2 %2821 }
 0x47f   :  { %v3407_v40 = vand.u32 4294901760, %v3406_v26 }
 0x481   :  { %v3076_v61 = vpop.permute.xlu1 %3075  ;;  %3408 = vmatmul.f32.gmra.mxu0 %v3407_v40 }
 0x482   :  { %v2820_v53 = vpop.permute.xlu0 %2819 }
 0x483   :  { %v3159_v43 = vsel %vm636_vm9, %v3143_v25, %v2820_v53 }
 0x484   :  { %v3176_v44 = vsel %vm3163_vm1, %v3159_v43, %v2884_v15 }
 0x485   :  { %v3193_v4 = vsel %vm3180_vm2, %v3176_v44, %v2948_v33  ;;  %v3112_v33 = vsel %vm535_vm3, %v14011_v42, %v2630_v45  ;;  %v3014_v15 = vpop.permute.xlu2 %3013 }
 0x489   :  { %v2758_v16 = vpop.permute.xlu1 %2757 }
 0x48a   :  { %v3012_v49 = vpop.permute.xlu0 %3011 }
 0x48b   :  { %v3210_v62 = vsel %vm3197_vm4, %v3193_v4, %v3012_v49 }
 0x48c   :  { %v3227_v11 = vsel %vm3214_vm5, %v3210_v62, %v3076_v61 }
 0x48d   :  { %v3279_v63 = vsel %vm3241_vm6, %v3227_v11, 0  ;;  %v2696_v34 = vpop.permute.xlu2 %2695 }
 0x48e   :  { %v10755_v51 = vand.u32 4294901760, %v3279_v63 }
 0x490   :  { %3554 = vmatmul.f32.gmra.mxu1 %v10755_v51  ;;  %v3412_v18 = vsub.f32 %v3279_v63, %v10755_v51 }
 0x492   :  { %3666 = vmatmul.f32.gmra.mxu2 %v3412_v18  ;;  %v3413_v30 = vand.u32 4294901760, %v3412_v18  ;;  %v2694_v57 = vpop.permute.xlu0 %2693 }
 0x493   :  { %v3128_v52 = vsel %vm31_vm0, %v3112_v33, %v2694_v57 }
 0x494   :  { %v2950_v3 = vpop.permute.xlu1 %2949  ;;  %3785 = vmatmul.f32.gmra.mxu3 %v3413_v30  ;;  %v3414_v1 = vsub.f32 %v3412_v18, %v3413_v30  ;;  %v3144_v8 = vsel %vm602_vm7, %v3128_v52, %v2758_v16 }
 0x495   :  { %v3160_v36 = vsel %vm636_vm9, %v3144_v8, %v2822_v14  ;;  %v2888_v4 = vpop.permute.xlu2 %2887 }
 0x496   :  { %v3415_v7 = vand.u32 4294901760, %v3414_v1 }
 0x498   :  { %3416 = vmatmul.f32.gmra.mxu0 %v3415_v7 }
 0x49a   :  { %v2886_v5 = vpop.permute.xlu0 %2885 }
 0x49b   :  { %v3177_v26 = vsel %vm3163_vm1, %v3160_v36, %v2886_v5 }
 0x49c   :  { %v2632_v60 = vpop.permute.xlu1 %2631  ;;  %v3194_v40 = vsel %vm3180_vm2, %v3177_v26, %v2950_v3 }
 0x49d   :  { %v3211_v53 = vsel %vm3197_vm4, %v3194_v40, %v3014_v15  ;;  %v3113_v16 = vsel %vm535_vm3, %v14015_v56, %v2632_v60  ;;  %v3080_v33 = vpop.permute.xlu2 %3079 }
 0x49e   :  { %v3129_v11 = vsel %vm31_vm0, %v3113_v16, %v2696_v34 }
 0x4a2   :  { %v3078_v61 = vpop.permute.xlu0 %3077 }
 0x4a3   :  { %v3228_v45 = vsel %vm3214_vm5, %v3211_v53, %v3078_v61 }
 0x4a4   :  { %v2824_v42 = vpop.permute.xlu1 %2823  ;;  %v3282_v25 = vsel %vm3241_vm6, %v3228_v45, 0 }
 0x4a5   :  { %v10769_v43 = vand.u32 4294901760, %v3282_v25  ;;  %v2762_v61 = vpop.permute.xlu2 %2761 }
 0x4a7   :  { %v3420_v44 = vsub.f32 %v3282_v25, %v10769_v43  ;;  %3558 = vmatmul.f32.gmra.mxu1 %v10769_v43 }
 0x4a9   :  { %3671 = vmatmul.f32.gmra.mxu2 %v3420_v44  ;;  %v3421_v49 = vand.u32 4294901760, %v3420_v44 }
 0x4aa   :  { %v2760_v62 = vpop.permute.xlu0 %2759 }
 0x4ab   :  { %3791 = vmatmul.f32.gmra.mxu3 %v3421_v49  ;;  %v3422_v14 = vsub.f32 %v3420_v44, %v3421_v49  ;;  %v3145_v63 = vsel %vm602_vm7, %v3129_v11, %v2760_v62 }
 0x4ac   :  { %v3016_v18 = vpop.permute.xlu1 %3015  ;;  %v3161_v30 = vsel %vm636_vm9, %v3145_v63, %v2824_v42 }
 0x4ad   :  { %v3423_v3 = vand.u32 4294901760, %v3422_v14  ;;  %v3178_v1 = vsel %vm3163_vm1, %v3161_v30, %v2888_v4  ;;  %v2954_v4 = vpop.permute.xlu2 %2953 }
 0x4af   :  { %3424 = vmatmul.f32.gmra.mxu0 %v3423_v3 }
 0x4b2   :  { %v2952_v57 = vpop.permute.xlu0 %2951 }
 0x4b3   :  { %v3195_v56 = vsel %vm3180_vm2, %v3178_v1, %v2952_v57 }
 0x4b4   :  { %v3212_v52 = vsel %vm3197_vm4, %v3195_v56, %v3016_v18  ;;  %v2698_v8 = vpop.permute.xlu1 %2697  ;;  %v10801_v56 = vpop.f32.mrf.mxu1 }
 0x4b5   :  { %v3229_v7 = vsel %vm3214_vm5, %v3212_v52, %v3080_v33  ;;  %v10804_v52 = vpop.f32.mrf.mxu0 }
 0x4b6   :  { %v3285_v15 = vsel %vm3241_vm6, %v3229_v7, 0 }
 0x4b7   :  { %v10783_v60 = vand.u32 4294901760, %v3285_v15 }
 0x4b9   :  { %3562 = vmatmul.f32.gmra.mxu1 %v10783_v60  ;;  %v3428_v5 = vsub.f32 %v3285_v15, %v10783_v60 }
 0x4ba   :  { %v2634_v36 = vpop.permute.xlu0 %2633 }
 0x4bb   :  { %3676 = vmatmul.f32.gmra.mxu2 %v3428_v5  ;;  %v3429_v26 = vand.u32 4294901760, %v3428_v5  ;;  %v3114_v40 = vsel %vm535_vm3, %v14023_v55, %v2634_v36 }
 0x4bc   :  { %v3130_v42 = vsel %vm31_vm0, %v3114_v40, %v2698_v8  ;;  %v2890_v45 = vpop.permute.xlu1 %2889  ;;  %v10806_v7 = vpop.f32.mrf.mxu1 }
 0x4bd   :  { %3797 = vmatmul.f32.gmra.mxu3 %v3429_v26  ;;  %v3430_v34 = vsub.f32 %v3428_v5, %v3429_v26  ;;  %v3146_v44 = vsel %vm602_vm7, %v3130_v42, %v2762_v61  ;;  %v10810_v15 = vpop.f32.mrf.mxu0 }
 0x4bf   :  { %v3431_v53 = vand.u32 4294901760, %v3430_v34 }
 0x4c1   :  { %3432 = vmatmul.f32.gmra.mxu0 %v3431_v53 }
 0x4c2   :  { %v2826_v25 = vpop.permute.xlu0 %2825 }
 0x4c3   :  { %v3162_v16 = vsel %vm636_vm9, %v3146_v44, %v2826_v25 }
 0x4c4   :  { %v3179_v49 = vsel %vm3163_vm1, %v3162_v16, %v2890_v45  ;;  %v3082_v62 = vpop.permute.xlu1 %3081  ;;  %v10812_v8 = vpop.f32.mrf.mxu1 }
 0x4c5   :  { %v3196_v11 = vsel %vm3180_vm2, %v3179_v49, %v2954_v4  ;;  %v10816_v5 = vpop.f32.mrf.mxu0 }
 0x4ca   :  { %v3018_v55 = vpop.permute.xlu0 %3017 }
 0x4cb   :  { %v3213_v14 = vsel %vm3197_vm4, %v3196_v11, %v3018_v55  ;;  %v10899_v55 = vpop.f32.mrf.mxu3 }
 0x4cc   :  { %v3230_v63 = vsel %vm3214_vm5, %v3213_v14, %v3082_v62  ;;  %v10818_v36 = vpop.f32.mrf.mxu1 }
 0x4cd   :  { %v3288_v18 = vsel %vm3241_vm6, %v3230_v63, 0  ;;  %v10822_v26 = vpop.f32.mrf.mxu0 }
 0x4ce   :  { %v10797_v3 = vand.u32 4294901760, %v3288_v18 }
 0x4d0   :  { %v3436_v30 = vsub.f32 %v3288_v18, %v10797_v3  ;;  %3566 = vmatmul.f32.gmra.mxu1 %v10797_v3 }
 0x4d2   :  { %3681 = vmatmul.f32.gmra.mxu2 %v3436_v30  ;;  %v3437_v57 = vand.u32 4294901760, %v3436_v30 }
 0x4d3   :  { %v3720_v18 = vpop.f32.mrf.mxu3 }
 0x4d4   :  { %3803 = vmatmul.f32.gmra.mxu3 %v3437_v57  ;;  %v3438_v1 = vsub.f32 %v3436_v30, %v3437_v57 }
 0x4d5   :  { %v10828_v40 = vpop.f32.mrf.mxu0 }
 0x4d6   :  { %v3439_v33 = vand.u32 4294901760, %v3438_v1 }
 0x4d8   :  { %3440 = vmatmul.f32.gmra.mxu0 %v3439_v33  ;;  %3941 = vmatmul.f32.vlgmr.msra.gmra.mxu1 %v10070_v35 }
 0x4db   :  { %v3726_v1 = vpop.f32.mrf.mxu3 }
 0x4dd   :  { %v10834_v34 = vpop.f32.mrf.mxu0 }
 0x4e0   :  { %3851 = vmatmul.f32.vlgmr.msra.gmra.mxu0 %v10070_v35  ;;  %3945 = vmatmul.f32.gmra.mxu1 %v10141_v46  ;;  %v10824_v35 = vpop.f32.mrf.mxu1 }
 0x4e5   :  { %v10840_v61 = vpop.f32.mrf.mxu0 }
 0x4e8   :  { %3855 = vmatmul.f32.gmra.mxu0 %v10141_v46  ;;  %3949 = vmatmul.f32.gmra.mxu1 %v10191_v20  ;;  %v10830_v46 = vpop.f32.mrf.mxu1 }
 0x4ed   :  { %v10846_v53 = vpop.f32.mrf.mxu0 }
 0x4f0   :  { %3859 = vmatmul.f32.gmra.mxu0 %v10191_v20  ;;  %3953 = vmatmul.f32.gmra.mxu1 %v10250_v0  ;;  %v10836_v20 = vpop.f32.mrf.mxu1 }
 0x4f5   :  { %v10852_v42 = vpop.f32.mrf.mxu0 }
 0x4f8   :  { %3863 = vmatmul.f32.gmra.mxu0 %v10250_v0  ;;  %3957 = vmatmul.f32.gmra.mxu1 %v10326_v39  ;;  %v10842_v0 = vpop.f32.mrf.mxu1 }
 0x4fd   :  { %v10858_v45 = vpop.f32.mrf.mxu0 }
 0x500   :  { %3867 = vmatmul.f32.gmra.mxu0 %v10326_v39  ;;  %3961 = vmatmul.f32.gmra.mxu1 %v10383_v31  ;;  %v10848_v39 = vpop.f32.mrf.mxu1 }
 0x505   :  { %v10864_v25 = vpop.f32.mrf.mxu0 }
 0x508   :  { %3871 = vmatmul.f32.gmra.mxu0 %v10383_v31  ;;  %3965 = vmatmul.f32.gmra.mxu1 %v10432_v27  ;;  %v10854_v31 = vpop.f32.mrf.mxu1 }
 0x50d   :  { %v10870_v44 = vpop.f32.mrf.mxu0 }
 0x510   :  { %3875 = vmatmul.f32.gmra.mxu0 %v10432_v27  ;;  %3969 = vmatmul.f32.gmra.mxu1 %v10568_v54  ;;  %v10860_v27 = vpop.f32.mrf.mxu1 }
 0x515   :  { %v10876_v16 = vpop.f32.mrf.mxu0 }
 0x518   :  { %3879 = vmatmul.f32.gmra.mxu0 %v10568_v54  ;;  %3973 = vmatmul.f32.gmra.mxu1 %v10611_v24  ;;  %v10866_v54 = vpop.f32.mrf.mxu1 }
 0x520   :  { %3883 = vmatmul.f32.gmra.mxu0 %v10611_v24  ;;  %3977 = vmatmul.f32.gmra.mxu1 %v10657_v12  ;;  %v10872_v24 = vpop.f32.mrf.mxu1 }
 0x521   :  { %14051 = vst [vmem:[#allocation8_spill] sm:$0xff] %v10872_v24 }
 0x528   :  { %3887 = vmatmul.f32.gmra.mxu0 %v10657_v12  ;;  %3981 = vmatmul.f32.gmra.mxu1 %v10731_v41  ;;  %v10878_v12 = vpop.f32.mrf.mxu1 }
 0x529   :  { %14052 = vst [vmem:[#allocation40_spill] sm:$0xff] %v10878_v12 }
 0x52c   :  { %v10882_v49 = vpop.f32.mrf.mxu0 }
 0x52d   :  { %14053 = vst [vmem:[#allocation49_spill] sm:$0xff] %v10882_v49 }
 0x530   :  { %3891 = vmatmul.f32.gmra.mxu0 %v10731_v41  ;;  %3985 = vmatmul.f32.gmra.mxu1 %v10741_v29 }
 0x536   :  { %v10884_v41 = vpop.f32.mrf.mxu1 }
 0x537   :  { %14054 = vst [vmem:[#allocation13_spill] sm:$0xff] %v10884_v41 }
 0x538   :  { %3895 = vmatmul.f32.gmra.mxu0 %v10741_v29  ;;  %3989 = vmatmul.f32.gmra.mxu1 %v10755_v51 }
 0x53e   :  { %v10888_v4 = vpop.f32.mrf.mxu0 }
 0x53f   :  { %14055 = vst [vmem:[#allocation52_spill] sm:$0xff] %v10888_v4 }
 0x540   :  { %3899 = vmatmul.f32.gmra.mxu0 %v10755_v51  ;;  %3993 = vmatmul.f32.gmra.mxu1 %v10769_v43  ;;  %v3607_v51 = vpop.f32.mrf.mxu2 }
 0x548   :  { %3903 = vmatmul.f32.gmra.mxu0 %v10769_v43  ;;  %3997 = vmatmul.f32.gmra.mxu1 %v10783_v60  ;;  %v3612_v14 = vpop.f32.mrf.mxu2 }
 0x54d   :  { %v10890_v29 = vpop.f32.mrf.mxu1 }
 0x54e   :  { %14056 = vst [vmem:[#allocation42_spill] sm:$0xff] %v10890_v29 }
 0x550   :  { %3907 = vmatmul.f32.gmra.mxu0 %v10783_v60  ;;  %4001 = vmatmul.f32.gmra.mxu1 %v10797_v3  ;;  %v3617_v60 = vpop.f32.mrf.mxu2 }
 0x555   :  { %v10894_v62 = vpop.f32.mrf.mxu0  ;;  %v10896_v11 = vpop.f32.mrf.mxu1 }
 0x556   :  { %14057 = vst [vmem:[#allocation44_spill] sm:$0xff] %v10894_v62 }
 0x558   :  { %3911 = vmatmul.f32.gmra.mxu0 %v10797_v3  ;;  %v3622_v47 = vpop.f32.mrf.mxu2  ;;  %v10913_v3 = vpop.f32.mrf.mxu3 }
 0x55d   :  { %v10901_v43 = vpop.f32.mrf.mxu0  ;;  %v10903_v63 = vpop.f32.mrf.mxu1 }
 0x560   :  { %v3627_v23 = vpop.f32.mrf.mxu2  ;;  %v10919_v21 = vpop.f32.mrf.mxu3 }
 0x565   :  { %v10905_v30 = vpop.f32.mrf.mxu0  ;;  %v10907_v57 = vpop.f32.mrf.mxu1 }
 0x568   :  { %v3632_v17 = vpop.f32.mrf.mxu2  ;;  %v10925_v28 = vpop.f32.mrf.mxu3 }
 0x56d   :  { %v10909_v33 = vpop.f32.mrf.mxu0  ;;  %v10911_v32 = vpop.f32.mrf.mxu1 }
 0x570   :  { %v3637_v19 = vpop.f32.mrf.mxu2  ;;  %v10931_v2 = vpop.f32.mrf.mxu3 }
 0x575   :  { %v10915_v38 = vpop.f32.mrf.mxu0  ;;  %v10917_v9 = vpop.f32.mrf.mxu1 }
 0x576   :  { %14058 = vst [vmem:[#allocation54_spill] sm:$0xff] %v10917_v9 }
 0x578   :  { %v3642_v48 = vpop.f32.mrf.mxu2  ;;  %v10937_v13 = vpop.f32.mrf.mxu3 }
 0x57d   :  { %v10921_v59 = vpop.f32.mrf.mxu0  ;;  %v10923_v10 = vpop.f32.mrf.mxu1 }
 0x57e   :  { %14059 = vst [vmem:[#allocation22_spill] sm:$0xff] %v10923_v10 }
 0x580   :  { %v10941_v29 = vpop.f32.mrf.mxu2  ;;  %v10945_v41 = vpop.f32.mrf.mxu3 }
 0x581   :  { %14065 = vst [vmem:[#allocation6_spill] sm:$0xff] %v10945_v41 }
 0x585   :  { %v10927_v37 = vpop.f32.mrf.mxu0  ;;  %v10929_v22 = vpop.f32.mrf.mxu1 }
 0x586   :  { %14060 = vst [vmem:[#allocation48_spill] sm:$0xff] %v10929_v22 }
 0x588   :  { %v10949_v22 = vpop.f32.mrf.mxu2  ;;  %v10958_v4 = vpop.f32.mrf.mxu3 }
 0x589   :  { %14069 = vst [vmem:[#allocation27_spill] sm:$0xff] %v10958_v4 }
 0x58d   :  { %v10933_v58 = vpop.f32.mrf.mxu0  ;;  %v10935_v50 = vpop.f32.mrf.mxu1 }
 0x58e   :  { %14061 = vst [vmem:[#allocation56_spill] sm:$0xff] %v10933_v58 }
 0x58f   :  { %14062 = vst [vmem:[#allocation19_spill] sm:$0xff] %v10935_v50  ;;  %v10956_v50 = vld [vmem:[%s13735_s6 + $0x8] sm:$0x7] }
 0x590   :  { %14068 = vst [vmem:[#allocation7_spill] sm:$0xff] %v10956_v50  ;;  %v10978_v9 = vpop.f32.mrf.mxu3 }
 0x595   :  { %v10939_v6 = vpop.f32.mrf.mxu0  ;;  %v10943_v62 = vpop.f32.mrf.mxu1 }
 0x596   :  { %14063 = vst [vmem:[#allocation17_spill] sm:$0xff] %v10939_v6  ;;  %v10961_v6 = vperm.slane %v10956_v50, 0 }
 0x597   :  { %14064 = vst [vmem:[#allocation51_spill] sm:$0xff] %v10943_v62 }
 0x598   :  { %v3330_v62 = vadd.f32 %v10810_v15, %v10961_v6  ;;  %v3338_v58 = vadd.f32 %v10816_v5, %v10961_v6  ;;  %v3346_v50 = vadd.f32 %v10822_v26, %v10961_v6  ;;  %v3370_v26 = vadd.f32 %v10840_v61, %v10961_v6 }
 0x599   :  { %v3386_v61 = vadd.f32 %v10852_v42, %v10961_v6 }
 0x59a   :  { %v3512_v4 = vadd.f32 %v10806_v7, %v3330_v62  ;;  %v3516_v15 = vadd.f32 %v10812_v8, %v3338_v58  ;;  %v3520_v49 = vadd.f32 %v10818_v36, %v3346_v50  ;;  %v3362_v7 = vadd.f32 %v10834_v34, %v10961_v6  ;;  %v10999_v36 = vpop.f32.mrf.mxu3 }
 0x59b   :  { %v3378_v8 = vadd.f32 %v10846_v53, %v10961_v6  ;;  %v3532_v34 = vadd.f32 %v10836_v20, %v3370_v26 }
 0x59c   :  { %v3618_v58 = vadd.f32 %v3617_v60, %v3516_v15  ;;  %v3528_v50 = vadd.f32 %v10830_v46, %v3362_v7  ;;  %v14074_v7 = vld [vmem:[#allocation54_spill] sm:$0xff] }
 0x59d   :  { %v10947_v12 = vpop.f32.mrf.mxu0  ;;  %v10951_v10 = vpop.f32.mrf.mxu1 }
 0x59e   :  { %14066 = vst [vmem:[#allocation53_spill] sm:$0xff] %v10947_v12  ;;  %v10967_v12 = vpop.f32.mrf.mxu2 }
 0x59f   :  { %14067 = vst [vmem:[#allocation14_spill] sm:$0xff] %v10951_v10  ;;  %v3322_v10 = vadd.f32 %v10804_v52, %v10961_v6  ;;  %v3613_v52 = vadd.f32 %v3612_v14, %v3512_v4  ;;  %v3623_v4 = vadd.f32 %v3622_v47, %v3520_v49  ;;  %v3394_v47 = vadd.f32 %v10858_v45, %v10961_v6 }
 0x5a0   :  { %14071 = vst [vmem:[#allocation26_spill] sm:$0xff] %v10967_v12  ;;  %v3633_v49 = vadd.f32 %v3632_v17, %v3528_v50 }
 0x5a1   :  { %v3733_v46 = vadd.f32 %v10913_v3, %v3623_v4  ;;  %v3544_v17 = vadd.f32 %v10854_v31, %v3394_v47  ;;  %v3418_v31 = vadd.f32 %v10876_v16, %v10961_v6 }
 0x5a3   :  { %v3865_v60 = vadd.f32 %v10915_v38, %v3733_v46 }
 0x5a5   :  { %v10963_v24 = vpop.f32.mrf.mxu0  ;;  %v10969_v41 = vpop.f32.mrf.mxu1 }
 0x5a6   :  { %14070 = vst [vmem:[#allocation21_spill] sm:$0xff] %v10963_v24  ;;  %v3508_v24 = vadd.f32 %v10801_v56, %v3322_v10  ;;  %v10989_v5 = vpop.f32.mrf.mxu2 }
 0x5a7   :  { %14072 = vst [vmem:[#allocation30_spill] sm:$0xff] %v10969_v41  ;;  %v3354_v41 = vadd.f32 %v10828_v40, %v10961_v6  ;;  %v3721_v40 = vadd.f32 %v3720_v18, %v3613_v52  ;;  %v14079_v4 = vld [vmem:[#allocation26_spill] sm:$0xff] }
 0x5a8   :  { %v3608_v10 = vadd.f32 %v3607_v51, %v3508_v24  ;;  %v3727_v24 = vadd.f32 %v3726_v1, %v3618_v58  ;;  %v14077_v58 = vld [vmem:[#allocation8_spill] sm:$0xff] }
 0x5a9   :  { %v3524_v56 = vadd.f32 %v10824_v35, %v3354_v41  ;;  %v3857_v35 = vadd.f32 %v10905_v30, %v3721_v40  ;;  %v3536_v41 = vadd.f32 %v10842_v0, %v3378_v8  ;;  %v3402_v0 = vadd.f32 %v10864_v25, %v10961_v6 }
 0x5aa   :  { %v3715_v14 = vadd.f32 %v10899_v55, %v3608_v10  ;;  %v3861_v42 = vadd.f32 %v10909_v33, %v3727_v24  ;;  %v3638_v55 = vadd.f32 %v3637_v19, %v3532_v34  ;;  %v3745_v19 = vadd.f32 %v10925_v28, %v3633_v49  ;;  %v14076_v10 = vld [vmem:[#allocation6_spill] sm:$0xff]  ;;  %v14081_v24 = vld [vmem:[#allocation17_spill] sm:$0xff]  ;;  %v14083_v49 = vld [vmem:[#allocation40_spill] sm:$0xff] }
 0x5ab   :  { %v3628_v51 = vadd.f32 %v3627_v23, %v3524_v56  ;;  %v3540_v23 = vadd.f32 %v10848_v39, %v3386_v61  ;;  %v11019_v45 = vadd.f32 %v10903_v63, %v3857_v35  ;;  %v3643_v1 = vadd.f32 %v3642_v48, %v3536_v41  ;;  %v3786_v39 = vpop.f32.mrf.mxu3  ;;  %v14078_v56 = vld [vmem:[#allocation52_spill] sm:$0xff]  ;;  %v14080_v61 = vld [vmem:[#allocation22_spill] sm:$0xff]  ;;  %v14082_v35 = vld [vmem:[#allocation27_spill] sm:$0xff] }
 0x5ac   :  { %v3853_v18 = vadd.f32 %v10901_v43, %v3715_v14  ;;  %v3410_v43 = vadd.f32 %v10870_v44, %v10961_v6  ;;  %v11032_v25 = vadd.f32 %v10907_v57, %v3861_v42  ;;  %v3751_v48 = vadd.f32 %v10931_v2, %v3638_v55 }
 0x5ad   :  { %v10984_v12 = vpop.f32.mrf.mxu0  ;;  %v10993_v62 = vpop.f32.mrf.mxu1  ;;  %v3739_v30 = vadd.f32 %v10919_v21, %v3628_v51  ;;  %v3648_v38 = vadd.f32 %v10941_v29, %v3540_v23  ;;  %v3548_v44 = vadd.f32 %v10860_v27, %v3402_v0  ;;  %v4006_v28 = vsel %vm535_vm3, %v11019_v45, 0.0  ;;  %v14073_v29 = vld [vmem:[#allocation49_spill] sm:$0xff]  ;;  %v14084_v23 = vld [vmem:[#allocation48_spill] sm:$0xff] }
 0x5ae   :  { %v3667_v20 = vpop.f32.mrf.mxu2  ;;  %v11029_v21 = vadd.f32 %v10896_v11, %v3853_v18  ;;  %v11043_v11 = vadd.f32 %v10911_v32, %v3865_v60  ;;  %v3873_v57 = vadd.f32 %v10927_v37, %v3745_v19  ;;  %v3757_v3 = vadd.f32 %v10937_v13, %v3643_v1  ;;  %v14075_v37 = vld [vmem:[#allocation56_spill] sm:$0xff]  ;;  %v14085_v0 = vld [vmem:[#allocation53_spill] sm:$0xff] }
 0x5af   :  { %v3869_v63 = vadd.f32 %v10921_v59, %v3739_v30  ;;  %v3653_v59 = vadd.f32 %v10949_v22, %v3544_v17  ;;  %v3552_v2 = vadd.f32 %v10866_v54, %v3410_v43  ;;  %v3426_v15 = vadd.f32 %v14073_v29, %v10961_v6  ;;  %v14086_v17 = vld [vmem:[#allocation13_spill] sm:$0xff] }
 0x5b0   :  { %v4005_v27 = vsel %vm535_vm3, %v11029_v21, 0.0  ;;  %v4008_v32 = vsel %vm535_vm3, %v11032_v25, 0.0  ;;  %v3877_v13 = vadd.f32 %v14075_v37, %v3751_v48  ;;  %v3763_v22 = vadd.f32 %v14076_v10, %v3648_v38  ;;  %v14087_v38 = vld [vmem:[#allocation19_spill] sm:$0xff] }
 0x5b1   :  { %v11056_v26 = vadd.f32 %v14074_v7, %v3869_v63  ;;  %v3556_v54 = vadd.f32 %v14077_v58, %v3418_v31  ;;  %v3434_v8 = vadd.f32 %v14078_v56, %v10961_v6  ;;  %v4007_v40 = vadd.f32 %v4006_v28, %v4005_v27 }
 0x5b2   :  { %v3658_v50 = vadd.f32 %v14079_v4, %v3548_v44  ;;  %v4010_v34 = vsel %vm535_vm3, %v11043_v11, 0.0  ;;  %v11067_v14 = vadd.f32 %v14080_v61, %v3873_v57  ;;  %v3881_v51 = vadd.f32 %v14081_v24, %v3757_v3  ;;  %v14088_v44 = vld [vmem:[#allocation21_spill] sm:$0xff] }
 0x5b3   :  { %v3769_v41 = vadd.f32 %v14082_v35, %v3653_v59  ;;  %v3663_v47 = vadd.f32 %v10989_v5, %v3552_v2  ;;  %v4009_v46 = vadd.f32 %v4008_v32, %v4007_v40  ;;  %v3560_v18 = vadd.f32 %v14083_v49, %v3426_v15  ;;  %v3792_v42 = vpop.f32.mrf.mxu3  ;;  %v14089_v15 = vld [vmem:[#allocation51_spill] sm:$0xff] }
 0x5b4   :  { %v4012_v55 = vsel %vm535_vm3, %v11056_v26, 0.0  ;;  %v11076_v30 = vadd.f32 %v14084_v23, %v3877_v13  ;;  %v3885_v60 = vadd.f32 %v14085_v0, %v3763_v22  ;;  %v3668_v1 = vadd.f32 %v3667_v20, %v3556_v54  ;;  %v14090_v13 = vld [vmem:[#allocation44_spill] sm:$0xff]  ;;  %v14091_v22 = vld [vmem:[#allocation14_spill] sm:$0xff] }
 0x5b5   :  { %v11009_v53 = vpop.f32.mrf.mxu0  ;;  %v11025_v33 = vpop.f32.mrf.mxu1  ;;  %v3564_v43 = vadd.f32 %v14086_v17, %v3434_v8  ;;  %v4011_v19 = vadd.f32 %v4010_v34, %v4009_v46  ;;  %v3775_v48 = vadd.f32 %v10978_v9, %v3658_v50  ;;  %v4014_v5 = vsel %vm535_vm3, %v11067_v14, 0.0  ;;  %v14093_v34 = vld [vmem:[#allocation42_spill] sm:$0xff] }
 0x5b6   :  { %v3672_v52 = vpop.f32.mrf.mxu2  ;;  %v11084_v31 = vadd.f32 %v14087_v38, %v3881_v51  ;;  %v3889_v28 = vadd.f32 %v14088_v44, %v3769_v41  ;;  %v3781_v57 = vadd.f32 %v10999_v36, %v3663_v47  ;;  %v4016_v29 = vsel %vm535_vm3, %v11076_v30, 0.0 }
 0x5b7   :  { %v4013_v3 = vadd.f32 %v4012_v55, %v4011_v19  ;;  %v3673_v2 = vadd.f32 %v3672_v52, %v3560_v18  ;;  %v11091_v27 = vadd.f32 %v14089_v15, %v3885_v60  ;;  %v3893_v9 = vadd.f32 %v10984_v12, %v3775_v48 }
 0x5b8   :  { %v3787_v32 = vadd.f32 %v3786_v39, %v3668_v1  ;;  %v3442_v10 = vadd.f32 %v14090_v13, %v10961_v6  ;;  %v4018_v36 = vsel %vm535_vm3, %v11084_v31, 0.0  ;;  %v11099_v52 = vadd.f32 %v14091_v22, %v3889_v28  ;;  %v14092_v39 = vld [vmem:[#allocation30_spill] sm:$0xff] }
 0x5b9   :  { %v4015_v37 = vadd.f32 %v4014_v5, %v4013_v3  ;;  %v3897_v58 = vadd.f32 %v11009_v53, %v3781_v57  ;;  %v3793_v56 = vadd.f32 %v3792_v42, %v3673_v2  ;;  %v4020_v12 = vsel %vm535_vm3, %v11091_v27, 0.0 }
 0x5ba   :  { %v11105_v40 = vadd.f32 %v14092_v39, %v3893_v9  ;;  %v3568_v61 = vadd.f32 %v14093_v34, %v3442_v10  ;;  %v4022_v24 = vsel %vm535_vm3, %v11099_v52, 0.0 }
 0x5bb   :  { %v4017_v54 = vadd.f32 %v4016_v29, %v4015_v37  ;;  %v3798_v8 = vpop.f32.mrf.mxu3  ;;  %v11111_v51 = vadd.f32 %v10993_v62, %v3897_v58  ;;  %v14094_v37 = vld [vmem:[#allocation25_spill] sm:$0xff] }
 0x5bc   :  { %v4024_v46 = vsel %vm535_vm3, %v11105_v40, 0.0 }
 0x5bd   :  { %v3900_v16 = vpop.f32.mrf.mxu0  ;;  %v3994_v63 = vpop.f32.mrf.mxu1  ;;  %v4019_v6 = vadd.f32 %v4018_v36, %v4017_v54  ;;  %v4026_v23 = vsel %vm535_vm3, %v11111_v51, 0.0 }
 0x5be   :  { %v3677_v20 = vpop.f32.mrf.mxu2  ;;  %v3901_v4 = vadd.f32 %v3900_v16, %v3787_v32 }
 0x5bf   :  { %v3678_v7 = vadd.f32 %v3677_v20, %v3564_v43  ;;  %v4021_v35 = vadd.f32 %v4020_v12, %v4019_v6 }
 0x5c0   :  { %v11116_v49 = vadd.f32 %v11025_v33, %v3901_v4 }
 0x5c1   :  { %v3799_v50 = vadd.f32 %v3798_v8, %v3678_v7  ;;  %v4023_v42 = vadd.f32 %v4022_v24, %v4021_v35 }
 0x5c2   :  { %v4028_v60 = vsel %vm535_vm3, %v11116_v49, 0.0 }
 0x5c3   :  { %v4025_v62 = vadd.f32 %v4024_v46, %v4023_v42  ;;  %v3804_v17 = vpop.f32.mrf.mxu3 }
 0x5c5   :  { %v3904_v59 = vpop.f32.mrf.mxu0  ;;  %v3998_v41 = vpop.f32.mrf.mxu1  ;;  %v4027_v43 = vadd.f32 %v4026_v23, %v4025_v62 }
 0x5c6   :  { %v3905_v53 = vadd.f32 %v3904_v59, %v3793_v56  ;;  %v3682_v18 = vpop.f32.mrf.mxu2 }
 0x5c7   :  { %v3683_v55 = vadd.f32 %v3682_v18, %v3568_v61  ;;  %v4029_v48 = vadd.f32 %v4028_v60, %v4027_v43 }
 0x5c8   :  { %v11120_v0 = vadd.f32 %v3994_v63, %v3905_v53 }
 0x5c9   :  { %v3805_v19 = vadd.f32 %v3804_v17, %v3683_v55 }
 0x5ca   :  { %v4030_v33 = vsel %vm535_vm3, %v11120_v0, 0.0 }
 0x5cb   :  { %v4031_v63 = vadd.f32 %v4030_v33, %v4029_v48 }
 0x5cd   :  { %v3908_v47 = vpop.f32.mrf.mxu0  ;;  %v4002_v28 = vpop.f32.mrf.mxu1 }
 0x5ce   :  { %v3909_v16 = vadd.f32 %v3908_v47, %v3799_v50 }
 0x5d0   :  { %v11124_v1 = vadd.f32 %v3998_v41, %v3909_v16 }
 0x5d2   :  { %v4032_v38 = vsel %vm535_vm3, %v11124_v1, 0.0 }
 0x5d3   :  { %v4033_v3 = vadd.f32 %v4032_v38, %v4031_v63 }
 0x5d5   :  { %v3912_v5 = vpop.f32.mrf.mxu0 }
 0x5d6   :  { %v3913_v44 = vadd.f32 %v3912_v5, %v3805_v19 }
 0x5d8   :  { %v4003_v57 = vadd.f32 %v4002_v28, %v3913_v44 }
 0x5da   :  { %v4034_v59 = vsel %vm535_vm3, %v4003_v57, 0.0 }
 0x5db   :  { %v4035_v2 = vadd.f32 %v4034_v59, %v4033_v3 }
 0x5dd   :  { %v4036_v20 = vrot.slane %v4035_v2, 4 }
 0x5df   :  { %v4037_v29 = vadd.f32 %v4036_v20, %v4035_v2 }
 0x5e1   :  { %v4038_v15 = vrot.slane %v4037_v29, 2 }
 0x5e3   :  { %v4039_v9 = vadd.f32 %v4038_v15, %v4037_v29 }
 0x5e5   :  { %v4040_v32 = vrot.slane %v4039_v9, 1 }
 0x5e7   :  { %v4041_v7 = vadd.f32 %v4040_v32, %v4039_v9 }
 0x5e9   :  { %v4042_v13 = vmul.f32 %v4041_v7, %v14094_v37 }
 0x5eb   :  { %v11133_v10 = vsub.f32 %v11029_v21, %v4042_v13  ;;  %v11136_v36 = vsub.f32 %v11019_v45, %v4042_v13  ;;  %v11139_v22 = vsub.f32 %v11032_v25, %v4042_v13  ;;  %v11142_v58 = vsub.f32 %v11043_v11, %v4042_v13 }
 0x5ec   :  { %v11149_v8 = vsub.f32 %v11056_v26, %v4042_v13  ;;  %v11154_v45 = vsub.f32 %v11067_v14, %v4042_v13  ;;  %v11161_v4 = vsub.f32 %v11076_v30, %v4042_v13  ;;  %v11167_v14 = vsub.f32 %v11084_v31, %v4042_v13 }
 0x5ed   :  { %v4059_v54 = vmul.f32 %v11133_v10, %v11133_v10  ;;  %v4060_v56 = vmul.f32 %v11136_v36, %v11136_v36  ;;  %v4061_v21 = vmul.f32 %v11139_v22, %v11139_v22  ;;  %v4062_v25 = vmul.f32 %v11142_v58, %v11142_v58 }
 0x5ee   :  { %v4063_v26 = vmul.f32 %v11149_v8, %v11149_v8  ;;  %v4064_v34 = vmul.f32 %v11154_v45, %v11154_v45  ;;  %v11173_v53 = vsub.f32 %v11091_v27, %v4042_v13  ;;  %v4065_v30 = vmul.f32 %v11161_v4, %v11161_v4 }
 0x5ef   :  { %v4075_v11 = vsel %vm535_vm3, %v4059_v54, 0.0  ;;  %v4076_v12 = vsel %vm535_vm3, %v4060_v56, 0.0  ;;  %v4078_v50 = vsel %vm535_vm3, %v4061_v21, 0.0  ;;  %v4080_v61 = vsel %vm535_vm3, %v4062_v25, 0.0 }
 0x5f0   :  { %v4077_v39 = vadd.f32 %v4076_v12, %v4075_v11  ;;  %v4082_v35 = vsel %vm535_vm3, %v4063_v26, 0.0  ;;  %v11179_v47 = vsub.f32 %v11099_v52, %v4042_v13  ;;  %v4066_v31 = vmul.f32 %v11167_v14, %v11167_v14 }
 0x5f1   :  { %v4084_v46 = vsel %vm535_vm3, %v4064_v34, 0.0  ;;  %v11185_v18 = vsub.f32 %v11105_v40, %v4042_v13  ;;  %v4067_v27 = vmul.f32 %v11173_v53, %v11173_v53  ;;  %v4086_v42 = vsel %vm535_vm3, %v4065_v30, 0.0 }
 0x5f2   :  { %v4079_v6 = vadd.f32 %v4078_v50, %v4077_v39  ;;  %v11191_v23 = vsub.f32 %v11111_v51, %v4042_v13  ;;  %v4068_v52 = vmul.f32 %v11179_v47, %v11179_v47  ;;  %v4088_v62 = vsel %vm535_vm3, %v4066_v31, 0.0  ;;  %v4310_v50 = vld [vmem:[#allocation3 + $0x2] sm:$0xff] }
 0x5f3   :  { %v11197_v17 = vsub.f32 %v11116_v49, %v4042_v13  ;;  %v4069_v40 = vmul.f32 %v11185_v18, %v11185_v18  ;;  %v4090_v43 = vsel %vm535_vm3, %v4067_v27, 0.0  ;;  %v11203_v33 = vsub.f32 %v11120_v0, %v4042_v13  ;;  %4502 = vrot.lane.b32.xlu0 %v4310_v50, %s7925_s8  ;;  %v14098_v27 = vld [vmem:[#allocation10_spill] sm:$0xff] }
 0x5f4   :  { %v4081_v24 = vadd.f32 %v4080_v61, %v4079_v6  ;;  %v4070_v51 = vmul.f32 %v11191_v23, %v11191_v23  ;;  %v4092_v48 = vsel %vm535_vm3, %v4068_v52, 0.0  ;;  %v11209_v38 = vsub.f32 %v11124_v1, %v4042_v13  ;;  %v7919_v61 = vld [vmem:[%s13735_s6 + $0x4] sm:$0x7] }
 0x5f5   :  { %v4071_v49 = vmul.f32 %v11197_v17, %v11197_v17  ;;  %v4094_v44 = vsel %vm535_vm3, %v4069_v40, 0.0  ;;  %v11214_v28 = vsub.f32 %v4003_v57, %v4042_v13  ;;  %v4072_v0 = vmul.f32 %v11203_v33, %v11203_v33 }
 0x5f6   :  { %v4083_v41 = vadd.f32 %v4082_v35, %v4081_v24  ;;  %v4096_v3 = vsel %vm535_vm3, %v4070_v51, 0.0  ;;  %v4073_v2 = vmul.f32 %v11209_v38, %v11209_v38  ;;  %v2350_v24 = vperm.slane %v7919_v61, 1  ;;  %v14095_v35 = vld [vmem:[#allocation15_spill] sm:$0xff] }
 0x5f7   :  { %v4098_v1 = vsel %vm535_vm3, %v4071_v49, 0.0  ;;  %v4074_v29 = vmul.f32 %v11214_v28, %v11214_v28  ;;  %v4100_v15 = vsel %vm535_vm3, %v4072_v0, 0.0 }
 0x5f8   :  { %v4085_v16 = vadd.f32 %v4084_v46, %v4083_v41  ;;  %v4102_v57 = vsel %vm535_vm3, %v4073_v2, 0.0  ;;  %v14096_v41 = vld [vmem:[#allocation12_spill] sm:$0xff]  ;;  %v14097_v46 = vld [vmem:[#allocation38_spill] sm:$0xff]  ;;  %v14101_v2 = vmov 0.0  }
 0x5f9   :  { %v4104_v7 = vsel %vm535_vm3, %v4074_v29, 0.0  ;;  %v2334_v31 = vmul.f32 %v14096_v41, %v14095_v35  ;;  %v14103_v29 = vld [vmem:[#allocation23_spill] sm:$0xff] }
 0x5fa   :  { %v4087_v55 = vadd.f32 %v4086_v42, %v4085_v16  ;;  %v2335_v16 = vmul.f32 %v14096_v41, %v14097_v46  ;;  %v2336_v42 = vmul.f32 %v14096_v41, %v14098_v27 }
 0x5fb   :  { %v2351_v51 = vmul.f32 %v2350_v24, %v2334_v31 }
 0x5fc   :  { %v4089_v60 = vadd.f32 %v4088_v62, %v4087_v55  ;;  %v14099_v55 = vld [vmem:[#allocation36_spill] sm:$0xff] }
 0x5fd   :  { %v2337_v52 = vmul.f32 %v14096_v41, %v14099_v55  ;;  %v14100_v62 = vld [vmem:[#allocation20_spill] sm:$0xff] }
 0x5fe   :  { %v4091_v19 = vadd.f32 %v4090_v43, %v4089_v60  ;;  %v2338_v60 = vmul.f32 %v14096_v41, %v14100_v62 }
 0x5ff   :  { %v2354_v49 = vmul.f32 %v2350_v24, %v2337_v52 }
 0x600   :  { %v4093_v5 = vadd.f32 %v4092_v48, %v4091_v19  ;;  %v4381_v19 = vld [vmem:[#allocation3 + $0x90] sm:$0xff]  ;;  %v2352_v48 = vmul.f32 %v2350_v24, %v2335_v16  ;;  %v2355_v0 = vmul.f32 %v2350_v24, %v2338_v60  ;;  %v14111_v16 = vld [vmem:[#allocation16_spill] sm:$0xff] }
 0x601   :  { %4772 = vrot.lane.b32.xlu0 %v4381_v19, %s7929_s9 }
 0x602   :  { %v4095_v63 = vadd.f32 %v4094_v44, %v4093_v5  ;;  %v2353_v5 = vmul.f32 %v2350_v24, %v2336_v42  ;;  %v4397_v44 = vld [vmem:[#allocation3 + $0x91] sm:$0xff] }
 0x603   :  { %4836 = vrot.lane.b32.xlu1 %v4397_v44, %s7930_s12 }
 0x604   :  { %v4097_v59 = vadd.f32 %v4096_v3, %v4095_v63  ;;  %v4294_v63 = vld [vmem:[#allocation3 + $0x1] sm:$0xff]  ;;  %v11243_v3 = vperm.slane %v7919_v61, 2 }
 0x605   :  { %6021 = vst.msk [vmem:[#allocation3 + $0x8] sm:$0x3] %vm2385_vm12, %v14101_v2  ;;  %4438 = vrot.lane.b32.xlu2 %v4294_v63, %s7923_s27 }
 0x606   :  { %v4099_v20 = vadd.f32 %v4098_v1, %v4097_v59  ;;  %v14102_v1 = vld [vmem:[#allocation29_spill] sm:$0xff]  ;;  %v2368_v55 = vadd.f32 %v11243_v3, %v2351_v51  ;;  %v2369_v52 = vadd.f32 %v11243_v3, %v2352_v48 }
 0x608   :  { %v4101_v9 = vadd.f32 %v4100_v15, %v4099_v20  ;;  %v2356_v20 = vmul.f32 %v2350_v24, %v14102_v1  ;;  %v2357_v15 = vmul.f32 %v2350_v24, %v14103_v29 }
 0x60a   :  { %v4103_v32 = vadd.f32 %v4102_v57, %v4101_v9  ;;  %v14104_v9 = vld [vmem:[#allocation4_spill] sm:$0xff] }
 0x60b   :  { %v2358_v57 = vmul.f32 %v2350_v24, %v14104_v9 }
 0x60c   :  { %v4105_v13 = vadd.f32 %v4104_v7, %v4103_v32  ;;  %v14105_v32 = vld [vmem:[#allocation5_spill] sm:$0xff] }
 0x60d   :  { %v11253_v7 = vmul.f32 %v2350_v24, %v14105_v32  ;;  %v2375_v1 = vadd.f32 %v11243_v3, %v2358_v57 }
 0x60e   :  { %v4106_v54 = vrot.slane %v4105_v13, 4 }
 0x610   :  { %v4107_v56 = vadd.f32 %v4106_v54, %v4105_v13  ;;  %v14106_v13 = vld [vmem:[#allocation37_spill] sm:$0xff] }
 0x611   :  { %v11257_v54 = vmul.f32 %v2350_v24, %v14106_v13 }
 0x612   :  { %v4108_v21 = vrot.slane %v4107_v56, 2 }
 0x614   :  { %v4109_v25 = vadd.f32 %v4108_v21, %v4107_v56  ;;  %v14107_v56 = vld [vmem:[#allocation41_spill] sm:$0xff] }
 0x615   :  { %v11260_v21 = vmul.f32 %v2350_v24, %v14107_v56 }
 0x616   :  { %v4110_v11 = vrot.slane %v4109_v25, 1 }
 0x618   :  { %v4111_v12 = vadd.f32 %v4110_v11, %v4109_v25  ;;  %v14108_v25 = vld [vmem:[#allocation35_spill] sm:$0xff] }
 0x619   :  { %v11263_v11 = vmul.f32 %v2350_v24, %v14108_v25 }
 0x61a   :  { %v4112_v39 = vmul.f32 %v4111_v12, %v14094_v37 }
 0x61c   :  { %v4113_v26 = vadd.f32 1e-05, %v4112_v39 }
 0x61e   :  { %7900 = vrsqrt.f32 %v4113_v26  ;;  %vm4120_vm14 = vweird.f32 %v4113_v26 }
 0x624   :  { %v7901_v6 = vpop.eup %7900 }
 0x625   :  { %v4115_v34 = vmul.f32 %v7901_v6, %v4113_v26  ;;  %vm4121_vm13 = vweird.f32 %v7901_v6 }
 0x626   :  { %vm4122_vm15 = vmor %vm4120_vm14, %vm4121_vm13 }
 0x627   :  { %v4116_v30 = vmul.f32 %v7901_v6, %v4115_v34  ;;  %v14109_v34 = vld [vmem:[#allocation7_spill] sm:$0xff] }
 0x628   :  { %v11269_v61 = vperm.slane %v14109_v34, 1 }
 0x629   :  { %v4117_v40 = vmul.f32 0.5, %v4116_v30  ;;  %v14110_v30 = vld [vmem:[#allocation43_spill] sm:$0xff] }
 0x62a   :  { %v11272_v35 = vmul.f32 %v2350_v24, %v14110_v30 }
 0x62b   :  { %v4118_v43 = vsub.f32 1.5, %v4117_v40 }
 0x62d   :  { %v4119_v59 = vmul.f32 %v7901_v6, %v4118_v43 }
 0x62f   :  { %v4123_v12 = vsel %vm4122_vm15, %v7901_v6, %v4119_v59  ;;  %v11278_v6 = vmul.f32 %v2350_v24, %v14111_v16  ;;  %v2374_v59 = vadd.f32 %v11243_v3, %v2357_v15 }
 0x630   :  { %v4124_v39 = vmul.f32 %v4123_v12, %v11133_v10  ;;  %v4125_v26 = vmul.f32 %v4123_v12, %v11136_v36  ;;  %v4126_v50 = vmul.f32 %v4123_v12, %v11139_v22  ;;  %v4127_v41 = vmul.f32 %v4123_v12, %v11142_v58  ;;  %v14112_v10 = vld [vmem:[#allocation45_spill] sm:$0xff]  ;;  %v14113_v36 = vld [vmem:[#allocation39_spill] sm:$0xff] }
 0x631   :  { %v4129_v31 = vmul.f32 %v4123_v12, %v11154_v45  ;;  %v4130_v46 = vmul.f32 %v4123_v12, %v11161_v4  ;;  %v11281_v27 = vmul.f32 %v2350_v24, %v14112_v10  ;;  %v11284_v22 = vmul.f32 %v2350_v24, %v14113_v36  ;;  %v4302_v4 = vld [vmem:[#allocation3 + $0xa1] sm:$0xff] }
 0x632   :  { %v4128_v42 = vmul.f32 %v4123_v12, %v11149_v8  ;;  %v2370_v58 = vadd.f32 %v11243_v3, %v2353_v5  ;;  %v11291_v45 = vadd.f32 %v11243_v3, %v2354_v49  ;;  %v4141_v62 = vmul.f32 %v11269_v61, %v4124_v39  ;;  %4454 = vrot.lane.b32.xlu0 %v4302_v4, %s7923_s27  ;;  %v4318_v8 = vld [vmem:[#allocation3 + $0xa2] sm:$0xff] }
 0x633   :  { %v4142_v60 = vmul.f32 %v11269_v61, %v4125_v26  ;;  %v4143_v40 = vmul.f32 %v11269_v61, %v4126_v50  ;;  %v11297_v24 = vperm.slane %v14109_v34, 2  ;;  %v4131_v43 = vmul.f32 %v4123_v12, %v11167_v14  ;;  %6041 = vst.msk [vmem:[#allocation3 + $0xa8] sm:$0x3] %vm2385_vm12, %v14101_v2  ;;  %4518 = vrot.lane.b32.xlu1 %v4318_v8, %s7925_s8  ;;  %v4413_v14 = vld [vmem:[#allocation3 + $0x92] sm:$0xff] }
 0x634   :  { %v4144_v19 = vmul.f32 %v11269_v61, %v4127_v41  ;;  %v4146_v51 = vmul.f32 %v11269_v61, %v4129_v31  ;;  %v4147_v48 = vmul.f32 %v11269_v61, %v4130_v46  ;;  %v2372_v5 = vadd.f32 %v11243_v3, %v2355_v0  ;;  %6038 = vst.msk [vmem:[#allocation3 + $0x90] sm:$0xff] %vm535_vm3, %v14101_v2 }
 0x635   :  { %v2373_v49 = vadd.f32 %v11243_v3, %v2356_v20  ;;  %v4132_v44 = vmul.f32 %v4123_v12, %v11173_v53  ;;  %v4145_v63 = vmul.f32 %v11269_v61, %v4128_v42  ;;  %v4133_v29 = vmul.f32 %v4123_v12, %v11179_v47  ;;  %6039 = vst.msk [vmem:[#allocation3 + $0x98] sm:$0x3] %vm2385_vm12, %v14101_v2 }
 0x636   :  { %v4134_v9 = vmul.f32 %v4123_v12, %v11185_v18  ;;  %v4135_v0 = vmul.f32 %v4123_v12, %v11191_v23  ;;  %v4158_v53 = vadd.f32 %v11297_v24, %v4141_v62  ;;  %v4159_v20 = vadd.f32 %v11297_v24, %v4142_v60  ;;  %4900 = vrot.lane.b32.xlu2 %v4413_v14, %s7931_s14 }
 0x637   :  { %v4160_v32 = vadd.f32 %v11297_v24, %v4143_v40  ;;  %v4148_v15 = vmul.f32 %v11269_v61, %v4131_v43  ;;  %v4161_v47 = vadd.f32 %v11297_v24, %v4144_v19  ;;  %v4163_v18 = vadd.f32 %v11297_v24, %v4146_v51 }
 0x638   :  { %v4164_v57 = vadd.f32 %v11297_v24, %v4147_v48  ;;  %v4136_v23 = vmul.f32 %v4123_v12, %v11197_v17  ;;  %v4137_v13 = vmul.f32 %v4123_v12, %v11203_v33  ;;  %v4149_v56 = vmul.f32 %v11269_v61, %v4132_v44 }
 0x639   :  { %v4162_v25 = vadd.f32 %v11297_v24, %v4145_v63  ;;  %v4138_v39 = vmul.f32 %v4123_v12, %v11209_v38  ;;  %v4139_v26 = vmul.f32 %v4123_v12, %v11214_v28  ;;  %v4150_v50 = vmul.f32 %v11269_v61, %v4133_v29 }
 0x63a   :  { %v4151_v34 = vmul.f32 %v11269_v61, %v4134_v9  ;;  %v4152_v30 = vmul.f32 %v11269_v61, %v4135_v0  ;;  %v4174_v41 = vmax.f32 %v4158_v53, 0.0  ;;  %v4175_v31 = vmax.f32 %v4159_v20, 0.0 }
 0x63b   :  { %v4176_v46 = vmax.f32 %v4160_v32, 0.0  ;;  %v4165_v17 = vadd.f32 %v11297_v24, %v4148_v15  ;;  %v4177_v33 = vmax.f32 %v4161_v47, 0.0  ;;  %v4179_v16 = vmax.f32 %v4163_v18, 0.0 }
 0x63c   :  { %v4180_v10 = vmax.f32 %v4164_v57, 0.0  ;;  %v4153_v36 = vmul.f32 %v11269_v61, %v4136_v23  ;;  %v4154_v38 = vmul.f32 %v11269_v61, %v4137_v13  ;;  %v4166_v28 = vadd.f32 %v11297_v24, %v4149_v56 }
 0x63d   :  { %v4178_v12 = vmax.f32 %v4162_v25, 0.0  ;;  %v4155_v42 = vmul.f32 %v11269_v61, %v4138_v39  ;;  %v4156_v4 = vmul.f32 %v11269_v61, %v4139_v26  ;;  %v4167_v62 = vadd.f32 %v11297_v24, %v4150_v50 }
 0x63e   :  { %v4168_v60 = vadd.f32 %v11297_v24, %v4151_v34  ;;  %v4169_v40 = vadd.f32 %v11297_v24, %v4152_v30  ;;  %v11346_v8 = vadd.f32 %v4174_v41, %v2368_v55  ;;  %v11348_v43 = vadd.f32 %v4175_v31, %v2369_v52 }
 0x63f   :  { %v11350_v19 = vadd.f32 %v4176_v46, %v2370_v58  ;;  %v4181_v51 = vmax.f32 %v4165_v17, 0.0  ;;  %v11353_v48 = vadd.f32 %v4177_v33, %v11291_v45  ;;  %v11355_v44 = vadd.f32 %v4179_v16, %v2373_v49 }
 0x640   :  { %14114 = vst [vmem:[#allocation33_spill] sm:$0xff] %v11346_v8  ;;  %v11357_v63 = vadd.f32 %v4180_v10, %v2374_v59  ;;  %v2376_v61 = vadd.f32 %v11243_v3, %v11253_v7  ;;  %v4170_v14 = vadd.f32 %v11297_v24, %v4153_v36  ;;  %v4182_v29 = vmax.f32 %v4166_v28, 0.0 }
 0x641   :  { %14115 = vst [vmem:[#allocation57_spill] sm:$0xff] %v11348_v43  ;;  %v11362_v55 = vadd.f32 %v4178_v12, %v2372_v5  ;;  %v2377_v52 = vadd.f32 %v11243_v3, %v11257_v54  ;;  %v4171_v58 = vadd.f32 %v11297_v24, %v4154_v38  ;;  %v4172_v45 = vadd.f32 %v11297_v24, %v4155_v42 }
 0x642   :  { %14116 = vst [vmem:[#allocation47_spill] sm:$0xff] %v11350_v19  ;;  %v4183_v9 = vmax.f32 %v4167_v62, 0.0  ;;  %v4184_v49 = vmax.f32 %v4168_v60, 0.0  ;;  %v13807_v59 = vmax.f32 %v11346_v8, 0.0  ;;  %v13806_v0 = vmax.f32 %v11348_v43, 0.0  ;;  %v5065_v43 = vld [vmem:[%s13737_s4 + $0x18] sm:$0xff] }
 0x643   :  { %14117 = vst [vmem:[#allocation32_spill] sm:$0xff] %v11353_v48  ;;  %v13805_v7 = vmax.f32 %v11350_v19, 0.0  ;;  %v4173_v53 = vadd.f32 %v11297_v24, %v4156_v4  ;;  %v4185_v20 = vmax.f32 %v4169_v40, 0.0  ;;  %v11372_v5 = vadd.f32 %v4181_v51, %v2375_v1 }
 0x644   :  { %14118 = vst [vmem:[#allocation50_spill] sm:$0xff] %v11355_v44  ;;  %v13804_v32 = vmax.f32 %v11353_v48, 0.0  ;;  %v2378_v54 = vadd.f32 %v11243_v3, %v11260_v21  ;;  %v4186_v15 = vmax.f32 %v4170_v14, 0.0  ;;  %v11377_v47 = vadd.f32 %v4182_v29, %v2376_v61 }
 0x645   :  { %14119 = vst [vmem:[#allocation55_spill] sm:$0xff] %v11357_v63  ;;  %v13803_v18 = vmax.f32 %v11362_v55, 0.0  ;;  %v2379_v24 = vadd.f32 %v11243_v3, %v11263_v11  ;;  %v4187_v57 = vmax.f32 %v4171_v58, 0.0  ;;  %v11385_v1 = vadd.f32 %v4183_v9, %v2377_v52 }
 0x646   :  { %14120 = vst [vmem:[#allocation46_spill] sm:$0xff] %v11362_v55  ;;  %v13802_v23 = vmax.f32 %v11355_v44, 0.0  ;;  %v2380_v21 = vadd.f32 %v11243_v3, %v11272_v35  ;;  %v4188_v13 = vmax.f32 %v4172_v45, 0.0  ;;  %v11393_v56 = vadd.f32 %v4184_v49, %v2378_v54 }
 0x647   :  { %14121 = vst [vmem:[#allocation58_spill] sm:$0xff] %v11372_v5  ;;  %v13801_v25 = vmax.f32 %v11357_v63, 0.0  ;;  %v2381_v11 = vadd.f32 %v11243_v3, %v11278_v6  ;;  %v4189_v39 = vmax.f32 %v4173_v53, 0.0  ;;  %v11401_v26 = vadd.f32 %v4185_v20, %v2379_v24 }
 0x648   :  { %14122 = vst [vmem:[#allocation9_spill] sm:$0xff] %v11377_v47  ;;  %v13800_v50 = vmax.f32 %v11372_v5, 0.0  ;;  %v2382_v35 = vadd.f32 %v11243_v3, %v11281_v27  ;;  %v11409_v34 = vadd.f32 %v4186_v15, %v2380_v21  ;;  %v13799_v30 = vmax.f32 %v11377_v47, 0.0 }
 0x649   :  { %4262 = vst.msk [vmem:[#allocation3 + $0x11] sm:$0xff] %vm535_vm3, %v13807_v59  ;;  %v2383_v6 = vadd.f32 %v11243_v3, %v11284_v22  ;;  %v11417_v41 = vadd.f32 %v4187_v57, %v2381_v11  ;;  %v13798_v31 = vmax.f32 %v11385_v1, 0.0  ;;  %v13797_v46 = vmax.f32 %v11393_v56, 0.0  ;;  %v11651_v59 = vld [vmem:[#allocation3] sm:$0xff] }
 0x64a   :  { %14123 = vst [vmem:[#allocation34_spill] sm:$0xff] %v11385_v1  ;;  %v11423_v27 = vadd.f32 %v4188_v13, %v2382_v35  ;;  %v13796_v3 = vmax.f32 %v11401_v26, 0.0  ;;  %v13795_v10 = vmax.f32 %v11409_v34, 0.0  ;;  %v11764_v37 = vand.u32 4294901760, %v5065_v43 }
 0x64b   :  { %4263 = vst.msk [vmem:[#allocation3 + $0x21] sm:$0xff] %vm535_vm3, %v13806_v0  ;;  %v11429_v17 = vadd.f32 %v4189_v39, %v2383_v6  ;;  %v13794_v36 = vmax.f32 %v11417_v41, 0.0 }
 0x64c   :  { %14124 = vst [vmem:[#allocation24_spill] sm:$0xff] %v11393_v56  ;;  %v13793_v38 = vmax.f32 %v11423_v27, 0.0 }
 0x64d   :  { %4264 = vst.msk [vmem:[#allocation3 + $0x31] sm:$0xff] %vm535_vm3, %v13805_v7  ;;  %v13792_v28 = vmax.f32 %v11429_v17, 0.0 }
 0x64e   :  { %14125 = vst [vmem:[#allocation28_spill] sm:$0xff] %v11401_v26  ;;  %v5069_v26 = vld [vmem:[%s13737_s4 + $0x38] sm:$0xff] }
 0x64f   :  { %4265 = vst.msk [vmem:[#allocation3 + $0x41] sm:$0xff] %vm535_vm3, %v13804_v32  ;;  %v11711_v56 = vand.u32 4294901760, %v5069_v26 }
 0x650   :  { %14126 = vst [vmem:[#allocation11_spill] sm:$0xff] %v11409_v34  ;;  %v4358_v22 = vld [vmem:[#allocation3 + $0x12] sm:$0xff] }
 0x651   :  { %4266 = vst.msk [vmem:[#allocation3 + $0x51] sm:$0xff] %vm535_vm3, %v13803_v18  ;;  %v4342_v33 = vld [vmem:[#allocation3 + $0x11] sm:$0xff]  ;;  %4694 = vrot.lane.b32.xlu0 %v4358_v22, %s7932_s15 }
 0x652   :  { %14127 = vst [vmem:[#allocation31_spill] sm:$0xff] %v11417_v41  ;;  %v11435_v16 = vld [vmem:[#allocation3 + $0x10] sm:$0xff]  ;;  %4630 = vrot.lane.b32.xlu2 %v4342_v33, %s7933_s16  ;;  %v11469_v12 = vld [vmem:[#allocation3 + $0x22] sm:$0xff] }
 0x653   :  { %4267 = vst.msk [vmem:[#allocation3 + $0x61] sm:$0xff] %vm535_vm3, %v13802_v23  ;;  %4566 = vrot.lane.b32.xlu1 %v11435_v16, %s7934_s17  ;;  %v11471_v42 = vld [vmem:[#allocation3 + $0x21] sm:$0xff] }
 0x654   :  { %14128 = vst [vmem:[#allocation18_spill] sm:$0xff] %v11423_v27  ;;  %v11477_v4 = vld [vmem:[#allocation3 + $0x20] sm:$0xff]  ;;  %v11483_v62 = vld [vmem:[#allocation3 + $0x32] sm:$0xff] }
 0x655   :  { %4268 = vst.msk [vmem:[#allocation3 + $0x71] sm:$0xff] %vm535_vm3, %v13801_v25  ;;  %v11485_v60 = vld [vmem:[#allocation3 + $0x31] sm:$0xff] }
 0x656   :  { %14129 = vst [vmem:[#allocation49_spill] sm:$0xff] %v11429_v17  ;;  %v11489_v40 = vld [vmem:[#allocation3 + $0x41] sm:$0xff]  ;;  %v11520_v9 = vld [vmem:[#allocation3 + $0x30] sm:$0xff] }
 0x657   :  { %4269 = vst.msk [vmem:[#allocation3 + $0x81] sm:$0xff] %vm535_vm3, %v13800_v50  ;;  %v11493_v51 = vld [vmem:[#allocation3 + $0x42] sm:$0xff] }
 0x658   :  { %4270 = vst.msk [vmem:[#allocation3 + $0xb1] sm:$0xff] %vm535_vm3, %v13799_v30  ;;  %v11495_v61 = vld [vmem:[#allocation3 + $0x52] sm:$0xff]  ;;  %v11541_v24 = vld [vmem:[#allocation3 + $0x40] sm:$0xff] }
 0x659   :  { %4271 = vst.msk [vmem:[#allocation3 + $0xc1] sm:$0xff] %vm535_vm3, %v13798_v31  ;;  %4886 = vrot.lane.b32.xlu0 %v11469_v12, %s7931_s14  ;;  %v11497_v14 = vld [vmem:[#allocation3 + $0x51] sm:$0xff] }
 0x65a   :  { %4272 = vst.msk [vmem:[#allocation3 + $0xd1] sm:$0xff] %vm535_vm3, %v13797_v46  ;;  %4822 = vrot.lane.b32.xlu2 %v11471_v42, %s7930_s12  ;;  %v11501_v29 = vld [vmem:[#allocation3 + $0x62] sm:$0xff]  ;;  %v11551_v13 = vld [vmem:[#allocation3 + $0x50] sm:$0xff] }
 0x65b   :  { %4273 = vst.msk [vmem:[#allocation3 + $0xe1] sm:$0xff] %vm535_vm3, %v13796_v3  ;;  %4758 = vrot.lane.b32.xlu1 %v11477_v4, %s7929_s9  ;;  %v11503_v52 = vld [vmem:[#allocation3 + $0x61] sm:$0xff] }
 0x65c   :  { %4274 = vst.msk [vmem:[#allocation3 + $0xf1] sm:$0xff] %vm535_vm3, %v13795_v10  ;;  %v11509_v58 = vld [vmem:[#allocation3 + $0x71] sm:$0xff]  ;;  %v11555_v11 = vld [vmem:[#allocation3 + $0x60] sm:$0xff] }
 0x65d   :  { %4275 = vst.msk [vmem:[#allocation3 + $0x101] sm:$0xff] %vm535_vm3, %v13794_v36  ;;  %v11511_v45 = vld [vmem:[#allocation3 + $0x72] sm:$0xff] }
 0x65e   :  { %4276 = vst.msk [vmem:[#allocation3 + $0x111] sm:$0xff] %vm535_vm3, %v13793_v38  ;;  %v11525_v49 = vld [vmem:[#allocation3 + $0x82] sm:$0xff] }
 0x65f   :  { %4277 = vst.msk [vmem:[#allocation3 + $0x121] sm:$0xff] %vm535_vm3, %v13792_v28  ;;  %v11527_v53 = vld [vmem:[#allocation3 + $0x81] sm:$0xff]  ;;  %v11535_v54 = vld [vmem:[#allocation3 + $0xb1] sm:$0xff] }
 0x660   :  { %6023 = vst.msk [vmem:[#allocation3 + $0x18] sm:$0x3] %vm2385_vm12, %v14101_v2  ;;  %v11529_v20 = vld [vmem:[#allocation3 + $0x80] sm:$0xff]  ;;  %v11539_v15 = vld [vmem:[#allocation3 + $0xb2] sm:$0xff] }
 0x661   :  { %6025 = vst.msk [vmem:[#allocation3 + $0x28] sm:$0x3] %vm2385_vm12, %v14101_v2  ;;  %4568 = vrot.lane.b32.xlu0 %v11477_v4, %s7934_s17  ;;  %v11545_v57 = vld [vmem:[#allocation3 + $0xc1] sm:$0xff]  ;;  %v11563_v39 = vld [vmem:[#allocation3 + $0xd2] sm:$0xff] }
 0x662   :  { %6027 = vst.msk [vmem:[#allocation3 + $0x38] sm:$0x3] %vm2385_vm12, %v14101_v2  ;;  %4504 = vrot.lane.b32.xlu2 %v4358_v22, %s7925_s8  ;;  %v11547_v21 = vld [vmem:[#allocation3 + $0xc2] sm:$0xff]  ;;  %v11565_v35 = vld [vmem:[#allocation3 + $0xd1] sm:$0xff] }
 0x663   :  { %6029 = vst.msk [vmem:[#allocation3 + $0x48] sm:$0x3] %vm2385_vm12, %v14101_v2  ;;  %4440 = vrot.lane.b32.xlu1 %v4342_v33, %s7923_s27  ;;  %v11571_v6 = vld [vmem:[#allocation3 + $0xe1] sm:$0xff]  ;;  %v11577_v33 = vld [vmem:[#allocation3 + $0x70] sm:$0xff] }
 0x664   :  { %6031 = vst.msk [vmem:[#allocation3 + $0x58] sm:$0x3] %vm2385_vm12, %v14101_v2  ;;  %v11573_v22 = vld [vmem:[#allocation3 + $0xe2] sm:$0xff]  ;;  %v11581_v28 = vld [vmem:[#allocation3 + $0xf1] sm:$0xff] }
 0x665   :  { %6033 = vst.msk [vmem:[#allocation3 + $0x68] sm:$0x3] %vm2385_vm12, %v14101_v2  ;;  %v11583_v38 = vld [vmem:[#allocation3 + $0xf2] sm:$0xff]  ;;  %v11591_v10 = vld [vmem:[#allocation3 + $0x102] sm:$0xff]  ;;  %v11713_v47 = vpop.permute.xlu0 %4502 }
 0x666   :  { %6022 = vst.msk [vmem:[#allocation3 + $0x10] sm:$0xff] %vm535_vm3, %v14101_v2  ;;  %v11587_v36 = vld [vmem:[#allocation3 + $0xb0] sm:$0xff]  ;;  %v11593_v3 = vld [vmem:[#allocation3 + $0x101] sm:$0xff] }
 0x667   :  { %6035 = vst.msk [vmem:[#allocation3 + $0x78] sm:$0x3] %vm2385_vm12, %v14101_v2  ;;  %v11597_v46 = vld [vmem:[#allocation3 + $0x111] sm:$0xff]  ;;  %v11603_v30 = vld [vmem:[#allocation3 + $0xc0] sm:$0xff] }
 0x668   :  { %6024 = vst.msk [vmem:[#allocation3 + $0x20] sm:$0xff] %vm535_vm3, %v14101_v2  ;;  %v11599_v31 = vld [vmem:[#allocation3 + $0x112] sm:$0xff]  ;;  %v11611_v50 = vld [vmem:[#allocation3 + $0x121] sm:$0xff] }
 0x669   :  { %6026 = vst.msk [vmem:[#allocation3 + $0x30] sm:$0xff] %vm535_vm3, %v14101_v2  ;;  %4760 = vrot.lane.b32.xlu0 %v11520_v9, %s7929_s9  ;;  %v11613_v25 = vld [vmem:[#allocation3 + $0x120] sm:$0xff]  ;;  %v11623_v18 = vld [vmem:[#allocation3 + $0xd0] sm:$0xff] }
 0x66a   :  { %6036 = vst.msk [vmem:[#allocation3 + $0x80] sm:$0xff] %vm535_vm3, %v14101_v2  ;;  %4696 = vrot.lane.b32.xlu2 %v11469_v12, %s7932_s15  ;;  %v11615_v23 = vld [vmem:[#allocation3 + $0x122] sm:$0xff]  ;;  %v11631_v32 = vld [vmem:[#allocation3 + $0xf0] sm:$0xff] }
 0x66b   :  { %6037 = vst.msk [vmem:[#allocation3 + $0x88] sm:$0x3] %vm2385_vm12, %v14101_v2  ;;  %4632 = vrot.lane.b32.xlu1 %v11471_v42, %s7933_s16  ;;  %v11635_v7 = vld [vmem:[#allocation3 + $0x100] sm:$0xff]  ;;  %v11639_v0 = vld [vmem:[#allocation3 + $0x110] sm:$0xff] }
 0x66c   :  { %6043 = vst.msk [vmem:[#allocation3 + $0xb8] sm:$0x3] %vm2385_vm12, %v14101_v2 }
 0x66d   :  { %6028 = vst.msk [vmem:[#allocation3 + $0x40] sm:$0xff] %vm535_vm3, %v14101_v2 }
 0x66e   :  { %6045 = vst.msk [vmem:[#allocation3 + $0xc8] sm:$0x3] %vm2385_vm12, %v14101_v2 }
 0x66f   :  { %6030 = vst.msk [vmem:[#allocation3 + $0x50] sm:$0xff] %vm535_vm3, %v14101_v2 }
 0x670   :  { %6032 = vst.msk [vmem:[#allocation3 + $0x60] sm:$0xff] %vm535_vm3, %v14101_v2 }
 0x671   :  { %6047 = vst.msk [vmem:[#allocation3 + $0xd8] sm:$0x3] %vm2385_vm12, %v14101_v2  ;;  %4442 = vrot.lane.b32.xlu0 %v11471_v42, %s7923_s27  ;;  %v11627_v42 = vld [vmem:[#allocation3 + $0xe0] sm:$0xff] }
 0x672   :  { %6049 = vst.msk [vmem:[#allocation3 + $0xe8] sm:$0x3] %vm2385_vm12, %v14101_v2  ;;  %4888 = vrot.lane.b32.xlu2 %v11483_v62, %s7931_s14 }
 0x673   :  { %6034 = vst.msk [vmem:[#allocation3 + $0x70] sm:$0xff] %vm535_vm3, %v14101_v2  ;;  %4824 = vrot.lane.b32.xlu1 %v11485_v60, %s7930_s12 }
 0x674   :  { %6051 = vst.msk [vmem:[#allocation3 + $0xf8] sm:$0x3] %vm2385_vm12, %v14101_v2 }
 0x675   :  { %14130 = vst [vmem:[#allocation54_spill] sm:$0xff] %v11591_v10 }
 0x676   :  { %14131 = vst [vmem:[#allocation56_spill] sm:$0xff] %v11593_v3 }
 0x677   :  { %6042 = vst.msk [vmem:[#allocation3 + $0xb0] sm:$0xff] %vm535_vm3, %v14101_v2 }
 0x678   :  { %14132 = vst [vmem:[#allocation6_spill] sm:$0xff] %v11597_v46 }
 0x679   :  { %14133 = vst [vmem:[#allocation8_spill] sm:$0xff] %v11599_v31  ;;  %4634 = vrot.lane.b32.xlu0 %v11485_v60, %s7933_s16 }
 0x67a   :  { %6053 = vst.msk [vmem:[#allocation3 + $0x108] sm:$0x3] %vm2385_vm12, %v14101_v2  ;;  %4570 = vrot.lane.b32.xlu2 %v11520_v9, %s7934_s17 }
 0x67b   :  { %6055 = vst.msk [vmem:[#allocation3 + $0x118] sm:$0x3] %vm2385_vm12, %v14101_v2  ;;  %4506 = vrot.lane.b32.xlu1 %v11469_v12, %s7925_s8  ;;  %v11673_v12 = vpop.permute.xlu2 %4438 }
 0x67c   :  { %14134 = vst [vmem:[#allocation52_spill] sm:$0xff] %v11611_v50 }
 0x67d   :  { %14135 = vst [vmem:[#allocation26_spill] sm:$0xff] %v11613_v25 }
 0x67e   :  { %14136 = vst [vmem:[#allocation22_spill] sm:$0xff] %v11615_v23  ;;  %v11777_v23 = vsub.f32 %v5065_v43, %v11764_v37  ;;  %v5064_v43 = vld [vmem:[%s13737_s4 + $0x10] sm:$0xff] }
 0x67f   :  { %6044 = vst.msk [vmem:[#allocation3 + $0xc0] sm:$0xff] %vm535_vm3, %v14101_v2 }
 0x680   :  { %6056 = vst.msk [vmem:[#allocation3 + $0x120] sm:$0xff] %vm535_vm3, %v14101_v2  ;;  %v13836_v50 = vand.u32 4294901760, %v11777_v23 }
 0x681   :  { %6057 = vst.msk [vmem:[#allocation3 + $0x128] sm:$0x3] %vm2385_vm12, %v14101_v2  ;;  %4826 = vrot.lane.b32.xlu0 %v11489_v40, %s7930_s12 }
 0x682   :  { %6046 = vst.msk [vmem:[#allocation3 + $0xd0] sm:$0xff] %vm535_vm3, %v14101_v2  ;;  %4762 = vrot.lane.b32.xlu2 %v11541_v24, %s7929_s9 }
 0x683   :  { %6048 = vst.msk [vmem:[#allocation3 + $0xe0] sm:$0xff] %vm535_vm3, %v14101_v2  ;;  %4698 = vrot.lane.b32.xlu1 %v11483_v62, %s7932_s15 }
 0x684   :  { %14137 = vst [vmem:[#allocation17_spill] sm:$0xff] %v11635_v7 }
 0x685   :  { %6050 = vst.msk [vmem:[#allocation3 + $0xf0] sm:$0xff] %vm535_vm3, %v14101_v2 }
 0x686   :  { %14138 = vst [vmem:[#allocation27_spill] sm:$0xff] %v11639_v0 }
 0x687   :  { %6052 = vst.msk [vmem:[#allocation3 + $0x100] sm:$0xff] %vm535_vm3, %v14101_v2 }
 0x688   :  { %6054 = vst.msk [vmem:[#allocation3 + $0x110] sm:$0xff] %vm535_vm3, %v14101_v2 }
 0x689   :  { %6020 = vst.msk [vmem:[#allocation3] sm:$0xff] %vm535_vm3, %v14101_v2  ;;  %4508 = vrot.lane.b32.xlu0 %v11483_v62, %s7925_s8  ;;  %v11681_v62 = vld [vmem:[#allocation3 + $0xa0] sm:$0xff] }
 0x68a   :  { %4444 = vrot.lane.b32.xlu2 %v11485_v60, %s7923_s27  ;;  %14139 = vst [vmem:[#allocation40_spill] sm:$0xff] %v11681_v62  ;;  %v5070_v60 = vld [vmem:[%s13737_s4 + $0x40] sm:$0xff] }
 0x68b   :  { %4890 = vrot.lane.b32.xlu1 %v11493_v51, %s7931_s14  ;;  %6040 = vst.msk [vmem:[#allocation3 + $0xa0] sm:$0xff] %vm535_vm3, %v14101_v2  ;;  %v11688_v17 = vand.u32 4294901760, %v5070_v60 }
 0x68d   :  { %v11691_v27 = vsub.f32 %v5070_v60, %v11688_v17  ;;  %5523 = vmatpush.msrb.mxu1 %v11688_v17  ;;  %5128 = vmatpush.msrb.mxu2 %v11688_v17 }
 0x68f   :  { %v13816_v41 = vand.u32 4294901760, %v11691_v27  ;;  %5409 = vmatpush.msrb.mxu0 %v11691_v27  ;;  %5525 = vmatpush.msrb.mxu1 %v11711_v56 }
 0x690   :  { %v11701_v34 = vpop.permute.xlu2 %4900  ;;  %5130 = vmatpush.msrb.mxu2 %v11711_v56 }
 0x691   :  { %4700 = vrot.lane.b32.xlu0 %v11493_v51, %s7932_s15  ;;  %14140 = vst [vmem:[#allocation48_spill] sm:$0xff] %v11701_v34  ;;  %v5284_v60 = vsub.f32 %v11691_v27, %v13816_v41  ;;  %v5067_v41 = vld [vmem:[%s13737_s4 + $0x28] sm:$0xff] }
 0x692   :  { %4636 = vrot.lane.b32.xlu2 %v11489_v40, %s7933_s16  ;;  %v11733_v63 = vand.u32 4294901760, %v5067_v41 }
 0x693   :  { %4572 = vrot.lane.b32.xlu1 %v11541_v24, %s7934_s17  ;;  %v5285_v1 = vand.u32 4294901760, %v5284_v60  ;;  %v5066_v60 = vld [vmem:[%s13737_s4 + $0x20] sm:$0xff] }
 0x694   :  { %v11748_v48 = vsub.f32 %v5067_v41, %v11733_v63 }
 0x695   :  { %5286 = vmatpush.msrb.mxu3 %v5285_v1  ;;  %v11735_v1 = vand.u32 4294901760, %v5066_v60 }
 0x696   :  { %v13832_v41 = vand.u32 4294901760, %v11748_v48 }
 0x697   :  { %v11753_v19 = vsub.f32 %v5066_v60, %v11735_v1 }
 0x699   :  { %4892 = vrot.lane.b32.xlu0 %v11495_v61, %s7931_s14  ;;  %v13834_v60 = vand.u32 4294901760, %v11753_v19 }
 0x69a   :  { %4828 = vrot.lane.b32.xlu2 %v11497_v14, %s7930_s12 }
 0x69b   :  { %4764 = vrot.lane.b32.xlu1 %v11551_v13, %s7929_s9  ;;  %v5308_v25 = vsub.f32 %v11753_v19, %v13834_v60  ;;  %v11804_v60 = vand.u32 4294901760, %v5064_v43 }
 0x6a1   :  { %4574 = vrot.lane.b32.xlu0 %v11551_v13, %s7934_s17 }
 0x6a2   :  { %4510 = vrot.lane.b32.xlu2 %v11493_v51, %s7925_s8  ;;  %v11716_v51 = vsub.f32 %v5069_v26, %v11711_v56 }
 0x6a3   :  { %4446 = vrot.lane.b32.xlu1 %v11489_v40, %s7923_s27  ;;  %v5068_v40 = vld [vmem:[%s13737_s4 + $0x30] sm:$0xff] }
 0x6a4   :  { %v13825_v26 = vand.u32 4294901760, %v11716_v51  ;;  %v11730_v5 = vand.u32 4294901760, %v5068_v40  ;;  %5412 = vmatpush.msrb.mxu0 %v11716_v51 }
 0x6a6   :  { %v5290_v44 = vsub.f32 %v11716_v51, %v13825_v26  ;;  %v11745_v55 = vsub.f32 %v5068_v40, %v11730_v5  ;;  %5527 = vmatpush.msrb.mxu1 %v11730_v5  ;;  %5132 = vmatpush.msrb.mxu2 %v11730_v5 }
 0x6a8   :  { %v5291_v26 = vand.u32 4294901760, %v5290_v44  ;;  %v13830_v40 = vand.u32 4294901760, %v11745_v55  ;;  %5415 = vmatpush.msrb.mxu0 %v11745_v55  ;;  %5529 = vmatpush.msrb.mxu1 %v11733_v63  ;;  %v5302_v44 = vsub.f32 %v11748_v48, %v13832_v41  ;;  %v11788_v41 = vpop.permute.xlu1 %4836 }
 0x6a9   :  { %4766 = vrot.lane.b32.xlu0 %v11555_v11, %s7929_s9  ;;  %5134 = vmatpush.msrb.mxu2 %v11733_v63  ;;  %14142 = vst [vmem:[#allocation13_spill] sm:$0xff] %v11788_v41 }
 0x6aa   :  { %4702 = vrot.lane.b32.xlu2 %v11495_v61, %s7932_s15  ;;  %5292 = vmatpush.msrb.mxu3 %v5291_v26  ;;  %v5296_v2 = vsub.f32 %v11745_v55, %v13830_v40  ;;  %v11784_v26 = vpop.permute.xlu0 %4772  ;;  %v5303_v31 = vand.u32 4294901760, %v5302_v44  ;;  %v5309_v44 = vand.u32 4294901760, %v5308_v25  ;;  %v5318_v25 = vsub.f32 %v5064_v43, %v11804_v60 }
 0x6ab   :  { %4638 = vrot.lane.b32.xlu1 %v11497_v14, %s7933_s16  ;;  %5418 = vmatpush.msrb.mxu0 %v11748_v48  ;;  %14141 = vst [vmem:[#allocation53_spill] sm:$0xff] %v11784_v26 }
 0x6ac   :  { %v11759_v8 = vpop.permute.xlu2 %4630  ;;  %5531 = vmatpush.msrb.mxu1 %v11735_v1  ;;  %v5297_v40 = vand.u32 4294901760, %v5296_v2  ;;  %5136 = vmatpush.msrb.mxu2 %v11735_v1  ;;  %v5314_v2 = vsub.f32 %v11777_v23, %v13836_v50  ;;  %v5062_v50 = vld [vmem:[%s13737_s4] sm:$0xff]  ;;  %v5319_v62 = vand.u32 4294901760, %v5318_v25 }
 0x6ad   :  { %5421 = vmatpush.msrb.mxu0 %v11753_v19  ;;  %v11819_v41 = vand.u32 4294901760, %v5062_v50 }
 0x6ae   :  { %5533 = vmatpush.msrb.mxu1 %v11764_v37  ;;  %5298 = vmatpush.msrb.mxu3 %v5297_v40  ;;  %v5315_v34 = vand.u32 4294901760, %v5314_v2 }
 0x6af   :  { %5424 = vmatpush.msrb.mxu0 %v11777_v23  ;;  %5138 = vmatpush.msrb.mxu2 %v11764_v37  ;;  %v5330_v0 = vsub.f32 %v5062_v50, %v11819_v41 }
 0x6b0   :  { %5304 = vmatpush.msrb.mxu3 %v5303_v31  ;;  %5535 = vmatpush.msrb.mxu1 %v11804_v60  ;;  %v5320_v31 = vsub.f32 %v5318_v25, %v5319_v62  ;;  %v11835_v50 = vpop.permute.xlu1 %4518 }
 0x6b1   :  { %4448 = vrot.lane.b32.xlu0 %v11497_v14, %s7923_s27  ;;  %v5063_v14 = vld [vmem:[%s13737_s4 + $0x8] sm:$0xff]  ;;  %5140 = vmatpush.msrb.mxu2 %v11804_v60  ;;  %v5331_v43 = vand.u32 4294901760, %v5330_v0 }
 0x6b2   :  { %4894 = vrot.lane.b32.xlu2 %v11501_v29, %s7931_s14  ;;  %v11817_v40 = vand.u32 4294901760, %v5063_v14  ;;  %5310 = vmatpush.msrb.mxu3 %v5309_v44  ;;  %v11831_v44 = vpop.permute.xlu0 %4454 }
 0x6b3   :  { %4830 = vrot.lane.b32.xlu1 %v11503_v52, %s7930_s12  ;;  %5427 = vmatpush.msrb.mxu0 %v5318_v25  ;;  %14143 = vst [vmem:[#allocation19_spill] sm:$0xff] %v11831_v44  ;;  %v14144_v44 = vand.u32 4294901760, %v11691_v27 }
 0x6b4   :  { %v11806_v46 = vpop.permute.xlu2 %4822  ;;  %v5324_v26 = vsub.f32 %v5063_v14, %v11817_v40  ;;  %5537 = vmatpush.msrb.mxu1 %v11817_v40  ;;  %5142 = vmatpush.msrb.mxu2 %v11817_v40  ;;  %v5321_v14 = vand.u32 4294901760, %v5320_v31 }
 0x6b5   :  { %5316 = vmatpush.msrb.mxu3 %v5315_v34  ;;  %v5332_v34 = vsub.f32 %v5330_v0, %v5331_v43 }
 0x6b6   :  { %v5325_v2 = vand.u32 4294901760, %v5324_v26  ;;  %5430 = vmatpush.msrb.mxu0 %v5324_v26  ;;  %5539 = vmatpush.msrb.mxu1 %v11819_v41 }
 0x6b7   :  { %5144 = vmatpush.msrb.mxu2 %v11819_v41  ;;  %5322 = vmatpush.msrb.mxu3 %v5321_v14  ;;  %v5333_v10 = vand.u32 4294901760, %v5332_v34 }
 0x6b8   :  { %v5326_v3 = vsub.f32 %v5324_v26, %v5325_v2  ;;  %5433 = vmatpush.msrb.mxu0 %v5330_v0  ;;  %v14146_v26 = vand.u32 4294901760, %v11745_v55  ;;  %v4934_v0 = vsel %vm535_vm3, %v11651_v59, %v11673_v12  ;;  %v14147_v55 = vand.u32 4294901760, %v11748_v48 }
 0x6b9   :  { %4640 = vrot.lane.b32.xlu0 %v11503_v52, %s7933_s16  ;;  %5647 = vmatpush.msra.mxu2 %v14144_v44 }
 0x6ba   :  { %4576 = vrot.lane.b32.xlu2 %v11555_v11, %s7934_s17  ;;  %v5327_v7 = vand.u32 4294901760, %v5326_v3 }
 0x6bb   :  { %4512 = vrot.lane.b32.xlu1 %v11495_v61, %s7925_s8  ;;  %v14145_v61 = vand.u32 4294901760, %v11716_v51  ;;  %v14148_v51 = vand.u32 4294901760, %v11753_v19 }
 0x6bc   :  { %v11837_v25 = vpop.permute.xlu2 %4504  ;;  %5328 = vmatpush.msrb.mxu3 %v5327_v7 }
 0x6bd   :  { %5651 = vmatpush.msra.mxu2 %v14145_v61 }
 0x6be   :  { %5334 = vmatpush.msrb.mxu3 %v5333_v10  ;;  %v4950_v10 = vsel %vm31_vm0, %v4934_v0, %v11713_v47 }
 0x6bf   :  { %5655 = vmatpush.msra.mxu2 %v14146_v26 }
 0x6c0   :  { %5753 = vmatpush.msra.mxu3 %v11688_v17  ;;  %v14149_v17 = vand.u32 4294901760, %v11777_v23 }
 0x6c1   :  { %4832 = vrot.lane.b32.xlu0 %v11509_v58, %s7930_s12  ;;  %5659 = vmatpush.msra.mxu2 %v14147_v55 }
 0x6c2   :  { %4768 = vrot.lane.b32.xlu2 %v11577_v33, %s7929_s9  ;;  %5755 = vmatpush.msra.mxu3 %v11711_v56 }
 0x6c3   :  { %4704 = vrot.lane.b32.xlu1 %v11501_v29, %s7932_s15  ;;  %v4695_v7 = vpop.permute.xlu0 %4694  ;;  %5663 = vmatpush.msra.mxu2 %v14148_v51 }
 0x6c4   :  { %v4697_v27 = vpop.permute.xlu2 %4696  ;;  %5757 = vmatpush.msra.mxu3 %v11730_v5 }
 0x6c5   :  { %v4567_v3 = vpop.permute.xlu1 %4566  ;;  %5667 = vmatpush.msra.mxu2 %v14149_v17 }
 0x6c6   :  { %v4966_v59 = vsel %vm602_vm7, %v4950_v10, %v4567_v3  ;;  %5759 = vmatpush.msra.mxu3 %v11733_v63 }
 0x6c7   :  { %v4982_v48 = vsel %vm636_vm9, %v4966_v59, %v11759_v8  ;;  %5671 = vmatpush.msra.mxu2 %v5319_v62 }
 0x6c8   :  { %5761 = vmatpush.msra.mxu3 %v11735_v1  ;;  %v4998_v63 = vsel %vm3163_vm1, %v4982_v48, %v4695_v7 }
 0x6c9   :  { %4514 = vrot.lane.b32.xlu0 %v11501_v29, %s7925_s8  ;;  %5675 = vmatpush.msra.mxu2 %v5325_v2 }
 0x6ca   :  { %4450 = vrot.lane.b32.xlu2 %v11503_v52, %s7923_s27  ;;  %5763 = vmatpush.msra.mxu3 %v11764_v37 }
 0x6cb   :  { %4896 = vrot.lane.b32.xlu1 %v11511_v45, %s7931_s14  ;;  %v4887_v19 = vpop.permute.xlu0 %4886  ;;  %5679 = vmatpush.msra.mxu2 %v5331_v43 }
 0x6cc   :  { %v4889_v5 = vpop.permute.xlu2 %4888  ;;  %5765 = vmatpush.msra.mxu3 %v11804_v60 }
 0x6cd   :  { %v4759_v47 = vpop.permute.xlu1 %4758 }
 0x6ce   :  { %v5014_v8 = vsel %vm3180_vm2, %v4998_v63, %v4759_v47  ;;  %5767 = vmatpush.msra.mxu3 %v11817_v40 }
 0x6cf   :  { %v5030_v23 = vsel %vm3197_vm4, %v5014_v8, %v11806_v46 }
 0x6d0   :  { %v5046_v56 = vsel %vm3214_vm5, %v5030_v23, %v4887_v19  ;;  %5769 = vmatpush.msra.mxu3 %v11819_v41 }
 0x6d1   :  { %v5073_v29 = vsel %vm3241_vm6, %v5046_v56, 0  ;;  %4706 = vrot.lane.b32.xlu0 %v11511_v45, %s7932_s15 }
 0x6d2   :  { %v11887_v52 = vand.u32 4294901760, %v5073_v29  ;;  %4642 = vrot.lane.b32.xlu2 %v11509_v58, %s7933_s16 }
 0x6d3   :  { %4578 = vrot.lane.b32.xlu1 %v11577_v33, %s7934_s17  ;;  %v4569_v46 = vpop.permute.xlu0 %4568 }
 0x6d4   :  { %v5146_v37 = vsub.f32 %v5073_v29, %v11887_v52  ;;  %5336 = vmatmul.f32.vlgmr.msrb.gmra.mxu3 %v11887_v52  ;;  %v4571_v12 = vpop.permute.xlu2 %4570 }
 0x6d5   :  { %v4441_v62 = vpop.permute.xlu1 %4440 }
 0x6d6   :  { %5436 = vmatmul.f32.vlgmr.msrb.gmra.mxu0 %v5146_v37  ;;  %v5147_v1 = vand.u32 4294901760, %v5146_v37  ;;  %v4935_v60 = vsel %vm535_vm3, %v11435_v16, %v4441_v62 }
 0x6d7   :  { %v4951_v31 = vsel %vm31_vm0, %v4935_v60, %v11837_v25 }
 0x6d8   :  { %5543 = vmatmul.f32.vlgmr.msrb.gmra.mxu1 %v5147_v1  ;;  %v5148_v40 = vsub.f32 %v5146_v37, %v5147_v1  ;;  %v4967_v16 = vsel %vm602_vm7, %v4951_v31, %v4569_v46 }
 0x6d9   :  { %4898 = vrot.lane.b32.xlu0 %v11525_v49, %s7931_s14 }
 0x6da   :  { %4834 = vrot.lane.b32.xlu2 %v11527_v53, %s7930_s12  ;;  %v5149_v41 = vand.u32 4294901760, %v5148_v40 }
 0x6db   :  { %4770 = vrot.lane.b32.xlu1 %v11529_v20, %s7929_s9  ;;  %v4761_v2 = vpop.permute.xlu0 %4760 }
 0x6dc   :  { %5150 = vmatmul.f32.vlgmr.msrb.gmra.mxu2 %v5149_v41  ;;  %v4763_v43 = vpop.permute.xlu2 %4762 }
 0x6dd   :  { %v4633_v44 = vpop.permute.xlu1 %4632 }
 0x6de   :  { %v4983_v14 = vsel %vm636_vm9, %v4967_v16, %v4633_v44 }
 0x6df   :  { %v4999_v34 = vsel %vm3163_vm1, %v4983_v14, %v4697_v27 }
 0x6e0   :  { %v5015_v0 = vsel %vm3180_vm2, %v4999_v34, %v4761_v2 }
 0x6e1   :  { %4580 = vrot.lane.b32.xlu0 %v11529_v20, %s7934_s17 }
 0x6e2   :  { %4516 = vrot.lane.b32.xlu2 %v11511_v45, %s7925_s8 }
 0x6e3   :  { %4452 = vrot.lane.b32.xlu1 %v11509_v58, %s7923_s27  ;;  %v4443_v25 = vpop.permute.xlu0 %4442 }
 0x6e4   :  { %v4445_v61 = vpop.permute.xlu2 %4444  ;;  %v4936_v59 = vsel %vm535_vm3, %v11477_v4, %v4443_v25 }
 0x6e5   :  { %v4825_v26 = vpop.permute.xlu1 %4824  ;;  %v4937_v41 = vsel %vm535_vm3, %v11520_v9, %v4445_v61 }
 0x6e6   :  { %v5031_v7 = vsel %vm3197_vm4, %v5015_v0, %v4825_v26 }
 0x6e7   :  { %v5047_v55 = vsel %vm3214_vm5, %v5031_v7, %v4889_v5 }
 0x6e8   :  { %v5076_v27 = vsel %vm3241_vm6, %v5047_v55, 0 }
 0x6e9   :  { %v11921_v3 = vand.u32 4294901760, %v5076_v27  ;;  %4646 = vrot.lane.b32.xlu0 %v11535_v54, %s7933_s16 }
 0x6ea   :  { %4708 = vrot.lane.b32.xlu2 %v11525_v49, %s7932_s15 }
 0x6eb   :  { %4644 = vrot.lane.b32.xlu1 %v11527_v53, %s7933_s16  ;;  %5340 = vmatmul.f32.gmra.mxu3 %v11921_v3  ;;  %v5154_v58 = vsub.f32 %v5076_v27, %v11921_v3  ;;  %v4635_v45 = vpop.permute.xlu0 %4634 }
 0x6ec   :  { %v4637_v20 = vpop.permute.xlu2 %4636 }
 0x6ed   :  { %v4507_v10 = vpop.permute.xlu1 %4506  ;;  %5441 = vmatmul.f32.gmra.mxu0 %v5154_v58  ;;  %v5155_v51 = vand.u32 4294901760, %v5154_v58 }
 0x6ee   :  { %v4952_v48 = vsel %vm31_vm0, %v4936_v59, %v4507_v10 }
 0x6ef   :  { %5549 = vmatmul.f32.gmra.mxu1 %v5155_v51  ;;  %v5156_v17 = vsub.f32 %v5154_v58, %v5155_v51  ;;  %v4968_v53 = vsel %vm602_vm7, %v4952_v48, %v4571_v12 }
 0x6f0   :  { %v4984_v47 = vsel %vm636_vm9, %v4968_v53, %v4635_v45 }
 0x6f1   :  { %v5157_v49 = vand.u32 4294901760, %v5156_v17  ;;  %4838 = vrot.lane.b32.xlu0 %v11545_v57, %s7930_s12 }
 0x6f2   :  { %4582 = vrot.lane.b32.xlu2 %v11587_v36, %s7934_s17 }
 0x6f3   :  { %4710 = vrot.lane.b32.xlu1 %v11539_v15, %s7932_s15  ;;  %5158 = vmatmul.f32.gmra.mxu2 %v5157_v49  ;;  %v4827_v19 = vpop.permute.xlu0 %4826 }
 0x6f4   :  { %v4829_v5 = vpop.permute.xlu2 %4828 }
 0x6f5   :  { %v4699_v4 = vpop.permute.xlu1 %4698 }
 0x6f6   :  { %v5000_v63 = vsel %vm3163_vm1, %v4984_v47, %v4699_v4 }
 0x6f7   :  { %v5016_v8 = vsel %vm3180_vm2, %v5000_v63, %v4763_v43 }
 0x6f8   :  { %v5032_v37 = vsel %vm3197_vm4, %v5016_v8, %v4827_v19 }
 0x6f9   :  { %4520 = vrot.lane.b32.xlu0 %v11539_v15, %s7925_s8 }
 0x6fa   :  { %4774 = vrot.lane.b32.xlu2 %v11603_v30, %s7929_s9 }
 0x6fb   :  { %4902 = vrot.lane.b32.xlu1 %v11547_v21, %s7931_s14  ;;  %v4509_v23 = vpop.permute.xlu0 %4508 }
 0x6fc   :  { %v4511_v56 = vpop.permute.xlu2 %4510  ;;  %v4953_v2 = vsel %vm31_vm0, %v4937_v41, %v4509_v23 }
 0x6fd   :  { %v4891_v29 = vpop.permute.xlu1 %4890 }
 0x6fe   :  { %v5048_v46 = vsel %vm3214_vm5, %v5032_v37, %v4891_v29 }
 0x6ff   :  { %v5079_v12 = vsel %vm3241_vm6, %v5048_v46, 0 }
 0x700   :  { %v11953_v62 = vand.u32 4294901760, %v5079_v12 }
 0x701   :  { %4712 = vrot.lane.b32.xlu0 %v11547_v21, %s7932_s15 }
 0x702   :  { %v5162_v1 = vsub.f32 %v5079_v12, %v11953_v62  ;;  %5344 = vmatmul.f32.gmra.mxu3 %v11953_v62  ;;  %4456 = vrot.lane.b32.xlu2 %v11535_v54, %s7923_s27 }
 0x703   :  { %4584 = vrot.lane.b32.xlu1 %v11603_v30, %s7934_s17  ;;  %v4701_v15 = vpop.permute.xlu0 %4700 }
 0x704   :  { %5446 = vmatmul.f32.gmra.mxu0 %v5162_v1  ;;  %v4703_v60 = vpop.permute.xlu2 %4702  ;;  %v5163_v40 = vand.u32 4294901760, %v5162_v1 }
 0x705   :  { %v4573_v31 = vpop.permute.xlu1 %4572 }
 0x706   :  { %5555 = vmatmul.f32.gmra.mxu1 %v5163_v40  ;;  %v5164_v43 = vsub.f32 %v5162_v1, %v5163_v40  ;;  %v4969_v44 = vsel %vm602_vm7, %v4953_v2, %v4573_v31 }
 0x707   :  { %v4985_v54 = vsel %vm636_vm9, %v4969_v44, %v4637_v20 }
 0x708   :  { %v5165_v16 = vand.u32 4294901760, %v5164_v43  ;;  %v5001_v25 = vsel %vm3163_vm1, %v4985_v54, %v4701_v15 }
 0x709   :  { %4904 = vrot.lane.b32.xlu0 %v11563_v39, %s7931_s14 }
 0x70a   :  { %5166 = vmatmul.f32.gmra.mxu2 %v5165_v16  ;;  %4648 = vrot.lane.b32.xlu2 %v11545_v57, %s7933_s16 }
 0x70b   :  { %4776 = vrot.lane.b32.xlu1 %v11623_v18, %s7929_s9  ;;  %v4893_v9 = vpop.permute.xlu0 %4892 }
 0x70c   :  { %v4895_v14 = vpop.permute.xlu2 %4894 }
 0x70d   :  { %v4765_v34 = vpop.permute.xlu1 %4764 }
 0x70e   :  { %v5017_v61 = vsel %vm3180_vm2, %v5001_v25, %v4765_v34 }
 0x70f   :  { %v5033_v26 = vsel %vm3197_vm4, %v5017_v61, %v4829_v5 }
 0x710   :  { %v5049_v0 = vsel %vm3214_vm5, %v5033_v26, %v4893_v9 }
 0x711   :  { %v5082_v7 = vsel %vm3241_vm6, %v5049_v0, 0  ;;  %4586 = vrot.lane.b32.xlu0 %v11623_v18, %s7934_s17 }
 0x712   :  { %v11981_v55 = vand.u32 4294901760, %v5082_v7  ;;  %4840 = vrot.lane.b32.xlu2 %v11565_v35, %s7930_s12 }
 0x713   :  { %4458 = vrot.lane.b32.xlu1 %v11545_v57, %s7923_s27  ;;  %v4575_v27 = vpop.permute.xlu0 %4574 }
 0x714   :  { %5348 = vmatmul.f32.gmra.mxu3 %v11981_v55  ;;  %v4577_v58 = vpop.permute.xlu2 %4576  ;;  %v5170_v45 = vsub.f32 %v5082_v7, %v11981_v55 }
 0x715   :  { %v4447_v20 = vpop.permute.xlu1 %4446 }
 0x716   :  { %5451 = vmatmul.f32.gmra.mxu0 %v5170_v45  ;;  %v5171_v10 = vand.u32 4294901760, %v5170_v45  ;;  %v4938_v51 = vsel %vm535_vm3, %v11541_v24, %v4447_v20 }
 0x717   :  { %v4954_v57 = vsel %vm31_vm0, %v4938_v51, %v4511_v56 }
 0x718   :  { %5561 = vmatmul.f32.gmra.mxu1 %v5171_v10  ;;  %v5172_v59 = vsub.f32 %v5170_v45, %v5171_v10  ;;  %v4970_v24 = vsel %vm602_vm7, %v4954_v57, %v4575_v27  ;;  %v14151_v57 = vld [vmem:[#allocation17_spill] sm:$0xff] }
 0x719   :  { %4778 = vrot.lane.b32.xlu0 %v11627_v42, %s7929_s9 }
 0x71a   :  { %v5173_v17 = vand.u32 4294901760, %v5172_v59  ;;  %4522 = vrot.lane.b32.xlu2 %v11547_v21, %s7925_s8 }
 0x71b   :  { %4650 = vrot.lane.b32.xlu1 %v11565_v35, %s7933_s16  ;;  %v4767_v48 = vpop.permute.xlu0 %4766 }
 0x71c   :  { %5174 = vmatmul.f32.gmra.mxu2 %v5173_v17  ;;  %v4769_v49 = vpop.permute.xlu2 %4768  ;;  %v14150_v17 = vld [vmem:[#allocation54_spill] sm:$0xff] }
 0x71d   :  { %v4639_v53 = vpop.permute.xlu1 %4638 }
 0x71e   :  { %v4986_v19 = vsel %vm636_vm9, %v4970_v24, %v4639_v53 }
 0x71f   :  { %v5002_v5 = vsel %vm3163_vm1, %v4986_v19, %v4703_v60 }
 0x720   :  { %v5018_v63 = vsel %vm3180_vm2, %v5002_v5, %v4767_v48 }
 0x721   :  { %4460 = vrot.lane.b32.xlu0 %v11565_v35, %s7923_s27 }
 0x722   :  { %4714 = vrot.lane.b32.xlu2 %v11563_v39, %s7932_s15 }
 0x723   :  { %4842 = vrot.lane.b32.xlu1 %v11571_v6, %s7930_s12  ;;  %v4449_v21 = vpop.permute.xlu0 %4448 }
 0x724   :  { %v4451_v4 = vpop.permute.xlu2 %4450  ;;  %v4939_v15 = vsel %vm535_vm3, %v11551_v13, %v4449_v21 }
 0x725   :  { %v4831_v47 = vpop.permute.xlu1 %4830 }
 0x726   :  { %v5034_v8 = vsel %vm3197_vm4, %v5018_v63, %v4831_v47  ;;  %v14152_v47 = vld [vmem:[#allocation56_spill] sm:$0xff] }
 0x727   :  { %v5050_v23 = vsel %vm3214_vm5, %v5034_v8, %v4895_v14 }
 0x728   :  { %v5085_v56 = vsel %vm3241_vm6, %v5050_v23, 0 }
 0x729   :  { %v12011_v29 = vand.u32 4294901760, %v5085_v56  ;;  %4652 = vrot.lane.b32.xlu0 %v11571_v6, %s7933_s16 }
 0x72a   :  { %4906 = vrot.lane.b32.xlu2 %v11573_v22, %s7931_s14 }
 0x72b   :  { %4524 = vrot.lane.b32.xlu1 %v11563_v39, %s7925_s8  ;;  %v5178_v35 = vsub.f32 %v5085_v56, %v12011_v29  ;;  %5352 = vmatmul.f32.gmra.mxu3 %v12011_v29  ;;  %v4641_v37 = vpop.permute.xlu0 %4640 }
 0x72c   :  { %v4643_v46 = vpop.permute.xlu2 %4642 }
 0x72d   :  { %v4513_v12 = vpop.permute.xlu1 %4512  ;;  %5456 = vmatmul.f32.gmra.mxu0 %v5178_v35  ;;  %v5179_v1 = vand.u32 4294901760, %v5178_v35 }
 0x72e   :  { %v4955_v40 = vsel %vm31_vm0, %v4939_v15, %v4513_v12 }
 0x72f   :  { %5567 = vmatmul.f32.gmra.mxu1 %v5179_v1  ;;  %v5180_v60 = vsub.f32 %v5178_v35, %v5179_v1  ;;  %v4971_v39 = vsel %vm602_vm7, %v4955_v40, %v4577_v58  ;;  %v4940_v58 = vsel %vm535_vm3, %v11555_v11, %v4451_v4  ;;  %v14153_v1 = vld [vmem:[#allocation27_spill] sm:$0xff] }
 0x730   :  { %v4987_v43 = vsel %vm636_vm9, %v4971_v39, %v4641_v37 }
 0x731   :  { %v5181_v41 = vand.u32 4294901760, %v5180_v60  ;;  %4844 = vrot.lane.b32.xlu0 %v11581_v28, %s7930_s12 }
 0x732   :  { %4588 = vrot.lane.b32.xlu2 %v11627_v42, %s7934_s17 }
 0x733   :  { %4716 = vrot.lane.b32.xlu1 %v11573_v22, %s7932_s15  ;;  %5182 = vmatmul.f32.gmra.mxu2 %v5181_v41  ;;  %v4833_v31 = vpop.permute.xlu0 %4832 }
 0x734   :  { %v4835_v2 = vpop.permute.xlu2 %4834 }
 0x735   :  { %v4705_v13 = vpop.permute.xlu1 %4704 }
 0x736   :  { %v5003_v44 = vsel %vm3163_vm1, %v4987_v43, %v4705_v13  ;;  %v14155_v13 = vld [vmem:[#allocation19_spill] sm:$0xff]  ;;  %v14156_v43 = vld [vmem:[#allocation40_spill] sm:$0xff] }
 0x737   :  { %v5019_v16 = vsel %vm3180_vm2, %v5003_v44, %v4769_v49  ;;  %v14157_v44 = vld [vmem:[#allocation13_spill] sm:$0xff] }
 0x738   :  { %v5035_v34 = vsel %vm3197_vm4, %v5019_v16, %v4833_v31  ;;  %v14154_v31 = vld [vmem:[#allocation53_spill] sm:$0xff] }
 0x739   :  { %4526 = vrot.lane.b32.xlu0 %v11573_v22, %s7925_s8 }
 0x73a   :  { %4780 = vrot.lane.b32.xlu2 %v11631_v32, %s7929_s9 }
 0x73b   :  { %4908 = vrot.lane.b32.xlu1 %v11583_v38, %s7931_s14  ;;  %v4515_v54 = vpop.permute.xlu0 %4514 }
 0x73c   :  { %v4517_v9 = vpop.permute.xlu2 %4516  ;;  %v4956_v20 = vsel %vm31_vm0, %v4940_v58, %v4515_v54  ;;  %v14158_v54 = vld [vmem:[#allocation48_spill] sm:$0xff] }
 0x73d   :  { %v4897_v14 = vpop.permute.xlu1 %4896 }
 0x73e   :  { %v5051_v25 = vsel %vm3214_vm5, %v5035_v34, %v4897_v14  ;;  %v14159_v14 = vld [vmem:[#allocation6_spill] sm:$0xff] }
 0x73f   :  { %v5088_v61 = vsel %vm3241_vm6, %v5051_v25, 0 }
 0x740   :  { %v12043_v26 = vand.u32 4294901760, %v5088_v61 }
 0x741   :  { %4718 = vrot.lane.b32.xlu0 %v11583_v38, %s7932_s15 }
 0x742   :  { %v5186_v0 = vsub.f32 %v5088_v61, %v12043_v26  ;;  %5356 = vmatmul.f32.gmra.mxu3 %v12043_v26  ;;  %4462 = vrot.lane.b32.xlu2 %v11571_v6, %s7923_s27 }
 0x743   :  { %4590 = vrot.lane.b32.xlu1 %v11631_v32, %s7934_s17  ;;  %v4707_v22 = vpop.permute.xlu0 %4706 }
 0x744   :  { %5461 = vmatmul.f32.gmra.mxu0 %v5186_v0  ;;  %v4709_v7 = vpop.permute.xlu2 %4708  ;;  %v5187_v27 = vand.u32 4294901760, %v5186_v0 }
 0x745   :  { %v4579_v45 = vpop.permute.xlu1 %4578 }
 0x746   :  { %5573 = vmatmul.f32.gmra.mxu1 %v5187_v27  ;;  %v5188_v10 = vsub.f32 %v5186_v0, %v5187_v27  ;;  %v4972_v51 = vsel %vm602_vm7, %v4956_v20, %v4579_v45 }
 0x747   :  { %v4988_v6 = vsel %vm636_vm9, %v4972_v51, %v4643_v46 }
 0x748   :  { %v5189_v59 = vand.u32 4294901760, %v5188_v10  ;;  %v5004_v53 = vsel %vm3163_vm1, %v4988_v6, %v4707_v22 }
 0x749   :  { %4910 = vrot.lane.b32.xlu0 %v14150_v17, %s7931_s14 }
 0x74a   :  { %5190 = vmatmul.f32.gmra.mxu2 %v5189_v59  ;;  %4654 = vrot.lane.b32.xlu2 %v11581_v28, %s7933_s16  ;;  %v14160_v59 = vld [vmem:[#allocation8_spill] sm:$0xff] }
 0x74b   :  { %4782 = vrot.lane.b32.xlu1 %v14151_v57, %s7929_s9  ;;  %v4899_v11 = vpop.permute.xlu0 %4898 }
 0x74c   :  { %v4583_v48 = vpop.permute.xlu2 %4582 }
 0x74d   :  { %v4771_v49 = vpop.permute.xlu1 %4770 }
 0x74e   :  { %v5020_v24 = vsel %vm3180_vm2, %v5004_v53, %v4771_v49 }
 0x74f   :  { %v5036_v19 = vsel %vm3197_vm4, %v5020_v24, %v4835_v2 }
 0x750   :  { %v5052_v5 = vsel %vm3214_vm5, %v5036_v19, %v4899_v11 }
 0x751   :  { %v5091_v21 = vsel %vm3241_vm6, %v5052_v5, 0  ;;  %4592 = vrot.lane.b32.xlu0 %v14151_v57, %s7934_s17 }
 0x752   :  { %v12071_v4 = vand.u32 4294901760, %v5091_v21  ;;  %4846 = vrot.lane.b32.xlu2 %v14152_v47, %s7930_s12 }
 0x753   :  { %4464 = vrot.lane.b32.xlu1 %v11581_v28, %s7923_s27  ;;  %v4581_v63 = vpop.permute.xlu0 %4580 }
 0x754   :  { %5360 = vmatmul.f32.gmra.mxu3 %v12071_v4  ;;  %v4775_v8 = vpop.permute.xlu2 %4774  ;;  %v5194_v23 = vsub.f32 %v5091_v21, %v12071_v4 }
 0x755   :  { %v4453_v56 = vpop.permute.xlu1 %4452 }
 0x756   :  { %5466 = vmatmul.f32.gmra.mxu0 %v5194_v23  ;;  %v5195_v35 = vand.u32 4294901760, %v5194_v23  ;;  %v4941_v37 = vsel %vm535_vm3, %v11577_v33, %v4453_v56 }
 0x757   :  { %v4957_v12 = vsel %vm31_vm0, %v4941_v37, %v4517_v9 }
 0x758   :  { %5579 = vmatmul.f32.gmra.mxu1 %v5195_v35  ;;  %v5196_v46 = vsub.f32 %v5194_v23, %v5195_v35  ;;  %v4973_v40 = vsel %vm602_vm7, %v4957_v12, %v4581_v63 }
 0x759   :  { %4784 = vrot.lane.b32.xlu0 %v14153_v1, %s7929_s9 }
 0x75a   :  { %v5197_v28 = vand.u32 4294901760, %v5196_v46  ;;  %4528 = vrot.lane.b32.xlu2 %v11583_v38, %s7925_s8  ;;  %v4942_v38 = vsel %vm535_vm3, %v14156_v43, %v14155_v13 }
 0x75b   :  { %4656 = vrot.lane.b32.xlu1 %v14152_v47, %s7933_s16  ;;  %v4647_v15 = vpop.permute.xlu0 %4646  ;;  %v4958_v25 = vsel %vm31_vm0, %v4942_v38, %v11835_v50  ;;  %v4389_v38 = vld [vmem:[#allocation3 + $0x130] sm:$0xff] }
 0x75c   :  { %5198 = vmatmul.f32.gmra.mxu2 %v5197_v28  ;;  %v4457_v33 = vpop.permute.xlu2 %4456  ;;  %v4974_v22 = vsel %vm602_vm7, %v4958_v25, %v4583_v48 }
 0x75d   :  { %v4645_v60 = vpop.permute.xlu1 %4644  ;;  %v4990_v58 = vsel %vm636_vm9, %v4974_v22, %v4647_v15  ;;  %v14162_v15 = vld [vmem:[#allocation26_spill] sm:$0xff] }
 0x75e   :  { %v4989_v41 = vsel %vm636_vm9, %v4973_v40, %v4645_v60 }
 0x75f   :  { %v5005_v39 = vsel %vm3163_vm1, %v4989_v41, %v4709_v7 }
 0x760   :  { %v5021_v2 = vsel %vm3180_vm2, %v5005_v39, %v14154_v31 }
 0x761   :  { %v5037_v16 = vsel %vm3197_vm4, %v5021_v2, %v14157_v44  ;;  %4466 = vrot.lane.b32.xlu0 %v14152_v47, %s7923_s27  ;;  %v14161_v47 = vld [vmem:[#allocation52_spill] sm:$0xff]  ;;  %v4421_v44 = vld [vmem:[#allocation3 + $0x132] sm:$0xff] }
 0x762   :  { %v5053_v9 = vsel %vm3214_vm5, %v5037_v16, %v14158_v54  ;;  %4720 = vrot.lane.b32.xlu2 %v14150_v17, %s7932_s15  ;;  %v4405_v16 = vld [vmem:[#allocation3 + $0x131] sm:$0xff] }
 0x763   :  { %4848 = vrot.lane.b32.xlu1 %v14159_v14, %s7930_s12  ;;  %v5094_v34 = vsel %vm3241_vm6, %v5053_v9, 0  ;;  %v4839_v61 = vpop.permute.xlu0 %4838 }
 0x764   :  { %v12109_v0 = vand.u32 4294901760, %v5094_v34  ;;  %v4649_v27 = vpop.permute.xlu2 %4648 }
 0x765   :  { %v4711_v7 = vpop.permute.xlu1 %4710 }
 0x766   :  { %5364 = vmatmul.f32.gmra.mxu3 %v12109_v0  ;;  %v5202_v45 = vsub.f32 %v5094_v34, %v12109_v0  ;;  %v5006_v20 = vsel %vm3163_vm1, %v4990_v58, %v4711_v7  ;;  %v14164_v34 = vmov 0.0  }
 0x767   :  { %v5022_v51 = vsel %vm3180_vm2, %v5006_v20, %v4775_v8  ;;  %v4943_v8 = vsel %vm535_vm3, %v11587_v36, %v4457_v33  ;;  %v14163_v36 = vld [vmem:[#allocation22_spill] sm:$0xff]  ;;  %6058 = vst.msk [vmem:[#allocation3 + $0x130] sm:$0xff] %vm535_vm3, %v14164_v34 }
 0x768   :  { %5471 = vmatmul.f32.gmra.mxu0 %v5202_v45  ;;  %v5203_v10 = vand.u32 4294901760, %v5202_v45  ;;  %v5038_v49 = vsel %vm3197_vm4, %v5022_v51, %v4839_v61  ;;  %6059 = vst.msk [vmem:[#allocation3 + $0x138] sm:$0x3] %vm2385_vm12, %v14164_v34 }
 0x769   :  { %4658 = vrot.lane.b32.xlu0 %v14159_v14, %s7933_s16 }
 0x76a   :  { %5585 = vmatmul.f32.gmra.mxu1 %v5203_v10  ;;  %v5204_v50 = vsub.f32 %v5202_v45, %v5203_v10  ;;  %4912 = vrot.lane.b32.xlu2 %v14160_v59, %s7931_s14 }
 0x76b   :  { %4530 = vrot.lane.b32.xlu1 %v14150_v17, %s7925_s8  ;;  %v4521_v6 = vpop.permute.xlu0 %4520 }
 0x76c   :  { %v5205_v11 = vand.u32 4294901760, %v5204_v50  ;;  %v4841_v53 = vpop.permute.xlu2 %4840  ;;  %v4959_v35 = vsel %vm31_vm0, %v4943_v8, %v4521_v6 }
 0x76d   :  { %v4903_v48 = vpop.permute.xlu1 %4902 }
 0x76e   :  { %v5054_v24 = vsel %vm3214_vm5, %v5038_v49, %v4903_v48  ;;  %5206 = vmatmul.f32.gmra.mxu2 %v5205_v11 }
 0x76f   :  { %v5097_v19 = vsel %vm3241_vm6, %v5054_v24, 0 }
 0x770   :  { %v12126_v5 = vand.u32 4294901760, %v5097_v19 }
 0x771   :  { %4850 = vrot.lane.b32.xlu0 %v14161_v47, %s7930_s12 }
 0x772   :  { %v5210_v21 = vsub.f32 %v5097_v19, %v12126_v5  ;;  %5368 = vmatmul.f32.gmra.mxu3 %v12126_v5  ;;  %4594 = vrot.lane.b32.xlu2 %v14153_v1, %s7934_s17 }
 0x773   :  { %4722 = vrot.lane.b32.xlu1 %v14160_v59, %s7932_s15  ;;  %v4713_v17 = vpop.permute.xlu0 %4712 }
 0x774   :  { %5476 = vmatmul.f32.gmra.mxu0 %v5210_v21  ;;  %v5211_v63 = vand.u32 4294901760, %v5210_v21  ;;  %v4523_v56 = vpop.permute.xlu2 %4522 }
 0x775   :  { %v4585_v23 = vpop.permute.xlu1 %4584 }
 0x776   :  { %5591 = vmatmul.f32.gmra.mxu1 %v5211_v63  ;;  %v5212_v37 = vsub.f32 %v5210_v21, %v5211_v63  ;;  %v4975_v46 = vsel %vm602_vm7, %v4959_v35, %v4585_v23 }
 0x777   :  { %v4991_v28 = vsel %vm636_vm9, %v4975_v46, %v4649_v27 }
 0x778   :  { %v5213_v12 = vand.u32 4294901760, %v5212_v37  ;;  %v5007_v33 = vsel %vm3163_vm1, %v4991_v28, %v4713_v17 }
 0x779   :  { %4532 = vrot.lane.b32.xlu0 %v14160_v59, %s7925_s8 }
 0x77a   :  { %5214 = vmatmul.f32.gmra.mxu2 %v5213_v12  ;;  %4786 = vrot.lane.b32.xlu2 %v14162_v15, %s7929_s9 }
 0x77b   :  { %4914 = vrot.lane.b32.xlu1 %v14163_v36, %s7931_s14  ;;  %v4905_v60 = vpop.permute.xlu0 %4904 }
 0x77c   :  { %v4715_v41 = vpop.permute.xlu2 %4714 }
 0x77d   :  { %v4777_v40 = vpop.permute.xlu1 %4776 }
 0x77e   :  { %v5023_v39 = vsel %vm3180_vm2, %v5007_v33, %v4777_v40 }
 0x77f   :  { %v5039_v31 = vsel %vm3197_vm4, %v5023_v39, %v4841_v53 }
 0x780   :  { %v5055_v2 = vsel %vm3214_vm5, %v5039_v31, %v4905_v60 }
 0x781   :  { %v5100_v13 = vsel %vm3241_vm6, %v5055_v2, 0  ;;  %4724 = vrot.lane.b32.xlu0 %v14163_v36, %s7932_s15 }
 0x782   :  { %v12154_v43 = vand.u32 4294901760, %v5100_v13  ;;  %4468 = vrot.lane.b32.xlu2 %v14159_v14, %s7923_s27 }
 0x783   :  { %4596 = vrot.lane.b32.xlu1 %v14162_v15, %s7934_s17  ;;  %v4587_v54 = vpop.permute.xlu0 %4586 }
 0x784   :  { %5372 = vmatmul.f32.gmra.mxu3 %v12154_v43  ;;  %v5218_v9 = vsub.f32 %v5100_v13, %v12154_v43  ;;  %v4907_v61 = vpop.permute.xlu2 %4906 }
 0x785   :  { %v4459_v25 = vpop.permute.xlu1 %4458 }
 0x786   :  { %5481 = vmatmul.f32.gmra.mxu0 %v5218_v9  ;;  %v5219_v14 = vand.u32 4294901760, %v5218_v9  ;;  %v4944_v22 = vsel %vm535_vm3, %v11603_v30, %v4459_v25 }
 0x787   :  { %v4960_v58 = vsel %vm31_vm0, %v4944_v22, %v4523_v56 }
 0x788   :  { %5597 = vmatmul.f32.gmra.mxu1 %v5219_v14  ;;  %v5220_v7 = vsub.f32 %v5218_v9, %v5219_v14  ;;  %v4976_v10 = vsel %vm602_vm7, %v4960_v58, %v4587_v54 }
 0x789   :  { %4916 = vrot.lane.b32.xlu0 %v4421_v44, %s7931_s14 }
 0x78a   :  { %v5221_v27 = vand.u32 4294901760, %v5220_v7  ;;  %4660 = vrot.lane.b32.xlu2 %v14161_v47, %s7933_s16 }
 0x78b   :  { %4788 = vrot.lane.b32.xlu1 %v4389_v38, %s7929_s9  ;;  %v4779_v45 = vpop.permute.xlu0 %4778 }
 0x78c   :  { %5222 = vmatmul.f32.gmra.mxu2 %v5221_v27  ;;  %v4589_v51 = vpop.permute.xlu2 %4588 }
 0x78d   :  { %v4651_v20 = vpop.permute.xlu1 %4650 }
 0x78e   :  { %v4992_v30 = vsel %vm636_vm9, %v4976_v10, %v4651_v20 }
 0x78f   :  { %v5008_v50 = vsel %vm3163_vm1, %v4992_v30, %v4715_v41 }
 0x790   :  { %v5024_v11 = vsel %vm3180_vm2, %v5008_v50, %v4779_v45 }
 0x792   :  { %4852 = vrot.lane.b32.xlu2 %v4405_v16, %s7930_s12 }
 0x793   :  { %v4461_v59 = vpop.permute.xlu0 %4460 }
 0x794   :  { %v4781_v49 = vpop.permute.xlu2 %4780  ;;  %v4945_v23 = vsel %vm535_vm3, %v11623_v18, %v4461_v59 }
 0x795   :  { %v4843_v6 = vpop.permute.xlu1 %4842 }
 0x796   :  { %v5040_v48 = vsel %vm3197_vm4, %v5024_v11, %v4843_v6 }
 0x797   :  { %v5056_v53 = vsel %vm3214_vm5, %v5040_v48, %v4907_v61 }
 0x798   :  { %v5103_v24 = vsel %vm3241_vm6, %v5056_v53, 0 }
 0x799   :  { %v12181_v19 = vand.u32 4294901760, %v5103_v24 }
 0x79b   :  { %5376 = vmatmul.f32.gmra.mxu3 %v12181_v19  ;;  %v5226_v21 = vsub.f32 %v5103_v24, %v12181_v19  ;;  %v4653_v47 = vpop.permute.xlu0 %4652 }
 0x79c   :  { %v4463_v8 = vpop.permute.xlu2 %4462 }
 0x79d   :  { %v4525_v17 = vpop.permute.xlu1 %4524  ;;  %5486 = vmatmul.f32.gmra.mxu0 %v5226_v21  ;;  %v5227_v63 = vand.u32 4294901760, %v5226_v21  ;;  %v4946_v54 = vsel %vm535_vm3, %v11627_v42, %v4463_v8 }
 0x79e   :  { %v4961_v35 = vsel %vm31_vm0, %v4945_v23, %v4525_v17 }
 0x79f   :  { %5603 = vmatmul.f32.gmra.mxu1 %v5227_v63  ;;  %v5228_v56 = vsub.f32 %v5226_v21, %v5227_v63  ;;  %v4977_v46 = vsel %vm602_vm7, %v4961_v35, %v4589_v51 }
 0x7a0   :  { %v4993_v15 = vsel %vm636_vm9, %v4977_v46, %v4653_v47 }
 0x7a1   :  { %v5229_v37 = vand.u32 4294901760, %v5228_v56 }
 0x7a3   :  { %5230 = vmatmul.f32.gmra.mxu2 %v5229_v37  ;;  %v4845_v12 = vpop.permute.xlu0 %4844 }
 0x7a4   :  { %v4655_v36 = vpop.permute.xlu2 %4654 }
 0x7a5   :  { %v4717_v28 = vpop.permute.xlu1 %4716 }
 0x7a6   :  { %v5009_v60 = vsel %vm3163_vm1, %v4993_v15, %v4717_v28 }
 0x7a7   :  { %v5025_v40 = vsel %vm3180_vm2, %v5009_v60, %v4781_v49 }
 0x7a8   :  { %v5041_v18 = vsel %vm3197_vm4, %v5025_v40, %v4845_v12 }
 0x7ab   :  { %v4527_v33 = vpop.permute.xlu0 %4526 }
 0x7ac   :  { %v4847_v31 = vpop.permute.xlu2 %4846  ;;  %v4962_v34 = vsel %vm31_vm0, %v4946_v54, %v4527_v33 }
 0x7ad   :  { %v4909_v41 = vpop.permute.xlu1 %4908 }
 0x7ae   :  { %v5057_v39 = vsel %vm3214_vm5, %v5041_v18, %v4909_v41 }
 0x7af   :  { %v5106_v2 = vsel %vm3241_vm6, %v5057_v39, 0 }
 0x7b0   :  { %v12195_v13 = vand.u32 4294901760, %v5106_v2 }
 0x7b2   :  { %v5234_v38 = vsub.f32 %v5106_v2, %v12195_v13  ;;  %5380 = vmatmul.f32.gmra.mxu3 %v12195_v13 }
 0x7b3   :  { %v4719_v44 = vpop.permute.xlu0 %4718 }
 0x7b4   :  { %5491 = vmatmul.f32.gmra.mxu0 %v5234_v38  ;;  %v5235_v16 = vand.u32 4294901760, %v5234_v38  ;;  %v4529_v14 = vpop.permute.xlu2 %4528 }
 0x7b5   :  { %v4591_v9 = vpop.permute.xlu1 %4590 }
 0x7b6   :  { %5609 = vmatmul.f32.gmra.mxu1 %v5235_v16  ;;  %v5236_v25 = vsub.f32 %v5234_v38, %v5235_v16  ;;  %v4978_v61 = vsel %vm602_vm7, %v4962_v34, %v4591_v9 }
 0x7b7   :  { %v4994_v7 = vsel %vm636_vm9, %v4978_v61, %v4655_v36 }
 0x7b8   :  { %v5237_v22 = vand.u32 4294901760, %v5236_v25  ;;  %v5010_v45 = vsel %vm3163_vm1, %v4994_v7, %v4719_v44 }
 0x7ba   :  { %5238 = vmatmul.f32.gmra.mxu2 %v5237_v22 }
 0x7bb   :  { %v4911_v27 = vpop.permute.xlu0 %4910 }
 0x7bc   :  { %v4721_v30 = vpop.permute.xlu2 %4720 }
 0x7bd   :  { %v4783_v58 = vpop.permute.xlu1 %4782 }
 0x7be   :  { %v5026_v20 = vsel %vm3180_vm2, %v5010_v45, %v4783_v58 }
 0x7bf   :  { %v5042_v42 = vsel %vm3197_vm4, %v5026_v20, %v4847_v31 }
 0x7c0   :  { %v5058_v10 = vsel %vm3214_vm5, %v5042_v42, %v4911_v27 }
 0x7c1   :  { %v5109_v51 = vsel %vm3241_vm6, %v5058_v10, 0 }
 0x7c2   :  { %v12209_v50 = vand.u32 4294901760, %v5109_v51 }
 0x7c3   :  { %v4593_v59 = vpop.permute.xlu0 %4592 }
 0x7c4   :  { %5384 = vmatmul.f32.gmra.mxu3 %v12209_v50  ;;  %v5242_v6 = vsub.f32 %v5109_v51, %v12209_v50  ;;  %v4913_v47 = vpop.permute.xlu2 %4912 }
 0x7c5   :  { %v4465_v11 = vpop.permute.xlu1 %4464 }
 0x7c6   :  { %5496 = vmatmul.f32.gmra.mxu0 %v5242_v6  ;;  %v5243_v48 = vand.u32 4294901760, %v5242_v6  ;;  %v4947_v49 = vsel %vm535_vm3, %v11631_v32, %v4465_v11 }
 0x7c7   :  { %v4963_v21 = vsel %vm31_vm0, %v4947_v49, %v4529_v14 }
 0x7c8   :  { %5615 = vmatmul.f32.gmra.mxu1 %v5243_v48  ;;  %v5244_v53 = vsub.f32 %v5242_v6, %v5243_v48  ;;  %v4979_v8 = vsel %vm602_vm7, %v4963_v21, %v4593_v59 }
 0x7ca   :  { %v5245_v24 = vand.u32 4294901760, %v5244_v53 }
 0x7cb   :  { %v4785_v17 = vpop.permute.xlu0 %4784 }
 0x7cc   :  { %5246 = vmatmul.f32.gmra.mxu2 %v5245_v24  ;;  %v4595_v32 = vpop.permute.xlu2 %4594 }
 0x7cd   :  { %v4657_v63 = vpop.permute.xlu1 %4656 }
 0x7ce   :  { %v4995_v23 = vsel %vm636_vm9, %v4979_v8, %v4657_v63 }
 0x7cf   :  { %v5011_v56 = vsel %vm3163_vm1, %v4995_v23, %v4721_v30 }
 0x7d0   :  { %v5027_v46 = vsel %vm3180_vm2, %v5011_v56, %v4785_v17 }
 0x7d3   :  { %v4467_v35 = vpop.permute.xlu0 %4466 }
 0x7d4   :  { %v4948_v18 = vsel %vm535_vm3, %v14151_v57, %v4467_v35  ;;  %v4787_v31 = vpop.permute.xlu2 %4786 }
 0x7d5   :  { %v4849_v37 = vpop.permute.xlu1 %4848 }
 0x7d6   :  { %v5043_v12 = vsel %vm3197_vm4, %v5027_v46, %v4849_v37 }
 0x7d7   :  { %v5059_v28 = vsel %vm3214_vm5, %v5043_v12, %v4913_v47  ;;  %v12260_v12 = vpop.f32.mrf.mxu2 }
 0x7d8   :  { %v5112_v15 = vsel %vm3241_vm6, %v5059_v28, 0 }
 0x7d9   :  { %v12223_v36 = vand.u32 4294901760, %v5112_v15 }
 0x7db   :  { %5388 = vmatmul.f32.gmra.mxu3 %v12223_v36  ;;  %v5250_v60 = vsub.f32 %v5112_v15, %v12223_v36  ;;  %v4659_v40 = vpop.permute.xlu0 %4658 }
 0x7dc   :  { %v4469_v25 = vpop.permute.xlu2 %4468 }
 0x7dd   :  { %v4531_v33 = vpop.permute.xlu1 %4530  ;;  %5501 = vmatmul.f32.gmra.mxu0 %v5250_v60  ;;  %v5251_v41 = vand.u32 4294901760, %v5250_v60  ;;  %v4949_v10 = vsel %vm535_vm3, %v14153_v1, %v4469_v25 }
 0x7de   :  { %v4964_v2 = vsel %vm31_vm0, %v4948_v18, %v4531_v33 }
 0x7df   :  { %5621 = vmatmul.f32.gmra.mxu1 %v5251_v41  ;;  %v5252_v39 = vsub.f32 %v5250_v60, %v5251_v41  ;;  %v4980_v44 = vsel %vm602_vm7, %v4964_v2, %v4595_v32  ;;  %v12256_v32 = vpop.f32.mrf.mxu3  ;;  %v12266_v15 = vpop.f32.mrf.mxu2 }
 0x7e0   :  { %v4996_v9 = vsel %vm636_vm9, %v4980_v44, %v4659_v40 }
 0x7e1   :  { %v5253_v38 = vand.u32 4294901760, %v5252_v39 }
 0x7e3   :  { %5254 = vmatmul.f32.gmra.mxu2 %v5253_v38  ;;  %v4851_v16 = vpop.permute.xlu0 %4850 }
 0x7e4   :  { %v4661_v20 = vpop.permute.xlu2 %4660 }
 0x7e5   :  { %v4723_v54 = vpop.permute.xlu1 %4722 }
 0x7e6   :  { %v5012_v34 = vsel %vm3163_vm1, %v4996_v9, %v4723_v54 }
 0x7e7   :  { %v5028_v61 = vsel %vm3180_vm2, %v5012_v34, %v4787_v31  ;;  %v12262_v28 = vpop.f32.mrf.mxu3  ;;  %v12272_v40 = vpop.f32.mrf.mxu2 }
 0x7e8   :  { %v5044_v22 = vsel %vm3197_vm4, %v5028_v61, %v4851_v16 }
 0x7eb   :  { %v4533_v14 = vpop.permute.xlu0 %4532 }
 0x7ec   :  { %v4965_v59 = vsel %vm31_vm0, %v4949_v10, %v4533_v14  ;;  %v4853_v53 = vpop.permute.xlu2 %4852  ;;  %v12353_v14 = vpop.f32.mrf.mxu1 }
 0x7ed   :  { %v4915_v57 = vpop.permute.xlu1 %4914 }
 0x7ee   :  { %v5060_v7 = vsel %vm3214_vm5, %v5044_v22, %v4915_v57 }
 0x7ef   :  { %v5115_v27 = vsel %vm3241_vm6, %v5060_v7, 0  ;;  %v12268_v60 = vpop.f32.mrf.mxu3  ;;  %v12278_v33 = vpop.f32.mrf.mxu2 }
 0x7f0   :  { %v12237_v58 = vand.u32 4294901760, %v5115_v27 }
 0x7f2   :  { %v5258_v45 = vsub.f32 %v5115_v27, %v12237_v58  ;;  %5392 = vmatmul.f32.gmra.mxu3 %v12237_v58 }
 0x7f3   :  { %v4725_v51 = vpop.permute.xlu0 %4724 }
 0x7f4   :  { %5506 = vmatmul.f32.gmra.mxu0 %v5258_v45  ;;  %v5259_v42 = vand.u32 4294901760, %v5258_v45  ;;  %v5550_v27 = vpop.f32.mrf.mxu1 }
 0x7f5   :  { %v4597_v30 = vpop.permute.xlu1 %4596 }
 0x7f6   :  { %5627 = vmatmul.f32.gmra.mxu1 %v5259_v42  ;;  %v5260_v6 = vsub.f32 %v5258_v45, %v5259_v42  ;;  %v4981_v11 = vsel %vm602_vm7, %v4965_v59, %v4597_v30 }
 0x7f7   :  { %v4997_v49 = vsel %vm636_vm9, %v4981_v11, %v4661_v20  ;;  %v12284_v41 = vpop.f32.mrf.mxu2 }
 0x7f8   :  { %v5261_v48 = vand.u32 4294901760, %v5260_v6  ;;  %v5013_v21 = vsel %vm3163_vm1, %v4997_v49, %v4725_v51 }
 0x7fa   :  { %5262 = vmatmul.f32.gmra.mxu2 %v5261_v48 }
 0x7fb   :  { %v4917_v47 = vpop.permute.xlu0 %4916 }
 0x7fc   :  { %v5556_v42 = vpop.f32.mrf.mxu1 }
 0x7fd   :  { %v4789_v24 = vpop.permute.xlu1 %4788 }
 0x7fe   :  { %v5029_v17 = vsel %vm3180_vm2, %v5013_v21, %v4789_v24 }
 0x7ff   :  { %v5045_v1 = vsel %vm3197_vm4, %v5029_v17, %v4853_v53  ;;  %v12290_v18 = vpop.f32.mrf.mxu2 }
 0x800   :  { %v5061_v63 = vsel %vm3214_vm5, %v5045_v1, %v4917_v47 }
 0x801   :  { %v5118_v8 = vsel %vm3241_vm6, %v5061_v63, 0 }
 0x802   :  { %v12251_v23 = vand.u32 4294901760, %v5118_v8 }
 0x804   :  { %v5266_v56 = vsub.f32 %v5118_v8, %v12251_v23  ;;  %5396 = vmatmul.f32.gmra.mxu3 %v12251_v23  ;;  %v12367_v59 = vpop.f32.mrf.mxu1 }
 0x806   :  { %5511 = vmatmul.f32.gmra.mxu0 %v5266_v56  ;;  %v5267_v35 = vand.u32 4294901760, %v5266_v56 }
 0x807   :  { %v12296_v39 = vpop.f32.mrf.mxu2 }
 0x808   :  { %5633 = vmatmul.f32.gmra.mxu1 %v5267_v35  ;;  %v5268_v37 = vsub.f32 %v5266_v56, %v5267_v35 }
 0x80a   :  { %v5269_v46 = vand.u32 4294901760, %v5268_v37 }
 0x80c   :  { %5270 = vmatmul.f32.gmra.mxu2 %v5269_v46  ;;  %5771 = vmatmul.f32.vlgmr.msra.gmra.mxu3 %v11887_v52  ;;  %v12373_v49 = vpop.f32.mrf.mxu1 }
 0x80f   :  { %v12302_v31 = vpop.f32.mrf.mxu2 }
 0x814   :  { %5681 = vmatmul.f32.vlgmr.msra.gmra.mxu2 %v11887_v52  ;;  %5775 = vmatmul.f32.gmra.mxu3 %v11921_v3  ;;  %v12274_v52 = vpop.f32.mrf.mxu3  ;;  %v12379_v47 = vpop.f32.mrf.mxu1 }
 0x817   :  { %v12308_v2 = vpop.f32.mrf.mxu2 }
 0x81c   :  { %5685 = vmatmul.f32.gmra.mxu2 %v11921_v3  ;;  %5779 = vmatmul.f32.gmra.mxu3 %v11953_v62  ;;  %v12280_v3 = vpop.f32.mrf.mxu3  ;;  %v12385_v8 = vpop.f32.mrf.mxu1 }
 0x81f   :  { %v12314_v38 = vpop.f32.mrf.mxu2 }
 0x824   :  { %5689 = vmatmul.f32.gmra.mxu2 %v11953_v62  ;;  %5783 = vmatmul.f32.gmra.mxu3 %v11981_v55  ;;  %v12286_v62 = vpop.f32.mrf.mxu3  ;;  %v12391_v37 = vpop.f32.mrf.mxu1 }
 0x827   :  { %v12320_v44 = vpop.f32.mrf.mxu2 }
 0x82c   :  { %5693 = vmatmul.f32.gmra.mxu2 %v11981_v55  ;;  %5787 = vmatmul.f32.gmra.mxu3 %v12011_v29  ;;  %v12292_v55 = vpop.f32.mrf.mxu3 }
 0x834   :  { %5697 = vmatmul.f32.gmra.mxu2 %v12011_v29  ;;  %5791 = vmatmul.f32.gmra.mxu3 %v12043_v26  ;;  %v12298_v29 = vpop.f32.mrf.mxu3 }
 0x83c   :  { %5701 = vmatmul.f32.gmra.mxu2 %v12043_v26  ;;  %5795 = vmatmul.f32.gmra.mxu3 %v12071_v4  ;;  %v12304_v26 = vpop.f32.mrf.mxu3 }
 0x83d   :  { %v12326_v16 = vpop.f32.mrf.mxu2 }
 0x844   :  { %5705 = vmatmul.f32.gmra.mxu2 %v12071_v4  ;;  %5799 = vmatmul.f32.gmra.mxu3 %v12109_v0  ;;  %v12310_v4 = vpop.f32.mrf.mxu3 }
 0x84c   :  { %5709 = vmatmul.f32.gmra.mxu2 %v12109_v0  ;;  %5803 = vmatmul.f32.gmra.mxu3 %v12126_v5  ;;  %v12316_v0 = vpop.f32.mrf.mxu3 }
 0x84f   :  { %v12332_v54 = vpop.f32.mrf.mxu2 }
 0x854   :  { %5713 = vmatmul.f32.gmra.mxu2 %v12126_v5  ;;  %5807 = vmatmul.f32.gmra.mxu3 %v12154_v43  ;;  %v12322_v5 = vpop.f32.mrf.mxu3 }
 0x85c   :  { %5717 = vmatmul.f32.gmra.mxu2 %v12154_v43  ;;  %5811 = vmatmul.f32.gmra.mxu3 %v12181_v19  ;;  %v12328_v43 = vpop.f32.mrf.mxu3 }
 0x85d   :  { %14165 = vst [vmem:[#allocation21_spill] sm:$0xff] %v12328_v43 }
 0x864   :  { %5721 = vmatmul.f32.gmra.mxu2 %v12181_v19  ;;  %5815 = vmatmul.f32.gmra.mxu3 %v12195_v13  ;;  %v12334_v19 = vpop.f32.mrf.mxu3 }
 0x865   :  { %14166 = vst [vmem:[#allocation51_spill] sm:$0xff] %v12334_v19 }
 0x866   :  { %v12338_v9 = vpop.f32.mrf.mxu2 }
 0x86c   :  { %5725 = vmatmul.f32.gmra.mxu2 %v12195_v13  ;;  %5819 = vmatmul.f32.gmra.mxu3 %v12209_v50 }
 0x874   :  { %5729 = vmatmul.f32.gmra.mxu2 %v12209_v50  ;;  %5823 = vmatmul.f32.gmra.mxu3 %v12223_v36 }
 0x875   :  { %v12340_v13 = vpop.f32.mrf.mxu3 }
 0x876   :  { %14167 = vst [vmem:[#allocation44_spill] sm:$0xff] %v12340_v13  ;;  %v12399_v13 = vpop.f32.mrf.mxu1 }
 0x877   :  { %14178 = vst [vmem:[#allocation23_spill] sm:$0xff] %v12399_v13 }
 0x87c   :  { %5733 = vmatmul.f32.gmra.mxu2 %v12223_v36  ;;  %5827 = vmatmul.f32.gmra.mxu3 %v12237_v58  ;;  %v5437_v36 = vpop.f32.mrf.mxu0 }
 0x87d   :  { %v12344_v34 = vpop.f32.mrf.mxu2 }
 0x87e   :  { %14168 = vst [vmem:[#allocation14_spill] sm:$0xff] %v12344_v34  ;;  %v12412_v34 = vpop.f32.mrf.mxu1 }
 0x87f   :  { %14182 = vst [vmem:[#allocation41_spill] sm:$0xff] %v12412_v34 }
 0x884   :  { %5737 = vmatmul.f32.gmra.mxu2 %v12237_v58  ;;  %5831 = vmatmul.f32.gmra.mxu3 %v12251_v23  ;;  %v5442_v7 = vpop.f32.mrf.mxu0 }
 0x887   :  { %v12346_v50 = vpop.f32.mrf.mxu3 }
 0x888   :  { %14169 = vst [vmem:[#allocation30_spill] sm:$0xff] %v12346_v50 }
 0x88c   :  { %5741 = vmatmul.f32.gmra.mxu2 %v12251_v23  ;;  %v5447_v20 = vpop.f32.mrf.mxu0 }
 0x88f   :  { %v12349_v25 = vpop.f32.mrf.mxu2  ;;  %v12351_v61 = vpop.f32.mrf.mxu3 }
 0x890   :  { %14170 = vst [vmem:[#allocation42_spill] sm:$0xff] %v12349_v25 }
 0x894   :  { %v5452_v30 = vpop.f32.mrf.mxu0 }
 0x897   :  { %v12355_v57 = vpop.f32.mrf.mxu2  ;;  %v12357_v22 = vpop.f32.mrf.mxu3 }
 0x89c   :  { %v5457_v48 = vpop.f32.mrf.mxu0 }
 0x89f   :  { %v12359_v58 = vpop.f32.mrf.mxu2  ;;  %v12361_v45 = vpop.f32.mrf.mxu3 }
 0x8a4   :  { %v5462_v21 = vpop.f32.mrf.mxu0 }
 0x8a7   :  { %v12363_v10 = vpop.f32.mrf.mxu2  ;;  %v12365_v51 = vpop.f32.mrf.mxu3 }
 0x8ac   :  { %v5467_v63 = vpop.f32.mrf.mxu0 }
 0x8af   :  { %v12369_v6 = vpop.f32.mrf.mxu2  ;;  %v12371_v11 = vpop.f32.mrf.mxu3 }
 0x8b0   :  { %14171 = vst [vmem:[#allocation15_spill] sm:$0xff] %v12371_v11  ;;  %v12432_v11 = vpop.f32.mrf.mxu1 }
 0x8b1   :  { %14186 = vst [vmem:[#allocation16_spill] sm:$0xff] %v12432_v11 }
 0x8b4   :  { %v5472_v35 = vpop.f32.mrf.mxu0 }
 0x8b7   :  { %v12375_v53 = vpop.f32.mrf.mxu2  ;;  %v12377_v24 = vpop.f32.mrf.mxu3 }
 0x8b8   :  { %14172 = vst [vmem:[#allocation12_spill] sm:$0xff] %v12377_v24 }
 0x8bc   :  { %v12397_v25 = vpop.f32.mrf.mxu0 }
 0x8bf   :  { %v12381_v17 = vpop.f32.mrf.mxu2  ;;  %v12383_v1 = vpop.f32.mrf.mxu3 }
 0x8c0   :  { %14173 = vst [vmem:[#allocation38_spill] sm:$0xff] %v12383_v1 }
 0x8c4   :  { %v12405_v24 = vpop.f32.mrf.mxu0 }
 0x8c7   :  { %v12387_v23 = vpop.f32.mrf.mxu2  ;;  %v12389_v56 = vpop.f32.mrf.mxu3 }
 0x8c8   :  { %14174 = vst [vmem:[#allocation10_spill] sm:$0xff] %v12387_v23 }
 0x8c9   :  { %14175 = vst [vmem:[#allocation36_spill] sm:$0xff] %v12389_v56  ;;  %v12410_v56 = vld [vmem:[%s13735_s6 + $0xc] sm:$0x7] }
 0x8ca   :  { %14181 = vst [vmem:[#allocation37_spill] sm:$0xff] %v12410_v56 }
 0x8cf   :  { %v12393_v46 = vpop.f32.mrf.mxu2  ;;  %v12395_v50 = vpop.f32.mrf.mxu3 }
 0x8d0   :  { %14176 = vst [vmem:[#allocation20_spill] sm:$0xff] %v12393_v46  ;;  %v12415_v46 = vperm.slane %v12410_v56, 0 }
 0x8d1   :  { %14177 = vst [vmem:[#allocation29_spill] sm:$0xff] %v12395_v50 }
 0x8d2   :  { %v5152_v13 = vadd.f32 %v12260_v12, %v12415_v46  ;;  %v5168_v23 = vadd.f32 %v12272_v40, %v12415_v46  ;;  %v5176_v56 = vadd.f32 %v12278_v33, %v12415_v46  ;;  %v5192_v40 = vadd.f32 %v12290_v18, %v12415_v46 }
 0x8d3   :  { %v5200_v33 = vadd.f32 %v12296_v39, %v12415_v46  ;;  %v5216_v39 = vadd.f32 %v12308_v2, %v12415_v46 }
 0x8d4   :  { %v5350_v12 = vadd.f32 %v12274_v52, %v5176_v56  ;;  %v5358_v52 = vadd.f32 %v12286_v62, %v5192_v40  ;;  %v5224_v62 = vadd.f32 %v12314_v38, %v12415_v46  ;;  %v14187_v40 = vld [vmem:[#allocation15_spill] sm:$0xff] }
 0x8d6   :  { %v5453_v56 = vadd.f32 %v5452_v30, %v5350_v12  ;;  %v5463_v30 = vadd.f32 %v5462_v21, %v5358_v52  ;;  %v14192_v52 = vld [vmem:[#allocation12_spill] sm:$0xff] }
 0x8d7   :  { %v12401_v19 = vpop.f32.mrf.mxu2  ;;  %v12403_v1 = vpop.f32.mrf.mxu3 }
 0x8d8   :  { %14179 = vst [vmem:[#allocation4_spill] sm:$0xff] %v12401_v19  ;;  %v5160_v19 = vadd.f32 %v12266_v15, %v12415_v46  ;;  %v5184_v15 = vadd.f32 %v12284_v41, %v12415_v46  ;;  %v5208_v41 = vadd.f32 %v12302_v31, %v12415_v46  ;;  %v5563_v2 = vadd.f32 %v12367_v59, %v5453_v56  ;;  %v14193_v56 = vld [vmem:[#allocation20_spill] sm:$0xff] }
 0x8d9   :  { %14180 = vst [vmem:[#allocation5_spill] sm:$0xff] %v12403_v1  ;;  %v12423_v1 = vpop.f32.mrf.mxu0 }
 0x8da   :  { %14185 = vst [vmem:[#allocation43_spill] sm:$0xff] %v12423_v1  ;;  %v5342_v34 = vadd.f32 %v12262_v28, %v5160_v19  ;;  %v5695_v38 = vadd.f32 %v12369_v6, %v5563_v2  ;;  %v5575_v6 = vadd.f32 %v12379_v47, %v5463_v30  ;;  %v5256_v47 = vadd.f32 %v12338_v9, %v12415_v46  ;;  %v14190_v9 = vld [vmem:[#allocation14_spill] sm:$0xff] }
 0x8db   :  { %v14197_v30 = vld [vmem:[#allocation38_spill] sm:$0xff] }
 0x8dc   :  { %v5443_v19 = vadd.f32 %v5442_v7, %v5342_v34  ;;  %v5362_v34 = vadd.f32 %v12292_v55, %v5200_v33  ;;  %v14189_v33 = vld [vmem:[#allocation21_spill] sm:$0xff] }
 0x8de   :  { %v5551_v18 = vadd.f32 %v5550_v27, %v5443_v19 }
 0x8df   :  { %v12417_v50 = vpop.f32.mrf.mxu2  ;;  %v12419_v43 = vpop.f32.mrf.mxu3 }
 0x8e0   :  { %14183 = vst [vmem:[#allocation35_spill] sm:$0xff] %v12417_v50  ;;  %v5346_v50 = vadd.f32 %v12268_v60, %v5168_v23  ;;  %v12453_v23 = vpop.f32.mrf.mxu1 }
 0x8e1   :  { %14184 = vst [vmem:[#allocation7_spill] sm:$0xff] %v12419_v43  ;;  %v5338_v43 = vadd.f32 %v12256_v32, %v5152_v13  ;;  %v12443_v28 = vpop.f32.mrf.mxu0  ;;  %v5354_v32 = vadd.f32 %v12280_v3, %v5184_v15  ;;  %v5687_v3 = vadd.f32 %v12359_v58, %v5551_v18  ;;  %v5468_v58 = vadd.f32 %v5467_v63, %v5362_v34 }
 0x8e2   :  { %v5448_v13 = vadd.f32 %v5447_v20, %v5346_v50  ;;  %v12497_v15 = vadd.f32 %v12365_v51, %v5695_v38  ;;  %v14199_v38 = vld [vmem:[#allocation44_spill] sm:$0xff] }
 0x8e3   :  { %v5438_v60 = vadd.f32 %v5437_v36, %v5338_v43  ;;  %v5458_v50 = vadd.f32 %v5457_v48, %v5354_v32  ;;  %v5366_v36 = vadd.f32 %v12298_v29, %v5208_v41  ;;  %v12472_v29 = vadd.f32 %v12357_v22, %v5687_v3 }
 0x8e4   :  { %v5557_v43 = vadd.f32 %v5556_v42, %v5448_v13  ;;  %v5232_v42 = vadd.f32 %v12320_v44, %v12415_v46  ;;  %v5840_v41 = vsel %vm535_vm3, %v12497_v15, 0.0 }
 0x8e5   :  { %v5545_v7 = vadd.f32 %v12353_v14, %v5438_v60  ;;  %v5370_v14 = vadd.f32 %v12304_v26, %v5216_v39  ;;  %v5569_v48 = vadd.f32 %v12373_v49, %v5458_v50  ;;  %v5473_v59 = vadd.f32 %v5472_v35, %v5366_v36  ;;  %v14194_v39 = vld [vmem:[#allocation43_spill] sm:$0xff] }
 0x8e6   :  { %v5691_v55 = vadd.f32 %v12363_v10, %v5557_v43  ;;  %v5240_v10 = vadd.f32 %v12326_v16, %v12415_v46  ;;  %v5581_v49 = vadd.f32 %v12385_v8, %v5468_v58  ;;  %v5378_v35 = vadd.f32 %v12316_v0, %v5232_v42  ;;  %v14195_v43 = vld [vmem:[#allocation41_spill] sm:$0xff]  ;;  %v14198_v58 = vld [vmem:[#allocation4_spill] sm:$0xff] }
 0x8e7   :  { %v12438_v1 = vpop.f32.mrf.mxu2  ;;  %v12447_v11 = vpop.f32.mrf.mxu3  ;;  %v5683_v20 = vadd.f32 %v12355_v57, %v5545_v7  ;;  %v5374_v57 = vadd.f32 %v12310_v4, %v5224_v62  ;;  %v5699_v22 = vadd.f32 %v12375_v53, %v5569_v48  ;;  %v5248_v4 = vadd.f32 %v12332_v54, %v12415_v46 }
 0x8e8   :  { %v5616_v26 = vpop.f32.mrf.mxu1  ;;  %v12485_v44 = vadd.f32 %v12361_v45, %v5691_v55  ;;  %v5478_v16 = vadd.f32 %v12397_v25, %v5370_v14  ;;  %v5703_v45 = vadd.f32 %v12381_v17, %v5575_v6  ;;  %v5382_v53 = vadd.f32 %v12322_v5, %v5240_v10  ;;  %v14188_v17 = vld [vmem:[#allocation10_spill] sm:$0xff] }
 0x8e9   :  { %v5497_v27 = vpop.f32.mrf.mxu0  ;;  %v12482_v63 = vadd.f32 %v12351_v61, %v5683_v20  ;;  %v5836_v61 = vsel %vm535_vm3, %v12472_v29, 0.0  ;;  %v5587_v54 = vadd.f32 %v12391_v37, %v5473_v59  ;;  %v5483_v8 = vadd.f32 %v12405_v24, %v5374_v57  ;;  %v14191_v24 = vld [vmem:[#allocation23_spill] sm:$0xff] }
 0x8ea   :  { %v5838_v51 = vsel %vm535_vm3, %v12485_v44, 0.0  ;;  %v12510_v19 = vadd.f32 %v14187_v40, %v5699_v22  ;;  %v5707_v5 = vadd.f32 %v14188_v17, %v5581_v49  ;;  %v5386_v32 = vadd.f32 %v14189_v33, %v5248_v4  ;;  %v14196_v20 = vld [vmem:[#allocation51_spill] sm:$0xff]  ;;  %v14204_v33 = vld [vmem:[#allocation42_spill] sm:$0xff] }
 0x8eb   :  { %v5835_v0 = vsel %vm535_vm3, %v12482_v63, 0.0  ;;  %v5264_v37 = vadd.f32 %v14190_v9, %v12415_v46  ;;  %v5593_v13 = vadd.f32 %v14191_v24, %v5478_v16  ;;  %v12520_v18 = vadd.f32 %v14192_v52, %v5703_v45  ;;  %v14201_v4 = vld [vmem:[#allocation35_spill] sm:$0xff]  ;;  %v14202_v16 = vld [vmem:[#allocation16_spill] sm:$0xff]  ;;  %v14205_v9 = vld [vmem:[#allocation5_spill] sm:$0xff] }
 0x8ec   :  { %v5837_v60 = vadd.f32 %v5836_v61, %v5835_v0  ;;  %v5711_v34 = vadd.f32 %v14193_v56, %v5587_v54  ;;  %v5488_v7 = vadd.f32 %v14194_v39, %v5378_v35  ;;  %v5599_v50 = vadd.f32 %v14195_v43, %v5483_v8 }
 0x8ed   :  { %v5493_v36 = vadd.f32 %v12443_v28, %v5382_v53  ;;  %v5390_v55 = vadd.f32 %v14196_v20, %v5256_v47  ;;  %v5842_v2 = vsel %vm535_vm3, %v12510_v19, 0.0  ;;  %v12530_v14 = vadd.f32 %v14197_v30, %v5707_v5  ;;  %v14200_v28 = vld [vmem:[#allocation36_spill] sm:$0xff] }
 0x8ee   :  { %v5839_v3 = vadd.f32 %v5838_v51, %v5837_v60  ;;  %v5715_v42 = vadd.f32 %v14198_v58, %v5593_v13  ;;  %v5394_v48 = vadd.f32 %v14199_v38, %v5264_v37  ;;  %v5498_v10 = vadd.f32 %v5497_v27, %v5386_v32  ;;  %v14203_v27 = vld [vmem:[#allocation29_spill] sm:$0xff] }
 0x8ef   :  { %v12463_v31 = vpop.f32.mrf.mxu2  ;;  %v12479_v21 = vpop.f32.mrf.mxu3  ;;  %v5844_v22 = vsel %vm535_vm3, %v12520_v18, 0.0  ;;  %v12537_v6 = vadd.f32 %v14200_v28, %v5711_v34  ;;  %v5719_v49 = vadd.f32 %v14201_v4, %v5599_v50  ;;  %v5605_v35 = vadd.f32 %v14202_v16, %v5488_v7  ;;  %v14207_v34 = vld [vmem:[#allocation30_spill] sm:$0xff] }
 0x8f0   :  { %v5622_v62 = vpop.f32.mrf.mxu1  ;;  %v5841_v57 = vadd.f32 %v5840_v41, %v5839_v3  ;;  %v5611_v45 = vadd.f32 %v12453_v23, %v5493_v36  ;;  %v5846_v54 = vsel %vm535_vm3, %v12530_v14, 0.0  ;;  %v12545_v8 = vadd.f32 %v14203_v27, %v5715_v42 }
 0x8f1   :  { %v5502_v12 = vpop.f32.mrf.mxu0  ;;  %v5723_v0 = vadd.f32 %v12438_v1, %v5605_v35  ;;  %v5617_v17 = vadd.f32 %v5616_v26, %v5498_v10  ;;  %v5272_v32 = vadd.f32 %v14204_v33, %v12415_v46  ;;  %v5848_v23 = vsel %vm535_vm3, %v12537_v6, 0.0 }
 0x8f2   :  { %v5843_v61 = vadd.f32 %v5842_v2, %v5841_v57  ;;  %v5503_v51 = vadd.f32 %v5502_v12, %v5390_v55  ;;  %v12553_v37 = vadd.f32 %v14205_v9, %v5719_v49  ;;  %v5727_v60 = vadd.f32 %v12463_v31, %v5611_v45  ;;  %v14206_v12 = vld [vmem:[#allocation7_spill] sm:$0xff] }
 0x8f3   :  { %v5850_v1 = vsel %vm535_vm3, %v12545_v8, 0.0  ;;  %v12559_v41 = vadd.f32 %v14206_v12, %v5723_v0  ;;  %v5398_v39 = vadd.f32 %v14207_v34, %v5272_v32 }
 0x8f4   :  { %v5845_v40 = vadd.f32 %v5844_v22, %v5843_v61  ;;  %v5623_v52 = vadd.f32 %v5622_v62, %v5503_v51  ;;  %v5852_v7 = vsel %vm535_vm3, %v12553_v37, 0.0  ;;  %v12565_v3 = vadd.f32 %v12447_v11, %v5727_v60 }
 0x8f5   :  { %v5854_v20 = vsel %vm535_vm3, %v12559_v41, 0.0 }
 0x8f6   :  { %v5847_v24 = vadd.f32 %v5846_v54, %v5845_v40  ;;  %v5856_v30 = vsel %vm535_vm3, %v12565_v3, 0.0 }
 0x8f7   :  { %v5730_v25 = vpop.f32.mrf.mxu2  ;;  %v5824_v59 = vpop.f32.mrf.mxu3 }
 0x8f8   :  { %v5628_v13 = vpop.f32.mrf.mxu1  ;;  %v5731_v26 = vadd.f32 %v5730_v25, %v5617_v17  ;;  %v5849_v56 = vadd.f32 %v5848_v23, %v5847_v24 }
 0x8f9   :  { %v5507_v47 = vpop.f32.mrf.mxu0 }
 0x8fa   :  { %v5508_v5 = vadd.f32 %v5507_v47, %v5394_v48  ;;  %v5851_v43 = vadd.f32 %v5850_v1, %v5849_v56  ;;  %v12570_v25 = vadd.f32 %v12479_v21, %v5731_v26 }
 0x8fc   :  { %v5629_v46 = vadd.f32 %v5628_v13, %v5508_v5  ;;  %v5853_v2 = vadd.f32 %v5852_v7, %v5851_v43  ;;  %v5858_v38 = vsel %vm535_vm3, %v12570_v25, 0.0  ;;  %v14208_v5 = vld [vmem:[#allocation25_spill] sm:$0xff] }
 0x8fe   :  { %v5855_v42 = vadd.f32 %v5854_v20, %v5853_v2 }
 0x8ff   :  { %v5734_v53 = vpop.f32.mrf.mxu2  ;;  %v5828_v50 = vpop.f32.mrf.mxu3 }
 0x900   :  { %v5735_v31 = vadd.f32 %v5734_v53, %v5623_v52  ;;  %v5634_v57 = vpop.f32.mrf.mxu1  ;;  %v5857_v10 = vadd.f32 %v5856_v30, %v5855_v42 }
 0x901   :  { %v5512_v55 = vpop.f32.mrf.mxu0 }
 0x902   :  { %v12574_v58 = vadd.f32 %v5824_v59, %v5735_v31  ;;  %v5513_v11 = vadd.f32 %v5512_v55, %v5398_v39  ;;  %v5859_v28 = vadd.f32 %v5858_v38, %v5857_v10 }
 0x904   :  { %v5860_v21 = vsel %vm535_vm3, %v12574_v58, 0.0  ;;  %v5635_v22 = vadd.f32 %v5634_v57, %v5513_v11 }
 0x905   :  { %v5861_v16 = vadd.f32 %v5860_v21, %v5859_v28 }
 0x907   :  { %v5738_v36 = vpop.f32.mrf.mxu2  ;;  %v5832_v35 = vpop.f32.mrf.mxu3 }
 0x908   :  { %v5739_v62 = vadd.f32 %v5738_v36, %v5629_v46 }
 0x90a   :  { %v12578_v48 = vadd.f32 %v5828_v50, %v5739_v62 }
 0x90c   :  { %v5862_v49 = vsel %vm535_vm3, %v12578_v48, 0.0 }
 0x90d   :  { %v5863_v45 = vadd.f32 %v5862_v49, %v5861_v16 }
 0x90f   :  { %v5742_v4 = vpop.f32.mrf.mxu2 }
 0x910   :  { %v5743_v59 = vadd.f32 %v5742_v4, %v5635_v22 }
 0x912   :  { %v5833_v61 = vadd.f32 %v5832_v35, %v5743_v59 }
 0x914   :  { %v5864_v53 = vsel %vm535_vm3, %v5833_v61, 0.0 }
 0x915   :  { %v5865_v47 = vadd.f32 %v5864_v53, %v5863_v45 }
 0x917   :  { %v5866_v54 = vrot.slane %v5865_v47, 4 }
 0x919   :  { %v5867_v27 = vadd.f32 %v5866_v54, %v5865_v47 }
 0x91b   :  { %v5868_v0 = vrot.slane %v5867_v27, 2 }
 0x91d   :  { %v5869_v51 = vadd.f32 %v5868_v0, %v5867_v27 }
 0x91f   :  { %v5870_v40 = vrot.slane %v5869_v51, 1 }
 0x921   :  { %v5871_v17 = vadd.f32 %v5870_v40, %v5869_v51 }
 0x923   :  { %v5872_v33 = vmul.f32 %v5871_v17, %v14208_v5 }
 0x925   :  { %v12587_v32 = vsub.f32 %v12482_v63, %v5872_v33  ;;  %v12590_v23 = vsub.f32 %v12472_v29, %v5872_v33  ;;  %v12593_v9 = vsub.f32 %v12485_v44, %v5872_v33  ;;  %v12596_v60 = vsub.f32 %v12497_v15, %v5872_v33 }
 0x926   :  { %v12603_v1 = vsub.f32 %v12510_v19, %v5872_v33  ;;  %v12608_v29 = vsub.f32 %v12520_v18, %v5872_v33  ;;  %v12615_v52 = vsub.f32 %v12530_v14, %v5872_v33  ;;  %v12621_v18 = vsub.f32 %v12537_v6, %v5872_v33 }
 0x927   :  { %v5889_v24 = vmul.f32 %v12587_v32, %v12587_v32  ;;  %v5890_v13 = vmul.f32 %v12590_v23, %v12590_v23  ;;  %v5891_v63 = vmul.f32 %v12593_v9, %v12593_v9  ;;  %v5892_v44 = vmul.f32 %v12596_v60, %v12596_v60 }
 0x928   :  { %v5893_v19 = vmul.f32 %v12603_v1, %v12603_v1  ;;  %v5894_v34 = vmul.f32 %v12608_v29, %v12608_v29  ;;  %v12627_v31 = vsub.f32 %v12545_v8, %v5872_v33  ;;  %v5895_v14 = vmul.f32 %v12615_v52, %v12615_v52 }
 0x929   :  { %v5905_v15 = vsel %vm535_vm3, %v5889_v24, 0.0  ;;  %v5906_v12 = vsel %vm535_vm3, %v5890_v13, 0.0  ;;  %v5908_v56 = vsel %vm535_vm3, %v5891_v63, 0.0  ;;  %v5910_v39 = vsel %vm535_vm3, %v5892_v44, 0.0 }
 0x92a   :  { %v5907_v26 = vadd.f32 %v5906_v12, %v5905_v15  ;;  %v5912_v43 = vsel %vm535_vm3, %v5893_v19, 0.0  ;;  %v12633_v36 = vsub.f32 %v12553_v37, %v5872_v33  ;;  %v5896_v6 = vmul.f32 %v12621_v18, %v12621_v18 }
 0x92b   :  { %v5914_v20 = vsel %vm535_vm3, %v5894_v34, 0.0  ;;  %v12639_v55 = vsub.f32 %v12559_v41, %v5872_v33  ;;  %v5897_v8 = vmul.f32 %v12627_v31, %v12627_v31  ;;  %v5916_v2 = vsel %vm535_vm3, %v5895_v14, 0.0  ;;  %v6195_v34 = vld [vmem:[#allocation3 + $0x91] sm:$0xff] }
 0x92c   :  { %v5909_v46 = vadd.f32 %v5908_v56, %v5907_v26  ;;  %v12645_v11 = vsub.f32 %v12565_v3, %v5872_v33  ;;  %v5898_v37 = vmul.f32 %v12633_v36, %v12633_v36  ;;  %v5918_v42 = vsel %vm535_vm3, %v5896_v6, 0.0  ;;  %v6108_v56 = vld [vmem:[#allocation3 + $0x2] sm:$0xff]  ;;  %6634 = vrot.lane.b32.xlu0 %v6195_v34, %s7930_s12 }
 0x92d   :  { %v12651_v57 = vsub.f32 %v12570_v25, %v5872_v33  ;;  %v5899_v41 = vmul.f32 %v12639_v55, %v12639_v55  ;;  %v5920_v10 = vsel %vm535_vm3, %v5897_v8, 0.0  ;;  %v12657_v22 = vsub.f32 %v12574_v58, %v5872_v33  ;;  %6300 = vrot.lane.b32.xlu2 %v6108_v56, %s7925_s8  ;;  %v6211_v8 = vld [vmem:[#allocation3 + $0x92] sm:$0xff] }
 0x92e   :  { %v5911_v7 = vadd.f32 %v5910_v39, %v5909_v46  ;;  %v5900_v3 = vmul.f32 %v12645_v11, %v12645_v11  ;;  %v5922_v28 = vsel %vm535_vm3, %v5898_v37, 0.0  ;;  %v12663_v49 = vsub.f32 %v12578_v48, %v5872_v33  ;;  %v6179_v39 = vld [vmem:[#allocation3 + $0x90] sm:$0xff] }
 0x92f   :  { %v5901_v25 = vmul.f32 %v12651_v57, %v12651_v57  ;;  %v5924_v59 = vsel %vm535_vm3, %v5899_v41, 0.0  ;;  %v12668_v35 = vsub.f32 %v5833_v61, %v5872_v33  ;;  %v5902_v58 = vmul.f32 %v12657_v22, %v12657_v22  ;;  %v14209_v41 = vld [vmem:[#allocation37_spill] sm:$0xff] }
 0x930   :  { %v5913_v50 = vadd.f32 %v5912_v43, %v5911_v7  ;;  %v5926_v45 = vsel %vm535_vm3, %v5900_v3, 0.0  ;;  %v5903_v47 = vmul.f32 %v12663_v49, %v12663_v49  ;;  %v6092_v7 = vld [vmem:[#allocation3 + $0x1] sm:$0xff] }
 0x931   :  { %v5928_v48 = vsel %vm535_vm3, %v5901_v25, 0.0  ;;  %v5904_v27 = vmul.f32 %v12668_v35, %v12668_v35  ;;  %v5930_v0 = vsel %vm535_vm3, %v5902_v58, 0.0  ;;  %6236 = vrot.lane.b32.xlu1 %v6092_v7, %s7923_s27 }
 0x932   :  { %v5915_v62 = vadd.f32 %v5914_v20, %v5913_v50  ;;  %v5932_v61 = vsel %vm535_vm3, %v5903_v47, 0.0  ;;  %v6116_v20 = vld [vmem:[#allocation3 + $0xa2] sm:$0xff] }
 0x933   :  { %v5934_v17 = vsel %vm535_vm3, %v5904_v27, 0.0 }
 0x934   :  { %v5917_v30 = vadd.f32 %v5916_v2, %v5915_v62  ;;  %v6100_v62 = vld [vmem:[#allocation3 + $0xa1] sm:$0xff]  ;;  %6316 = vrot.lane.b32.xlu0 %v6116_v20, %s7925_s8 }
 0x935   :  { %6570 = vrot.lane.b32.xlu2 %v6179_v39, %s7929_s9 }
 0x936   :  { %v5919_v38 = vadd.f32 %v5918_v42, %v5917_v30 }
 0x938   :  { %v5921_v21 = vadd.f32 %v5920_v10, %v5919_v38  ;;  %v5970_v10 = vperm.slane %v14209_v41, 1 }
 0x939   :  { %6698 = vrot.lane.b32.xlu1 %v6211_v8, %s7931_s14 }
 0x93a   :  { %v5923_v4 = vadd.f32 %v5922_v28, %v5921_v21 }
 0x93c   :  { %v5925_v16 = vadd.f32 %v5924_v59, %v5923_v4  ;;  %v5987_v4 = vperm.slane %v14209_v41, 2 }
 0x93d   :  { %6252 = vrot.lane.b32.xlu2 %v6100_v62, %s7923_s27 }
 0x93e   :  { %v5927_v53 = vadd.f32 %v5926_v45, %v5925_v16 }
 0x940   :  { %v5929_v54 = vadd.f32 %v5928_v48, %v5927_v53 }
 0x942   :  { %v5931_v51 = vadd.f32 %v5930_v0, %v5929_v54 }
 0x944   :  { %v5933_v40 = vadd.f32 %v5932_v61, %v5931_v51 }
 0x946   :  { %v5935_v33 = vadd.f32 %v5934_v17, %v5933_v40 }
 0x948   :  { %v5936_v24 = vrot.slane %v5935_v33, 4 }
 0x94a   :  { %v5937_v13 = vadd.f32 %v5936_v24, %v5935_v33 }
 0x94c   :  { %v5938_v63 = vrot.slane %v5937_v13, 2 }
 0x94e   :  { %v5939_v44 = vadd.f32 %v5938_v63, %v5937_v13 }
 0x950   :  { %v5940_v15 = vrot.slane %v5939_v44, 1 }
 0x952   :  { %v5941_v12 = vadd.f32 %v5940_v15, %v5939_v44 }
 0x954   :  { %v5942_v26 = vmul.f32 %v5941_v12, %v14208_v5 }
 0x956   :  { %v5943_v19 = vadd.f32 1e-05, %v5942_v26 }
 0x958   :  { %7902 = vrsqrt.f32 %v5943_v19  ;;  %vm5950_vm8 = vweird.f32 %v5943_v19 }
 0x95e   :  { %v7903_v46 = vpop.eup %7902 }
 0x95f   :  { %v5945_v14 = vmul.f32 %v7903_v46, %v5943_v19  ;;  %vm5951_vm12 = vweird.f32 %v7903_v46 }
 0x960   :  { %vm5952_vm10 = vmor %vm5950_vm8, %vm5951_vm12 }
 0x961   :  { %v5946_v43 = vmul.f32 %v7903_v46, %v5945_v14 }
 0x963   :  { %v5947_v50 = vmul.f32 0.5, %v5946_v43 }
 0x965   :  { %v5948_v6 = vsub.f32 1.5, %v5947_v50 }
 0x967   :  { %v5949_v2 = vmul.f32 %v7903_v46, %v5948_v6 }
 0x969   :  { %v5953_v30 = vsel %vm5952_vm10, %v7903_v46, %v5949_v2 }
 0x96a   :  { %v5954_v37 = vmul.f32 %v5953_v30, %v12587_v32  ;;  %v5955_v42 = vmul.f32 %v5953_v30, %v12590_v23  ;;  %v5956_v38 = vmul.f32 %v5953_v30, %v12593_v9  ;;  %v5957_v21 = vmul.f32 %v5953_v30, %v12596_v60 }
 0x96b   :  { %v5958_v3 = vmul.f32 %v5953_v30, %v12603_v1  ;;  %v5959_v28 = vmul.f32 %v5953_v30, %v12608_v29  ;;  %v5960_v25 = vmul.f32 %v5953_v30, %v12615_v52  ;;  %v5961_v32 = vmul.f32 %v5953_v30, %v12621_v18 }
 0x96c   :  { %v5971_v59 = vmul.f32 %v5970_v10, %v5954_v37  ;;  %v5972_v16 = vmul.f32 %v5970_v10, %v5955_v42  ;;  %v5973_v58 = vmul.f32 %v5970_v10, %v5956_v38  ;;  %v5974_v23 = vmul.f32 %v5970_v10, %v5957_v21 }
 0x96d   :  { %v5962_v9 = vmul.f32 %v5953_v30, %v12627_v31  ;;  %v5975_v45 = vmul.f32 %v5970_v10, %v5958_v3  ;;  %v5963_v53 = vmul.f32 %v5953_v30, %v12633_v36  ;;  %v5964_v60 = vmul.f32 %v5953_v30, %v12639_v55 }
 0x96e   :  { %v5976_v1 = vmul.f32 %v5970_v10, %v5959_v28  ;;  %v5977_v47 = vmul.f32 %v5970_v10, %v5960_v25  ;;  %v5988_v29 = vadd.f32 %v5987_v4, %v5971_v59  ;;  %v5989_v48 = vadd.f32 %v5987_v4, %v5972_v16 }
 0x96f   :  { %v5990_v54 = vadd.f32 %v5987_v4, %v5973_v58  ;;  %v5965_v52 = vmul.f32 %v5953_v30, %v12645_v11  ;;  %v5978_v27 = vmul.f32 %v5970_v10, %v5961_v32  ;;  %v5991_v0 = vadd.f32 %v5987_v4, %v5974_v23 }
 0x970   :  { %v5966_v51 = vmul.f32 %v5953_v30, %v12651_v57  ;;  %v5967_v18 = vmul.f32 %v5953_v30, %v12657_v22  ;;  %v5979_v61 = vmul.f32 %v5970_v10, %v5962_v9  ;;  %v5992_v31 = vadd.f32 %v5987_v4, %v5975_v45 }
 0x971   :  { %v5968_v40 = vmul.f32 %v5953_v30, %v12663_v49  ;;  %v5980_v36 = vmul.f32 %v5970_v10, %v5963_v53  ;;  %v5981_v17 = vmul.f32 %v5970_v10, %v5964_v60  ;;  %v5993_v55 = vadd.f32 %v5987_v4, %v5976_v1 }
 0x972   :  { %v5994_v33 = vadd.f32 %v5987_v4, %v5977_v47  ;;  %v6004_v24 = vmax.f32 %v5988_v29, 0.0  ;;  %v6005_v13 = vmax.f32 %v5989_v48, 0.0  ;;  %v6006_v63 = vmax.f32 %v5990_v54, 0.0  ;;  %v6868_v29 = vld [vmem:[%s13738_s5 + $0x40] sm:$0xff] }
 0x973   :  { %v5969_v44 = vmul.f32 %v5953_v30, %v12668_v35  ;;  %v5982_v11 = vmul.f32 %v5970_v10, %v5965_v52  ;;  %v5995_v15 = vadd.f32 %v5987_v4, %v5978_v27  ;;  %v6007_v12 = vmax.f32 %v5991_v0, 0.0 }
 0x974   :  { %v5983_v26 = vmul.f32 %v5970_v10, %v5966_v51  ;;  %v5996_v57 = vadd.f32 %v5987_v4, %v5979_v61  ;;  %v6008_v19 = vmax.f32 %v5992_v31, 0.0  ;;  %6060 = vst.msk [vmem:[#allocation3 + $0x11] sm:$0xff] %vm535_vm3, %v6004_v24  ;;  %v5984_v22 = vmul.f32 %v5970_v10, %v5967_v18  ;;  %v6867_v18 = vld [vmem:[%s13738_s5 + $0x38] sm:$0xff] }
 0x975   :  { %v5997_v56 = vadd.f32 %v5987_v4, %v5980_v36  ;;  %v6009_v49 = vmax.f32 %v5993_v55, 0.0  ;;  %6061 = vst.msk [vmem:[#allocation3 + $0x21] sm:$0xff] %vm535_vm3, %v6005_v13  ;;  %v5985_v46 = vmul.f32 %v5970_v10, %v5968_v40  ;;  %v5998_v34 = vadd.f32 %v5987_v4, %v5981_v17  ;;  %v6084_v40 = vld [vmem:[#allocation3 + $0xa0] sm:$0xff]  ;;  %v6866_v17 = vld [vmem:[%s13738_s5 + $0x30] sm:$0xff]  ;;  %v6865_v55 = vld [vmem:[%s13738_s5 + $0x28] sm:$0xff] }
 0x976   :  { %v6010_v39 = vmax.f32 %v5994_v33, 0.0  ;;  %6062 = vst.msk [vmem:[#allocation3 + $0x31] sm:$0xff] %vm535_vm3, %v6006_v63  ;;  %v5986_v7 = vmul.f32 %v5970_v10, %v5969_v44  ;;  %v5999_v35 = vadd.f32 %v5987_v4, %v5982_v11  ;;  %v6011_v14 = vmax.f32 %v5995_v15, 0.0  ;;  %v6864_v33 = vld [vmem:[%s13738_s5 + $0x20] sm:$0xff] }
 0x977   :  { %6063 = vst.msk [vmem:[#allocation3 + $0x41] sm:$0xff] %vm535_vm3, %v6007_v12  ;;  %v6000_v43 = vadd.f32 %v5987_v4, %v5983_v26  ;;  %v6012_v50 = vmax.f32 %v5996_v57, 0.0  ;;  %v6001_v6 = vadd.f32 %v5987_v4, %v5984_v22  ;;  %v6013_v20 = vmax.f32 %v5997_v56, 0.0  ;;  %v6863_v56 = vld [vmem:[%s13738_s5 + $0x18] sm:$0xff] }
 0x978   :  { %6064 = vst.msk [vmem:[#allocation3 + $0x51] sm:$0xff] %vm535_vm3, %v6008_v19  ;;  %v6002_v62 = vadd.f32 %v5987_v4, %v5985_v46  ;;  %v6014_v8 = vmax.f32 %v5998_v34, 0.0  ;;  %v6003_v2 = vadd.f32 %v5987_v4, %v5986_v7  ;;  %v6015_v30 = vmax.f32 %v5999_v35, 0.0 }
 0x979   :  { %6065 = vst.msk [vmem:[#allocation3 + $0x61] sm:$0xff] %vm535_vm3, %v6009_v49  ;;  %v6016_v41 = vmax.f32 %v6000_v43, 0.0  ;;  %v6017_v10 = vmax.f32 %v6001_v6, 0.0  ;;  %v12784_v48 = vand.u32 4294901760, %v6868_v29  ;;  %v12805_v61 = vand.u32 4294901760, %v6867_v18 }
 0x97a   :  { %6066 = vst.msk [vmem:[#allocation3 + $0x71] sm:$0xff] %vm535_vm3, %v6010_v39  ;;  %v6018_v21 = vmax.f32 %v6002_v62, 0.0  ;;  %v6019_v3 = vmax.f32 %v6003_v2, 0.0  ;;  %v12822_v13 = vand.u32 4294901760, %v6866_v17  ;;  %v12825_v63 = vand.u32 4294901760, %v6865_v55 }
 0x97b   :  { %6067 = vst.msk [vmem:[#allocation3 + $0x81] sm:$0xff] %vm535_vm3, %v6011_v14  ;;  %v6156_v37 = vld [vmem:[#allocation3 + $0x12] sm:$0xff]  ;;  %v12787_v54 = vsub.f32 %v6868_v29, %v12784_v48  ;;  %7321 = vmatpush.msrb.mxu3 %v12784_v48  ;;  %6926 = vmatpush.msra.mxu0 %v12784_v48  ;;  %v12808_v36 = vsub.f32 %v6867_v18, %v12805_v61  ;;  %v12827_v44 = vand.u32 4294901760, %v6864_v33  ;;  %v12864_v14 = vand.u32 4294901760, %v6863_v56 }
 0x97c   :  { %v6140_v42 = vld [vmem:[#allocation3 + $0x11] sm:$0xff]  ;;  %6068 = vst.msk [vmem:[#allocation3 + $0xb1] sm:$0xff] %vm535_vm3, %v6012_v50  ;;  %6492 = vrot.lane.b32.xlu2 %v6156_v37, %s7932_s15  ;;  %v6204_v28 = vld [vmem:[#allocation3 + $0x22] sm:$0xff]  ;;  %v12840_v26 = vsub.f32 %v6866_v17, %v12822_v13  ;;  %v12843_v57 = vsub.f32 %v6865_v55, %v12825_v63 }
 0x97d   :  { %v12715_v38 = vld [vmem:[#allocation3 + $0x10] sm:$0xff]  ;;  %6428 = vrot.lane.b32.xlu1 %v6140_v42, %s7933_s16  ;;  %6069 = vst.msk [vmem:[#allocation3 + $0xc1] sm:$0xff] %vm535_vm3, %v6013_v20  ;;  %v6188_v4 = vld [vmem:[#allocation3 + $0x21] sm:$0xff]  ;;  %v7081_v52 = vand.u32 4294901760, %v12787_v54  ;;  %7207 = vmatpush.msrb.mxu2 %v12787_v54  ;;  %v7087_v24 = vand.u32 4294901760, %v12808_v36  ;;  %v12848_v22 = vsub.f32 %v6864_v33, %v12827_v44  ;;  %v12878_v20 = vsub.f32 %v6863_v56, %v12864_v14 }
 0x97e   :  { %6364 = vrot.lane.b32.xlu0 %v12715_v38, %s7934_s17  ;;  %6070 = vst.msk [vmem:[#allocation3 + $0xd1] sm:$0xff] %vm535_vm3, %v6014_v8  ;;  %v12731_v25 = vld [vmem:[#allocation3 + $0x20] sm:$0xff]  ;;  %v12739_v59 = vld [vmem:[#allocation3 + $0x30] sm:$0xff]  ;;  %7323 = vmatpush.msrb.mxu3 %v12805_v61  ;;  %v7093_v39 = vand.u32 4294901760, %v12840_v26  ;;  %v7099_v7 = vand.u32 4294901760, %v12843_v57 }
 0x97f   :  { %6071 = vst.msk [vmem:[#allocation3 + $0xe1] sm:$0xff] %vm535_vm3, %v6015_v30  ;;  %v6205_v16 = vld [vmem:[#allocation3 + $0x32] sm:$0xff]  ;;  %v6190_v32 = vld [vmem:[#allocation3 + $0x41] sm:$0xff]  ;;  %v7082_v51 = vsub.f32 %v12787_v54, %v7081_v52  ;;  %6928 = vmatpush.msra.mxu0 %v12805_v61  ;;  %7210 = vmatpush.msrb.mxu2 %v12808_v36  ;;  %v7088_v12 = vsub.f32 %v12808_v36, %v7087_v24  ;;  %v7105_v35 = vand.u32 4294901760, %v12848_v22 }
 0x980   :  { %6072 = vst.msk [vmem:[#allocation3 + $0xf1] sm:$0xff] %vm535_vm3, %v6016_v41  ;;  %v6189_v58 = vld [vmem:[#allocation3 + $0x31] sm:$0xff]  ;;  %v12752_v23 = vld [vmem:[#allocation3 + $0x40] sm:$0xff]  ;;  %7325 = vmatpush.msrb.mxu3 %v12822_v13  ;;  %v7094_v43 = vsub.f32 %v12840_v26, %v7093_v39  ;;  %v7100_v50 = vsub.f32 %v12843_v57, %v7099_v7 }
 0x981   :  { %6073 = vst.msk [vmem:[#allocation3 + $0x101] sm:$0xff] %vm535_vm3, %v6017_v10  ;;  %v6206_v9 = vld [vmem:[#allocation3 + $0x42] sm:$0xff]  ;;  %v12769_v60 = vld [vmem:[#allocation3 + $0x52] sm:$0xff]  ;;  %v7083_v31 = vand.u32 4294901760, %v7082_v51  ;;  %v7089_v34 = vand.u32 4294901760, %v7088_v12  ;;  %7213 = vmatpush.msrb.mxu2 %v12840_v26  ;;  %6930 = vmatpush.msra.mxu0 %v12822_v13  ;;  %v7106_v6 = vsub.f32 %v12848_v22, %v7105_v35 }
 0x982   :  { %6074 = vst.msk [vmem:[#allocation3 + $0x111] sm:$0xff] %vm535_vm3, %v6018_v21  ;;  %v12771_v1 = vld [vmem:[#allocation3 + $0x51] sm:$0xff]  ;;  %v12830_v15 = vld [vmem:[#allocation3 + $0x60] sm:$0xff]  ;;  %7327 = vmatpush.msrb.mxu3 %v12825_v63  ;;  %v7095_v8 = vand.u32 4294901760, %v7094_v43  ;;  %v7101_v30 = vand.u32 4294901760, %v7100_v50 }
 0x983   :  { %6075 = vst.msk [vmem:[#allocation3 + $0x121] sm:$0xff] %vm535_vm3, %v6019_v3  ;;  %v12777_v47 = vld [vmem:[#allocation3 + $0x50] sm:$0xff]  ;;  %7084 = vmatpush.msra.mxu1 %v7083_v31  ;;  %7216 = vmatpush.msrb.mxu2 %v12843_v57  ;;  %v12885_v2 = vld [vmem:[#allocation3 + $0x62] sm:$0xff]  ;;  %v7107_v10 = vand.u32 4294901760, %v7106_v6 }
 0x984   :  { %6684 = vrot.lane.b32.xlu2 %v6204_v28, %s7931_s14  ;;  %7329 = vmatpush.msrb.mxu3 %v12827_v44  ;;  %v6862_v41 = vld [vmem:[%s13738_s5 + $0x10] sm:$0xff] }
 0x985   :  { %6620 = vrot.lane.b32.xlu1 %v6188_v4, %s7930_s12  ;;  %7090 = vmatpush.msra.mxu1 %v7089_v34  ;;  %v12904_v3 = vand.u32 4294901760, %v6862_v41  ;;  %v12953_v34 = vld [vmem:[#allocation3 + $0x71] sm:$0xff] }
 0x986   :  { %6556 = vrot.lane.b32.xlu0 %v12731_v25, %s7929_s9  ;;  %6932 = vmatpush.msra.mxu0 %v12825_v63  ;;  %v12955_v43 = vld [vmem:[#allocation3 + $0x70] sm:$0xff] }
 0x987   :  { %v12761_v45 = vpop.permute.xlu2 %6300  ;;  %7219 = vmatpush.msrb.mxu2 %v12848_v22  ;;  %7331 = vmatpush.msrb.mxu3 %v12864_v14 }
 0x988   :  { %6934 = vmatpush.msra.mxu0 %v12827_v44  ;;  %7096 = vmatpush.msra.mxu1 %v7095_v8 }
 0x989   :  { %7222 = vmatpush.msrb.mxu2 %v12878_v20  ;;  %7333 = vmatpush.msrb.mxu3 %v12904_v3 }
 0x98a   :  { %6936 = vmatpush.msra.mxu0 %v12864_v14  ;;  %7102 = vmatpush.msra.mxu1 %v7101_v30  ;;  %v6210_v30 = vld [vmem:[#allocation3 + $0x82] sm:$0xff] }
 0x98c   :  { %6366 = vrot.lane.b32.xlu2 %v12731_v25, %s7934_s17  ;;  %6938 = vmatpush.msra.mxu0 %v12904_v3 }
 0x98d   :  { %6302 = vrot.lane.b32.xlu1 %v6156_v37, %s7925_s8  ;;  %v7111_v37 = vand.u32 4294901760, %v12878_v20  ;;  %7108 = vmatpush.msra.mxu1 %v7107_v10 }
 0x98e   :  { %6238 = vrot.lane.b32.xlu0 %v6140_v42, %s7923_s27  ;;  %v12894_v42 = vld [vmem:[#allocation3 + $0x61] sm:$0xff] }
 0x98f   :  { %v12767_v53 = vpop.permute.xlu2 %6570  ;;  %v7112_v21 = vsub.f32 %v12878_v20, %v7111_v37 }
 0x994   :  { %6558 = vrot.lane.b32.xlu2 %v12739_v59, %s7929_s9 }
 0x995   :  { %6494 = vrot.lane.b32.xlu1 %v6204_v28, %s7932_s15 }
 0x996   :  { %6430 = vrot.lane.b32.xlu0 %v6188_v4, %s7933_s16 }
 0x997   :  { %v6253_v27 = vpop.permute.xlu2 %6252 }
 0x998   :  { %v6740_v11 = vsel %vm535_vm3, %v6084_v40, %v6253_v27 }
 0x99c   :  { %6240 = vrot.lane.b32.xlu2 %v6188_v4, %s7923_s27  ;;  %v6861_v4 = vld [vmem:[%s13738_s5 + $0x8] sm:$0xff] }
 0x99d   :  { %6686 = vrot.lane.b32.xlu1 %v6205_v16, %s7931_s14 }
 0x99e   :  { %6622 = vrot.lane.b32.xlu0 %v6189_v58, %s7930_s12  ;;  %v12797_v0 = vpop.permute.xlu0 %6634 }
 0x9a3   :  { %v12882_v62 = vpop.permute.xlu1 %6236 }
 0x9a4   :  { %6432 = vrot.lane.b32.xlu2 %v6189_v58, %s7933_s16 }
 0x9a5   :  { %6368 = vrot.lane.b32.xlu1 %v12739_v59, %s7934_s17 }
 0x9a6   :  { %6304 = vrot.lane.b32.xlu0 %v6204_v28, %s7925_s8  ;;  %v6317_v19 = vpop.permute.xlu0 %6316 }
 0x9a7   :  { %v12857_v46 = vsel %vm31_vm0, %v6740_v11, %v6317_v19 }
 0x9ab   :  { %v12939_v17 = vpop.permute.xlu1 %6698 }
 0x9ac   :  { %6624 = vrot.lane.b32.xlu2 %v6190_v32, %s7930_s12 }
 0x9ad   :  { %6560 = vrot.lane.b32.xlu1 %v12752_v23, %s7929_s9 }
 0x9ae   :  { %6496 = vrot.lane.b32.xlu0 %v6205_v16, %s7932_s15 }
 0x9b4   :  { %6306 = vrot.lane.b32.xlu2 %v6205_v16, %s7925_s8  ;;  %v6860_v16 = vld [vmem:[%s13738_s5] sm:$0xff] }
 0x9b5   :  { %6242 = vrot.lane.b32.xlu1 %v6189_v58, %s7923_s27  ;;  %v7113_v58 = vand.u32 4294901760, %v7112_v21 }
 0x9b6   :  { %6688 = vrot.lane.b32.xlu0 %v6206_v9, %s7931_s14 }
 0x9b7   :  { %7114 = vmatpush.msra.mxu1 %v7113_v58 }
 0x9bc   :  { %6498 = vrot.lane.b32.xlu2 %v6206_v9, %s7932_s15 }
 0x9bd   :  { %6434 = vrot.lane.b32.xlu1 %v6190_v32, %s7933_s16 }
 0x9be   :  { %6370 = vrot.lane.b32.xlu0 %v12752_v23, %s7934_s17 }
 0x9c4   :  { %6690 = vrot.lane.b32.xlu2 %v12769_v60, %s7931_s14 }
 0x9c5   :  { %6626 = vrot.lane.b32.xlu1 %v12771_v1, %s7930_s12 }
 0x9c6   :  { %6562 = vrot.lane.b32.xlu0 %v12777_v47, %s7929_s9 }
 0x9cc   :  { %6372 = vrot.lane.b32.xlu2 %v12777_v47, %s7934_s17 }
 0x9cd   :  { %6308 = vrot.lane.b32.xlu1 %v6206_v9, %s7925_s8  ;;  %v12919_v9 = vand.u32 4294901760, %v6861_v4 }
 0x9ce   :  { %6244 = vrot.lane.b32.xlu0 %v6190_v32, %s7923_s27  ;;  %v12917_v32 = vsub.f32 %v6862_v41, %v12904_v3 }
 0x9cf   :  { %v7122_v27 = vsub.f32 %v6861_v4, %v12919_v9  ;;  %7335 = vmatpush.msrb.mxu3 %v12919_v9  ;;  %6940 = vmatpush.msra.mxu0 %v12919_v9 }
 0x9d0   :  { %v7117_v29 = vand.u32 4294901760, %v12917_v32  ;;  %7225 = vmatpush.msrb.mxu2 %v12917_v32 }
 0x9d1   :  { %v7123_v31 = vand.u32 4294901760, %v7122_v27 }
 0x9d2   :  { %v7118_v18 = vsub.f32 %v12917_v32, %v7117_v29  ;;  %7228 = vmatpush.msrb.mxu2 %v7122_v27 }
 0x9d3   :  { %v7124_v33 = vsub.f32 %v7122_v27, %v7123_v31 }
 0x9d4   :  { %6564 = vrot.lane.b32.xlu2 %v12830_v15, %s7929_s9  ;;  %v7119_v55 = vand.u32 4294901760, %v7118_v18 }
 0x9d5   :  { %6500 = vrot.lane.b32.xlu1 %v12769_v60, %s7932_s15  ;;  %v7125_v19 = vand.u32 4294901760, %v7124_v33 }
 0x9d6   :  { %6436 = vrot.lane.b32.xlu0 %v12771_v1, %s7933_s16  ;;  %v12854_v49 = vpop.permute.xlu2 %6492  ;;  %7120 = vmatpush.msra.mxu1 %v7119_v55 }
 0x9d8   :  { %7126 = vmatpush.msra.mxu1 %v7125_v19 }
 0x9dc   :  { %6246 = vrot.lane.b32.xlu2 %v12771_v1, %s7923_s27  ;;  %v12921_v1 = vand.u32 4294901760, %v6860_v16 }
 0x9dd   :  { %6692 = vrot.lane.b32.xlu1 %v12885_v2, %s7931_s14 }
 0x9de   :  { %6628 = vrot.lane.b32.xlu0 %v12894_v42, %s7930_s12  ;;  %v12906_v28 = vpop.permute.xlu2 %6684  ;;  %v12929_v51 = vsub.f32 %v6860_v16, %v12921_v1  ;;  %7337 = vmatpush.msrb.mxu3 %v12921_v1 }
 0x9df   :  { %6942 = vmatpush.msra.mxu0 %v12921_v1 }
 0x9e0   :  { %v7129_v40 = vand.u32 4294901760, %v12929_v51  ;;  %7231 = vmatpush.msrb.mxu2 %v12929_v51 }
 0x9e1   :  { %7445 = vmatpush.msrb.mxu0 %v7081_v52 }
 0x9e2   :  { %v7130_v11 = vsub.f32 %v12929_v51, %v7129_v40 }
 0x9e3   :  { %7449 = vmatpush.msrb.mxu0 %v7087_v24 }
 0x9e4   :  { %6438 = vrot.lane.b32.xlu2 %v12894_v42, %s7933_s16  ;;  %v7131_v56 = vand.u32 4294901760, %v7130_v11 }
 0x9e5   :  { %6374 = vrot.lane.b32.xlu1 %v12830_v15, %s7934_s17  ;;  %7453 = vmatpush.msrb.mxu0 %v7093_v39 }
 0x9e6   :  { %6310 = vrot.lane.b32.xlu0 %v12769_v60, %s7925_s8  ;;  %v12945_v12 = vpop.permute.xlu2 %6366  ;;  %v6076_v60 = vld [vmem:[#allocation3] sm:$0xff]  ;;  %7132 = vmatpush.msra.mxu1 %v7131_v56 }
 0x9e7   :  { %v6732_v54 = vsel %vm535_vm3, %v6076_v60, %v12882_v62  ;;  %7457 = vmatpush.msrb.mxu0 %v7099_v7 }
 0x9e8   :  { %7551 = vmatpush.msrb.mxu1 %v12784_v48  ;;  %v6748_v26 = vsel %vm31_vm0, %v6732_v54, %v12761_v45  ;;  %v6209_v45 = vld [vmem:[#allocation3 + $0x72] sm:$0xff] }
 0x9e9   :  { %7461 = vmatpush.msrb.mxu0 %v7105_v35  ;;  %v13041_v54 = vld [vmem:[#allocation3 + $0xb0] sm:$0xff] }
 0x9ea   :  { %7553 = vmatpush.msrb.mxu1 %v12805_v61 }
 0x9eb   :  { %7465 = vmatpush.msrb.mxu0 %v7111_v37  ;;  %v6194_v37 = vld [vmem:[#allocation3 + $0x81] sm:$0xff] }
 0x9ec   :  { %6630 = vrot.lane.b32.xlu2 %v12953_v34, %s7930_s12  ;;  %7555 = vmatpush.msrb.mxu1 %v12822_v13 }
 0x9ed   :  { %6566 = vrot.lane.b32.xlu1 %v12955_v43, %s7929_s9  ;;  %7469 = vmatpush.msrb.mxu0 %v7117_v29 }
 0x9ee   :  { %6502 = vrot.lane.b32.xlu0 %v12885_v2, %s7932_s15  ;;  %v12968_v36 = vpop.permute.xlu2 %6558  ;;  %7557 = vmatpush.msrb.mxu1 %v12825_v63 }
 0x9ef   :  { %v6429_v52 = vpop.permute.xlu1 %6428  ;;  %7473 = vmatpush.msrb.mxu0 %v7123_v31  ;;  %v6148_v31 = vld [vmem:[#allocation3 + $0xb1] sm:$0xff] }
 0x9f0   :  { %v6365_v24 = vpop.permute.xlu0 %6364  ;;  %7559 = vmatpush.msrb.mxu1 %v12827_v44 }
 0x9f1   :  { %v6764_v39 = vsel %vm602_vm7, %v6748_v26, %v6365_v24  ;;  %7477 = vmatpush.msrb.mxu0 %v7129_v40 }
 0x9f2   :  { %v6780_v48 = vsel %vm636_vm9, %v6764_v39, %v6429_v52  ;;  %7561 = vmatpush.msrb.mxu1 %v12864_v14 }
 0x9f3   :  { %v6796_v63 = vsel %vm3163_vm1, %v6780_v48, %v12854_v49 }
 0x9f4   :  { %6312 = vrot.lane.b32.xlu2 %v12885_v2, %s7925_s8  ;;  %7563 = vmatpush.msrb.mxu1 %v12904_v3 }
 0x9f5   :  { %6248 = vrot.lane.b32.xlu1 %v12894_v42, %s7923_s27  ;;  %v6178_v42 = vld [vmem:[#allocation3 + $0x80] sm:$0xff] }
 0x9f6   :  { %6694 = vrot.lane.b32.xlu0 %v6209_v45, %s7931_s14  ;;  %v12989_v13 = vpop.permute.xlu2 %6240  ;;  %7565 = vmatpush.msrb.mxu1 %v12919_v9 }
 0x9f7   :  { %v6621_v61 = vpop.permute.xlu1 %6620  ;;  %v6734_v19 = vsel %vm535_vm3, %v12731_v25, %v12989_v13 }
 0x9f8   :  { %v6557_v57 = vpop.permute.xlu0 %6556  ;;  %7567 = vmatpush.msrb.mxu1 %v12921_v1 }
 0x9f9   :  { %v6812_v22 = vsel %vm3180_vm2, %v6796_v63, %v6557_v57  ;;  %v6212_v57 = vld [vmem:[#allocation3 + $0xc2] sm:$0xff] }
 0x9fa   :  { %v6828_v7 = vsel %vm3197_vm4, %v6812_v22, %v6621_v61  ;;  %v13050_v61 = vld [vmem:[#allocation3 + $0xc0] sm:$0xff] }
 0x9fb   :  { %v6844_v44 = vsel %vm3214_vm5, %v6828_v7, %v12906_v28 }
 0x9fc   :  { %v6871_v35 = vsel %vm3241_vm6, %v6844_v44, 0  ;;  %6504 = vrot.lane.b32.xlu2 %v6209_v45, %s7932_s15 }
 0x9fd   :  { %v13001_v50 = vand.u32 4294901760, %v6871_v35  ;;  %6440 = vrot.lane.b32.xlu1 %v12953_v34, %s7933_s16 }
 0x9fe   :  { %6376 = vrot.lane.b32.xlu0 %v12955_v43, %s7934_s17  ;;  %v6433_v6 = vpop.permute.xlu2 %6432 }
 0x9ff   :  { %v6944_v49 = vsub.f32 %v6871_v35, %v13001_v50  ;;  %7134 = vmatmul.f32.vlgmr.msra.gmra.mxu1 %v13001_v50  ;;  %v6303_v14 = vpop.permute.xlu1 %6302 }
 0xa00   :  { %v6239_v20 = vpop.permute.xlu0 %6238 }
 0xa01   :  { %7234 = vmatmul.f32.vlgmr.msrb.gmra.mxu2 %v6944_v49  ;;  %v6945_v62 = vand.u32 4294901760, %v6944_v49  ;;  %v6733_v8 = vsel %vm535_vm3, %v12715_v38, %v6239_v20 }
 0xa02   :  { %v6749_v10 = vsel %vm31_vm0, %v6733_v8, %v6303_v14 }
 0xa03   :  { %7341 = vmatmul.f32.vlgmr.msrb.gmra.mxu3 %v6945_v62  ;;  %v6946_v2 = vsub.f32 %v6944_v49, %v6945_v62  ;;  %v6765_v38 = vsel %vm602_vm7, %v6749_v10, %v12945_v12 }
 0xa04   :  { %6696 = vrot.lane.b32.xlu2 %v6210_v30, %s7931_s14 }
 0xa05   :  { %6632 = vrot.lane.b32.xlu1 %v6194_v37, %s7930_s12  ;;  %v6947_v41 = vand.u32 4294901760, %v6946_v2 }
 0xa06   :  { %6568 = vrot.lane.b32.xlu0 %v6178_v42, %s7929_s9  ;;  %v6625_v3 = vpop.permute.xlu2 %6624 }
 0xa07   :  { %6948 = vmatmul.f32.vlgmr.msra.gmra.mxu0 %v6947_v41  ;;  %v6495_v21 = vpop.permute.xlu1 %6494 }
 0xa08   :  { %v6431_v28 = vpop.permute.xlu0 %6430 }
 0xa09   :  { %v6781_v4 = vsel %vm636_vm9, %v6765_v38, %v6431_v28 }
 0xa0a   :  { %v6797_v16 = vsel %vm3163_vm1, %v6781_v4, %v6495_v21  ;;  %v6213_v21 = vld [vmem:[#allocation3 + $0xd2] sm:$0xff] }
 0xa0b   :  { %v6813_v1 = vsel %vm3180_vm2, %v6797_v16, %v12968_v36  ;;  %v6164_v36 = vld [vmem:[#allocation3 + $0xb2] sm:$0xff] }
 0xa0c   :  { %6378 = vrot.lane.b32.xlu2 %v6178_v42, %s7934_s17 }
 0xa0d   :  { %6314 = vrot.lane.b32.xlu1 %v6209_v45, %s7925_s8 }
 0xa0e   :  { %6250 = vrot.lane.b32.xlu0 %v12953_v34, %s7923_s27  ;;  %v6307_v32 = vpop.permute.xlu2 %6306  ;;  %v6196_v34 = vld [vmem:[#allocation3 + $0xc1] sm:$0xff] }
 0xa0f   :  { %v6687_v58 = vpop.permute.xlu1 %6686 }
 0xa10   :  { %v6623_v9 = vpop.permute.xlu0 %6622 }
 0xa11   :  { %v6829_v29 = vsel %vm3197_vm4, %v6813_v1, %v6623_v9 }
 0xa12   :  { %v6845_v27 = vsel %vm3214_vm5, %v6829_v29, %v6687_v58  ;;  %v6197_v29 = vld [vmem:[#allocation3 + $0xd1] sm:$0xff] }
 0xa13   :  { %v6874_v51 = vsel %vm3241_vm6, %v6845_v27, 0 }
 0xa14   :  { %v13030_v18 = vand.u32 4294901760, %v6874_v51  ;;  %6444 = vrot.lane.b32.xlu2 %v6148_v31, %s7933_s16 }
 0xa15   :  { %6506 = vrot.lane.b32.xlu1 %v6210_v30, %s7932_s15 }
 0xa16   :  { %6442 = vrot.lane.b32.xlu0 %v6194_v37, %s7933_s16  ;;  %7138 = vmatmul.f32.gmra.mxu1 %v13030_v18  ;;  %v6952_v40 = vsub.f32 %v6874_v51, %v13030_v18  ;;  %v6499_v33 = vpop.permute.xlu2 %6498 }
 0xa17   :  { %v6369_v55 = vpop.permute.xlu1 %6368 }
 0xa18   :  { %v6305_v11 = vpop.permute.xlu0 %6304  ;;  %7239 = vmatmul.f32.gmra.mxu2 %v6952_v40  ;;  %v6953_v12 = vand.u32 4294901760, %v6952_v40 }
 0xa19   :  { %v6750_v60 = vsel %vm31_vm0, %v6734_v19, %v6305_v11  ;;  %v13096_v19 = vld [vmem:[#allocation3 + $0xe0] sm:$0xff] }
 0xa1a   :  { %7347 = vmatmul.f32.gmra.mxu3 %v6953_v12  ;;  %v6954_v56 = vsub.f32 %v6952_v40, %v6953_v12  ;;  %v6766_v24 = vsel %vm602_vm7, %v6750_v60, %v6369_v55 }
 0xa1b   :  { %v6782_v48 = vsel %vm636_vm9, %v6766_v24, %v6433_v6 }
 0xa1c   :  { %v6955_v52 = vand.u32 4294901760, %v6954_v56  ;;  %6636 = vrot.lane.b32.xlu2 %v6196_v34, %s7930_s12 }
 0xa1d   :  { %6380 = vrot.lane.b32.xlu1 %v13041_v54, %s7934_s17 }
 0xa1e   :  { %6508 = vrot.lane.b32.xlu0 %v6164_v36, %s7932_s15  ;;  %6956 = vmatmul.f32.gmra.mxu0 %v6955_v52  ;;  %v6691_v26 = vpop.permute.xlu2 %6690 }
 0xa1f   :  { %v6561_v25 = vpop.permute.xlu1 %6560 }
 0xa20   :  { %v6497_v39 = vpop.permute.xlu0 %6496 }
 0xa21   :  { %v6798_v45 = vsel %vm3163_vm1, %v6782_v48, %v6497_v39 }
 0xa22   :  { %v6814_v13 = vsel %vm3180_vm2, %v6798_v45, %v6561_v25 }
 0xa23   :  { %v6830_v44 = vsel %vm3197_vm4, %v6814_v13, %v6625_v3  ;;  %v13076_v3 = vld [vmem:[#allocation3 + $0xd0] sm:$0xff] }
 0xa24   :  { %6318 = vrot.lane.b32.xlu2 %v6164_v36, %s7925_s8 }
 0xa25   :  { %6572 = vrot.lane.b32.xlu1 %v13050_v61, %s7929_s9 }
 0xa26   :  { %6700 = vrot.lane.b32.xlu0 %v6212_v57, %s7931_s14  ;;  %v13057_v22 = vpop.permute.xlu2 %6372 }
 0xa27   :  { %v6243_v63 = vpop.permute.xlu1 %6242 }
 0xa28   :  { %v6689_v7 = vpop.permute.xlu0 %6688  ;;  %v6735_v20 = vsel %vm535_vm3, %v12739_v59, %v6243_v63 }
 0xa29   :  { %v6846_v35 = vsel %vm3214_vm5, %v6830_v44, %v6689_v7  ;;  %v6751_v37 = vsel %vm31_vm0, %v6735_v20, %v6307_v32  ;;  %v6214_v44 = vld [vmem:[#allocation3 + $0xe2] sm:$0xff] }
 0xa2a   :  { %v6877_v49 = vsel %vm3241_vm6, %v6846_v35, 0 }
 0xa2b   :  { %v13062_v14 = vand.u32 4294901760, %v6877_v49 }
 0xa2c   :  { %6510 = vrot.lane.b32.xlu2 %v6212_v57, %s7932_s15 }
 0xa2d   :  { %v6960_v6 = vsub.f32 %v6877_v49, %v13062_v14  ;;  %7142 = vmatmul.f32.gmra.mxu1 %v13062_v14  ;;  %6254 = vrot.lane.b32.xlu1 %v6148_v31, %s7923_s27 }
 0xa2e   :  { %6382 = vrot.lane.b32.xlu0 %v13050_v61, %s7934_s17  ;;  %v6565_v8 = vpop.permute.xlu2 %6564 }
 0xa2f   :  { %7244 = vmatmul.f32.gmra.mxu2 %v6960_v6  ;;  %v6435_v62 = vpop.permute.xlu1 %6434  ;;  %v6961_v2 = vand.u32 4294901760, %v6960_v6 }
 0xa30   :  { %v6371_v30 = vpop.permute.xlu0 %6370 }
 0xa31   :  { %7353 = vmatmul.f32.gmra.mxu3 %v6961_v2  ;;  %v6962_v42 = vsub.f32 %v6960_v6, %v6961_v2  ;;  %v6767_v41 = vsel %vm602_vm7, %v6751_v37, %v6371_v30  ;;  %v6199_v37 = vld [vmem:[#allocation3 + $0xf1] sm:$0xff] }
 0xa32   :  { %v6783_v59 = vsel %vm636_vm9, %v6767_v41, %v6435_v62 }
 0xa33   :  { %v6963_v10 = vand.u32 4294901760, %v6962_v42  ;;  %v6799_v16 = vsel %vm3163_vm1, %v6783_v59, %v6499_v33 }
 0xa34   :  { %6702 = vrot.lane.b32.xlu2 %v6213_v21, %s7931_s14 }
 0xa35   :  { %6964 = vmatmul.f32.gmra.mxu0 %v6963_v10  ;;  %6446 = vrot.lane.b32.xlu1 %v6196_v34, %s7933_s16 }
 0xa36   :  { %6574 = vrot.lane.b32.xlu0 %v13076_v3, %s7929_s9  ;;  %v6247_v38 = vpop.permute.xlu2 %6246 }
 0xa37   :  { %v6627_v28 = vpop.permute.xlu1 %6626 }
 0xa38   :  { %v6563_v4 = vpop.permute.xlu0 %6562 }
 0xa39   :  { %v6815_v58 = vsel %vm3180_vm2, %v6799_v16, %v6563_v4  ;;  %v13133_v4 = vld [vmem:[#allocation3 + $0xf0] sm:$0xff] }
 0xa3a   :  { %v6831_v32 = vsel %vm3197_vm4, %v6815_v58, %v6627_v28  ;;  %v13135_v16 = vld [vmem:[#allocation3 + $0xf2] sm:$0xff] }
 0xa3b   :  { %v6847_v9 = vsel %vm3214_vm5, %v6831_v32, %v6691_v26  ;;  %v6198_v26 = vld [vmem:[#allocation3 + $0xe1] sm:$0xff] }
 0xa3c   :  { %v6880_v1 = vsel %vm3241_vm6, %v6847_v9, 0  ;;  %6384 = vrot.lane.b32.xlu2 %v13076_v3, %s7934_s17 }
 0xa3d   :  { %v13088_v27 = vand.u32 4294901760, %v6880_v1  ;;  %6638 = vrot.lane.b32.xlu1 %v6197_v29, %s7930_s12 }
 0xa3e   :  { %6256 = vrot.lane.b32.xlu0 %v6196_v34, %s7923_s27  ;;  %v6439_v31 = vpop.permute.xlu2 %6438 }
 0xa3f   :  { %7146 = vmatmul.f32.gmra.mxu1 %v13088_v27  ;;  %v6309_v51 = vpop.permute.xlu1 %6308  ;;  %v6968_v40 = vsub.f32 %v6880_v1, %v13088_v27 }
 0xa40   :  { %v6245_v55 = vpop.permute.xlu0 %6244 }
 0xa41   :  { %7249 = vmatmul.f32.gmra.mxu2 %v6968_v40  ;;  %v6969_v33 = vand.u32 4294901760, %v6968_v40  ;;  %v6736_v11 = vsel %vm535_vm3, %v12752_v23, %v6245_v55 }
 0xa42   :  { %v6752_v60 = vsel %vm31_vm0, %v6736_v11, %v6309_v51 }
 0xa43   :  { %7359 = vmatmul.f32.gmra.mxu3 %v6969_v33  ;;  %v6970_v12 = vsub.f32 %v6968_v40, %v6969_v33  ;;  %v6768_v23 = vsel %vm602_vm7, %v6752_v60, %v13057_v22 }
 0xa44   :  { %6576 = vrot.lane.b32.xlu2 %v13096_v19, %s7929_s9 }
 0xa45   :  { %v6971_v56 = vand.u32 4294901760, %v6970_v12  ;;  %6320 = vrot.lane.b32.xlu1 %v6212_v57, %s7925_s8 }
 0xa46   :  { %6448 = vrot.lane.b32.xlu0 %v6197_v29, %s7933_s16  ;;  %v6631_v52 = vpop.permute.xlu2 %6630 }
 0xa47   :  { %6972 = vmatmul.f32.gmra.mxu0 %v6971_v56  ;;  %v6501_v34 = vpop.permute.xlu1 %6500 }
 0xa48   :  { %v6437_v36 = vpop.permute.xlu0 %6436 }
 0xa49   :  { %v6784_v24 = vsel %vm636_vm9, %v6768_v23, %v6437_v36  ;;  %v13161_v23 = vld [vmem:[#allocation3 + $0x102] sm:$0xff] }
 0xa4a   :  { %v6800_v25 = vsel %vm3163_vm1, %v6784_v24, %v6501_v34  ;;  %v13166_v24 = vld [vmem:[#allocation3 + $0x100] sm:$0xff] }
 0xa4b   :  { %v6816_v13 = vsel %vm3180_vm2, %v6800_v25, %v6565_v8  ;;  %v6737_v8 = vsel %vm535_vm3, %v12777_v47, %v6247_v38 }
 0xa4c   :  { %6258 = vrot.lane.b32.xlu2 %v6197_v29, %s7923_s27 }
 0xa4d   :  { %6512 = vrot.lane.b32.xlu1 %v6213_v21, %s7932_s15 }
 0xa4e   :  { %6640 = vrot.lane.b32.xlu0 %v6198_v26, %s7930_s12  ;;  %v6313_v48 = vpop.permute.xlu2 %6312 }
 0xa4f   :  { %v6693_v39 = vpop.permute.xlu1 %6692 }
 0xa50   :  { %v6629_v45 = vpop.permute.xlu0 %6628 }
 0xa51   :  { %v6832_v57 = vsel %vm3197_vm4, %v6816_v13, %v6629_v45 }
 0xa52   :  { %v6848_v63 = vsel %vm3214_vm5, %v6832_v57, %v6693_v39 }
 0xa53   :  { %v6883_v22 = vsel %vm3241_vm6, %v6848_v63, 0 }
 0xa54   :  { %v13114_v7 = vand.u32 4294901760, %v6883_v22  ;;  %6450 = vrot.lane.b32.xlu2 %v6198_v26, %s7933_s16 }
 0xa55   :  { %6704 = vrot.lane.b32.xlu1 %v6214_v44, %s7931_s14 }
 0xa56   :  { %6322 = vrot.lane.b32.xlu0 %v6213_v21, %s7925_s8  ;;  %v6976_v35 = vsub.f32 %v6883_v22, %v13114_v7  ;;  %7150 = vmatmul.f32.gmra.mxu1 %v13114_v7  ;;  %v6505_v6 = vpop.permute.xlu2 %6504  ;;  %v6200_v22 = vld [vmem:[#allocation3 + $0x101] sm:$0xff] }
 0xa57   :  { %v6375_v49 = vpop.permute.xlu1 %6374 }
 0xa58   :  { %v6311_v20 = vpop.permute.xlu0 %6310  ;;  %7254 = vmatmul.f32.gmra.mxu2 %v6976_v35  ;;  %v6977_v62 = vand.u32 4294901760, %v6976_v35 }
 0xa59   :  { %v6753_v30 = vsel %vm31_vm0, %v6737_v8, %v6311_v20 }
 0xa5a   :  { %7365 = vmatmul.f32.gmra.mxu3 %v6977_v62  ;;  %v6978_v2 = vsub.f32 %v6976_v35, %v6977_v62  ;;  %v6769_v41 = vsel %vm602_vm7, %v6753_v30, %v6375_v49  ;;  %v30_v35 = vld [vmem:[%s13735_s6 + $0x10] sm:$0x7] }
 0xa5b   :  { %v6785_v47 = vsel %vm636_vm9, %v6769_v41, %v6439_v31  ;;  %v13195_v41 = vld [vmem:[#allocation3 + $0x110] sm:$0xff] }
 0xa5c   :  { %v6979_v42 = vand.u32 4294901760, %v6978_v2  ;;  %6642 = vrot.lane.b32.xlu2 %v6199_v37, %s7930_s12  ;;  %v13191_v2 = vperm.slane %v30_v35, 0 }
 0xa5d   :  { %6386 = vrot.lane.b32.xlu1 %v13096_v19, %s7934_s17 }
 0xa5e   :  { %6514 = vrot.lane.b32.xlu0 %v6214_v44, %s7932_s15  ;;  %6980 = vmatmul.f32.gmra.mxu0 %v6979_v42  ;;  %v6697_v21 = vpop.permute.xlu2 %6696 }
 0xa5f   :  { %v6567_v10 = vpop.permute.xlu1 %6566 }
 0xa60   :  { %v6503_v59 = vpop.permute.xlu0 %6502 }
 0xa61   :  { %v6801_v28 = vsel %vm3163_vm1, %v6785_v47, %v6503_v59 }
 0xa62   :  { %v6817_v38 = vsel %vm3180_vm2, %v6801_v28, %v6567_v10 }
 0xa63   :  { %v6833_v1 = vsel %vm3197_vm4, %v6817_v38, %v6631_v52 }
 0xa64   :  { %6324 = vrot.lane.b32.xlu2 %v6214_v44, %s7925_s8 }
 0xa65   :  { %6578 = vrot.lane.b32.xlu1 %v13133_v4, %s7929_s9 }
 0xa66   :  { %6706 = vrot.lane.b32.xlu0 %v13135_v16, %s7931_s14  ;;  %v13141_v32 = vpop.permute.xlu2 %6378 }
 0xa67   :  { %v6249_v58 = vpop.permute.xlu1 %6248 }
 0xa68   :  { %v6695_v9 = vpop.permute.xlu0 %6694  ;;  %v6738_v55 = vsel %vm535_vm3, %v12830_v15, %v6249_v58 }
 0xa69   :  { %v6849_v29 = vsel %vm3214_vm5, %v6833_v1, %v6695_v9  ;;  %v6754_v60 = vsel %vm31_vm0, %v6738_v55, %v6313_v48 }
 0xa6a   :  { %v6886_v51 = vsel %vm3241_vm6, %v6849_v29, 0 }
 0xa6b   :  { %v13146_v31 = vand.u32 4294901760, %v6886_v51 }
 0xa6c   :  { %6516 = vrot.lane.b32.xlu2 %v13135_v16, %s7932_s15 }
 0xa6d   :  { %v6984_v40 = vsub.f32 %v6886_v51, %v13146_v31  ;;  %7154 = vmatmul.f32.gmra.mxu1 %v13146_v31  ;;  %6260 = vrot.lane.b32.xlu1 %v6198_v26, %s7923_s27 }
 0xa6e   :  { %6388 = vrot.lane.b32.xlu0 %v13133_v4, %s7934_s17  ;;  %v13157_v11 = vpop.permute.xlu2 %6444 }
 0xa6f   :  { %7259 = vmatmul.f32.gmra.mxu2 %v6984_v40  ;;  %v6441_v33 = vpop.permute.xlu1 %6440  ;;  %v6985_v12 = vand.u32 4294901760, %v6984_v40 }
 0xa70   :  { %v6377_v56 = vpop.permute.xlu0 %6376 }
 0xa71   :  { %7371 = vmatmul.f32.gmra.mxu3 %v6985_v12  ;;  %v6986_v34 = vsub.f32 %v6984_v40, %v6985_v12  ;;  %v6770_v52 = vsel %vm602_vm7, %v6754_v60, %v6377_v56  ;;  %v13217_v56 = vld [vmem:[#allocation3 + $0x111] sm:$0xff] }
 0xa72   :  { %v6786_v15 = vsel %vm636_vm9, %v6770_v52, %v6441_v33 }
 0xa73   :  { %v6987_v36 = vand.u32 4294901760, %v6986_v34  ;;  %v6802_v48 = vsel %vm3163_vm1, %v6786_v15, %v6505_v6 }
 0xa74   :  { %6708 = vrot.lane.b32.xlu2 %v13161_v23, %s7931_s14 }
 0xa75   :  { %6988 = vmatmul.f32.gmra.mxu0 %v6987_v36  ;;  %6452 = vrot.lane.b32.xlu1 %v6199_v37, %s7933_s16 }
 0xa76   :  { %6580 = vrot.lane.b32.xlu0 %v13166_v24, %s7929_s9  ;;  %v13171_v26 = vpop.permute.xlu2 %6636 }
 0xa77   :  { %v6633_v25 = vpop.permute.xlu1 %6632 }
 0xa78   :  { %v6569_v39 = vpop.permute.xlu0 %6568 }
 0xa79   :  { %v6818_v45 = vsel %vm3180_vm2, %v6802_v48, %v6569_v39  ;;  %v6217_v39 = vld [vmem:[#allocation3 + $0x112] sm:$0xff] }
 0xa7a   :  { %v6834_v13 = vsel %vm3197_vm4, %v6818_v45, %v6633_v25 }
 0xa7b   :  { %v6850_v57 = vsel %vm3214_vm5, %v6834_v13, %v6697_v21 }
 0xa7c   :  { %v6889_v63 = vsel %vm3241_vm6, %v6850_v57, 0  ;;  %6390 = vrot.lane.b32.xlu2 %v13166_v24, %s7934_s17  ;;  %v7135_v47 = vpop.f32.mrf.mxu1 }
 0xa7d   :  { %v13180_v44 = vand.u32 4294901760, %v6889_v63  ;;  %6644 = vrot.lane.b32.xlu1 %v6200_v22, %s7930_s12 }
 0xa7e   :  { %6262 = vrot.lane.b32.xlu0 %v6199_v37, %s7923_s27  ;;  %v13188_v6 = vpop.permute.xlu2 %6318 }
 0xa7f   :  { %7158 = vmatmul.f32.gmra.mxu1 %v13180_v44  ;;  %v6315_v49 = vpop.permute.xlu1 %6314  ;;  %v6992_v20 = vsub.f32 %v6889_v63, %v13180_v44 }
 0xa80   :  { %v6251_v62 = vpop.permute.xlu0 %6250 }
 0xa81   :  { %7264 = vmatmul.f32.gmra.mxu2 %v6992_v20  ;;  %v6993_v8 = vand.u32 4294901760, %v6992_v20  ;;  %v6739_v30 = vsel %vm535_vm3, %v12955_v43, %v6251_v62 }
 0xa82   :  { %v6755_v10 = vsel %vm31_vm0, %v6739_v30, %v6315_v49 }
 0xa83   :  { %7377 = vmatmul.f32.gmra.mxu3 %v6993_v8  ;;  %v6994_v37 = vsub.f32 %v6992_v20, %v6993_v8  ;;  %v6771_v1 = vsel %vm602_vm7, %v6755_v10, %v13141_v32  ;;  %v6202_v8 = vld [vmem:[#allocation3 + $0x121] sm:$0xff] }
 0xa84   :  { %v6949_v42 = vpop.f32.mrf.mxu0  ;;  %6582 = vrot.lane.b32.xlu2 %v13195_v41, %s7929_s9  ;;  %v7235_v58 = vpop.f32.mrf.mxu2 }
 0xa85   :  { %v6950_v21 = vadd.f32 %v6949_v42, %v13191_v2  ;;  %v6995_v59 = vand.u32 4294901760, %v6994_v37  ;;  %6326 = vrot.lane.b32.xlu1 %v13135_v16, %s7925_s8 }
 0xa86   :  { %6454 = vrot.lane.b32.xlu0 %v6200_v22, %s7933_s16  ;;  %v13204_v38 = vpop.permute.xlu2 %6510  ;;  %v7342_v40 = vpop.f32.mrf.mxu3 }
 0xa87   :  { %v7136_v43 = vadd.f32 %v7135_v47, %v6950_v21  ;;  %6996 = vmatmul.f32.gmra.mxu0 %v6995_v59  ;;  %v6507_v28 = vpop.permute.xlu1 %6506 }
 0xa88   :  { %v6443_v9 = vpop.permute.xlu0 %6442 }
 0xa89   :  { %v7236_v29 = vadd.f32 %v7235_v58, %v7136_v43  ;;  %v6787_v51 = vsel %vm636_vm9, %v6771_v1, %v6443_v9 }
 0xa8a   :  { %v6803_v55 = vsel %vm3163_vm1, %v6787_v51, %v6507_v28  ;;  %v6186_v51 = vld [vmem:[#allocation3 + $0x120] sm:$0xff] }
 0xa8b   :  { %v13210_v33 = vadd.f32 %v7342_v40, %v7236_v29  ;;  %v6819_v16 = vsel %vm3180_vm2, %v6803_v55, %v12767_v53  ;;  %v6218_v40 = vld [vmem:[#allocation3 + $0x122] sm:$0xff] }
 0xa8c   :  { %v6835_v12 = vsel %vm3197_vm4, %v6819_v16, %v12797_v0  ;;  %6264 = vrot.lane.b32.xlu2 %v6200_v22, %s7923_s27 }
 0xa8d   :  { %v6851_v32 = vsel %vm3214_vm5, %v6835_v12, %v12939_v17  ;;  %6518 = vrot.lane.b32.xlu1 %v13161_v23, %s7932_s15 }
 0xa8e   :  { %6646 = vrot.lane.b32.xlu0 %v13217_v56, %s7930_s12  ;;  %v6892_v60 = vsel %vm3241_vm6, %v6851_v32, 0  ;;  %v13230_v36 = vpop.permute.xlu2 %6702 }
 0xa8f   :  { %v6381_v34 = vpop.permute.xlu1 %6380  ;;  %v13226_v53 = vand.u32 4294901760, %v6892_v60 }
 0xa90   :  { %v6509_v52 = vpop.permute.xlu0 %6508  ;;  %v6772_v0 = vsel %vm602_vm7, %v12857_v46, %v6381_v34 }
 0xa91   :  { %7162 = vmatmul.f32.gmra.mxu1 %v13226_v53  ;;  %v7000_v17 = vsub.f32 %v6892_v60, %v13226_v53  ;;  %v6788_v25 = vsel %vm636_vm9, %v6772_v0, %v13157_v11 }
 0xa92   :  { %v6804_v46 = vsel %vm3163_vm1, %v6788_v25, %v6509_v52 }
 0xa93   :  { %7269 = vmatmul.f32.gmra.mxu2 %v7000_v17  ;;  %v7001_v15 = vand.u32 4294901760, %v7000_v17  ;;  %v7139_v30 = vpop.f32.mrf.mxu1 }
 0xa94   :  { %6456 = vrot.lane.b32.xlu2 %v13217_v56, %s7933_s16 }
 0xa95   :  { %7383 = vmatmul.f32.gmra.mxu3 %v7001_v15  ;;  %v7002_v48 = vsub.f32 %v7000_v17, %v7001_v15  ;;  %6710 = vrot.lane.b32.xlu1 %v6217_v39, %s7931_s14 }
 0xa96   :  { %6328 = vrot.lane.b32.xlu0 %v13161_v23, %s7925_s8  ;;  %v13247_v49 = vpop.permute.xlu2 %6384 }
 0xa97   :  { %v6573_v45 = vpop.permute.xlu1 %6572  ;;  %v7003_v13 = vand.u32 4294901760, %v7002_v48 }
 0xa98   :  { %v6820_v57 = vsel %vm3180_vm2, %v6804_v46, %v6573_v45  ;;  %v6701_v63 = vpop.permute.xlu0 %6700  ;;  %v6187_v46 = vld [vmem:[#allocation3 + $0x130] sm:$0xff] }
 0xa99   :  { %v6836_v11 = vsel %vm3197_vm4, %v6820_v57, %v13171_v26  ;;  %7004 = vmatmul.f32.gmra.mxu0 %v7003_v13  ;;  %v6219_v13 = vld [vmem:[#allocation3 + $0x132] sm:$0xff] }
 0xa9a   :  { %v6852_v22 = vsel %vm3214_vm5, %v6836_v11, %v6701_v63 }
 0xa9b   :  { %v6895_v35 = vsel %vm3241_vm6, %v6852_v22, 0  ;;  %v6957_v20 = vpop.f32.mrf.mxu0  ;;  %v7240_v26 = vpop.f32.mrf.mxu2 }
 0xa9c   :  { %v13249_v62 = vand.u32 4294901760, %v6895_v35  ;;  %v6958_v23 = vadd.f32 %v6957_v20, %v13191_v2  ;;  %6648 = vrot.lane.b32.xlu2 %v6202_v8, %s7930_s12 }
 0xa9d   :  { %6392 = vrot.lane.b32.xlu1 %v13195_v41, %s7934_s17  ;;  %v7348_v43 = vpop.f32.mrf.mxu3 }
 0xa9e   :  { %v7008_v37 = vsub.f32 %v6895_v35, %v13249_v62  ;;  %v7140_v42 = vadd.f32 %v7139_v30, %v6958_v23  ;;  %6520 = vrot.lane.b32.xlu0 %v6217_v39, %s7932_s15  ;;  %7166 = vmatmul.f32.gmra.mxu1 %v13249_v62  ;;  %v6577_v29 = vpop.permute.xlu2 %6576 }
 0xa9f   :  { %v6255_v21 = vpop.permute.xlu1 %6254 }
 0xaa0   :  { %v7241_v10 = vadd.f32 %v7240_v26, %v7140_v42  ;;  %v6383_v59 = vpop.permute.xlu0 %6382  ;;  %7274 = vmatmul.f32.gmra.mxu2 %v7008_v37  ;;  %v7009_v47 = vand.u32 4294901760, %v7008_v37  ;;  %v6741_v9 = vsel %vm535_vm3, %v13041_v54, %v6255_v21  ;;  %v6203_v26 = vld [vmem:[#allocation3 + $0x131] sm:$0xff] }
 0xaa1   :  { %v6757_v55 = vsel %vm31_vm0, %v6741_v9, %v13188_v6 }
 0xaa2   :  { %v13258_v28 = vadd.f32 %v7348_v43, %v7241_v10  ;;  %7389 = vmatmul.f32.gmra.mxu3 %v7009_v47  ;;  %v7010_v58 = vsub.f32 %v7008_v37, %v7009_v47  ;;  %v6773_v32 = vsel %vm602_vm7, %v6757_v55, %v6383_v59 }
 0xaa4   :  { %v7011_v1 = vand.u32 4294901760, %v7010_v58  ;;  %6330 = vrot.lane.b32.xlu2 %v6217_v39, %s7925_s8 }
 0xaa5   :  { %6584 = vrot.lane.b32.xlu1 %v6186_v51, %s7929_s9 }
 0xaa6   :  { %6712 = vrot.lane.b32.xlu0 %v6218_v40, %s7931_s14  ;;  %7012 = vmatmul.f32.gmra.mxu0 %v7011_v1  ;;  %v13275_v6 = vpop.permute.xlu2 %6258 }
 0xaa7   :  { %v6447_v16 = vpop.permute.xlu1 %6446 }
 0xaa8   :  { %v6575_v12 = vpop.permute.xlu0 %6574  ;;  %v6789_v54 = vsel %vm636_vm9, %v6773_v32, %v6447_v16 }
 0xaa9   :  { %v6805_v60 = vsel %vm3163_vm1, %v6789_v54, %v13204_v38 }
 0xaaa   :  { %v6821_v34 = vsel %vm3180_vm2, %v6805_v60, %v6575_v12  ;;  %v7143_v48 = vpop.f32.mrf.mxu1 }
 0xaac   :  { %6522 = vrot.lane.b32.xlu2 %v6218_v40, %s7932_s15 }
 0xaad   :  { %6266 = vrot.lane.b32.xlu1 %v13217_v56, %s7923_s27 }
 0xaae   :  { %6394 = vrot.lane.b32.xlu0 %v6186_v51, %s7934_s17  ;;  %v6451_v23 = vpop.permute.xlu2 %6450 }
 0xaaf   :  { %v6639_v52 = vpop.permute.xlu1 %6638 }
 0xab0   :  { %v6257_v0 = vpop.permute.xlu0 %6256  ;;  %v6837_v17 = vsel %vm3197_vm4, %v6821_v34, %v6639_v52 }
 0xab1   :  { %v6853_v15 = vsel %vm3214_vm5, %v6837_v17, %v13230_v36 }
 0xab2   :  { %v6965_v25 = vpop.f32.mrf.mxu0  ;;  %v6898_v38 = vsel %vm3241_vm6, %v6853_v15, 0  ;;  %v7245_v57 = vpop.f32.mrf.mxu2 }
 0xab3   :  { %v6966_v39 = vadd.f32 %v6965_v25, %v13191_v2  ;;  %v13283_v56 = vand.u32 4294901760, %v6898_v38 }
 0xab4   :  { %v7354_v36 = vpop.f32.mrf.mxu3  ;;  %6714 = vrot.lane.b32.xlu2 %v6219_v13, %s7931_s14 }
 0xab5   :  { %v7144_v45 = vadd.f32 %v7143_v48, %v6966_v39  ;;  %6458 = vrot.lane.b32.xlu1 %v6202_v8, %s7933_s16  ;;  %7170 = vmatmul.f32.gmra.mxu1 %v13283_v56  ;;  %v7016_v63 = vsub.f32 %v6898_v38, %v13283_v56  ;;  %v6742_v8 = vsel %vm535_vm3, %v13050_v61, %v6257_v0 }
 0xab6   :  { %6586 = vrot.lane.b32.xlu0 %v6187_v46, %s7929_s9  ;;  %v6643_v9 = vpop.permute.xlu2 %6642  ;;  %v6743_v38 = vsel %vm535_vm3, %v13076_v3, %v13275_v6 }
 0xab7   :  { %v7246_v11 = vadd.f32 %v7245_v57, %v7144_v45  ;;  %v6321_v22 = vpop.permute.xlu1 %6320  ;;  %7279 = vmatmul.f32.gmra.mxu2 %v7016_v63  ;;  %v7017_v20 = vand.u32 4294901760, %v7016_v63 }
 0xab8   :  { %v6449_v35 = vpop.permute.xlu0 %6448  ;;  %v6758_v42 = vsel %vm31_vm0, %v6742_v8, %v6321_v22 }
 0xab9   :  { %v13290_v30 = vadd.f32 %v7354_v36, %v7246_v11  ;;  %7395 = vmatmul.f32.gmra.mxu3 %v7017_v20  ;;  %v7018_v37 = vsub.f32 %v7016_v63, %v7017_v20  ;;  %v6774_v21 = vsel %vm602_vm7, %v6758_v42, %v13247_v49 }
 0xaba   :  { %v6790_v43 = vsel %vm636_vm9, %v6774_v21, %v6449_v35 }
 0xabb   :  { %v7019_v10 = vand.u32 4294901760, %v7018_v37 }
 0xabc   :  { %v7147_v40 = vpop.f32.mrf.mxu1 }
 0xabd   :  { %6650 = vrot.lane.b32.xlu1 %v6203_v26, %s7930_s12  ;;  %7020 = vmatmul.f32.gmra.mxu0 %v7019_v10 }
 0xabf   :  { %v6513_v59 = vpop.permute.xlu1 %6512 }
 0xac0   :  { %v6641_v47 = vpop.permute.xlu0 %6640  ;;  %v6806_v58 = vsel %vm3163_vm1, %v6790_v43, %v6513_v59 }
 0xac1   :  { %v6822_v1 = vsel %vm3180_vm2, %v6806_v58, %v6577_v29  ;;  %v6325_v29 = vpop.permute.xlu2 %6324 }
 0xac2   :  { %v6838_v49 = vsel %vm3197_vm4, %v6822_v1, %v6641_v47 }
 0xac4   :  { %v6973_v61 = vpop.f32.mrf.mxu0  ;;  %v7250_v16 = vpop.f32.mrf.mxu2 }
 0xac5   :  { %v6974_v51 = vadd.f32 %v6973_v61, %v13191_v2 }
 0xac6   :  { %v7360_v34 = vpop.f32.mrf.mxu3 }
 0xac7   :  { %v7148_v55 = vadd.f32 %v7147_v40, %v6974_v51  ;;  %v6705_v12 = vpop.permute.xlu1 %6704 }
 0xac8   :  { %v6323_v32 = vpop.permute.xlu0 %6322  ;;  %v6854_v60 = vsel %vm3214_vm5, %v6838_v49, %v6705_v12 }
 0xac9   :  { %v7251_v54 = vadd.f32 %v7250_v16, %v7148_v55  ;;  %v6901_v52 = vsel %vm3241_vm6, %v6854_v60, 0  ;;  %v6759_v46 = vsel %vm31_vm0, %v6743_v38, %v6323_v32  ;;  %v6517_v11 = vpop.permute.xlu2 %6516 }
 0xaca   :  { %v13307_v17 = vand.u32 4294901760, %v6901_v52 }
 0xacb   :  { %v13305_v0 = vadd.f32 %v7360_v34, %v7251_v54 }
 0xacc   :  { %v7024_v15 = vsub.f32 %v6901_v52, %v13307_v17  ;;  %7174 = vmatmul.f32.gmra.mxu1 %v13307_v17 }
 0xace   :  { %7284 = vmatmul.f32.gmra.mxu2 %v7024_v15  ;;  %v7025_v25 = vand.u32 4294901760, %v7024_v15 }
 0xacf   :  { %v6387_v39 = vpop.permute.xlu1 %6386 }
 0xad0   :  { %v6515_v48 = vpop.permute.xlu0 %6514  ;;  %7401 = vmatmul.f32.gmra.mxu3 %v7025_v25  ;;  %v7026_v45 = vsub.f32 %v7024_v15, %v7025_v25  ;;  %v6775_v13 = vsel %vm602_vm7, %v6759_v46, %v6387_v39 }
 0xad1   :  { %v6791_v63 = vsel %vm636_vm9, %v6775_v13, %v6451_v23  ;;  %v6709_v58 = vpop.permute.xlu2 %6708 }
 0xad2   :  { %v7027_v57 = vand.u32 4294901760, %v7026_v45  ;;  %v6807_v36 = vsel %vm3163_vm1, %v6791_v63, %v6515_v48 }
 0xad3   :  { %v7151_v23 = vpop.f32.mrf.mxu1 }
 0xad4   :  { %7028 = vmatmul.f32.gmra.mxu0 %v7027_v57 }
 0xad7   :  { %v6579_v22 = vpop.permute.xlu1 %6578 }
 0xad8   :  { %v6707_v35 = vpop.permute.xlu0 %6706  ;;  %v6823_v20 = vsel %vm3180_vm2, %v6807_v36, %v6579_v22 }
 0xad9   :  { %v6839_v3 = vsel %vm3197_vm4, %v6823_v20, %v6643_v9  ;;  %v6391_v34 = vpop.permute.xlu2 %6390 }
 0xada   :  { %v6855_v6 = vsel %vm3214_vm5, %v6839_v3, %v6707_v35 }
 0xadb   :  { %v6904_v8 = vsel %vm3241_vm6, %v6855_v6, 0  ;;  %v6981_v37 = vpop.f32.mrf.mxu0  ;;  %v7255_v59 = vpop.f32.mrf.mxu2 }
 0xadc   :  { %v13322_v42 = vand.u32 4294901760, %v6904_v8  ;;  %v6982_v26 = vadd.f32 %v6981_v37, %v13191_v2 }
 0xadd   :  { %v7366_v1 = vpop.f32.mrf.mxu3 }
 0xade   :  { %v7032_v10 = vsub.f32 %v6904_v8, %v13322_v42  ;;  %v7152_v21 = vadd.f32 %v7151_v23, %v6982_v26  ;;  %7178 = vmatmul.f32.gmra.mxu1 %v13322_v42 }
 0xadf   :  { %v6261_v47 = vpop.permute.xlu1 %6260 }
 0xae0   :  { %v6389_v43 = vpop.permute.xlu0 %6388  ;;  %v7256_v9 = vadd.f32 %v7255_v59, %v7152_v21  ;;  %7289 = vmatmul.f32.gmra.mxu2 %v7032_v10  ;;  %v7033_v61 = vand.u32 4294901760, %v7032_v10  ;;  %v6744_v40 = vsel %vm535_vm3, %v13096_v19, %v6261_v47 }
 0xae1   :  { %v6760_v49 = vsel %vm31_vm0, %v6744_v40, %v6325_v29  ;;  %v6583_v46 = vpop.permute.xlu2 %6582 }
 0xae2   :  { %v13327_v51 = vadd.f32 %v7366_v1, %v7256_v9  ;;  %7407 = vmatmul.f32.gmra.mxu3 %v7033_v61  ;;  %v7034_v55 = vsub.f32 %v7032_v10, %v7033_v61  ;;  %v6776_v54 = vsel %vm602_vm7, %v6760_v49, %v6389_v43 }
 0xae4   :  { %v7035_v16 = vand.u32 4294901760, %v7034_v55 }
 0xae6   :  { %7036 = vmatmul.f32.gmra.mxu0 %v7035_v16 }
 0xae7   :  { %v6453_v12 = vpop.permute.xlu1 %6452 }
 0xae8   :  { %v6581_v32 = vpop.permute.xlu0 %6580  ;;  %v6792_v60 = vsel %vm636_vm9, %v6776_v54, %v6453_v12 }
 0xae9   :  { %v6808_v52 = vsel %vm3163_vm1, %v6792_v60, %v6517_v11  ;;  %v6265_v3 = vpop.permute.xlu2 %6264 }
 0xaea   :  { %v6824_v15 = vsel %vm3180_vm2, %v6808_v52, %v6581_v32  ;;  %v13359_v1 = vpop.f32.mrf.mxu1  ;;  %v6746_v55 = vsel %vm535_vm3, %v13166_v24, %v6265_v3 }
 0xaef   :  { %v6645_v25 = vpop.permute.xlu1 %6644 }
 0xaf0   :  { %v6263_v38 = vpop.permute.xlu0 %6262  ;;  %v6840_v19 = vsel %vm3197_vm4, %v6824_v15, %v6645_v25 }
 0xaf1   :  { %v6856_v39 = vsel %vm3214_vm5, %v6840_v19, %v6709_v58  ;;  %v6745_v11 = vsel %vm535_vm3, %v13133_v4, %v6263_v38  ;;  %v6457_v59 = vpop.permute.xlu2 %6456 }
 0xaf2   :  { %v6907_v29 = vsel %vm3241_vm6, %v6856_v39, 0  ;;  %v13355_v9 = vpop.f32.mrf.mxu0 }
 0xaf3   :  { %v13339_v48 = vand.u32 4294901760, %v6907_v29 }
 0xaf5   :  { %7182 = vmatmul.f32.gmra.mxu1 %v13339_v48  ;;  %v7040_v45 = vsub.f32 %v6907_v29, %v13339_v48 }
 0xaf7   :  { %v6327_v13 = vpop.permute.xlu1 %6326  ;;  %7294 = vmatmul.f32.gmra.mxu2 %v7040_v45  ;;  %v7041_v63 = vand.u32 4294901760, %v7040_v45 }
 0xaf8   :  { %v6455_v57 = vpop.permute.xlu0 %6454  ;;  %v6761_v22 = vsel %vm31_vm0, %v6745_v11, %v6327_v13 }
 0xaf9   :  { %7413 = vmatmul.f32.gmra.mxu3 %v7041_v63  ;;  %v7042_v36 = vsub.f32 %v7040_v45, %v7041_v63  ;;  %v6777_v20 = vsel %vm602_vm7, %v6761_v22, %v6391_v34  ;;  %v6649_v60 = vpop.permute.xlu2 %6648 }
 0xafa   :  { %v6793_v37 = vsel %vm636_vm9, %v6777_v20, %v6455_v57 }
 0xafb   :  { %v7043_v35 = vand.u32 4294901760, %v7042_v36 }
 0xafc   :  { %v13368_v25 = vpop.f32.mrf.mxu1 }
 0xafd   :  { %7044 = vmatmul.f32.gmra.mxu0 %v7043_v35 }
 0xaff   :  { %v6519_v6 = vpop.permute.xlu1 %6518 }
 0xb00   :  { %v6647_v8 = vpop.permute.xlu0 %6646  ;;  %v6809_v26 = vsel %vm3163_vm1, %v6793_v37, %v6519_v6 }
 0xb01   :  { %v6825_v23 = vsel %vm3180_vm2, %v6809_v26, %v6583_v46  ;;  %v6331_v57 = vpop.permute.xlu2 %6330 }
 0xb02   :  { %v6841_v10 = vsel %vm3197_vm4, %v6825_v23, %v6647_v8 }
 0xb04   :  { %v13365_v52 = vpop.f32.mrf.mxu0 }
 0xb07   :  { %v6711_v4 = vpop.permute.xlu1 %6710 }
 0xb08   :  { %v6329_v21 = vpop.permute.xlu0 %6328  ;;  %v6857_v47 = vsel %vm3214_vm5, %v6841_v10, %v6711_v4 }
 0xb09   :  { %v6910_v43 = vsel %vm3241_vm6, %v6857_v47, 0  ;;  %v6762_v12 = vsel %vm31_vm0, %v6746_v55, %v6329_v21  ;;  %v6523_v4 = vpop.permute.xlu2 %6522 }
 0xb0a   :  { %v13353_v58 = vand.u32 4294901760, %v6910_v43 }
 0xb0c   :  { %v7048_v61 = vsub.f32 %v6910_v43, %v13353_v58  ;;  %7186 = vmatmul.f32.gmra.mxu1 %v13353_v58 }
 0xb0e   :  { %7299 = vmatmul.f32.gmra.mxu2 %v7048_v61  ;;  %v7049_v40 = vand.u32 4294901760, %v7048_v61  ;;  %v13379_v11 = vpop.f32.mrf.mxu1 }
 0xb0f   :  { %v6393_v16 = vpop.permute.xlu1 %6392 }
 0xb10   :  { %v6521_v49 = vpop.permute.xlu0 %6520  ;;  %7419 = vmatmul.f32.gmra.mxu3 %v7049_v40  ;;  %v7050_v32 = vsub.f32 %v7048_v61, %v7049_v40  ;;  %v6778_v54 = vsel %vm602_vm7, %v6762_v12, %v6393_v16 }
 0xb11   :  { %v6794_v15 = vsel %vm636_vm9, %v6778_v54, %v6457_v59  ;;  %v6715_v40 = vpop.permute.xlu2 %6714 }
 0xb12   :  { %v7051_v34 = vand.u32 4294901760, %v7050_v32  ;;  %v6810_v38 = vsel %vm3163_vm1, %v6794_v15, %v6521_v49 }
 0xb14   :  { %7052 = vmatmul.f32.gmra.mxu0 %v7051_v34 }
 0xb16   :  { %v13374_v45 = vpop.f32.mrf.mxu0 }
 0xb17   :  { %v6585_v24 = vpop.permute.xlu1 %6584 }
 0xb18   :  { %v6826_v19 = vsel %vm3180_vm2, %v6810_v38, %v6585_v24  ;;  %v6713_v39 = vpop.permute.xlu0 %6712 }
 0xb19   :  { %v6842_v29 = vsel %vm3197_vm4, %v6826_v19, %v6649_v60 }
 0xb1a   :  { %v6858_v46 = vsel %vm3214_vm5, %v6842_v29, %v6713_v39 }
 0xb1b   :  { %v6913_v13 = vsel %vm3241_vm6, %v6858_v46, 0  ;;  %v7167_v23 = vpop.f32.mrf.mxu1 }
 0xb1c   :  { %v13377_v63 = vand.u32 4294901760, %v6913_v13 }
 0xb1e   :  { %v7056_v36 = vsub.f32 %v6913_v13, %v13377_v63  ;;  %7190 = vmatmul.f32.gmra.mxu1 %v13377_v63 }
 0xb1f   :  { %v6267_v22 = vpop.permute.xlu1 %6266 }
 0xb20   :  { %7304 = vmatmul.f32.gmra.mxu2 %v7056_v36  ;;  %v7057_v35 = vand.u32 4294901760, %v7056_v36  ;;  %v6747_v20 = vsel %vm535_vm3, %v13195_v41, %v6267_v22  ;;  %v6395_v8 = vpop.permute.xlu0 %6394 }
 0xb21   :  { %v6763_v10 = vsel %vm31_vm0, %v6747_v20, %v6331_v57 }
 0xb22   :  { %7425 = vmatmul.f32.gmra.mxu3 %v7057_v35  ;;  %v7058_v3 = vsub.f32 %v7056_v36, %v7057_v35  ;;  %v6779_v47 = vsel %vm602_vm7, %v6763_v10, %v6395_v8 }
 0xb23   :  { %v7013_v6 = vpop.f32.mrf.mxu0 }
 0xb24   :  { %v7014_v37 = vadd.f32 %v7013_v6, %v13191_v2  ;;  %v7059_v26 = vand.u32 4294901760, %v7058_v3 }
 0xb26   :  { %v13387_v21 = vadd.f32 %v7167_v23, %v7014_v37  ;;  %7060 = vmatmul.f32.gmra.mxu0 %v7059_v26 }
 0xb27   :  { %v6459_v59 = vpop.permute.xlu1 %6458 }
 0xb28   :  { %v6795_v43 = vsel %vm636_vm9, %v6779_v47, %v6459_v59  ;;  %v6587_v41 = vpop.permute.xlu0 %6586 }
 0xb29   :  { %v6811_v61 = vsel %vm3163_vm1, %v6795_v43, %v6523_v4 }
 0xb2a   :  { %v6827_v55 = vsel %vm3180_vm2, %v6811_v61, %v6587_v41 }
 0xb2f   :  { %v6651_v16 = vpop.permute.xlu1 %6650 }
 0xb30   :  { %v6843_v49 = vsel %vm3197_vm4, %v6827_v55, %v6651_v16 }
 0xb31   :  { %v6859_v12 = vsel %vm3214_vm5, %v6843_v49, %v6715_v40 }
 0xb32   :  { %v6916_v32 = vsel %vm3241_vm6, %v6859_v12, 0  ;;  %v7171_v39 = vpop.f32.mrf.mxu1 }
 0xb33   :  { %v13396_v54 = vand.u32 4294901760, %v6916_v32 }
 0xb35   :  { %v7064_v60 = vsub.f32 %v6916_v32, %v13396_v54  ;;  %7194 = vmatmul.f32.gmra.mxu1 %v13396_v54 }
 0xb37   :  { %7309 = vmatmul.f32.gmra.mxu2 %v7064_v60  ;;  %v7065_v34 = vand.u32 4294901760, %v7064_v60 }
 0xb39   :  { %7431 = vmatmul.f32.gmra.mxu3 %v7065_v34  ;;  %v7066_v15 = vsub.f32 %v7064_v60, %v7065_v34 }
 0xb3a   :  { %v7021_v38 = vpop.f32.mrf.mxu0 }
 0xb3b   :  { %v7022_v24 = vadd.f32 %v7021_v38, %v13191_v2  ;;  %v7067_v19 = vand.u32 4294901760, %v7066_v15 }
 0xb3d   :  { %v13401_v29 = vadd.f32 %v7171_v39, %v7022_v24  ;;  %7068 = vmatmul.f32.gmra.mxu0 %v7067_v19  ;;  %7569 = vmatmul.f32.vlgmr.msrb.gmra.mxu1 %v13001_v50  ;;  %v7260_v39 = vpop.f32.mrf.mxu2 }
 0xb45   :  { %7479 = vmatmul.f32.vlgmr.msrb.gmra.mxu0 %v13001_v50  ;;  %7573 = vmatmul.f32.gmra.mxu1 %v13030_v18 }
 0xb49   :  { %v7175_v57 = vpop.f32.mrf.mxu1 }
 0xb4d   :  { %7483 = vmatmul.f32.gmra.mxu0 %v13030_v18  ;;  %7577 = vmatmul.f32.gmra.mxu1 %v13062_v14 }
 0xb51   :  { %v7029_v46 = vpop.f32.mrf.mxu0 }
 0xb52   :  { %v7030_v13 = vadd.f32 %v7029_v46, %v13191_v2 }
 0xb54   :  { %v13409_v36 = vadd.f32 %v7175_v57, %v7030_v13  ;;  %v7372_v57 = vpop.f32.mrf.mxu3 }
 0xb55   :  { %7487 = vmatmul.f32.gmra.mxu0 %v13062_v14  ;;  %7581 = vmatmul.f32.gmra.mxu1 %v13088_v27 }
 0xb5b   :  { %v7179_v18 = vpop.f32.mrf.mxu1 }
 0xb5d   :  { %7491 = vmatmul.f32.gmra.mxu0 %v13088_v27  ;;  %7585 = vmatmul.f32.gmra.mxu1 %v13114_v7 }
 0xb63   :  { %v7037_v50 = vpop.f32.mrf.mxu0 }
 0xb64   :  { %v7038_v22 = vadd.f32 %v7037_v50, %v13191_v2 }
 0xb65   :  { %7495 = vmatmul.f32.gmra.mxu0 %v13114_v7  ;;  %7589 = vmatmul.f32.gmra.mxu1 %v13146_v31 }
 0xb66   :  { %v13418_v35 = vadd.f32 %v7179_v18, %v7038_v22  ;;  %v6998_v18 = vadd.f32 %v13365_v52, %v13191_v2 }
 0xb6d   :  { %7499 = vmatmul.f32.gmra.mxu0 %v13146_v31  ;;  %7593 = vmatmul.f32.gmra.mxu1 %v13180_v44 }
 0xb72   :  { %v7183_v20 = vpop.f32.mrf.mxu1 }
 0xb75   :  { %7503 = vmatmul.f32.gmra.mxu0 %v13180_v44  ;;  %7597 = vmatmul.f32.gmra.mxu1 %v13226_v53 }
 0xb7a   :  { %v7045_v14 = vpop.f32.mrf.mxu0 }
 0xb7b   :  { %v7046_v27 = vadd.f32 %v7045_v14, %v13191_v2 }
 0xb7d   :  { %v13425_v3 = vadd.f32 %v7183_v20, %v7046_v27  ;;  %7507 = vmatmul.f32.gmra.mxu0 %v13226_v53  ;;  %7601 = vmatmul.f32.gmra.mxu1 %v13249_v62  ;;  %v7265_v27 = vpop.f32.mrf.mxu2  ;;  %v7006_v20 = vadd.f32 %v13374_v45, %v13191_v2 }
 0xb85   :  { %7511 = vmatmul.f32.gmra.mxu0 %v13249_v62  ;;  %7605 = vmatmul.f32.gmra.mxu1 %v13283_v56 }
 0xb89   :  { %v7187_v44 = vpop.f32.mrf.mxu1 }
 0xb8d   :  { %7515 = vmatmul.f32.gmra.mxu0 %v13283_v56  ;;  %7609 = vmatmul.f32.gmra.mxu1 %v13307_v17 }
 0xb91   :  { %v7053_v7 = vpop.f32.mrf.mxu0 }
 0xb92   :  { %v7054_v31 = vadd.f32 %v7053_v7, %v13191_v2  ;;  %v7160_v7 = vadd.f32 %v13368_v25, %v6998_v18 }
 0xb94   :  { %v13434_v6 = vadd.f32 %v7187_v44, %v7054_v31  ;;  %v7378_v31 = vpop.f32.mrf.mxu3 }
 0xb95   :  { %7519 = vmatmul.f32.gmra.mxu0 %v13307_v17  ;;  %7613 = vmatmul.f32.gmra.mxu1 %v13322_v42 }
 0xb9b   :  { %v7191_v56 = vpop.f32.mrf.mxu1 }
 0xb9d   :  { %7523 = vmatmul.f32.gmra.mxu0 %v13322_v42  ;;  %7617 = vmatmul.f32.gmra.mxu1 %v13339_v48 }
 0xba3   :  { %v7061_v53 = vpop.f32.mrf.mxu0 }
 0xba4   :  { %v7062_v62 = vadd.f32 %v7061_v53, %v13191_v2  ;;  %v7164_v53 = vadd.f32 %v13379_v11, %v7006_v20 }
 0xba5   :  { %7527 = vmatmul.f32.gmra.mxu0 %v13339_v48  ;;  %7621 = vmatmul.f32.gmra.mxu1 %v13353_v58 }
 0xba6   :  { %v13443_v8 = vadd.f32 %v7191_v56, %v7062_v62  ;;  %v7266_v56 = vadd.f32 %v7265_v27, %v7160_v7 }
 0xba8   :  { %v7379_v52 = vadd.f32 %v7378_v31, %v7266_v56 }
 0xbad   :  { %7531 = vmatmul.f32.gmra.mxu0 %v13353_v58  ;;  %7625 = vmatmul.f32.gmra.mxu1 %v13377_v63 }
 0xbb2   :  { %v7195_v17 = vpop.f32.mrf.mxu1 }
 0xbb5   :  { %7535 = vmatmul.f32.gmra.mxu0 %v13377_v63  ;;  %7629 = vmatmul.f32.gmra.mxu1 %v13396_v54 }
 0xbba   :  { %v7069_v42 = vpop.f32.mrf.mxu0  ;;  %v7570_v26 = vpop.f32.mrf.mxu1 }
 0xbbb   :  { %v7070_v37 = vadd.f32 %v7069_v42, %v13191_v2 }
 0xbbd   :  { %v13450_v23 = vadd.f32 %v7195_v17, %v7070_v37  ;;  %7539 = vmatmul.f32.gmra.mxu0 %v13396_v54  ;;  %v7270_v17 = vpop.f32.mrf.mxu2 }
 0xbbe   :  { %v7271_v37 = vadd.f32 %v7270_v17, %v7164_v53 }
 0xbc2   :  { %v7480_v48 = vpop.f32.mrf.mxu0  ;;  %v7574_v4 = vpop.f32.mrf.mxu1 }
 0xbc3   :  { %v7481_v10 = vadd.f32 %v7480_v48, %v13210_v33  ;;  %v7384_v48 = vpop.f32.mrf.mxu3 }
 0xbc5   :  { %v13454_v58 = vadd.f32 %v7570_v26, %v7481_v10  ;;  %v7385_v10 = vadd.f32 %v7384_v48, %v7271_v37  ;;  %v7275_v45 = vpop.f32.mrf.mxu2 }
 0xbc7   :  { %v7633_v41 = vsel %vm535_vm3, %v13454_v58, 0.0 }
 0xbca   :  { %v7484_v59 = vpop.f32.mrf.mxu0  ;;  %v7578_v63 = vpop.f32.mrf.mxu1 }
 0xbcb   :  { %v7485_v47 = vadd.f32 %v7484_v59, %v13258_v28 }
 0xbcd   :  { %v13457_v43 = vadd.f32 %v7574_v4, %v7485_v47  ;;  %v7276_v47 = vadd.f32 %v7275_v45, %v13387_v21  ;;  %v7280_v21 = vpop.f32.mrf.mxu2 }
 0xbcf   :  { %v7634_v61 = vsel %vm535_vm3, %v13457_v43, 0.0 }
 0xbd0   :  { %v7635_v40 = vadd.f32 %v7634_v61, %v7633_v41  ;;  %v7390_v61 = vpop.f32.mrf.mxu3 }
 0xbd2   :  { %v7488_v55 = vpop.f32.mrf.mxu0  ;;  %v7582_v33 = vpop.f32.mrf.mxu1 }
 0xbd3   :  { %v7489_v16 = vadd.f32 %v7488_v55, %v13290_v30 }
 0xbd5   :  { %v13464_v49 = vadd.f32 %v7578_v63, %v7489_v16 }
 0xbd7   :  { %v7636_v12 = vsel %vm535_vm3, %v13464_v49, 0.0 }
 0xbd8   :  { %v7637_v28 = vadd.f32 %v7636_v12, %v7635_v40  ;;  %v7391_v40 = vadd.f32 %v7390_v61, %v7276_v47 }
 0xbda   :  { %v7492_v32 = vpop.f32.mrf.mxu0  ;;  %v7586_v60 = vpop.f32.mrf.mxu1 }
 0xbdb   :  { %v7493_v54 = vadd.f32 %v7492_v32, %v13305_v0  ;;  %v6990_v0 = vadd.f32 %v13355_v9, %v13191_v2 }
 0xbdd   :  { %v13469_v34 = vadd.f32 %v7582_v33, %v7493_v54 }
 0xbdf   :  { %v7638_v15 = vsel %vm535_vm3, %v13469_v34, 0.0 }
 0xbe0   :  { %v7639_v38 = vadd.f32 %v7638_v15, %v7637_v28 }
 0xbe2   :  { %v7496_v24 = vpop.f32.mrf.mxu0  ;;  %v7590_v19 = vpop.f32.mrf.mxu1 }
 0xbe3   :  { %v7497_v30 = vadd.f32 %v7496_v24, %v13327_v51  ;;  %v7156_v51 = vadd.f32 %v13359_v1, %v6990_v0  ;;  %v7285_v0 = vpop.f32.mrf.mxu2 }
 0xbe5   :  { %v13474_v46 = vadd.f32 %v7586_v60, %v7497_v30  ;;  %v7261_v44 = vadd.f32 %v7260_v39, %v7156_v51  ;;  %v7281_v60 = vadd.f32 %v7280_v21, %v13401_v29  ;;  %v7396_v30 = vpop.f32.mrf.mxu3 }
 0xbe7   :  { %v7640_v13 = vsel %vm535_vm3, %v13474_v46, 0.0  ;;  %v7373_v42 = vadd.f32 %v7372_v57, %v7261_v44  ;;  %v7397_v39 = vadd.f32 %v7396_v30, %v7281_v60 }
 0xbe8   :  { %v7641_v50 = vadd.f32 %v7640_v13, %v7639_v38 }
 0xbea   :  { %v7500_v22 = vpop.f32.mrf.mxu0  ;;  %v7594_v14 = vpop.f32.mrf.mxu1 }
 0xbeb   :  { %v7501_v26 = vadd.f32 %v7500_v22, %v7373_v42  ;;  %v7286_v22 = vadd.f32 %v7285_v0, %v13409_v36  ;;  %v7290_v31 = vpop.f32.mrf.mxu2 }
 0xbec   :  { %v7291_v53 = vadd.f32 %v7290_v31, %v13418_v35 }
 0xbed   :  { %v13487_v59 = vadd.f32 %v7590_v19, %v7501_v26 }
 0xbef   :  { %v7642_v63 = vsel %vm535_vm3, %v13487_v59, 0.0 }
 0xbf0   :  { %v7643_v16 = vadd.f32 %v7642_v63, %v7641_v50 }
 0xbf2   :  { %v7504_v62 = vpop.f32.mrf.mxu0  ;;  %v7598_v9 = vpop.f32.mrf.mxu1 }
 0xbf3   :  { %v7505_v1 = vadd.f32 %v7504_v62, %v7379_v52  ;;  %v7295_v52 = vpop.f32.mrf.mxu2 }
 0xbf4   :  { %v7296_v26 = vadd.f32 %v7295_v52, %v13425_v3 }
 0xbf5   :  { %v13490_v11 = vadd.f32 %v7594_v14, %v7505_v1  ;;  %v7402_v14 = vpop.f32.mrf.mxu3 }
 0xbf6   :  { %v7403_v51 = vadd.f32 %v7402_v14, %v7286_v22 }
 0xbf7   :  { %v7644_v55 = vsel %vm535_vm3, %v13490_v11, 0.0 }
 0xbf8   :  { %v7645_v54 = vadd.f32 %v7644_v55, %v7643_v16 }
 0xbfa   :  { %v7508_v4 = vpop.f32.mrf.mxu0  ;;  %v7602_v25 = vpop.f32.mrf.mxu1 }
 0xbfb   :  { %v7509_v2 = vadd.f32 %v7508_v4, %v7385_v10  ;;  %v7300_v47 = vpop.f32.mrf.mxu2 }
 0xbfc   :  { %v7301_v63 = vadd.f32 %v7300_v47, %v13434_v6 }
 0xbfd   :  { %v13494_v41 = vadd.f32 %v7598_v9, %v7509_v2  ;;  %v7408_v36 = vpop.f32.mrf.mxu3 }
 0xbfe   :  { %v7409_v17 = vadd.f32 %v7408_v36, %v7291_v53 }
 0xbff   :  { %v7646_v12 = vsel %vm535_vm3, %v13494_v41, 0.0 }
 0xc00   :  { %v7647_v38 = vadd.f32 %v7646_v12, %v7645_v54 }
 0xc02   :  { %v7512_v33 = vpop.f32.mrf.mxu0  ;;  %v7606_v32 = vpop.f32.mrf.mxu1 }
 0xc03   :  { %v7513_v28 = vadd.f32 %v7512_v33, %v7391_v40 }
 0xc05   :  { %v13501_v15 = vadd.f32 %v7602_v25, %v7513_v28  ;;  %v7414_v4 = vpop.f32.mrf.mxu3 }
 0xc06   :  { %v7415_v35 = vadd.f32 %v7414_v4, %v7296_v26 }
 0xc07   :  { %v7648_v24 = vsel %vm535_vm3, %v13501_v15, 0.0 }
 0xc08   :  { %v7649_v19 = vadd.f32 %v7648_v24, %v7647_v38 }
 0xc0a   :  { %v7516_v13 = vpop.f32.mrf.mxu0  ;;  %v7610_v50 = vpop.f32.mrf.mxu1 }
 0xc0b   :  { %v7517_v57 = vadd.f32 %v7516_v13, %v7397_v39 }
 0xc0d   :  { %v13506_v18 = vadd.f32 %v7606_v32, %v7517_v57  ;;  %v7420_v55 = vpop.f32.mrf.mxu3  ;;  %v7305_v32 = vpop.f32.mrf.mxu2 }
 0xc0e   :  { %v7421_v12 = vadd.f32 %v7420_v55, %v7301_v63  ;;  %v7306_v21 = vadd.f32 %v7305_v32, %v13443_v8 }
 0xc0f   :  { %v7650_v29 = vsel %vm535_vm3, %v13506_v18, 0.0 }
 0xc10   :  { %v7651_v27 = vadd.f32 %v7650_v29, %v7649_v19 }
 0xc12   :  { %v7520_v20 = vpop.f32.mrf.mxu0  ;;  %v7614_v44 = vpop.f32.mrf.mxu1 }
 0xc13   :  { %v7521_v7 = vadd.f32 %v7520_v20, %v7403_v51 }
 0xc15   :  { %v13511_v62 = vadd.f32 %v7610_v50, %v7521_v7  ;;  %v7426_v38 = vpop.f32.mrf.mxu3  ;;  %v7310_v13 = vpop.f32.mrf.mxu2 }
 0xc16   :  { %v7427_v30 = vadd.f32 %v7426_v38, %v7306_v21  ;;  %v7311_v57 = vadd.f32 %v7310_v13, %v13450_v23 }
 0xc17   :  { %v7652_v56 = vsel %vm535_vm3, %v13511_v62, 0.0 }
 0xc18   :  { %v7653_v9 = vadd.f32 %v7652_v56, %v7651_v27 }
 0xc1a   :  { %v7524_v42 = vpop.f32.mrf.mxu0  ;;  %v7618_v10 = vpop.f32.mrf.mxu1 }
 0xc1b   :  { %v7525_v37 = vadd.f32 %v7524_v42, %v7409_v17 }
 0xc1d   :  { %v7615_v48 = vadd.f32 %v7614_v44, %v7525_v37  ;;  %v7432_v22 = vpop.f32.mrf.mxu3 }
 0xc1e   :  { %v7433_v14 = vadd.f32 %v7432_v22, %v7311_v57 }
 0xc1f   :  { %v7654_v1 = vsel %vm535_vm3, %v7615_v48, 0.0 }
 0xc20   :  { %v7655_v2 = vadd.f32 %v7654_v1, %v7653_v9 }
 0xc22   :  { %v7528_v25 = vpop.f32.mrf.mxu0  ;;  %v7622_v33 = vpop.f32.mrf.mxu1 }
 0xc23   :  { %v7529_v45 = vadd.f32 %v7528_v25, %v7415_v35 }
 0xc25   :  { %v7619_v61 = vadd.f32 %v7618_v10, %v7529_v45 }
 0xc27   :  { %v7656_v40 = vsel %vm535_vm3, %v7619_v61, 0.0 }
 0xc28   :  { %v7657_v16 = vadd.f32 %v7656_v40, %v7655_v2 }
 0xc2a   :  { %v7532_v3 = vpop.f32.mrf.mxu0  ;;  %v7626_v19 = vpop.f32.mrf.mxu1 }
 0xc2b   :  { %v7533_v28 = vadd.f32 %v7532_v3, %v7421_v12 }
 0xc2d   :  { %v7623_v54 = vadd.f32 %v7622_v33, %v7533_v28 }
 0xc2f   :  { %v7658_v60 = vsel %vm535_vm3, %v7623_v54, 0.0 }
 0xc30   :  { %v7659_v24 = vadd.f32 %v7658_v60, %v7657_v16 }
 0xc32   :  { %v7536_v6 = vpop.f32.mrf.mxu0  ;;  %v7630_v51 = vpop.f32.mrf.mxu1 }
 0xc33   :  { %v7537_v39 = vadd.f32 %v7536_v6, %v7427_v30 }
 0xc35   :  { %v7627_v50 = vadd.f32 %v7626_v19, %v7537_v39 }
 0xc37   :  { %v7660_v0 = vsel %vm535_vm3, %v7627_v50, 0.0 }
 0xc38   :  { %v7661_v29 = vadd.f32 %v7660_v0, %v7659_v24 }
 0xc3a   :  { %v7540_v27 = vpop.f32.mrf.mxu0 }
 0xc3b   :  { %v7541_v8 = vadd.f32 %v7540_v27, %v7433_v14 }
 0xc3d   :  { %v7631_v20 = vadd.f32 %v7630_v51, %v7541_v8 }
 0xc3f   :  { %v7662_v7 = vsel %vm535_vm3, %v7631_v20, 0.0 }
 0xc40   :  { %v7663_v31 = vadd.f32 %v7662_v7, %v7661_v29 }
 0xc42   :  { %v7664_v44 = vrot.slane %v7663_v31, 4 }
 0xc44   :  { %v7665_v53 = vadd.f32 %v7664_v44, %v7663_v31 }
 0xc46   :  { %v7666_v56 = vrot.slane %v7665_v53, 2 }
 0xc48   :  { %v7667_v36 = vadd.f32 %v7666_v56, %v7665_v53 }
 0xc4a   :  { %v7668_v9 = vrot.slane %v7667_v36, 1 }
 0xc4c   :  { %v7669_v17 = vadd.f32 %v7668_v9, %v7667_v36 }
 0xc4e   :  { %v7670_v23 = vmul.f32 %v7669_v17, %v14208_v5 }
 0xc50   :  { %v13526_v42 = vsub.f32 %v13454_v58, %v7670_v23  ;;  %v13529_v37 = vsub.f32 %v13457_v43, %v7670_v23  ;;  %v13532_v52 = vsub.f32 %v13464_v49, %v7670_v23  ;;  %v13535_v26 = vsub.f32 %v13469_v34, %v7670_v23 }
 0xc51   :  { %v13538_v10 = vsub.f32 %v13474_v46, %v7670_v23  ;;  %v13541_v1 = vsub.f32 %v13501_v15, %v7670_v23  ;;  %v13544_v4 = vsub.f32 %v13506_v18, %v7670_v23  ;;  %v13547_v58 = vsub.f32 %v13511_v62, %v7670_v23 }
 0xc52   :  { %v13549_v43 = vsub.f32 %v7615_v48, %v7670_v23  ;;  %v13551_v2 = vsub.f32 %v7619_v61, %v7670_v23  ;;  %v13553_v49 = vsub.f32 %v7623_v54, %v7670_v23  ;;  %v13555_v34 = vsub.f32 %v7627_v50, %v7670_v23 }
 0xc53   :  { %v13557_v35 = vsub.f32 %v7631_v20, %v7670_v23  ;;  %v7687_v46 = vmul.f32 %v13526_v42, %v13526_v42  ;;  %v7688_v15 = vmul.f32 %v13529_v37, %v13529_v37  ;;  %v7689_v18 = vmul.f32 %v13532_v52, %v13532_v52 }
 0xc54   :  { %v13566_v62 = vsub.f32 %v13487_v59, %v7670_v23  ;;  %v7690_v48 = vmul.f32 %v13535_v26, %v13535_v26  ;;  %v13573_v63 = vsub.f32 %v13490_v11, %v7670_v23  ;;  %v7691_v61 = vmul.f32 %v13538_v10, %v13538_v10 }
 0xc55   :  { %v7703_v25 = vsel %vm535_vm3, %v7687_v46, 0.0  ;;  %v7704_v45 = vsel %vm535_vm3, %v7688_v15, 0.0  ;;  %v7706_v40 = vsel %vm535_vm3, %v7689_v18, 0.0  ;;  %v13579_v59 = vsub.f32 %v13494_v41, %v7670_v23 }
 0xc56   :  { %v7705_v47 = vadd.f32 %v7704_v45, %v7703_v25  ;;  %v7692_v16 = vmul.f32 %v13566_v62, %v13566_v62  ;;  %v7708_v33 = vsel %vm535_vm3, %v7690_v48, 0.0  ;;  %v7693_v3 = vmul.f32 %v13573_v63, %v13573_v63 }
 0xc57   :  { %v7710_v11 = vsel %vm535_vm3, %v7691_v61, 0.0  ;;  %v7694_v32 = vmul.f32 %v13579_v59, %v13579_v59  ;;  %v7695_v41 = vmul.f32 %v13541_v1, %v13541_v1  ;;  %v7696_v24 = vmul.f32 %v13544_v4, %v13544_v4 }
 0xc58   :  { %v7707_v55 = vadd.f32 %v7706_v40, %v7705_v47  ;;  %v7712_v21 = vsel %vm535_vm3, %v7692_v16, 0.0  ;;  %v7714_v60 = vsel %vm535_vm3, %v7693_v3, 0.0  ;;  %v7697_v6 = vmul.f32 %v13547_v58, %v13547_v58 }
 0xc59   :  { %v7716_v30 = vsel %vm535_vm3, %v7694_v32, 0.0  ;;  %v7718_v39 = vsel %vm535_vm3, %v7695_v41, 0.0  ;;  %v7698_v57 = vmul.f32 %v13549_v43, %v13549_v43  ;;  %v7720_v50 = vsel %vm535_vm3, %v7696_v24, 0.0 }
 0xc5a   :  { %v7709_v12 = vadd.f32 %v7708_v33, %v7707_v55  ;;  %v7699_v22 = vmul.f32 %v13551_v2, %v13551_v2  ;;  %v7722_v29 = vsel %vm535_vm3, %v7697_v6, 0.0  ;;  %v7700_v27 = vmul.f32 %v13553_v49, %v13553_v49 }
 0xc5b   :  { %v7724_v8 = vsel %vm535_vm3, %v7698_v57, 0.0  ;;  %v7701_v20 = vmul.f32 %v13555_v34, %v13555_v34  ;;  %v7702_v44 = vmul.f32 %v13557_v35, %v13557_v35 }
 0xc5c   :  { %v7711_v28 = vadd.f32 %v7710_v11, %v7709_v12  ;;  %v7726_v7 = vsel %vm535_vm3, %v7699_v22, 0.0  ;;  %v7728_v53 = vsel %vm535_vm3, %v7700_v27, 0.0 }
 0xc5d   :  { %v7730_v36 = vsel %vm535_vm3, %v7701_v20, 0.0  ;;  %v7732_v17 = vsel %vm535_vm3, %v7702_v44, 0.0 }
 0xc5e   :  { %v7713_v54 = vadd.f32 %v7712_v21, %v7711_v28  ;;  %v7920_v28 = vld [vmem:[%s13735_s6 + $0x10] sm:$0x7] }
 0xc5f   :  { %v7768_v32 = vperm.slane %v7920_v28, 1 }
 0xc60   :  { %v7715_v38 = vadd.f32 %v7714_v60, %v7713_v54 }
 0xc62   :  { %v7717_v19 = vadd.f32 %v7716_v30, %v7715_v38 }
 0xc64   :  { %v7719_v13 = vadd.f32 %v7718_v39, %v7717_v19 }
 0xc66   :  { %v7721_v0 = vadd.f32 %v7720_v50, %v7719_v13 }
 0xc68   :  { %v7723_v14 = vadd.f32 %v7722_v29, %v7721_v0 }
 0xc6a   :  { %v7725_v51 = vadd.f32 %v7724_v8, %v7723_v14 }
 0xc6c   :  { %v7727_v31 = vadd.f32 %v7726_v7, %v7725_v51 }
 0xc6e   :  { %v7729_v56 = vadd.f32 %v7728_v53, %v7727_v31 }
 0xc70   :  { %v7731_v9 = vadd.f32 %v7730_v36, %v7729_v56 }
 0xc72   :  { %v7733_v23 = vadd.f32 %v7732_v17, %v7731_v9 }
 0xc74   :  { %v7734_v46 = vrot.slane %v7733_v23, 4 }
 0xc76   :  { %v7735_v15 = vadd.f32 %v7734_v46, %v7733_v23 }
 0xc78   :  { %v7736_v18 = vrot.slane %v7735_v15, 2 }
 0xc7a   :  { %v7737_v48 = vadd.f32 %v7736_v18, %v7735_v15 }
 0xc7c   :  { %v7738_v25 = vrot.slane %v7737_v48, 1 }
 0xc7e   :  { %v7739_v45 = vadd.f32 %v7738_v25, %v7737_v48  ;;  %v14210_v48 = vld [vmem:[#allocation33_spill] sm:$0xff] }
 0xc7f   :  { %v14211_v25 = vmax.f32 %v14210_v48, 0.0 }
 0xc80   :  { %v7740_v47 = vmul.f32 %v7739_v45, %v14208_v5 }
 0xc82   :  { %v7741_v61 = vadd.f32 1e-05, %v7740_v47  ;;  %v14212_v47 = vld [vmem:[#allocation57_spill] sm:$0xff] }
 0xc84   :  { %7904 = vrsqrt.f32 %v7741_v61  ;;  %vm7748_vm7 = vweird.f32 %v7741_v61 }
 0xc8a   :  { %v7905_v40 = vpop.eup %7904 }
 0xc8b   :  { %v7743_v55 = vmul.f32 %v7905_v40, %v7741_v61  ;;  %vm7749_vm0 = vweird.f32 %v7905_v40  ;;  %v14213_v61 = vmax.f32 %v14212_v47, 0.0  ;;  %v14238_v47 = vld [vmem:[#allocation18_spill] sm:$0xff] }
 0xc8c   :  { %vm7750_vm9 = vmor %vm7748_vm7, %vm7749_vm0 }
 0xc8d   :  { %v7744_v16 = vmul.f32 %v7905_v40, %v7743_v55  ;;  %v14214_v55 = vld [vmem:[#allocation47_spill] sm:$0xff] }
 0xc8f   :  { %v7745_v33 = vmul.f32 0.5, %v7744_v16  ;;  %v14215_v16 = vmax.f32 %v14214_v55, 0.0 }
 0xc91   :  { %v7746_v12 = vsub.f32 1.5, %v7745_v33 }
 0xc93   :  { %v7747_v3 = vmul.f32 %v7905_v40, %v7746_v12 }
 0xc95   :  { %v7751_v11 = vsel %vm7750_vm9, %v7905_v40, %v7747_v3 }
 0xc96   :  { %v7752_v21 = vmul.f32 %v7751_v11, %v13526_v42  ;;  %v7753_v5 = vmul.f32 %v7751_v11, %v13529_v37  ;;  %v7754_v54 = vmul.f32 %v7751_v11, %v13532_v52  ;;  %v7755_v41 = vmul.f32 %v7751_v11, %v13535_v26 }
 0xc97   :  { %v7756_v60 = vmul.f32 %v7751_v11, %v13538_v10  ;;  %v7757_v38 = vmul.f32 %v7751_v11, %v13566_v62  ;;  %v7758_v24 = vmul.f32 %v7751_v11, %v13573_v63  ;;  %v7759_v30 = vmul.f32 %v7751_v11, %v13579_v59 }
 0xc98   :  { %v7760_v19 = vmul.f32 %v7751_v11, %v13541_v1  ;;  %v7761_v6 = vmul.f32 %v7751_v11, %v13544_v4  ;;  %v7762_v42 = vmul.f32 %v7751_v11, %v13547_v58  ;;  %v7763_v37 = vmul.f32 %v7751_v11, %v13549_v43 }
 0xc99   :  { %v7764_v52 = vmul.f32 %v7751_v11, %v13551_v2  ;;  %v7765_v26 = vmul.f32 %v7751_v11, %v13553_v49  ;;  %v7766_v10 = vmul.f32 %v7751_v11, %v13555_v34  ;;  %v7767_v62 = vmul.f32 %v7751_v11, %v13557_v35 }
 0xc9a   :  { %v7769_v39 = vmul.f32 %v7768_v32, %v7752_v21  ;;  %v7770_v63 = vmul.f32 %v7768_v32, %v7753_v5  ;;  %v7771_v13 = vmul.f32 %v7768_v32, %v7754_v54  ;;  %v7785_v59 = vperm.slane %v7920_v28, 2  ;;  %v14216_v28 = vld [vmem:[#allocation32_spill] sm:$0xff] }
 0xc9b   :  { %v7772_v57 = vmul.f32 %v7768_v32, %v7755_v41  ;;  %v7773_v1 = vmul.f32 %v7768_v32, %v7756_v60  ;;  %v7774_v50 = vmul.f32 %v7768_v32, %v7757_v38  ;;  %v7775_v4 = vmul.f32 %v7768_v32, %v7758_v24  ;;  %v14218_v38 = vld [vmem:[#allocation46_spill] sm:$0xff] }
 0xc9c   :  { %v7786_v0 = vadd.f32 %v7785_v59, %v7769_v39  ;;  %v7787_v58 = vadd.f32 %v7785_v59, %v7770_v63  ;;  %v7788_v22 = vadd.f32 %v7785_v59, %v7771_v13  ;;  %v7776_v43 = vmul.f32 %v7768_v32, %v7759_v30 }
 0xc9d   :  { %v7789_v29 = vadd.f32 %v7785_v59, %v7772_v57  ;;  %v7777_v2 = vmul.f32 %v7768_v32, %v7760_v19  ;;  %v7790_v14 = vadd.f32 %v7785_v59, %v7773_v1  ;;  %v7778_v49 = vmul.f32 %v7768_v32, %v7761_v6 }
 0xc9e   :  { %v7779_v27 = vmul.f32 %v7768_v32, %v7762_v42  ;;  %v7791_v34 = vadd.f32 %v7785_v59, %v7774_v50  ;;  %v7792_v8 = vadd.f32 %v7785_v59, %v7775_v4  ;;  %v7802_v35 = vmax.f32 %v7786_v0, 0.0  ;;  %v14224_v50 = vld [vmem:[#allocation58_spill] sm:$0xff] }
 0xc9f   :  { %v7803_v51 = vmax.f32 %v7787_v58, 0.0  ;;  %v7804_v20 = vmax.f32 %v7788_v22, 0.0  ;;  %v7780_v7 = vmul.f32 %v7768_v32, %v7763_v37  ;;  %v7793_v31 = vadd.f32 %v7785_v59, %v7776_v43  ;;  %v14220_v37 = vld [vmem:[#allocation50_spill] sm:$0xff]  ;;  %v14226_v43 = vld [vmem:[#allocation9_spill] sm:$0xff] }
 0xca0   :  { %v7805_v44 = vmax.f32 %v7789_v29, 0.0  ;;  %v7781_v53 = vmul.f32 %v7768_v32, %v7764_v52  ;;  %v7782_v56 = vmul.f32 %v7768_v32, %v7765_v26  ;;  %v7794_v36 = vadd.f32 %v7785_v59, %v7777_v2 }
 0xca1   :  { %v7806_v9 = vmax.f32 %v7790_v14, 0.0  ;;  %v7783_v17 = vmul.f32 %v7768_v32, %v7766_v10  ;;  %v7795_v23 = vadd.f32 %v7785_v59, %v7778_v49  ;;  %v7796_v46 = vadd.f32 %v7785_v59, %v7779_v27  ;;  %v14222_v10 = vld [vmem:[#allocation55_spill] sm:$0xff]  ;;  %v14228_v27 = vld [vmem:[#allocation34_spill] sm:$0xff] }
 0xca2   :  { %v7807_v15 = vmax.f32 %v7791_v34, 0.0  ;;  %v7808_v18 = vmax.f32 %v7792_v8, 0.0  ;;  %v7818_v45 = vadd.f32 %v7802_v35, %v14211_v25  ;;  %v7819_v40 = vadd.f32 %v7803_v51, %v14213_v61  ;;  %v14230_v51 = vld [vmem:[#allocation24_spill] sm:$0xff] }
 0xca3   :  { %v7820_v33 = vadd.f32 %v7804_v20, %v14215_v16  ;;  %v7784_v12 = vmul.f32 %v7768_v32, %v7767_v62  ;;  %v7797_v3 = vadd.f32 %v7785_v59, %v7780_v7  ;;  %v7809_v11 = vmax.f32 %v7793_v31, 0.0  ;;  %v14240_v16 = vld [vmem:[#allocation49_spill] sm:$0xff] }
 0xca4   :  { %v14217_v21 = vmax.f32 %v14216_v28, 0.0  ;;  %v7798_v54 = vadd.f32 %v7785_v59, %v7781_v53  ;;  %v7799_v41 = vadd.f32 %v7785_v59, %v7782_v56  ;;  %v7810_v60 = vmax.f32 %v7794_v36, 0.0  ;;  %v14232_v53 = vld [vmem:[#allocation28_spill] sm:$0xff] }
 0xca5   :  { %v14219_v24 = vmax.f32 %v14218_v38, 0.0  ;;  %v7800_v19 = vadd.f32 %v7785_v59, %v7783_v17  ;;  %v7811_v6 = vmax.f32 %v7795_v23, 0.0  ;;  %v7812_v42 = vmax.f32 %v7796_v46, 0.0  ;;  %v14234_v17 = vld [vmem:[#allocation11_spill] sm:$0xff] }
 0xca6   :  { %v7821_v5 = vadd.f32 %v7805_v44, %v14217_v21  ;;  %v14221_v52 = vmax.f32 %v14220_v37, 0.0  ;;  %v14223_v39 = vmax.f32 %v14222_v10, 0.0  ;;  %v7834_v62 = vmax.f32 %v7818_v45, 0.0 }
 0xca7   :  { %v7822_v30 = vadd.f32 %v7806_v9, %v14219_v24  ;;  %v7835_v63 = vmax.f32 %v7819_v40, 0.0  ;;  %v7836_v13 = vmax.f32 %v7820_v33, 0.0  ;;  %v7801_v57 = vadd.f32 %v7785_v59, %v7784_v12 }
 0xca8   :  { %v7823_v26 = vadd.f32 %v7807_v15, %v14221_v52  ;;  %v7824_v32 = vadd.f32 %v7808_v18, %v14223_v39  ;;  %v7813_v1 = vmax.f32 %v7797_v3, 0.0  ;;  %v14225_v4 = vmax.f32 %v14224_v50, 0.0  ;;  %7850 = vst.msk [vmem:[%s13739_s7] sm:$0xff] %vm535_vm3, %v7834_v62  ;;  %v14236_v18 = vld [vmem:[#allocation31_spill] sm:$0xff] }
 0xca9   :  { %v7837_v58 = vmax.f32 %v7821_v5, 0.0  ;;  %v7814_v22 = vmax.f32 %v7798_v54, 0.0  ;;  %v14227_v29 = vmax.f32 %v14226_v43, 0.0  ;;  %v7838_v14 = vmax.f32 %v7822_v30, 0.0  ;;  %7851 = vst.msk [vmem:[%s13739_s7 + $0x8] sm:$0xff] %vm535_vm3, %v7835_v63 }
 0xcaa   :  { %v7825_v0 = vadd.f32 %v7809_v11, %v14225_v4  ;;  %v7815_v49 = vmax.f32 %v7799_v41, 0.0  ;;  %v14229_v34 = vmax.f32 %v14228_v27, 0.0  ;;  %v7839_v59 = vmax.f32 %v7823_v26, 0.0  ;;  %7852 = vst.msk [vmem:[%s13739_s7 + $0x10] sm:$0xff] %vm535_vm3, %v7836_v13 }
 0xcab   :  { %v7826_v2 = vadd.f32 %v7810_v60, %v14227_v29  ;;  %v7816_v35 = vmax.f32 %v7800_v19, 0.0  ;;  %v14231_v20 = vmax.f32 %v14230_v51, 0.0  ;;  %v7840_v31 = vmax.f32 %v7824_v32, 0.0  ;;  %7853 = vst.msk [vmem:[%s13739_s7 + $0x18] sm:$0xff] %vm535_vm3, %v7837_v58 }
 0xcac   :  { %v7827_v8 = vadd.f32 %v7811_v6, %v14229_v34  ;;  %v7817_v44 = vmax.f32 %v7801_v57, 0.0  ;;  %v14233_v56 = vmax.f32 %v14232_v53, 0.0  ;;  %v7841_v9 = vmax.f32 %v7825_v0, 0.0  ;;  %7854 = vst.msk [vmem:[%s13739_s7 + $0x20] sm:$0xff] %vm535_vm3, %v7838_v14 }
 0xcad   :  { %v7828_v7 = vadd.f32 %v7812_v42, %v14231_v20  ;;  %v14235_v23 = vmax.f32 %v14234_v17, 0.0  ;;  %v7842_v15 = vmax.f32 %v7826_v2, 0.0  ;;  %v14237_v48 = vmax.f32 %v14236_v18, 0.0  ;;  %7855 = vst.msk [vmem:[%s13739_s7 + $0x28] sm:$0xff] %vm535_vm3, %v7839_v59 }
 0xcae   :  { %v7829_v36 = vadd.f32 %v7813_v1, %v14233_v56  ;;  %v7843_v45 = vmax.f32 %v7827_v8, 0.0  ;;  %v14239_v61 = vmax.f32 %v14238_v47, 0.0  ;;  %7856 = vst.msk [vmem:[%s13739_s7 + $0x30] sm:$0xff] %vm535_vm3, %v7840_v31  ;;  %v14241_v33 = vmax.f32 %v14240_v16, 0.0 }
 0xcaf   :  { %v7830_v46 = vadd.f32 %v7814_v22, %v14235_v23  ;;  %v7831_v25 = vadd.f32 %v7815_v49, %v14237_v48  ;;  %v7844_v55 = vmax.f32 %v7828_v7, 0.0  ;;  %7857 = vst.msk [vmem:[%s13739_s7 + $0x38] sm:$0xff] %vm535_vm3, %v7841_v9 }
 0xcb0   :  { %v7832_v40 = vadd.f32 %v7816_v35, %v14239_v61  ;;  %v7833_v12 = vadd.f32 %v7817_v44, %v14241_v33  ;;  %v7845_v3 = vmax.f32 %v7829_v36, 0.0  ;;  %7858 = vst.msk [vmem:[%s13739_s7 + $0x40] sm:$0xff] %vm535_vm3, %v7842_v15 }
 0xcb1   :  { %v7846_v11 = vmax.f32 %v7830_v46, 0.0  ;;  %v7847_v28 = vmax.f32 %v7831_v25, 0.0  ;;  %7859 = vst.msk [vmem:[%s13739_s7 + $0x48] sm:$0xff] %vm535_vm3, %v7843_v45 }
 0xcb2   :  { %v7848_v21 = vmax.f32 %v7832_v40, 0.0  ;;  %7860 = vst.msk [vmem:[%s13739_s7 + $0x50] sm:$0xff] %vm535_vm3, %v7844_v55  ;;  %v7849_v5 = vmax.f32 %v7833_v12, 0.0 }
 0xcb3   :  { %7861 = vst.msk [vmem:[%s13739_s7 + $0x58] sm:$0xff] %vm535_vm3, %v7845_v3 }
 0xcb4   :  { %7862 = vst.msk [vmem:[%s13739_s7 + $0x60] sm:$0xff] %vm535_vm3, %v7846_v11 }
 0xcb5   :  { %7863 = vst.msk [vmem:[%s13739_s7 + $0x68] sm:$0xff] %vm535_vm3, %v7847_v28 }
 0xcb6   :  { %7864 = vst.msk [vmem:[%s13739_s7 + $0x70] sm:$0xff] %vm535_vm3, %v7848_v21 }
 0xcb7   :  { %7865 = vst.msk [vmem:[%s13739_s7 + $0x78] sm:$0xff] %vm535_vm3, %v7849_v5 }

</bundles_post_ra>
